<compile_context>
chip_gen: v7x
topology: tpu7x:2x2x1
jax: 0.10.0
libtpu: 0.0.40
codegen_flags: <defaults>
</compile_context>

<pallas_src>
import jax
import jax.numpy as jnp
from jax import lax
from jax.experimental import pallas as pl
from jax.experimental.pallas import tpu as pltpu


def _round_up(x, m):
    return (x + m - 1) // m * m


# ------------------------------ Pallas kernel -------------------------------

def dqn_fused_kernel(wc_ref, bc_ref, patches_ref, wfc_ref, bfc_ref, wo_ref, bo_ref,
                     o_ref, act_ref):
    """One B_tile-sized batch block per grid step.

    wc_ref      : SMEM (Cout, K) f32        conv weight, flattened over (cin, kh, kw)
    bc_ref      : SMEM (Cout,)   f32        conv bias
    patches_ref : VMEM (K, B_tile, Pp) f32  im2col patches for this batch block
    wfc_ref     : VMEM (Cout*Pp, Fp) bf16   fc weight, Flatten() order folded in
    bfc_ref     : VMEM (1, Fp) f32          fc bias
    wo_ref      : VMEM (Fp, Ap) bf16        output-layer weight
    bo_ref      : VMEM (1, Ap) f32          output-layer bias
    o_ref       : VMEM (B_tile, Ap) f32     padded Q-values for this batch block
    act_ref     : VMEM scratch (B_tile, Cout*Pp) bf16  relu(conv) activations
    """
    cout, kdim = wc_ref.shape
    pp = patches_ref.shape[-1]

    # Conv2d (stride 1, VALID) per output channel: K scalar-broadcast multiply-adds
    # on (B_tile, Pp) f32 tiles (VPU), bias + ReLU, then one contiguous lane-aligned
    # bf16 store into the wide activation scratch (column order == torch Flatten()).
    for c in range(cout):
        acc = wc_ref[c, 0] * patches_ref[0]
        for k in range(1, kdim):
            acc = acc + wc_ref[c, k] * patches_ref[k]
        act_ref[:, c * pp:(c + 1) * pp] = jnp.maximum(
            acc + bc_ref[c], 0.0).astype(jnp.bfloat16)

    # fc layer: ONE (B_tile, Cout*Pp) @ (Cout*Pp, Fp) bf16 MXU matmul, f32 accum.
    h = jnp.dot(act_ref[...], wfc_ref[...],
                preferred_element_type=jnp.float32) + bfc_ref[...]
    h = jnp.maximum(h, 0.0).astype(jnp.bfloat16)

    # output layer: (B_tile, Fp) @ (Fp, Ap); lane- and sublane-dense f32 store.
    o_ref[...] = jnp.dot(h, wo_ref[...],
                         preferred_element_type=jnp.float32) + bo_ref[...]


# ------------------------------- Wrapper (JAX) -------------------------------

@jax.jit
def dqn_forward(x, params):
    """Pallas implementation of DeepQNetwork.forward. x: (N, Cin, H, W)."""
    w_conv, b_conv, w_fc, b_fc, w_out, b_out = params
    Cout, Cin, kh, kw = w_conv.shape
    N, _, H, W = x.shape
    Ho, Wo = H - kh + 1, W - kw + 1
    P, K = Ho * Wo, Cin * kh * kw
    F = w_fc.shape[0]
    A = w_out.shape[0]
    Pp = _round_up(P, 128)
    Fp = _round_up(F, 128)
    Ap = _round_up(A, 128)
    B_tile = min(128, _round_up(N, 8))
    N_pad = _round_up(N, B_tile)

    x = x.astype(jnp.float32)

    # im2col in (K, N, P) orientation so patches_ref[k] is a clean (B_tile, Pp)
    # tile inside the kernel; K stays a leading, un-padded dim (no 128-padding).
    # TODO(synk): the im2col could move in-kernel (rolled views of the raw NCHW
    # block) to remove the ~9x HBM patch amplification; at these sizes the kernel
    # is VPU-bound either way, so it is kept in the wrapper for simplicity.
    cols = jnp.stack(
        [x[:, cin, i:i + Ho, j:j + Wo].reshape(N, P)
         for cin in range(Cin) for i in range(kh) for j in range(kw)], axis=0)
    patches = jnp.zeros((K, N_pad, Pp), jnp.float32).at[:, :N, :P].set(cols)

    # Conv weight/bias as SMEM scalars (flattened (cin, kh, kw) order).
    wc = w_conv.reshape(Cout, K).astype(jnp.float32)
    bc = b_conv.astype(jnp.float32)

    # Fold PyTorch Flatten() order (feature j = c*P + p) into the fc weight and lay
    # it out as (Cout*Pp, Fp).  Rows for padded positions / columns for padded
    # features are exactly zero, so the relu(conv_bias) values sitting in padded
    # conv positions (and padded batch rows) contribute nothing.
    wfc3 = w_fc.astype(jnp.float32).reshape(F, Cout, P).transpose(1, 2, 0)
    wfc_wide = jnp.zeros((Cout, Pp, F), jnp.float32).at[:, :P, :].set(wfc3)
    wfc_wide = (jnp.zeros((Cout * Pp, Fp), jnp.float32)
                .at[:, :F].set(wfc_wide.reshape(Cout * Pp, F))
                .astype(jnp.bfloat16))
    bfc_p = jnp.zeros((1, Fp), jnp.float32).at[0, :F].set(b_fc.astype(jnp.float32))
    wo_p = (jnp.zeros((Fp, Ap), jnp.float32)
            .at[:F, :A].set(w_out.T.astype(jnp.float32)).astype(jnp.bfloat16))
    bo_p = jnp.zeros((1, Ap), jnp.float32).at[0, :A].set(b_out.astype(jnp.float32))

    out = pl.pallas_call(
        dqn_fused_kernel,
        out_shape=jax.ShapeDtypeStruct((N_pad, Ap), jnp.float32),
        grid=(N_pad // B_tile,),
        in_specs=[
            pl.BlockSpec(memory_space=pltpu.MemorySpace.SMEM),      # conv weight
            pl.BlockSpec(memory_space=pltpu.MemorySpace.SMEM),      # conv bias
            pl.BlockSpec((K, B_tile, Pp), lambda nb: (0, nb, 0)),   # patches (streamed)
            pl.BlockSpec((Cout * Pp, Fp), lambda nb: (0, 0)),       # fc weight (resident)
            pl.BlockSpec((1, Fp), lambda nb: (0, 0)),               # fc bias
            pl.BlockSpec((Fp, Ap), lambda nb: (0, 0)),              # out weight
            pl.BlockSpec((1, Ap), lambda nb: (0, 0)),               # out bias
        ],
        out_specs=pl.BlockSpec((B_tile, Ap), lambda nb: (nb, 0)),
        scratch_shapes=[pltpu.VMEM((B_tile, Cout * Pp), jnp.bfloat16)],
        compiler_params=pltpu.CompilerParams(
            dimension_semantics=("parallel",),
            vmem_limit_bytes=32 * 1024 * 1024),
    )(wc, bc, patches, wfc_wide, bfc_p, wo_p, bo_p)

    return out[:N, :A]


def dqn_forward_ref(x, params):
    """Pure-JAX reference (mirrors the PyTorch forward)."""
    w_conv, b_conv, w_fc, b_fc, w_out, b_out = params
    conv = lax.conv_general_dilated(
        x.astype(jnp.float32), w_conv, window_strides=(1, 1), padding="VALID",
        dimension_numbers=("NCHW", "OIHW", "NCHW"),
    ) + b_conv[None, :, None, None]
    conv = jnp.maximum(conv, 0.0)
    feat = conv.reshape(conv.shape[0], -1)
    h = jnp.maximum(feat @ w_fc.T + b_fc, 0.0)
    return h @ w_out.T + b_out


# TODO(synk): train_step (Adam optimizer update, TD-target loss) is training logic,
# not part of the forward pass, and is not implemented here.

# --------------------------------- Main --------------------------------------

if __name__ == "__main__":
    # Small shapes consistent with the module's __init__:
    N, C_IN, H, W = 2, 4, 16, 16          # env.state_shape = (4, 16, 16)
    K_SIZE = 3                             # kernel_size
    C_OUT = 8                              # conv_out_channels
    FC_OUT = 32                            # fc_out_features
    N_ACTIONS = 6                          # env.n_actions

    key = jax.random.PRNGKey(0)
    ks = jax.random.split(key, 7)

    # Deterministic synthetic parameters (same shapes as the torch layers).
    w_conv = jax.random.normal(ks[0], (C_OUT, C_IN, K_SIZE, K_SIZE), jnp.float32) * 0.1
    b_conv = jax.random.normal(ks[1], (C_OUT,), jnp.float32) * 0.1
    D1 = (H - K_SIZE + 1) * (W - K_SIZE + 1) * C_OUT
    w_fc = jax.random.normal(ks[2], (FC_OUT, D1), jnp.float32) * 0.02
    b_fc = jax.random.normal(ks[3], (FC_OUT,), jnp.float32) * 0.1
    w_out = jax.random.normal(ks[4], (N_ACTIONS, FC_OUT), jnp.float32) * 0.1
    b_out = jax.random.normal(ks[5], (N_ACTIONS,), jnp.float32) * 0.1
    params = (w_conv, b_conv, w_fc, b_fc, w_out, b_out)

    x = jax.random.normal(ks[6], (N, C_IN, H, W), jnp.float32)

    out = jax.block_until_ready(dqn_forward(x, params))
    ref = jax.block_until_ready(dqn_forward_ref(x, params))

    assert out.shape == (N, N_ACTIONS), out.shape
    # bf16 MXU operands (f32 accumulation) -> tolerance loosened vs f32 reference.
    assert jnp.allclose(out, ref, rtol=2e-2, atol=2e-2), (out, ref)
    print("KERNEL_OK")
</pallas_src>

<mosaic_0001>
module attributes {stable_mosaic.version = 11 : i64} {
  func.func @dqn_fused_kernel(%arg0: i32, %arg1: memref<8x36xf32, #tpu.memory_space<smem>>, %arg2: memref<8xf32, #tpu.memory_space<smem>>, %arg3: memref<36x8x256xf32, #tpu.memory_space<vmem>>, %arg4: memref<2048x128xbf16, #tpu.memory_space<vmem>>, %arg5: memref<1x128xf32, #tpu.memory_space<vmem>>, %arg6: memref<128x128xbf16, #tpu.memory_space<vmem>>, %arg7: memref<1x128xf32, #tpu.memory_space<vmem>>, %arg8: memref<8x128xf32, #tpu.memory_space<vmem>>, %arg9: memref<8x2048xbf16, #tpu.memory_space<vmem>>) attributes {dimension_semantics = [#tpu.dimension_semantics<parallel>], iteration_bounds = array<i64: 1>, scalar_prefetch = 0 : i64, scratch_operands = 1 : i64, tpu.core_type = #tpu.core_type<tc>, window_params = [{transform_indices = @transform_0, window_bounds = array<i64: 8, 36>}, {transform_indices = @transform_1, window_bounds = array<i64: 8>}, {transform_indices = @transform_2, window_bounds = array<i64: 36, 8, 256>}, {pipeline_mode = #tpu.pipeline_mode<synchronous>, transform_indices = @transform_3, window_bounds = array<i64: 2048, 128>}, {pipeline_mode = #tpu.pipeline_mode<synchronous>, transform_indices = @transform_4, window_bounds = array<i64: 1, 128>}, {pipeline_mode = #tpu.pipeline_mode<synchronous>, transform_indices = @transform_5, window_bounds = array<i64: 128, 128>}, {pipeline_mode = #tpu.pipeline_mode<synchronous>, transform_indices = @transform_6, window_bounds = array<i64: 1, 128>}, {transform_indices = @transform_7, window_bounds = array<i64: 8, 128>}]} {
    %c0 = arith.constant 0 : index
    %c0_0 = arith.constant 0 : index
    %0 = memref.load %arg1[%c0, %c0_0] : memref<8x36xf32, #tpu.memory_space<smem>>
    %c0_1 = arith.constant 0 : index
    %c0_2 = arith.constant 0 : index
    %c0_3 = arith.constant 0 : index
    %1 = vector.load %arg3[%c0_1, %c0_2, %c0_3] : memref<36x8x256xf32, #tpu.memory_space<vmem>>, vector<1x8x256xf32>
    %2 = vector.shape_cast %1 : vector<1x8x256xf32> to vector<8x256xf32>
    %3 = vector.broadcast %0 : f32 to vector<8x256xf32>
    %4 = arith.mulf %3, %2 : vector<8x256xf32>
    %c0_4 = arith.constant 0 : index
    %c1 = arith.constant 1 : index
    %5 = memref.load %arg1[%c0_4, %c1] : memref<8x36xf32, #tpu.memory_space<smem>>
    %c1_5 = arith.constant 1 : index
    %c0_6 = arith.constant 0 : index
    %c0_7 = arith.constant 0 : index
    %6 = vector.load %arg3[%c1_5, %c0_6, %c0_7] : memref<36x8x256xf32, #tpu.memory_space<vmem>>, vector<1x8x256xf32>
    %7 = vector.shape_cast %6 : vector<1x8x256xf32> to vector<8x256xf32>
    %8 = vector.broadcast %5 : f32 to vector<8x256xf32>
    %9 = arith.mulf %8, %7 : vector<8x256xf32>
    %10 = arith.addf %4, %9 : vector<8x256xf32>
    %c0_8 = arith.constant 0 : index
    %c2 = arith.constant 2 : index
    %11 = memref.load %arg1[%c0_8, %c2] : memref<8x36xf32, #tpu.memory_space<smem>>
    %c2_9 = arith.constant 2 : index
    %c0_10 = arith.constant 0 : index
    %c0_11 = arith.constant 0 : index
    %12 = vector.load %arg3[%c2_9, %c0_10, %c0_11] : memref<36x8x256xf32, #tpu.memory_space<vmem>>, vector<1x8x256xf32>
    %13 = vector.shape_cast %12 : vector<1x8x256xf32> to vector<8x256xf32>
    %14 = vector.broadcast %11 : f32 to vector<8x256xf32>
    %15 = arith.mulf %14, %13 : vector<8x256xf32>
    %16 = arith.addf %10, %15 : vector<8x256xf32>
    %c0_12 = arith.constant 0 : index
    %c3 = arith.constant 3 : index
    %17 = memref.load %arg1[%c0_12, %c3] : memref<8x36xf32, #tpu.memory_space<smem>>
    %c3_13 = arith.constant 3 : index
    %c0_14 = arith.constant 0 : index
    %c0_15 = arith.constant 0 : index
    %18 = vector.load %arg3[%c3_13, %c0_14, %c0_15] : memref<36x8x256xf32, #tpu.memory_space<vmem>>, vector<1x8x256xf32>
    %19 = vector.shape_cast %18 : vector<1x8x256xf32> to vector<8x256xf32>
    %20 = vector.broadcast %17 : f32 to vector<8x256xf32>
    %21 = arith.mulf %20, %19 : vector<8x256xf32>
    %22 = arith.addf %16, %21 : vector<8x256xf32>
    %c0_16 = arith.constant 0 : index
    %c4 = arith.constant 4 : index
    %23 = memref.load %arg1[%c0_16, %c4] : memref<8x36xf32, #tpu.memory_space<smem>>
    %c4_17 = arith.constant 4 : index
    %c0_18 = arith.constant 0 : index
    %c0_19 = arith.constant 0 : index
    %24 = vector.load %arg3[%c4_17, %c0_18, %c0_19] : memref<36x8x256xf32, #tpu.memory_space<vmem>>, vector<1x8x256xf32>
    %25 = vector.shape_cast %24 : vector<1x8x256xf32> to vector<8x256xf32>
    %26 = vector.broadcast %23 : f32 to vector<8x256xf32>
    %27 = arith.mulf %26, %25 : vector<8x256xf32>
    %28 = arith.addf %22, %27 : vector<8x256xf32>
    %c0_20 = arith.constant 0 : index
    %c5 = arith.constant 5 : index
    %29 = memref.load %arg1[%c0_20, %c5] : memref<8x36xf32, #tpu.memory_space<smem>>
    %c5_21 = arith.constant 5 : index
    %c0_22 = arith.constant 0 : index
    %c0_23 = arith.constant 0 : index
    %30 = vector.load %arg3[%c5_21, %c0_22, %c0_23] : memref<36x8x256xf32, #tpu.memory_space<vmem>>, vector<1x8x256xf32>
    %31 = vector.shape_cast %30 : vector<1x8x256xf32> to vector<8x256xf32>
    %32 = vector.broadcast %29 : f32 to vector<8x256xf32>
    %33 = arith.mulf %32, %31 : vector<8x256xf32>
    %34 = arith.addf %28, %33 : vector<8x256xf32>
    %c0_24 = arith.constant 0 : index
    %c6 = arith.constant 6 : index
    %35 = memref.load %arg1[%c0_24, %c6] : memref<8x36xf32, #tpu.memory_space<smem>>
    %c6_25 = arith.constant 6 : index
    %c0_26 = arith.constant 0 : index
    %c0_27 = arith.constant 0 : index
    %36 = vector.load %arg3[%c6_25, %c0_26, %c0_27] : memref<36x8x256xf32, #tpu.memory_space<vmem>>, vector<1x8x256xf32>
    %37 = vector.shape_cast %36 : vector<1x8x256xf32> to vector<8x256xf32>
    %38 = vector.broadcast %35 : f32 to vector<8x256xf32>
    %39 = arith.mulf %38, %37 : vector<8x256xf32>
    %40 = arith.addf %34, %39 : vector<8x256xf32>
    %c0_28 = arith.constant 0 : index
    %c7 = arith.constant 7 : index
    %41 = memref.load %arg1[%c0_28, %c7] : memref<8x36xf32, #tpu.memory_space<smem>>
    %c7_29 = arith.constant 7 : index
    %c0_30 = arith.constant 0 : index
    %c0_31 = arith.constant 0 : index
    %42 = vector.load %arg3[%c7_29, %c0_30, %c0_31] : memref<36x8x256xf32, #tpu.memory_space<vmem>>, vector<1x8x256xf32>
    %43 = vector.shape_cast %42 : vector<1x8x256xf32> to vector<8x256xf32>
    %44 = vector.broadcast %41 : f32 to vector<8x256xf32>
    %45 = arith.mulf %44, %43 : vector<8x256xf32>
    %46 = arith.addf %40, %45 : vector<8x256xf32>
    %c0_32 = arith.constant 0 : index
    %c8 = arith.constant 8 : index
    %47 = memref.load %arg1[%c0_32, %c8] : memref<8x36xf32, #tpu.memory_space<smem>>
    %c8_33 = arith.constant 8 : index
    %c0_34 = arith.constant 0 : index
    %c0_35 = arith.constant 0 : index
    %48 = vector.load %arg3[%c8_33, %c0_34, %c0_35] : memref<36x8x256xf32, #tpu.memory_space<vmem>>, vector<1x8x256xf32>
    %49 = vector.shape_cast %48 : vector<1x8x256xf32> to vector<8x256xf32>
    %50 = vector.broadcast %47 : f32 to vector<8x256xf32>
    %51 = arith.mulf %50, %49 : vector<8x256xf32>
    %52 = arith.addf %46, %51 : vector<8x256xf32>
    %c0_36 = arith.constant 0 : index
    %c9 = arith.constant 9 : index
    %53 = memref.load %arg1[%c0_36, %c9] : memref<8x36xf32, #tpu.memory_space<smem>>
    %c9_37 = arith.constant 9 : index
    %c0_38 = arith.constant 0 : index
    %c0_39 = arith.constant 0 : index
    %54 = vector.load %arg3[%c9_37, %c0_38, %c0_39] : memref<36x8x256xf32, #tpu.memory_space<vmem>>, vector<1x8x256xf32>
    %55 = vector.shape_cast %54 : vector<1x8x256xf32> to vector<8x256xf32>
    %56 = vector.broadcast %53 : f32 to vector<8x256xf32>
    %57 = arith.mulf %56, %55 : vector<8x256xf32>
    %58 = arith.addf %52, %57 : vector<8x256xf32>
    %c0_40 = arith.constant 0 : index
    %c10 = arith.constant 10 : index
    %59 = memref.load %arg1[%c0_40, %c10] : memref<8x36xf32, #tpu.memory_space<smem>>
    %c10_41 = arith.constant 10 : index
    %c0_42 = arith.constant 0 : index
    %c0_43 = arith.constant 0 : index
    %60 = vector.load %arg3[%c10_41, %c0_42, %c0_43] : memref<36x8x256xf32, #tpu.memory_space<vmem>>, vector<1x8x256xf32>
    %61 = vector.shape_cast %60 : vector<1x8x256xf32> to vector<8x256xf32>
    %62 = vector.broadcast %59 : f32 to vector<8x256xf32>
    %63 = arith.mulf %62, %61 : vector<8x256xf32>
    %64 = arith.addf %58, %63 : vector<8x256xf32>
    %c0_44 = arith.constant 0 : index
    %c11 = arith.constant 11 : index
    %65 = memref.load %arg1[%c0_44, %c11] : memref<8x36xf32, #tpu.memory_space<smem>>
    %c11_45 = arith.constant 11 : index
    %c0_46 = arith.constant 0 : index
    %c0_47 = arith.constant 0 : index
    %66 = vector.load %arg3[%c11_45, %c0_46, %c0_47] : memref<36x8x256xf32, #tpu.memory_space<vmem>>, vector<1x8x256xf32>
    %67 = vector.shape_cast %66 : vector<1x8x256xf32> to vector<8x256xf32>
    %68 = vector.broadcast %65 : f32 to vector<8x256xf32>
    %69 = arith.mulf %68, %67 : vector<8x256xf32>
    %70 = arith.addf %64, %69 : vector<8x256xf32>
    %c0_48 = arith.constant 0 : index
    %c12 = arith.constant 12 : index
    %71 = memref.load %arg1[%c0_48, %c12] : memref<8x36xf32, #tpu.memory_space<smem>>
    %c12_49 = arith.constant 12 : index
    %c0_50 = arith.constant 0 : index
    %c0_51 = arith.constant 0 : index
    %72 = vector.load %arg3[%c12_49, %c0_50, %c0_51] : memref<36x8x256xf32, #tpu.memory_space<vmem>>, vector<1x8x256xf32>
    %73 = vector.shape_cast %72 : vector<1x8x256xf32> to vector<8x256xf32>
    %74 = vector.broadcast %71 : f32 to vector<8x256xf32>
    %75 = arith.mulf %74, %73 : vector<8x256xf32>
    %76 = arith.addf %70, %75 : vector<8x256xf32>
    %c0_52 = arith.constant 0 : index
    %c13 = arith.constant 13 : index
    %77 = memref.load %arg1[%c0_52, %c13] : memref<8x36xf32, #tpu.memory_space<smem>>
    %c13_53 = arith.constant 13 : index
    %c0_54 = arith.constant 0 : index
    %c0_55 = arith.constant 0 : index
    %78 = vector.load %arg3[%c13_53, %c0_54, %c0_55] : memref<36x8x256xf32, #tpu.memory_space<vmem>>, vector<1x8x256xf32>
    %79 = vector.shape_cast %78 : vector<1x8x256xf32> to vector<8x256xf32>
    %80 = vector.broadcast %77 : f32 to vector<8x256xf32>
    %81 = arith.mulf %80, %79 : vector<8x256xf32>
    %82 = arith.addf %76, %81 : vector<8x256xf32>
    %c0_56 = arith.constant 0 : index
    %c14 = arith.constant 14 : index
    %83 = memref.load %arg1[%c0_56, %c14] : memref<8x36xf32, #tpu.memory_space<smem>>
    %c14_57 = arith.constant 14 : index
    %c0_58 = arith.constant 0 : index
    %c0_59 = arith.constant 0 : index
    %84 = vector.load %arg3[%c14_57, %c0_58, %c0_59] : memref<36x8x256xf32, #tpu.memory_space<vmem>>, vector<1x8x256xf32>
    %85 = vector.shape_cast %84 : vector<1x8x256xf32> to vector<8x256xf32>
    %86 = vector.broadcast %83 : f32 to vector<8x256xf32>
    %87 = arith.mulf %86, %85 : vector<8x256xf32>
    %88 = arith.addf %82, %87 : vector<8x256xf32>
    %c0_60 = arith.constant 0 : index
    %c15 = arith.constant 15 : index
    %89 = memref.load %arg1[%c0_60, %c15] : memref<8x36xf32, #tpu.memory_space<smem>>
    %c15_61 = arith.constant 15 : index
    %c0_62 = arith.constant 0 : index
    %c0_63 = arith.constant 0 : index
    %90 = vector.load %arg3[%c15_61, %c0_62, %c0_63] : memref<36x8x256xf32, #tpu.memory_space<vmem>>, vector<1x8x256xf32>
    %91 = vector.shape_cast %90 : vector<1x8x256xf32> to vector<8x256xf32>
    %92 = vector.broadcast %89 : f32 to vector<8x256xf32>
    %93 = arith.mulf %92, %91 : vector<8x256xf32>
    %94 = arith.addf %88, %93 : vector<8x256xf32>
    %c0_64 = arith.constant 0 : index
    %c16 = arith.constant 16 : index
    %95 = memref.load %arg1[%c0_64, %c16] : memref<8x36xf32, #tpu.memory_space<smem>>
    %c16_65 = arith.constant 16 : index
    %c0_66 = arith.constant 0 : index
    %c0_67 = arith.constant 0 : index
    %96 = vector.load %arg3[%c16_65, %c0_66, %c0_67] : memref<36x8x256xf32, #tpu.memory_space<vmem>>, vector<1x8x256xf32>
    %97 = vector.shape_cast %96 : vector<1x8x256xf32> to vector<8x256xf32>
    %98 = vector.broadcast %95 : f32 to vector<8x256xf32>
    %99 = arith.mulf %98, %97 : vector<8x256xf32>
    %100 = arith.addf %94, %99 : vector<8x256xf32>
    %c0_68 = arith.constant 0 : index
    %c17 = arith.constant 17 : index
    %101 = memref.load %arg1[%c0_68, %c17] : memref<8x36xf32, #tpu.memory_space<smem>>
    %c17_69 = arith.constant 17 : index
    %c0_70 = arith.constant 0 : index
    %c0_71 = arith.constant 0 : index
    %102 = vector.load %arg3[%c17_69, %c0_70, %c0_71] : memref<36x8x256xf32, #tpu.memory_space<vmem>>, vector<1x8x256xf32>
    %103 = vector.shape_cast %102 : vector<1x8x256xf32> to vector<8x256xf32>
    %104 = vector.broadcast %101 : f32 to vector<8x256xf32>
    %105 = arith.mulf %104, %103 : vector<8x256xf32>
    %106 = arith.addf %100, %105 : vector<8x256xf32>
    %c0_72 = arith.constant 0 : index
    %c18 = arith.constant 18 : index
    %107 = memref.load %arg1[%c0_72, %c18] : memref<8x36xf32, #tpu.memory_space<smem>>
    %c18_73 = arith.constant 18 : index
    %c0_74 = arith.constant 0 : index
    %c0_75 = arith.constant 0 : index
    %108 = vector.load %arg3[%c18_73, %c0_74, %c0_75] : memref<36x8x256xf32, #tpu.memory_space<vmem>>, vector<1x8x256xf32>
    %109 = vector.shape_cast %108 : vector<1x8x256xf32> to vector<8x256xf32>
    %110 = vector.broadcast %107 : f32 to vector<8x256xf32>
    %111 = arith.mulf %110, %109 : vector<8x256xf32>
    %112 = arith.addf %106, %111 : vector<8x256xf32>
    %c0_76 = arith.constant 0 : index
    %c19 = arith.constant 19 : index
    %113 = memref.load %arg1[%c0_76, %c19] : memref<8x36xf32, #tpu.memory_space<smem>>
    %c19_77 = arith.constant 19 : index
    %c0_78 = arith.constant 0 : index
    %c0_79 = arith.constant 0 : index
    %114 = vector.load %arg3[%c19_77, %c0_78, %c0_79] : memref<36x8x256xf32, #tpu.memory_space<vmem>>, vector<1x8x256xf32>
    %115 = vector.shape_cast %114 : vector<1x8x256xf32> to vector<8x256xf32>
    %116 = vector.broadcast %113 : f32 to vector<8x256xf32>
    %117 = arith.mulf %116, %115 : vector<8x256xf32>
    %118 = arith.addf %112, %117 : vector<8x256xf32>
    %c0_80 = arith.constant 0 : index
    %c20 = arith.constant 20 : index
    %119 = memref.load %arg1[%c0_80, %c20] : memref<8x36xf32, #tpu.memory_space<smem>>
    %c20_81 = arith.constant 20 : index
    %c0_82 = arith.constant 0 : index
    %c0_83 = arith.constant 0 : index
    %120 = vector.load %arg3[%c20_81, %c0_82, %c0_83] : memref<36x8x256xf32, #tpu.memory_space<vmem>>, vector<1x8x256xf32>
    %121 = vector.shape_cast %120 : vector<1x8x256xf32> to vector<8x256xf32>
    %122 = vector.broadcast %119 : f32 to vector<8x256xf32>
    %123 = arith.mulf %122, %121 : vector<8x256xf32>
    %124 = arith.addf %118, %123 : vector<8x256xf32>
    %c0_84 = arith.constant 0 : index
    %c21 = arith.constant 21 : index
    %125 = memref.load %arg1[%c0_84, %c21] : memref<8x36xf32, #tpu.memory_space<smem>>
    %c21_85 = arith.constant 21 : index
    %c0_86 = arith.constant 0 : index
    %c0_87 = arith.constant 0 : index
    %126 = vector.load %arg3[%c21_85, %c0_86, %c0_87] : memref<36x8x256xf32, #tpu.memory_space<vmem>>, vector<1x8x256xf32>
    %127 = vector.shape_cast %126 : vector<1x8x256xf32> to vector<8x256xf32>
    %128 = vector.broadcast %125 : f32 to vector<8x256xf32>
    %129 = arith.mulf %128, %127 : vector<8x256xf32>
    %130 = arith.addf %124, %129 : vector<8x256xf32>
    %c0_88 = arith.constant 0 : index
    %c22 = arith.constant 22 : index
    %131 = memref.load %arg1[%c0_88, %c22] : memref<8x36xf32, #tpu.memory_space<smem>>
    %c22_89 = arith.constant 22 : index
    %c0_90 = arith.constant 0 : index
    %c0_91 = arith.constant 0 : index
    %132 = vector.load %arg3[%c22_89, %c0_90, %c0_91] : memref<36x8x256xf32, #tpu.memory_space<vmem>>, vector<1x8x256xf32>
    %133 = vector.shape_cast %132 : vector<1x8x256xf32> to vector<8x256xf32>
    %134 = vector.broadcast %131 : f32 to vector<8x256xf32>
    %135 = arith.mulf %134, %133 : vector<8x256xf32>
    %136 = arith.addf %130, %135 : vector<8x256xf32>
    %c0_92 = arith.constant 0 : index
    %c23 = arith.constant 23 : index
    %137 = memref.load %arg1[%c0_92, %c23] : memref<8x36xf32, #tpu.memory_space<smem>>
    %c23_93 = arith.constant 23 : index
    %c0_94 = arith.constant 0 : index
    %c0_95 = arith.constant 0 : index
    %138 = vector.load %arg3[%c23_93, %c0_94, %c0_95] : memref<36x8x256xf32, #tpu.memory_space<vmem>>, vector<1x8x256xf32>
    %139 = vector.shape_cast %138 : vector<1x8x256xf32> to vector<8x256xf32>
    %140 = vector.broadcast %137 : f32 to vector<8x256xf32>
    %141 = arith.mulf %140, %139 : vector<8x256xf32>
    %142 = arith.addf %136, %141 : vector<8x256xf32>
    %c0_96 = arith.constant 0 : index
    %c24 = arith.constant 24 : index
    %143 = memref.load %arg1[%c0_96, %c24] : memref<8x36xf32, #tpu.memory_space<smem>>
    %c24_97 = arith.constant 24 : index
    %c0_98 = arith.constant 0 : index
    %c0_99 = arith.constant 0 : index
    %144 = vector.load %arg3[%c24_97, %c0_98, %c0_99] : memref<36x8x256xf32, #tpu.memory_space<vmem>>, vector<1x8x256xf32>
    %145 = vector.shape_cast %144 : vector<1x8x256xf32> to vector<8x256xf32>
    %146 = vector.broadcast %143 : f32 to vector<8x256xf32>
    %147 = arith.mulf %146, %145 : vector<8x256xf32>
    %148 = arith.addf %142, %147 : vector<8x256xf32>
    %c0_100 = arith.constant 0 : index
    %c25 = arith.constant 25 : index
    %149 = memref.load %arg1[%c0_100, %c25] : memref<8x36xf32, #tpu.memory_space<smem>>
    %c25_101 = arith.constant 25 : index
    %c0_102 = arith.constant 0 : index
    %c0_103 = arith.constant 0 : index
    %150 = vector.load %arg3[%c25_101, %c0_102, %c0_103] : memref<36x8x256xf32, #tpu.memory_space<vmem>>, vector<1x8x256xf32>
    %151 = vector.shape_cast %150 : vector<1x8x256xf32> to vector<8x256xf32>
    %152 = vector.broadcast %149 : f32 to vector<8x256xf32>
    %153 = arith.mulf %152, %151 : vector<8x256xf32>
    %154 = arith.addf %148, %153 : vector<8x256xf32>
    %c0_104 = arith.constant 0 : index
    %c26 = arith.constant 26 : index
    %155 = memref.load %arg1[%c0_104, %c26] : memref<8x36xf32, #tpu.memory_space<smem>>
    %c26_105 = arith.constant 26 : index
    %c0_106 = arith.constant 0 : index
    %c0_107 = arith.constant 0 : index
    %156 = vector.load %arg3[%c26_105, %c0_106, %c0_107] : memref<36x8x256xf32, #tpu.memory_space<vmem>>, vector<1x8x256xf32>
    %157 = vector.shape_cast %156 : vector<1x8x256xf32> to vector<8x256xf32>
    %158 = vector.broadcast %155 : f32 to vector<8x256xf32>
    %159 = arith.mulf %158, %157 : vector<8x256xf32>
    %160 = arith.addf %154, %159 : vector<8x256xf32>
    %c0_108 = arith.constant 0 : index
    %c27 = arith.constant 27 : index
    %161 = memref.load %arg1[%c0_108, %c27] : memref<8x36xf32, #tpu.memory_space<smem>>
    %c27_109 = arith.constant 27 : index
    %c0_110 = arith.constant 0 : index
    %c0_111 = arith.constant 0 : index
    %162 = vector.load %arg3[%c27_109, %c0_110, %c0_111] : memref<36x8x256xf32, #tpu.memory_space<vmem>>, vector<1x8x256xf32>
    %163 = vector.shape_cast %162 : vector<1x8x256xf32> to vector<8x256xf32>
    %164 = vector.broadcast %161 : f32 to vector<8x256xf32>
    %165 = arith.mulf %164, %163 : vector<8x256xf32>
    %166 = arith.addf %160, %165 : vector<8x256xf32>
    %c0_112 = arith.constant 0 : index
    %c28 = arith.constant 28 : index
    %167 = memref.load %arg1[%c0_112, %c28] : memref<8x36xf32, #tpu.memory_space<smem>>
    %c28_113 = arith.constant 28 : index
    %c0_114 = arith.constant 0 : index
    %c0_115 = arith.constant 0 : index
    %168 = vector.load %arg3[%c28_113, %c0_114, %c0_115] : memref<36x8x256xf32, #tpu.memory_space<vmem>>, vector<1x8x256xf32>
    %169 = vector.shape_cast %168 : vector<1x8x256xf32> to vector<8x256xf32>
    %170 = vector.broadcast %167 : f32 to vector<8x256xf32>
    %171 = arith.mulf %170, %169 : vector<8x256xf32>
    %172 = arith.addf %166, %171 : vector<8x256xf32>
    %c0_116 = arith.constant 0 : index
    %c29 = arith.constant 29 : index
    %173 = memref.load %arg1[%c0_116, %c29] : memref<8x36xf32, #tpu.memory_space<smem>>
    %c29_117 = arith.constant 29 : index
    %c0_118 = arith.constant 0 : index
    %c0_119 = arith.constant 0 : index
    %174 = vector.load %arg3[%c29_117, %c0_118, %c0_119] : memref<36x8x256xf32, #tpu.memory_space<vmem>>, vector<1x8x256xf32>
    %175 = vector.shape_cast %174 : vector<1x8x256xf32> to vector<8x256xf32>
    %176 = vector.broadcast %173 : f32 to vector<8x256xf32>
    %177 = arith.mulf %176, %175 : vector<8x256xf32>
    %178 = arith.addf %172, %177 : vector<8x256xf32>
    %c0_120 = arith.constant 0 : index
    %c30 = arith.constant 30 : index
    %179 = memref.load %arg1[%c0_120, %c30] : memref<8x36xf32, #tpu.memory_space<smem>>
    %c30_121 = arith.constant 30 : index
    %c0_122 = arith.constant 0 : index
    %c0_123 = arith.constant 0 : index
    %180 = vector.load %arg3[%c30_121, %c0_122, %c0_123] : memref<36x8x256xf32, #tpu.memory_space<vmem>>, vector<1x8x256xf32>
    %181 = vector.shape_cast %180 : vector<1x8x256xf32> to vector<8x256xf32>
    %182 = vector.broadcast %179 : f32 to vector<8x256xf32>
    %183 = arith.mulf %182, %181 : vector<8x256xf32>
    %184 = arith.addf %178, %183 : vector<8x256xf32>
    %c0_124 = arith.constant 0 : index
    %c31 = arith.constant 31 : index
    %185 = memref.load %arg1[%c0_124, %c31] : memref<8x36xf32, #tpu.memory_space<smem>>
    %c31_125 = arith.constant 31 : index
    %c0_126 = arith.constant 0 : index
    %c0_127 = arith.constant 0 : index
    %186 = vector.load %arg3[%c31_125, %c0_126, %c0_127] : memref<36x8x256xf32, #tpu.memory_space<vmem>>, vector<1x8x256xf32>
    %187 = vector.shape_cast %186 : vector<1x8x256xf32> to vector<8x256xf32>
    %188 = vector.broadcast %185 : f32 to vector<8x256xf32>
    %189 = arith.mulf %188, %187 : vector<8x256xf32>
    %190 = arith.addf %184, %189 : vector<8x256xf32>
    %c0_128 = arith.constant 0 : index
    %c32 = arith.constant 32 : index
    %191 = memref.load %arg1[%c0_128, %c32] : memref<8x36xf32, #tpu.memory_space<smem>>
    %c32_129 = arith.constant 32 : index
    %c0_130 = arith.constant 0 : index
    %c0_131 = arith.constant 0 : index
    %192 = vector.load %arg3[%c32_129, %c0_130, %c0_131] : memref<36x8x256xf32, #tpu.memory_space<vmem>>, vector<1x8x256xf32>
    %193 = vector.shape_cast %192 : vector<1x8x256xf32> to vector<8x256xf32>
    %194 = vector.broadcast %191 : f32 to vector<8x256xf32>
    %195 = arith.mulf %194, %193 : vector<8x256xf32>
    %196 = arith.addf %190, %195 : vector<8x256xf32>
    %c0_132 = arith.constant 0 : index
    %c33 = arith.constant 33 : index
    %197 = memref.load %arg1[%c0_132, %c33] : memref<8x36xf32, #tpu.memory_space<smem>>
    %c33_133 = arith.constant 33 : index
    %c0_134 = arith.constant 0 : index
    %c0_135 = arith.constant 0 : index
    %198 = vector.load %arg3[%c33_133, %c0_134, %c0_135] : memref<36x8x256xf32, #tpu.memory_space<vmem>>, vector<1x8x256xf32>
    %199 = vector.shape_cast %198 : vector<1x8x256xf32> to vector<8x256xf32>
    %200 = vector.broadcast %197 : f32 to vector<8x256xf32>
    %201 = arith.mulf %200, %199 : vector<8x256xf32>
    %202 = arith.addf %196, %201 : vector<8x256xf32>
    %c0_136 = arith.constant 0 : index
    %c34 = arith.constant 34 : index
    %203 = memref.load %arg1[%c0_136, %c34] : memref<8x36xf32, #tpu.memory_space<smem>>
    %c34_137 = arith.constant 34 : index
    %c0_138 = arith.constant 0 : index
    %c0_139 = arith.constant 0 : index
    %204 = vector.load %arg3[%c34_137, %c0_138, %c0_139] : memref<36x8x256xf32, #tpu.memory_space<vmem>>, vector<1x8x256xf32>
    %205 = vector.shape_cast %204 : vector<1x8x256xf32> to vector<8x256xf32>
    %206 = vector.broadcast %203 : f32 to vector<8x256xf32>
    %207 = arith.mulf %206, %205 : vector<8x256xf32>
    %208 = arith.addf %202, %207 : vector<8x256xf32>
    %c0_140 = arith.constant 0 : index
    %c35 = arith.constant 35 : index
    %209 = memref.load %arg1[%c0_140, %c35] : memref<8x36xf32, #tpu.memory_space<smem>>
    %c35_141 = arith.constant 35 : index
    %c0_142 = arith.constant 0 : index
    %c0_143 = arith.constant 0 : index
    %210 = vector.load %arg3[%c35_141, %c0_142, %c0_143] : memref<36x8x256xf32, #tpu.memory_space<vmem>>, vector<1x8x256xf32>
    %211 = vector.shape_cast %210 : vector<1x8x256xf32> to vector<8x256xf32>
    %212 = vector.broadcast %209 : f32 to vector<8x256xf32>
    %213 = arith.mulf %212, %211 : vector<8x256xf32>
    %214 = arith.addf %208, %213 : vector<8x256xf32>
    %c0_144 = arith.constant 0 : index
    %215 = memref.load %arg2[%c0_144] : memref<8xf32, #tpu.memory_space<smem>>
    %216 = vector.broadcast %215 : f32 to vector<8x256xf32>
    %217 = arith.addf %214, %216 : vector<8x256xf32>
    %cst = arith.constant 0.000000e+00 : f32
    %218 = vector.broadcast %cst : f32 to vector<8x256xf32>
    %219 = arith.maximumf %217, %218 : vector<8x256xf32>
    %220 = arith.truncf %219 : vector<8x256xf32> to vector<8x256xbf16>
    %c0_145 = arith.constant 0 : index
    %c0_146 = arith.constant 0 : index
    %221 = vector.load %arg9[%c0_145, %c0_146] : memref<8x2048xbf16, #tpu.memory_space<vmem>>, vector<8x256xbf16>
    tpu.vector_store %arg9[%c0_145, %c0_146], %220 {strides = array<i32>} : memref<8x2048xbf16, #tpu.memory_space<vmem>>, vector<8x256xbf16>,
    %c1_147 = arith.constant 1 : index
    %c0_148 = arith.constant 0 : index
    %222 = memref.load %arg1[%c1_147, %c0_148] : memref<8x36xf32, #tpu.memory_space<smem>>
    %c0_149 = arith.constant 0 : index
    %c0_150 = arith.constant 0 : index
    %c0_151 = arith.constant 0 : index
    %223 = vector.load %arg3[%c0_149, %c0_150, %c0_151] : memref<36x8x256xf32, #tpu.memory_space<vmem>>, vector<1x8x256xf32>
    %224 = vector.shape_cast %223 : vector<1x8x256xf32> to vector<8x256xf32>
    %225 = vector.broadcast %222 : f32 to vector<8x256xf32>
    %226 = arith.mulf %225, %224 : vector<8x256xf32>
    %c1_152 = arith.constant 1 : index
    %c1_153 = arith.constant 1 : index
    %227 = memref.load %arg1[%c1_152, %c1_153] : memref<8x36xf32, #tpu.memory_space<smem>>
    %c1_154 = arith.constant 1 : index
    %c0_155 = arith.constant 0 : index
    %c0_156 = arith.constant 0 : index
    %228 = vector.load %arg3[%c1_154, %c0_155, %c0_156] : memref<36x8x256xf32, #tpu.memory_space<vmem>>, vector<1x8x256xf32>
    %229 = vector.shape_cast %228 : vector<1x8x256xf32> to vector<8x256xf32>
    %230 = vector.broadcast %227 : f32 to vector<8x256xf32>
    %231 = arith.mulf %230, %229 : vector<8x256xf32>
    %232 = arith.addf %226, %231 : vector<8x256xf32>
    %c1_157 = arith.constant 1 : index
    %c2_158 = arith.constant 2 : index
    %233 = memref.load %arg1[%c1_157, %c2_158] : memref<8x36xf32, #tpu.memory_space<smem>>
    %c2_159 = arith.constant 2 : index
    %c0_160 = arith.constant 0 : index
    %c0_161 = arith.constant 0 : index
    %234 = vector.load %arg3[%c2_159, %c0_160, %c0_161] : memref<36x8x256xf32, #tpu.memory_space<vmem>>, vector<1x8x256xf32>
    %235 = vector.shape_cast %234 : vector<1x8x256xf32> to vector<8x256xf32>
    %236 = vector.broadcast %233 : f32 to vector<8x256xf32>
    %237 = arith.mulf %236, %235 : vector<8x256xf32>
    %238 = arith.addf %232, %237 : vector<8x256xf32>
    %c1_162 = arith.constant 1 : index
    %c3_163 = arith.constant 3 : index
    %239 = memref.load %arg1[%c1_162, %c3_163] : memref<8x36xf32, #tpu.memory_space<smem>>
    %c3_164 = arith.constant 3 : index
    %c0_165 = arith.constant 0 : index
    %c0_166 = arith.constant 0 : index
    %240 = vector.load %arg3[%c3_164, %c0_165, %c0_166] : memref<36x8x256xf32, #tpu.memory_space<vmem>>, vector<1x8x256xf32>
    %241 = vector.shape_cast %240 : vector<1x8x256xf32> to vector<8x256xf32>
    %242 = vector.broadcast %239 : f32 to vector<8x256xf32>
    %243 = arith.mulf %242, %241 : vector<8x256xf32>
    %244 = arith.addf %238, %243 : vector<8x256xf32>
    %c1_167 = arith.constant 1 : index
    %c4_168 = arith.constant 4 : index
    %245 = memref.load %arg1[%c1_167, %c4_168] : memref<8x36xf32, #tpu.memory_space<smem>>
    %c4_169 = arith.constant 4 : index
    %c0_170 = arith.constant 0 : index
    %c0_171 = arith.constant 0 : index
    %246 = vector.load %arg3[%c4_169, %c0_170, %c0_171] : memref<36x8x256xf32, #tpu.memory_space<vmem>>, vector<1x8x256xf32>
    %247 = vector.shape_cast %246 : vector<1x8x256xf32> to vector<8x256xf32>
    %248 = vector.broadcast %245 : f32 to vector<8x256xf32>
    %249 = arith.mulf %248, %247 : vector<8x256xf32>
    %250 = arith.addf %244, %249 : vector<8x256xf32>
    %c1_172 = arith.constant 1 : index
    %c5_173 = arith.constant 5 : index
    %251 = memref.load %arg1[%c1_172, %c5_173] : memref<8x36xf32, #tpu.memory_space<smem>>
    %c5_174 = arith.constant 5 : index
    %c0_175 = arith.constant 0 : index
    %c0_176 = arith.constant 0 : index
    %252 = vector.load %arg3[%c5_174, %c0_175, %c0_176] : memref<36x8x256xf32, #tpu.memory_space<vmem>>, vector<1x8x256xf32>
    %253 = vector.shape_cast %252 : vector<1x8x256xf32> to vector<8x256xf32>
    %254 = vector.broadcast %251 : f32 to vector<8x256xf32>
    %255 = arith.mulf %254, %253 : vector<8x256xf32>
    %256 = arith.addf %250, %255 : vector<8x256xf32>
    %c1_177 = arith.constant 1 : index
    %c6_178 = arith.constant 6 : index
    %257 = memref.load %arg1[%c1_177, %c6_178] : memref<8x36xf32, #tpu.memory_space<smem>>
    %c6_179 = arith.constant 6 : index
    %c0_180 = arith.constant 0 : index
    %c0_181 = arith.constant 0 : index
    %258 = vector.load %arg3[%c6_179, %c0_180, %c0_181] : memref<36x8x256xf32, #tpu.memory_space<vmem>>, vector<1x8x256xf32>
    %259 = vector.shape_cast %258 : vector<1x8x256xf32> to vector<8x256xf32>
    %260 = vector.broadcast %257 : f32 to vector<8x256xf32>
    %261 = arith.mulf %260, %259 : vector<8x256xf32>
    %262 = arith.addf %256, %261 : vector<8x256xf32>
    %c1_182 = arith.constant 1 : index
    %c7_183 = arith.constant 7 : index
    %263 = memref.load %arg1[%c1_182, %c7_183] : memref<8x36xf32, #tpu.memory_space<smem>>
    %c7_184 = arith.constant 7 : index
    %c0_185 = arith.constant 0 : index
    %c0_186 = arith.constant 0 : index
    %264 = vector.load %arg3[%c7_184, %c0_185, %c0_186] : memref<36x8x256xf32, #tpu.memory_space<vmem>>, vector<1x8x256xf32>
    %265 = vector.shape_cast %264 : vector<1x8x256xf32> to vector<8x256xf32>
    %266 = vector.broadcast %263 : f32 to vector<8x256xf32>
    %267 = arith.mulf %266, %265 : vector<8x256xf32>
    %268 = arith.addf %262, %267 : vector<8x256xf32>
    %c1_187 = arith.constant 1 : index
    %c8_188 = arith.constant 8 : index
    %269 = memref.load %arg1[%c1_187, %c8_188] : memref<8x36xf32, #tpu.memory_space<smem>>
    %c8_189 = arith.constant 8 : index
    %c0_190 = arith.constant 0 : index
    %c0_191 = arith.constant 0 : index
    %270 = vector.load %arg3[%c8_189, %c0_190, %c0_191] : memref<36x8x256xf32, #tpu.memory_space<vmem>>, vector<1x8x256xf32>
    %271 = vector.shape_cast %270 : vector<1x8x256xf32> to vector<8x256xf32>
    %272 = vector.broadcast %269 : f32 to vector<8x256xf32>
    %273 = arith.mulf %272, %271 : vector<8x256xf32>
    %274 = arith.addf %268, %273 : vector<8x256xf32>
    %c1_192 = arith.constant 1 : index
    %c9_193 = arith.constant 9 : index
    %275 = memref.load %arg1[%c1_192, %c9_193] : memref<8x36xf32, #tpu.memory_space<smem>>
    %c9_194 = arith.constant 9 : index
    %c0_195 = arith.constant 0 : index
    %c0_196 = arith.constant 0 : index
    %276 = vector.load %arg3[%c9_194, %c0_195, %c0_196] : memref<36x8x256xf32, #tpu.memory_space<vmem>>, vector<1x8x256xf32>
    %277 = vector.shape_cast %276 : vector<1x8x256xf32> to vector<8x256xf32>
    %278 = vector.broadcast %275 : f32 to vector<8x256xf32>
    %279 = arith.mulf %278, %277 : vector<8x256xf32>
    %280 = arith.addf %274, %279 : vector<8x256xf32>
    %c1_197 = arith.constant 1 : index
    %c10_198 = arith.constant 10 : index
    %281 = memref.load %arg1[%c1_197, %c10_198] : memref<8x36xf32, #tpu.memory_space<smem>>
    %c10_199 = arith.constant 10 : index
    %c0_200 = arith.constant 0 : index
    %c0_201 = arith.constant 0 : index
    %282 = vector.load %arg3[%c10_199, %c0_200, %c0_201] : memref<36x8x256xf32, #tpu.memory_space<vmem>>, vector<1x8x256xf32>
    %283 = vector.shape_cast %282 : vector<1x8x256xf32> to vector<8x256xf32>
    %284 = vector.broadcast %281 : f32 to vector<8x256xf32>
    %285 = arith.mulf %284, %283 : vector<8x256xf32>
    %286 = arith.addf %280, %285 : vector<8x256xf32>
    %c1_202 = arith.constant 1 : index
    %c11_203 = arith.constant 11 : index
    %287 = memref.load %arg1[%c1_202, %c11_203] : memref<8x36xf32, #tpu.memory_space<smem>>
    %c11_204 = arith.constant 11 : index
    %c0_205 = arith.constant 0 : index
    %c0_206 = arith.constant 0 : index
    %288 = vector.load %arg3[%c11_204, %c0_205, %c0_206] : memref<36x8x256xf32, #tpu.memory_space<vmem>>, vector<1x8x256xf32>
    %289 = vector.shape_cast %288 : vector<1x8x256xf32> to vector<8x256xf32>
    %290 = vector.broadcast %287 : f32 to vector<8x256xf32>
    %291 = arith.mulf %290, %289 : vector<8x256xf32>
    %292 = arith.addf %286, %291 : vector<8x256xf32>
    %c1_207 = arith.constant 1 : index
    %c12_208 = arith.constant 12 : index
    %293 = memref.load %arg1[%c1_207, %c12_208] : memref<8x36xf32, #tpu.memory_space<smem>>
    %c12_209 = arith.constant 12 : index
    %c0_210 = arith.constant 0 : index
    %c0_211 = arith.constant 0 : index
    %294 = vector.load %arg3[%c12_209, %c0_210, %c0_211] : memref<36x8x256xf32, #tpu.memory_space<vmem>>, vector<1x8x256xf32>
    %295 = vector.shape_cast %294 : vector<1x8x256xf32> to vector<8x256xf32>
    %296 = vector.broadcast %293 : f32 to vector<8x256xf32>
    %297 = arith.mulf %296, %295 : vector<8x256xf32>
    %298 = arith.addf %292, %297 : vector<8x256xf32>
    %c1_212 = arith.constant 1 : index
    %c13_213 = arith.constant 13 : index
    %299 = memref.load %arg1[%c1_212, %c13_213] : memref<8x36xf32, #tpu.memory_space<smem>>
    %c13_214 = arith.constant 13 : index
    %c0_215 = arith.constant 0 : index
    %c0_216 = arith.constant 0 : index
    %300 = vector.load %arg3[%c13_214, %c0_215, %c0_216] : memref<36x8x256xf32, #tpu.memory_space<vmem>>, vector<1x8x256xf32>
    %301 = vector.shape_cast %300 : vector<1x8x256xf32> to vector<8x256xf32>
    %302 = vector.broadcast %299 : f32 to vector<8x256xf32>
    %303 = arith.mulf %302, %301 : vector<8x256xf32>
    %304 = arith.addf %298, %303 : vector<8x256xf32>
    %c1_217 = arith.constant 1 : index
    %c14_218 = arith.constant 14 : index
    %305 = memref.load %arg1[%c1_217, %c14_218] : memref<8x36xf32, #tpu.memory_space<smem>>
    %c14_219 = arith.constant 14 : index
    %c0_220 = arith.constant 0 : index
    %c0_221 = arith.constant 0 : index
    %306 = vector.load %arg3[%c14_219, %c0_220, %c0_221] : memref<36x8x256xf32, #tpu.memory_space<vmem>>, vector<1x8x256xf32>
    %307 = vector.shape_cast %306 : vector<1x8x256xf32> to vector<8x256xf32>
    %308 = vector.broadcast %305 : f32 to vector<8x256xf32>
    %309 = arith.mulf %308, %307 : vector<8x256xf32>
    %310 = arith.addf %304, %309 : vector<8x256xf32>
    %c1_222 = arith.constant 1 : index
    %c15_223 = arith.constant 15 : index
    %311 = memref.load %arg1[%c1_222, %c15_223] : memref<8x36xf32, #tpu.memory_space<smem>>
    %c15_224 = arith.constant 15 : index
    %c0_225 = arith.constant 0 : index
    %c0_226 = arith.constant 0 : index
    %312 = vector.load %arg3[%c15_224, %c0_225, %c0_226] : memref<36x8x256xf32, #tpu.memory_space<vmem>>, vector<1x8x256xf32>
    %313 = vector.shape_cast %312 : vector<1x8x256xf32> to vector<8x256xf32>
    %314 = vector.broadcast %311 : f32 to vector<8x256xf32>
    %315 = arith.mulf %314, %313 : vector<8x256xf32>
    %316 = arith.addf %310, %315 : vector<8x256xf32>
    %c1_227 = arith.constant 1 : index
    %c16_228 = arith.constant 16 : index
    %317 = memref.load %arg1[%c1_227, %c16_228] : memref<8x36xf32, #tpu.memory_space<smem>>
    %c16_229 = arith.constant 16 : index
    %c0_230 = arith.constant 0 : index
    %c0_231 = arith.constant 0 : index
    %318 = vector.load %arg3[%c16_229, %c0_230, %c0_231] : memref<36x8x256xf32, #tpu.memory_space<vmem>>, vector<1x8x256xf32>
    %319 = vector.shape_cast %318 : vector<1x8x256xf32> to vector<8x256xf32>
    %320 = vector.broadcast %317 : f32 to vector<8x256xf32>
    %321 = arith.mulf %320, %319 : vector<8x256xf32>
    %322 = arith.addf %316, %321 : vector<8x256xf32>
    %c1_232 = arith.constant 1 : index
    %c17_233 = arith.constant 17 : index
    %323 = memref.load %arg1[%c1_232, %c17_233] : memref<8x36xf32, #tpu.memory_space<smem>>
    %c17_234 = arith.constant 17 : index
    %c0_235 = arith.constant 0 : index
    %c0_236 = arith.constant 0 : index
    %324 = vector.load %arg3[%c17_234, %c0_235, %c0_236] : memref<36x8x256xf32, #tpu.memory_space<vmem>>, vector<1x8x256xf32>
    %325 = vector.shape_cast %324 : vector<1x8x256xf32> to vector<8x256xf32>
    %326 = vector.broadcast %323 : f32 to vector<8x256xf32>
    %327 = arith.mulf %326, %325 : vector<8x256xf32>
    %328 = arith.addf %322, %327 : vector<8x256xf32>
    %c1_237 = arith.constant 1 : index
    %c18_238 = arith.constant 18 : index
    %329 = memref.load %arg1[%c1_237, %c18_238] : memref<8x36xf32, #tpu.memory_space<smem>>
    %c18_239 = arith.constant 18 : index
    %c0_240 = arith.constant 0 : index
    %c0_241 = arith.constant 0 : index
    %330 = vector.load %arg3[%c18_239, %c0_240, %c0_241] : memref<36x8x256xf32, #tpu.memory_space<vmem>>, vector<1x8x256xf32>
    %331 = vector.shape_cast %330 : vector<1x8x256xf32> to vector<8x256xf32>
    %332 = vector.broadcast %329 : f32 to vector<8x256xf32>
    %333 = arith.mulf %332, %331 : vector<8x256xf32>
    %334 = arith.addf %328, %333 : vector<8x256xf32>
    %c1_242 = arith.constant 1 : index
    %c19_243 = arith.constant 19 : index
    %335 = memref.load %arg1[%c1_242, %c19_243] : memref<8x36xf32, #tpu.memory_space<smem>>
    %c19_244 = arith.constant 19 : index
    %c0_245 = arith.constant 0 : index
    %c0_246 = arith.constant 0 : index
    %336 = vector.load %arg3[%c19_244, %c0_245, %c0_246] : memref<36x8x256xf32, #tpu.memory_space<vmem>>, vector<1x8x256xf32>
    %337 = vector.shape_cast %336 : vector<1x8x256xf32> to vector<8x256xf32>
    %338 = vector.broadcast %335 : f32 to vector<8x256xf32>
    %339 = arith.mulf %338, %337 : vector<8x256xf32>
    %340 = arith.addf %334, %339 : vector<8x256xf32>
    %c1_247 = arith.constant 1 : index
    %c20_248 = arith.constant 20 : index
    %341 = memref.load %arg1[%c1_247, %c20_248] : memref<8x36xf32, #tpu.memory_space<smem>>
    %c20_249 = arith.constant 20 : index
    %c0_250 = arith.constant 0 : index
    %c0_251 = arith.constant 0 : index
    %342 = vector.load %arg3[%c20_249, %c0_250, %c0_251] : memref<36x8x256xf32, #tpu.memory_space<vmem>>, vector<1x8x256xf32>
    %343 = vector.shape_cast %342 : vector<1x8x256xf32> to vector<8x256xf32>
    %344 = vector.broadcast %341 : f32 to vector<8x256xf32>
    %345 = arith.mulf %344, %343 : vector<8x256xf32>
    %346 = arith.addf %340, %345 : vector<8x256xf32>
    %c1_252 = arith.constant 1 : index
    %c21_253 = arith.constant 21 : index
    %347 = memref.load %arg1[%c1_252, %c21_253] : memref<8x36xf32, #tpu.memory_space<smem>>
    %c21_254 = arith.constant 21 : index
    %c0_255 = arith.constant 0 : index
    %c0_256 = arith.constant 0 : index
    %348 = vector.load %arg3[%c21_254, %c0_255, %c0_256] : memref<36x8x256xf32, #tpu.memory_space<vmem>>, vector<1x8x256xf32>
    %349 = vector.shape_cast %348 : vector<1x8x256xf32> to vector<8x256xf32>
    %350 = vector.broadcast %347 : f32 to vector<8x256xf32>
    %351 = arith.mulf %350, %349 : vector<8x256xf32>
    %352 = arith.addf %346, %351 : vector<8x256xf32>
    %c1_257 = arith.constant 1 : index
    %c22_258 = arith.constant 22 : index
    %353 = memref.load %arg1[%c1_257, %c22_258] : memref<8x36xf32, #tpu.memory_space<smem>>
    %c22_259 = arith.constant 22 : index
    %c0_260 = arith.constant 0 : index
    %c0_261 = arith.constant 0 : index
    %354 = vector.load %arg3[%c22_259, %c0_260, %c0_261] : memref<36x8x256xf32, #tpu.memory_space<vmem>>, vector<1x8x256xf32>
    %355 = vector.shape_cast %354 : vector<1x8x256xf32> to vector<8x256xf32>
    %356 = vector.broadcast %353 : f32 to vector<8x256xf32>
    %357 = arith.mulf %356, %355 : vector<8x256xf32>
    %358 = arith.addf %352, %357 : vector<8x256xf32>
    %c1_262 = arith.constant 1 : index
    %c23_263 = arith.constant 23 : index
    %359 = memref.load %arg1[%c1_262, %c23_263] : memref<8x36xf32, #tpu.memory_space<smem>>
    %c23_264 = arith.constant 23 : index
    %c0_265 = arith.constant 0 : index
    %c0_266 = arith.constant 0 : index
    %360 = vector.load %arg3[%c23_264, %c0_265, %c0_266] : memref<36x8x256xf32, #tpu.memory_space<vmem>>, vector<1x8x256xf32>
    %361 = vector.shape_cast %360 : vector<1x8x256xf32> to vector<8x256xf32>
    %362 = vector.broadcast %359 : f32 to vector<8x256xf32>
    %363 = arith.mulf %362, %361 : vector<8x256xf32>
    %364 = arith.addf %358, %363 : vector<8x256xf32>
    %c1_267 = arith.constant 1 : index
    %c24_268 = arith.constant 24 : index
    %365 = memref.load %arg1[%c1_267, %c24_268] : memref<8x36xf32, #tpu.memory_space<smem>>
    %c24_269 = arith.constant 24 : index
    %c0_270 = arith.constant 0 : index
    %c0_271 = arith.constant 0 : index
    %366 = vector.load %arg3[%c24_269, %c0_270, %c0_271] : memref<36x8x256xf32, #tpu.memory_space<vmem>>, vector<1x8x256xf32>
    %367 = vector.shape_cast %366 : vector<1x8x256xf32> to vector<8x256xf32>
    %368 = vector.broadcast %365 : f32 to vector<8x256xf32>
    %369 = arith.mulf %368, %367 : vector<8x256xf32>
    %370 = arith.addf %364, %369 : vector<8x256xf32>
    %c1_272 = arith.constant 1 : index
    %c25_273 = arith.constant 25 : index
    %371 = memref.load %arg1[%c1_272, %c25_273] : memref<8x36xf32, #tpu.memory_space<smem>>
    %c25_274 = arith.constant 25 : index
    %c0_275 = arith.constant 0 : index
    %c0_276 = arith.constant 0 : index
    %372 = vector.load %arg3[%c25_274, %c0_275, %c0_276] : memref<36x8x256xf32, #tpu.memory_space<vmem>>, vector<1x8x256xf32>
    %373 = vector.shape_cast %372 : vector<1x8x256xf32> to vector<8x256xf32>
    %374 = vector.broadcast %371 : f32 to vector<8x256xf32>
    %375 = arith.mulf %374, %373 : vector<8x256xf32>
    %376 = arith.addf %370, %375 : vector<8x256xf32>
    %c1_277 = arith.constant 1 : index
    %c26_278 = arith.constant 26 : index
    %377 = memref.load %arg1[%c1_277, %c26_278] : memref<8x36xf32, #tpu.memory_space<smem>>
    %c26_279 = arith.constant 26 : index
    %c0_280 = arith.constant 0 : index
    %c0_281 = arith.constant 0 : index
    %378 = vector.load %arg3[%c26_279, %c0_280, %c0_281] : memref<36x8x256xf32, #tpu.memory_space<vmem>>, vector<1x8x256xf32>
    %379 = vector.shape_cast %378 : vector<1x8x256xf32> to vector<8x256xf32>
    %380 = vector.broadcast %377 : f32 to vector<8x256xf32>
    %381 = arith.mulf %380, %379 : vector<8x256xf32>
    %382 = arith.addf %376, %381 : vector<8x256xf32>
    %c1_282 = arith.constant 1 : index
    %c27_283 = arith.constant 27 : index
    %383 = memref.load %arg1[%c1_282, %c27_283] : memref<8x36xf32, #tpu.memory_space<smem>>
    %c27_284 = arith.constant 27 : index
    %c0_285 = arith.constant 0 : index
    %c0_286 = arith.constant 0 : index
    %384 = vector.load %arg3[%c27_284, %c0_285, %c0_286] : memref<36x8x256xf32, #tpu.memory_space<vmem>>, vector<1x8x256xf32>
    %385 = vector.shape_cast %384 : vector<1x8x256xf32> to vector<8x256xf32>
    %386 = vector.broadcast %383 : f32 to vector<8x256xf32>
    %387 = arith.mulf %386, %385 : vector<8x256xf32>
    %388 = arith.addf %382, %387 : vector<8x256xf32>
    %c1_287 = arith.constant 1 : index
    %c28_288 = arith.constant 28 : index
    %389 = memref.load %arg1[%c1_287, %c28_288] : memref<8x36xf32, #tpu.memory_space<smem>>
    %c28_289 = arith.constant 28 : index
    %c0_290 = arith.constant 0 : index
    %c0_291 = arith.constant 0 : index
    %390 = vector.load %arg3[%c28_289, %c0_290, %c0_291] : memref<36x8x256xf32, #tpu.memory_space<vmem>>, vector<1x8x256xf32>
    %391 = vector.shape_cast %390 : vector<1x8x256xf32> to vector<8x256xf32>
    %392 = vector.broadcast %389 : f32 to vector<8x256xf32>
    %393 = arith.mulf %392, %391 : vector<8x256xf32>
    %394 = arith.addf %388, %393 : vector<8x256xf32>
    %c1_292 = arith.constant 1 : index
    %c29_293 = arith.constant 29 : index
    %395 = memref.load %arg1[%c1_292, %c29_293] : memref<8x36xf32, #tpu.memory_space<smem>>
    %c29_294 = arith.constant 29 : index
    %c0_295 = arith.constant 0 : index
    %c0_296 = arith.constant 0 : index
    %396 = vector.load %arg3[%c29_294, %c0_295, %c0_296] : memref<36x8x256xf32, #tpu.memory_space<vmem>>, vector<1x8x256xf32>
    %397 = vector.shape_cast %396 : vector<1x8x256xf32> to vector<8x256xf32>
    %398 = vector.broadcast %395 : f32 to vector<8x256xf32>
    %399 = arith.mulf %398, %397 : vector<8x256xf32>
    %400 = arith.addf %394, %399 : vector<8x256xf32>
    %c1_297 = arith.constant 1 : index
    %c30_298 = arith.constant 30 : index
    %401 = memref.load %arg1[%c1_297, %c30_298] : memref<8x36xf32, #tpu.memory_space<smem>>
    %c30_299 = arith.constant 30 : index
    %c0_300 = arith.constant 0 : index
    %c0_301 = arith.constant 0 : index
    %402 = vector.load %arg3[%c30_299, %c0_300, %c0_301] : memref<36x8x256xf32, #tpu.memory_space<vmem>>, vector<1x8x256xf32>
    %403 = vector.shape_cast %402 : vector<1x8x256xf32> to vector<8x256xf32>
    %404 = vector.broadcast %401 : f32 to vector<8x256xf32>
    %405 = arith.mulf %404, %403 : vector<8x256xf32>
    %406 = arith.addf %400, %405 : vector<8x256xf32>
    %c1_302 = arith.constant 1 : index
    %c31_303 = arith.constant 31 : index
    %407 = memref.load %arg1[%c1_302, %c31_303] : memref<8x36xf32, #tpu.memory_space<smem>>
    %c31_304 = arith.constant 31 : index
    %c0_305 = arith.constant 0 : index
    %c0_306 = arith.constant 0 : index
    %408 = vector.load %arg3[%c31_304, %c0_305, %c0_306] : memref<36x8x256xf32, #tpu.memory_space<vmem>>, vector<1x8x256xf32>
    %409 = vector.shape_cast %408 : vector<1x8x256xf32> to vector<8x256xf32>
    %410 = vector.broadcast %407 : f32 to vector<8x256xf32>
    %411 = arith.mulf %410, %409 : vector<8x256xf32>
    %412 = arith.addf %406, %411 : vector<8x256xf32>
    %c1_307 = arith.constant 1 : index
    %c32_308 = arith.constant 32 : index
    %413 = memref.load %arg1[%c1_307, %c32_308] : memref<8x36xf32, #tpu.memory_space<smem>>
    %c32_309 = arith.constant 32 : index
    %c0_310 = arith.constant 0 : index
    %c0_311 = arith.constant 0 : index
    %414 = vector.load %arg3[%c32_309, %c0_310, %c0_311] : memref<36x8x256xf32, #tpu.memory_space<vmem>>, vector<1x8x256xf32>
    %415 = vector.shape_cast %414 : vector<1x8x256xf32> to vector<8x256xf32>
    %416 = vector.broadcast %413 : f32 to vector<8x256xf32>
    %417 = arith.mulf %416, %415 : vector<8x256xf32>
    %418 = arith.addf %412, %417 : vector<8x256xf32>
    %c1_312 = arith.constant 1 : index
    %c33_313 = arith.constant 33 : index
    %419 = memref.load %arg1[%c1_312, %c33_313] : memref<8x36xf32, #tpu.memory_space<smem>>
    %c33_314 = arith.constant 33 : index
    %c0_315 = arith.constant 0 : index
    %c0_316 = arith.constant 0 : index
    %420 = vector.load %arg3[%c33_314, %c0_315, %c0_316] : memref<36x8x256xf32, #tpu.memory_space<vmem>>, vector<1x8x256xf32>
    %421 = vector.shape_cast %420 : vector<1x8x256xf32> to vector<8x256xf32>
    %422 = vector.broadcast %419 : f32 to vector<8x256xf32>
    %423 = arith.mulf %422, %421 : vector<8x256xf32>
    %424 = arith.addf %418, %423 : vector<8x256xf32>
    %c1_317 = arith.constant 1 : index
    %c34_318 = arith.constant 34 : index
    %425 = memref.load %arg1[%c1_317, %c34_318] : memref<8x36xf32, #tpu.memory_space<smem>>
    %c34_319 = arith.constant 34 : index
    %c0_320 = arith.constant 0 : index
    %c0_321 = arith.constant 0 : index
    %426 = vector.load %arg3[%c34_319, %c0_320, %c0_321] : memref<36x8x256xf32, #tpu.memory_space<vmem>>, vector<1x8x256xf32>
    %427 = vector.shape_cast %426 : vector<1x8x256xf32> to vector<8x256xf32>
    %428 = vector.broadcast %425 : f32 to vector<8x256xf32>
    %429 = arith.mulf %428, %427 : vector<8x256xf32>
    %430 = arith.addf %424, %429 : vector<8x256xf32>
    %c1_322 = arith.constant 1 : index
    %c35_323 = arith.constant 35 : index
    %431 = memref.load %arg1[%c1_322, %c35_323] : memref<8x36xf32, #tpu.memory_space<smem>>
    %c35_324 = arith.constant 35 : index
    %c0_325 = arith.constant 0 : index
    %c0_326 = arith.constant 0 : index
    %432 = vector.load %arg3[%c35_324, %c0_325, %c0_326] : memref<36x8x256xf32, #tpu.memory_space<vmem>>, vector<1x8x256xf32>
    %433 = vector.shape_cast %432 : vector<1x8x256xf32> to vector<8x256xf32>
    %434 = vector.broadcast %431 : f32 to vector<8x256xf32>
    %435 = arith.mulf %434, %433 : vector<8x256xf32>
    %436 = arith.addf %430, %435 : vector<8x256xf32>
    %c1_327 = arith.constant 1 : index
    %437 = memref.load %arg2[%c1_327] : memref<8xf32, #tpu.memory_space<smem>>
    %438 = vector.broadcast %437 : f32 to vector<8x256xf32>
    %439 = arith.addf %436, %438 : vector<8x256xf32>
    %cst_328 = arith.constant 0.000000e+00 : f32
    %440 = vector.broadcast %cst_328 : f32 to vector<8x256xf32>
    %441 = arith.maximumf %439, %440 : vector<8x256xf32>
    %442 = arith.truncf %441 : vector<8x256xf32> to vector<8x256xbf16>
    %c0_329 = arith.constant 0 : index
    %c256 = arith.constant 256 : index
    %443 = vector.load %arg9[%c0_329, %c256] : memref<8x2048xbf16, #tpu.memory_space<vmem>>, vector<8x256xbf16>
    tpu.vector_store %arg9[%c0_329, %c256], %442 {strides = array<i32>} : memref<8x2048xbf16, #tpu.memory_space<vmem>>, vector<8x256xbf16>,
    %c2_330 = arith.constant 2 : index
    %c0_331 = arith.constant 0 : index
    %444 = memref.load %arg1[%c2_330, %c0_331] : memref<8x36xf32, #tpu.memory_space<smem>>
    %c0_332 = arith.constant 0 : index
    %c0_333 = arith.constant 0 : index
    %c0_334 = arith.constant 0 : index
    %445 = vector.load %arg3[%c0_332, %c0_333, %c0_334] : memref<36x8x256xf32, #tpu.memory_space<vmem>>, vector<1x8x256xf32>
    %446 = vector.shape_cast %445 : vector<1x8x256xf32> to vector<8x256xf32>
    %447 = vector.broadcast %444 : f32 to vector<8x256xf32>
    %448 = arith.mulf %447, %446 : vector<8x256xf32>
    %c2_335 = arith.constant 2 : index
    %c1_336 = arith.constant 1 : index
    %449 = memref.load %arg1[%c2_335, %c1_336] : memref<8x36xf32, #tpu.memory_space<smem>>
    %c1_337 = arith.constant 1 : index
    %c0_338 = arith.constant 0 : index
    %c0_339 = arith.constant 0 : index
    %450 = vector.load %arg3[%c1_337, %c0_338, %c0_339] : memref<36x8x256xf32, #tpu.memory_space<vmem>>, vector<1x8x256xf32>
    %451 = vector.shape_cast %450 : vector<1x8x256xf32> to vector<8x256xf32>
    %452 = vector.broadcast %449 : f32 to vector<8x256xf32>
    %453 = arith.mulf %452, %451 : vector<8x256xf32>
    %454 = arith.addf %448, %453 : vector<8x256xf32>
    %c2_340 = arith.constant 2 : index
    %c2_341 = arith.constant 2 : index
    %455 = memref.load %arg1[%c2_340, %c2_341] : memref<8x36xf32, #tpu.memory_space<smem>>
    %c2_342 = arith.constant 2 : index
    %c0_343 = arith.constant 0 : index
    %c0_344 = arith.constant 0 : index
    %456 = vector.load %arg3[%c2_342, %c0_343, %c0_344] : memref<36x8x256xf32, #tpu.memory_space<vmem>>, vector<1x8x256xf32>
    %457 = vector.shape_cast %456 : vector<1x8x256xf32> to vector<8x256xf32>
    %458 = vector.broadcast %455 : f32 to vector<8x256xf32>
    %459 = arith.mulf %458, %457 : vector<8x256xf32>
    %460 = arith.addf %454, %459 : vector<8x256xf32>
    %c2_345 = arith.constant 2 : index
    %c3_346 = arith.constant 3 : index
    %461 = memref.load %arg1[%c2_345, %c3_346] : memref<8x36xf32, #tpu.memory_space<smem>>
    %c3_347 = arith.constant 3 : index
    %c0_348 = arith.constant 0 : index
    %c0_349 = arith.constant 0 : index
    %462 = vector.load %arg3[%c3_347, %c0_348, %c0_349] : memref<36x8x256xf32, #tpu.memory_space<vmem>>, vector<1x8x256xf32>
    %463 = vector.shape_cast %462 : vector<1x8x256xf32> to vector<8x256xf32>
    %464 = vector.broadcast %461 : f32 to vector<8x256xf32>
    %465 = arith.mulf %464, %463 : vector<8x256xf32>
    %466 = arith.addf %460, %465 : vector<8x256xf32>
    %c2_350 = arith.constant 2 : index
    %c4_351 = arith.constant 4 : index
    %467 = memref.load %arg1[%c2_350, %c4_351] : memref<8x36xf32, #tpu.memory_space<smem>>
    %c4_352 = arith.constant 4 : index
    %c0_353 = arith.constant 0 : index
    %c0_354 = arith.constant 0 : index
    %468 = vector.load %arg3[%c4_352, %c0_353, %c0_354] : memref<36x8x256xf32, #tpu.memory_space<vmem>>, vector<1x8x256xf32>
    %469 = vector.shape_cast %468 : vector<1x8x256xf32> to vector<8x256xf32>
    %470 = vector.broadcast %467 : f32 to vector<8x256xf32>
    %471 = arith.mulf %470, %469 : vector<8x256xf32>
    %472 = arith.addf %466, %471 : vector<8x256xf32>
    %c2_355 = arith.constant 2 : index
    %c5_356 = arith.constant 5 : index
    %473 = memref.load %arg1[%c2_355, %c5_356] : memref<8x36xf32, #tpu.memory_space<smem>>
    %c5_357 = arith.constant 5 : index
    %c0_358 = arith.constant 0 : index
    %c0_359 = arith.constant 0 : index
    %474 = vector.load %arg3[%c5_357, %c0_358, %c0_359] : memref<36x8x256xf32, #tpu.memory_space<vmem>>, vector<1x8x256xf32>
    %475 = vector.shape_cast %474 : vector<1x8x256xf32> to vector<8x256xf32>
    %476 = vector.broadcast %473 : f32 to vector<8x256xf32>
    %477 = arith.mulf %476, %475 : vector<8x256xf32>
    %478 = arith.addf %472, %477 : vector<8x256xf32>
    %c2_360 = arith.constant 2 : index
    %c6_361 = arith.constant 6 : index
    %479 = memref.load %arg1[%c2_360, %c6_361] : memref<8x36xf32, #tpu.memory_space<smem>>
    %c6_362 = arith.constant 6 : index
    %c0_363 = arith.constant 0 : index
    %c0_364 = arith.constant 0 : index
    %480 = vector.load %arg3[%c6_362, %c0_363, %c0_364] : memref<36x8x256xf32, #tpu.memory_space<vmem>>, vector<1x8x256xf32>
    %481 = vector.shape_cast %480 : vector<1x8x256xf32> to vector<8x256xf32>
    %482 = vector.broadcast %479 : f32 to vector<8x256xf32>
    %483 = arith.mulf %482, %481 : vector<8x256xf32>
    %484 = arith.addf %478, %483 : vector<8x256xf32>
    %c2_365 = arith.constant 2 : index
    %c7_366 = arith.constant 7 : index
    %485 = memref.load %arg1[%c2_365, %c7_366] : memref<8x36xf32, #tpu.memory_space<smem>>
    %c7_367 = arith.constant 7 : index
    %c0_368 = arith.constant 0 : index
    %c0_369 = arith.constant 0 : index
    %486 = vector.load %arg3[%c7_367, %c0_368, %c0_369] : memref<36x8x256xf32, #tpu.memory_space<vmem>>, vector<1x8x256xf32>
    %487 = vector.shape_cast %486 : vector<1x8x256xf32> to vector<8x256xf32>
    %488 = vector.broadcast %485 : f32 to vector<8x256xf32>
    %489 = arith.mulf %488, %487 : vector<8x256xf32>
    %490 = arith.addf %484, %489 : vector<8x256xf32>
    %c2_370 = arith.constant 2 : index
    %c8_371 = arith.constant 8 : index
    %491 = memref.load %arg1[%c2_370, %c8_371] : memref<8x36xf32, #tpu.memory_space<smem>>
    %c8_372 = arith.constant 8 : index
    %c0_373 = arith.constant 0 : index
    %c0_374 = arith.constant 0 : index
    %492 = vector.load %arg3[%c8_372, %c0_373, %c0_374] : memref<36x8x256xf32, #tpu.memory_space<vmem>>, vector<1x8x256xf32>
    %493 = vector.shape_cast %492 : vector<1x8x256xf32> to vector<8x256xf32>
    %494 = vector.broadcast %491 : f32 to vector<8x256xf32>
    %495 = arith.mulf %494, %493 : vector<8x256xf32>
    %496 = arith.addf %490, %495 : vector<8x256xf32>
    %c2_375 = arith.constant 2 : index
    %c9_376 = arith.constant 9 : index
    %497 = memref.load %arg1[%c2_375, %c9_376] : memref<8x36xf32, #tpu.memory_space<smem>>
    %c9_377 = arith.constant 9 : index
    %c0_378 = arith.constant 0 : index
    %c0_379 = arith.constant 0 : index
    %498 = vector.load %arg3[%c9_377, %c0_378, %c0_379] : memref<36x8x256xf32, #tpu.memory_space<vmem>>, vector<1x8x256xf32>
    %499 = vector.shape_cast %498 : vector<1x8x256xf32> to vector<8x256xf32>
    %500 = vector.broadcast %497 : f32 to vector<8x256xf32>
    %501 = arith.mulf %500, %499 : vector<8x256xf32>
    %502 = arith.addf %496, %501 : vector<8x256xf32>
    %c2_380 = arith.constant 2 : index
    %c10_381 = arith.constant 10 : index
    %503 = memref.load %arg1[%c2_380, %c10_381] : memref<8x36xf32, #tpu.memory_space<smem>>
    %c10_382 = arith.constant 10 : index
    %c0_383 = arith.constant 0 : index
    %c0_384 = arith.constant 0 : index
    %504 = vector.load %arg3[%c10_382, %c0_383, %c0_384] : memref<36x8x256xf32, #tpu.memory_space<vmem>>, vector<1x8x256xf32>
    %505 = vector.shape_cast %504 : vector<1x8x256xf32> to vector<8x256xf32>
    %506 = vector.broadcast %503 : f32 to vector<8x256xf32>
    %507 = arith.mulf %506, %505 : vector<8x256xf32>
    %508 = arith.addf %502, %507 : vector<8x256xf32>
    %c2_385 = arith.constant 2 : index
    %c11_386 = arith.constant 11 : index
    %509 = memref.load %arg1[%c2_385, %c11_386] : memref<8x36xf32, #tpu.memory_space<smem>>
    %c11_387 = arith.constant 11 : index
    %c0_388 = arith.constant 0 : index
    %c0_389 = arith.constant 0 : index
    %510 = vector.load %arg3[%c11_387, %c0_388, %c0_389] : memref<36x8x256xf32, #tpu.memory_space<vmem>>, vector<1x8x256xf32>
    %511 = vector.shape_cast %510 : vector<1x8x256xf32> to vector<8x256xf32>
    %512 = vector.broadcast %509 : f32 to vector<8x256xf32>
    %513 = arith.mulf %512, %511 : vector<8x256xf32>
    %514 = arith.addf %508, %513 : vector<8x256xf32>
    %c2_390 = arith.constant 2 : index
    %c12_391 = arith.constant 12 : index
    %515 = memref.load %arg1[%c2_390, %c12_391] : memref<8x36xf32, #tpu.memory_space<smem>>
    %c12_392 = arith.constant 12 : index
    %c0_393 = arith.constant 0 : index
    %c0_394 = arith.constant 0 : index
    %516 = vector.load %arg3[%c12_392, %c0_393, %c0_394] : memref<36x8x256xf32, #tpu.memory_space<vmem>>, vector<1x8x256xf32>
    %517 = vector.shape_cast %516 : vector<1x8x256xf32> to vector<8x256xf32>
    %518 = vector.broadcast %515 : f32 to vector<8x256xf32>
    %519 = arith.mulf %518, %517 : vector<8x256xf32>
    %520 = arith.addf %514, %519 : vector<8x256xf32>
    %c2_395 = arith.constant 2 : index
    %c13_396 = arith.constant 13 : index
    %521 = memref.load %arg1[%c2_395, %c13_396] : memref<8x36xf32, #tpu.memory_space<smem>>
    %c13_397 = arith.constant 13 : index
    %c0_398 = arith.constant 0 : index
    %c0_399 = arith.constant 0 : index
    %522 = vector.load %arg3[%c13_397, %c0_398, %c0_399] : memref<36x8x256xf32, #tpu.memory_space<vmem>>, vector<1x8x256xf32>
    %523 = vector.shape_cast %522 : vector<1x8x256xf32> to vector<8x256xf32>
    %524 = vector.broadcast %521 : f32 to vector<8x256xf32>
    %525 = arith.mulf %524, %523 : vector<8x256xf32>
    %526 = arith.addf %520, %525 : vector<8x256xf32>
    %c2_400 = arith.constant 2 : index
    %c14_401 = arith.constant 14 : index
    %527 = memref.load %arg1[%c2_400, %c14_401] : memref<8x36xf32, #tpu.memory_space<smem>>
    %c14_402 = arith.constant 14 : index
    %c0_403 = arith.constant 0 : index
    %c0_404 = arith.constant 0 : index
    %528 = vector.load %arg3[%c14_402, %c0_403, %c0_404] : memref<36x8x256xf32, #tpu.memory_space<vmem>>, vector<1x8x256xf32>
    %529 = vector.shape_cast %528 : vector<1x8x256xf32> to vector<8x256xf32>
    %530 = vector.broadcast %527 : f32 to vector<8x256xf32>
    %531 = arith.mulf %530, %529 : vector<8x256xf32>
    %532 = arith.addf %526, %531 : vector<8x256xf32>
    %c2_405 = arith.constant 2 : index
    %c15_406 = arith.constant 15 : index
    %533 = memref.load %arg1[%c2_405, %c15_406] : memref<8x36xf32, #tpu.memory_space<smem>>
    %c15_407 = arith.constant 15 : index
    %c0_408 = arith.constant 0 : index
    %c0_409 = arith.constant 0 : index
    %534 = vector.load %arg3[%c15_407, %c0_408, %c0_409] : memref<36x8x256xf32, #tpu.memory_space<vmem>>, vector<1x8x256xf32>
    %535 = vector.shape_cast %534 : vector<1x8x256xf32> to vector<8x256xf32>
    %536 = vector.broadcast %533 : f32 to vector<8x256xf32>
    %537 = arith.mulf %536, %535 : vector<8x256xf32>
    %538 = arith.addf %532, %537 : vector<8x256xf32>
    %c2_410 = arith.constant 2 : index
    %c16_411 = arith.constant 16 : index
    %539 = memref.load %arg1[%c2_410, %c16_411] : memref<8x36xf32, #tpu.memory_space<smem>>
    %c16_412 = arith.constant 16 : index
    %c0_413 = arith.constant 0 : index
    %c0_414 = arith.constant 0 : index
    %540 = vector.load %arg3[%c16_412, %c0_413, %c0_414] : memref<36x8x256xf32, #tpu.memory_space<vmem>>, vector<1x8x256xf32>
    %541 = vector.shape_cast %540 : vector<1x8x256xf32> to vector<8x256xf32>
    %542 = vector.broadcast %539 : f32 to vector<8x256xf32>
    %543 = arith.mulf %542, %541 : vector<8x256xf32>
    %544 = arith.addf %538, %543 : vector<8x256xf32>
    %c2_415 = arith.constant 2 : index
    %c17_416 = arith.constant 17 : index
    %545 = memref.load %arg1[%c2_415, %c17_416] : memref<8x36xf32, #tpu.memory_space<smem>>
    %c17_417 = arith.constant 17 : index
    %c0_418 = arith.constant 0 : index
    %c0_419 = arith.constant 0 : index
    %546 = vector.load %arg3[%c17_417, %c0_418, %c0_419] : memref<36x8x256xf32, #tpu.memory_space<vmem>>, vector<1x8x256xf32>
    %547 = vector.shape_cast %546 : vector<1x8x256xf32> to vector<8x256xf32>
    %548 = vector.broadcast %545 : f32 to vector<8x256xf32>
    %549 = arith.mulf %548, %547 : vector<8x256xf32>
    %550 = arith.addf %544, %549 : vector<8x256xf32>
    %c2_420 = arith.constant 2 : index
    %c18_421 = arith.constant 18 : index
    %551 = memref.load %arg1[%c2_420, %c18_421] : memref<8x36xf32, #tpu.memory_space<smem>>
    %c18_422 = arith.constant 18 : index
    %c0_423 = arith.constant 0 : index
    %c0_424 = arith.constant 0 : index
    %552 = vector.load %arg3[%c18_422, %c0_423, %c0_424] : memref<36x8x256xf32, #tpu.memory_space<vmem>>, vector<1x8x256xf32>
    %553 = vector.shape_cast %552 : vector<1x8x256xf32> to vector<8x256xf32>
    %554 = vector.broadcast %551 : f32 to vector<8x256xf32>
    %555 = arith.mulf %554, %553 : vector<8x256xf32>
    %556 = arith.addf %550, %555 : vector<8x256xf32>
    %c2_425 = arith.constant 2 : index
    %c19_426 = arith.constant 19 : index
    %557 = memref.load %arg1[%c2_425, %c19_426] : memref<8x36xf32, #tpu.memory_space<smem>>
    %c19_427 = arith.constant 19 : index
    %c0_428 = arith.constant 0 : index
    %c0_429 = arith.constant 0 : index
    %558 = vector.load %arg3[%c19_427, %c0_428, %c0_429] : memref<36x8x256xf32, #tpu.memory_space<vmem>>, vector<1x8x256xf32>
    %559 = vector.shape_cast %558 : vector<1x8x256xf32> to vector<8x256xf32>
    %560 = vector.broadcast %557 : f32 to vector<8x256xf32>
    %561 = arith.mulf %560, %559 : vector<8x256xf32>
    %562 = arith.addf %556, %561 : vector<8x256xf32>
    %c2_430 = arith.constant 2 : index
    %c20_431 = arith.constant 20 : index
    %563 = memref.load %arg1[%c2_430, %c20_431] : memref<8x36xf32, #tpu.memory_space<smem>>
    %c20_432 = arith.constant 20 : index
    %c0_433 = arith.constant 0 : index
    %c0_434 = arith.constant 0 : index
    %564 = vector.load %arg3[%c20_432, %c0_433, %c0_434] : memref<36x8x256xf32, #tpu.memory_space<vmem>>, vector<1x8x256xf32>
    %565 = vector.shape_cast %564 : vector<1x8x256xf32> to vector<8x256xf32>
    %566 = vector.broadcast %563 : f32 to vector<8x256xf32>
    %567 = arith.mulf %566, %565 : vector<8x256xf32>
    %568 = arith.addf %562, %567 : vector<8x256xf32>
    %c2_435 = arith.constant 2 : index
    %c21_436 = arith.constant 21 : index
    %569 = memref.load %arg1[%c2_435, %c21_436] : memref<8x36xf32, #tpu.memory_space<smem>>
    %c21_437 = arith.constant 21 : index
    %c0_438 = arith.constant 0 : index
    %c0_439 = arith.constant 0 : index
    %570 = vector.load %arg3[%c21_437, %c0_438, %c0_439] : memref<36x8x256xf32, #tpu.memory_space<vmem>>, vector<1x8x256xf32>
    %571 = vector.shape_cast %570 : vector<1x8x256xf32> to vector<8x256xf32>
    %572 = vector.broadcast %569 : f32 to vector<8x256xf32>
    %573 = arith.mulf %572, %571 : vector<8x256xf32>
    %574 = arith.addf %568, %573 : vector<8x256xf32>
    %c2_440 = arith.constant 2 : index
    %c22_441 = arith.constant 22 : index
    %575 = memref.load %arg1[%c2_440, %c22_441] : memref<8x36xf32, #tpu.memory_space<smem>>
    %c22_442 = arith.constant 22 : index
    %c0_443 = arith.constant 0 : index
    %c0_444 = arith.constant 0 : index
    %576 = vector.load %arg3[%c22_442, %c0_443, %c0_444] : memref<36x8x256xf32, #tpu.memory_space<vmem>>, vector<1x8x256xf32>
    %577 = vector.shape_cast %576 : vector<1x8x256xf32> to vector<8x256xf32>
    %578 = vector.broadcast %575 : f32 to vector<8x256xf32>
    %579 = arith.mulf %578, %577 : vector<8x256xf32>
    %580 = arith.addf %574, %579 : vector<8x256xf32>
    %c2_445 = arith.constant 2 : index
    %c23_446 = arith.constant 23 : index
    %581 = memref.load %arg1[%c2_445, %c23_446] : memref<8x36xf32, #tpu.memory_space<smem>>
    %c23_447 = arith.constant 23 : index
    %c0_448 = arith.constant 0 : index
    %c0_449 = arith.constant 0 : index
    %582 = vector.load %arg3[%c23_447, %c0_448, %c0_449] : memref<36x8x256xf32, #tpu.memory_space<vmem>>, vector<1x8x256xf32>
    %583 = vector.shape_cast %582 : vector<1x8x256xf32> to vector<8x256xf32>
    %584 = vector.broadcast %581 : f32 to vector<8x256xf32>
    %585 = arith.mulf %584, %583 : vector<8x256xf32>
    %586 = arith.addf %580, %585 : vector<8x256xf32>
    %c2_450 = arith.constant 2 : index
    %c24_451 = arith.constant 24 : index
    %587 = memref.load %arg1[%c2_450, %c24_451] : memref<8x36xf32, #tpu.memory_space<smem>>
    %c24_452 = arith.constant 24 : index
    %c0_453 = arith.constant 0 : index
    %c0_454 = arith.constant 0 : index
    %588 = vector.load %arg3[%c24_452, %c0_453, %c0_454] : memref<36x8x256xf32, #tpu.memory_space<vmem>>, vector<1x8x256xf32>
    %589 = vector.shape_cast %588 : vector<1x8x256xf32> to vector<8x256xf32>
    %590 = vector.broadcast %587 : f32 to vector<8x256xf32>
    %591 = arith.mulf %590, %589 : vector<8x256xf32>
    %592 = arith.addf %586, %591 : vector<8x256xf32>
    %c2_455 = arith.constant 2 : index
    %c25_456 = arith.constant 25 : index
    %593 = memref.load %arg1[%c2_455, %c25_456] : memref<8x36xf32, #tpu.memory_space<smem>>
    %c25_457 = arith.constant 25 : index
    %c0_458 = arith.constant 0 : index
    %c0_459 = arith.constant 0 : index
    %594 = vector.load %arg3[%c25_457, %c0_458, %c0_459] : memref<36x8x256xf32, #tpu.memory_space<vmem>>, vector<1x8x256xf32>
    %595 = vector.shape_cast %594 : vector<1x8x256xf32> to vector<8x256xf32>
    %596 = vector.broadcast %593 : f32 to vector<8x256xf32>
    %597 = arith.mulf %596, %595 : vector<8x256xf32>
    %598 = arith.addf %592, %597 : vector<8x256xf32>
    %c2_460 = arith.constant 2 : index
    %c26_461 = arith.constant 26 : index
    %599 = memref.load %arg1[%c2_460, %c26_461] : memref<8x36xf32, #tpu.memory_space<smem>>
    %c26_462 = arith.constant 26 : index
    %c0_463 = arith.constant 0 : index
    %c0_464 = arith.constant 0 : index
    %600 = vector.load %arg3[%c26_462, %c0_463, %c0_464] : memref<36x8x256xf32, #tpu.memory_space<vmem>>, vector<1x8x256xf32>
    %601 = vector.shape_cast %600 : vector<1x8x256xf32> to vector<8x256xf32>
    %602 = vector.broadcast %599 : f32 to vector<8x256xf32>
    %603 = arith.mulf %602, %601 : vector<8x256xf32>
    %604 = arith.addf %598, %603 : vector<8x256xf32>
    %c2_465 = arith.constant 2 : index
    %c27_466 = arith.constant 27 : index
    %605 = memref.load %arg1[%c2_465, %c27_466] : memref<8x36xf32, #tpu.memory_space<smem>>
    %c27_467 = arith.constant 27 : index
    %c0_468 = arith.constant 0 : index
    %c0_469 = arith.constant 0 : index
    %606 = vector.load %arg3[%c27_467, %c0_468, %c0_469] : memref<36x8x256xf32, #tpu.memory_space<vmem>>, vector<1x8x256xf32>
    %607 = vector.shape_cast %606 : vector<1x8x256xf32> to vector<8x256xf32>
    %608 = vector.broadcast %605 : f32 to vector<8x256xf32>
    %609 = arith.mulf %608, %607 : vector<8x256xf32>
    %610 = arith.addf %604, %609 : vector<8x256xf32>
    %c2_470 = arith.constant 2 : index
    %c28_471 = arith.constant 28 : index
    %611 = memref.load %arg1[%c2_470, %c28_471] : memref<8x36xf32, #tpu.memory_space<smem>>
    %c28_472 = arith.constant 28 : index
    %c0_473 = arith.constant 0 : index
    %c0_474 = arith.constant 0 : index
    %612 = vector.load %arg3[%c28_472, %c0_473, %c0_474] : memref<36x8x256xf32, #tpu.memory_space<vmem>>, vector<1x8x256xf32>
    %613 = vector.shape_cast %612 : vector<1x8x256xf32> to vector<8x256xf32>
    %614 = vector.broadcast %611 : f32 to vector<8x256xf32>
    %615 = arith.mulf %614, %613 : vector<8x256xf32>
    %616 = arith.addf %610, %615 : vector<8x256xf32>
    %c2_475 = arith.constant 2 : index
    %c29_476 = arith.constant 29 : index
    %617 = memref.load %arg1[%c2_475, %c29_476] : memref<8x36xf32, #tpu.memory_space<smem>>
    %c29_477 = arith.constant 29 : index
    %c0_478 = arith.constant 0 : index
    %c0_479 = arith.constant 0 : index
    %618 = vector.load %arg3[%c29_477, %c0_478, %c0_479] : memref<36x8x256xf32, #tpu.memory_space<vmem>>, vector<1x8x256xf32>
    %619 = vector.shape_cast %618 : vector<1x8x256xf32> to vector<8x256xf32>
    %620 = vector.broadcast %617 : f32 to vector<8x256xf32>
    %621 = arith.mulf %620, %619 : vector<8x256xf32>
    %622 = arith.addf %616, %621 : vector<8x256xf32>
    %c2_480 = arith.constant 2 : index
    %c30_481 = arith.constant 30 : index
    %623 = memref.load %arg1[%c2_480, %c30_481] : memref<8x36xf32, #tpu.memory_space<smem>>
    %c30_482 = arith.constant 30 : index
    %c0_483 = arith.constant 0 : index
    %c0_484 = arith.constant 0 : index
    %624 = vector.load %arg3[%c30_482, %c0_483, %c0_484] : memref<36x8x256xf32, #tpu.memory_space<vmem>>, vector<1x8x256xf32>
    %625 = vector.shape_cast %624 : vector<1x8x256xf32> to vector<8x256xf32>
    %626 = vector.broadcast %623 : f32 to vector<8x256xf32>
    %627 = arith.mulf %626, %625 : vector<8x256xf32>
    %628 = arith.addf %622, %627 : vector<8x256xf32>
    %c2_485 = arith.constant 2 : index
    %c31_486 = arith.constant 31 : index
    %629 = memref.load %arg1[%c2_485, %c31_486] : memref<8x36xf32, #tpu.memory_space<smem>>
    %c31_487 = arith.constant 31 : index
    %c0_488 = arith.constant 0 : index
    %c0_489 = arith.constant 0 : index
    %630 = vector.load %arg3[%c31_487, %c0_488, %c0_489] : memref<36x8x256xf32, #tpu.memory_space<vmem>>, vector<1x8x256xf32>
    %631 = vector.shape_cast %630 : vector<1x8x256xf32> to vector<8x256xf32>
    %632 = vector.broadcast %629 : f32 to vector<8x256xf32>
    %633 = arith.mulf %632, %631 : vector<8x256xf32>
    %634 = arith.addf %628, %633 : vector<8x256xf32>
    %c2_490 = arith.constant 2 : index
    %c32_491 = arith.constant 32 : index
    %635 = memref.load %arg1[%c2_490, %c32_491] : memref<8x36xf32, #tpu.memory_space<smem>>
    %c32_492 = arith.constant 32 : index
    %c0_493 = arith.constant 0 : index
    %c0_494 = arith.constant 0 : index
    %636 = vector.load %arg3[%c32_492, %c0_493, %c0_494] : memref<36x8x256xf32, #tpu.memory_space<vmem>>, vector<1x8x256xf32>
    %637 = vector.shape_cast %636 : vector<1x8x256xf32> to vector<8x256xf32>
    %638 = vector.broadcast %635 : f32 to vector<8x256xf32>
    %639 = arith.mulf %638, %637 : vector<8x256xf32>
    %640 = arith.addf %634, %639 : vector<8x256xf32>
    %c2_495 = arith.constant 2 : index
    %c33_496 = arith.constant 33 : index
    %641 = memref.load %arg1[%c2_495, %c33_496] : memref<8x36xf32, #tpu.memory_space<smem>>
    %c33_497 = arith.constant 33 : index
    %c0_498 = arith.constant 0 : index
    %c0_499 = arith.constant 0 : index
    %642 = vector.load %arg3[%c33_497, %c0_498, %c0_499] : memref<36x8x256xf32, #tpu.memory_space<vmem>>, vector<1x8x256xf32>
    %643 = vector.shape_cast %642 : vector<1x8x256xf32> to vector<8x256xf32>
    %644 = vector.broadcast %641 : f32 to vector<8x256xf32>
    %645 = arith.mulf %644, %643 : vector<8x256xf32>
    %646 = arith.addf %640, %645 : vector<8x256xf32>
    %c2_500 = arith.constant 2 : index
    %c34_501 = arith.constant 34 : index
    %647 = memref.load %arg1[%c2_500, %c34_501] : memref<8x36xf32, #tpu.memory_space<smem>>
    %c34_502 = arith.constant 34 : index
    %c0_503 = arith.constant 0 : index
    %c0_504 = arith.constant 0 : index
    %648 = vector.load %arg3[%c34_502, %c0_503, %c0_504] : memref<36x8x256xf32, #tpu.memory_space<vmem>>, vector<1x8x256xf32>
    %649 = vector.shape_cast %648 : vector<1x8x256xf32> to vector<8x256xf32>
    %650 = vector.broadcast %647 : f32 to vector<8x256xf32>
    %651 = arith.mulf %650, %649 : vector<8x256xf32>
    %652 = arith.addf %646, %651 : vector<8x256xf32>
    %c2_505 = arith.constant 2 : index
    %c35_506 = arith.constant 35 : index
    %653 = memref.load %arg1[%c2_505, %c35_506] : memref<8x36xf32, #tpu.memory_space<smem>>
    %c35_507 = arith.constant 35 : index
    %c0_508 = arith.constant 0 : index
    %c0_509 = arith.constant 0 : index
    %654 = vector.load %arg3[%c35_507, %c0_508, %c0_509] : memref<36x8x256xf32, #tpu.memory_space<vmem>>, vector<1x8x256xf32>
    %655 = vector.shape_cast %654 : vector<1x8x256xf32> to vector<8x256xf32>
    %656 = vector.broadcast %653 : f32 to vector<8x256xf32>
    %657 = arith.mulf %656, %655 : vector<8x256xf32>
    %658 = arith.addf %652, %657 : vector<8x256xf32>
    %c2_510 = arith.constant 2 : index
    %659 = memref.load %arg2[%c2_510] : memref<8xf32, #tpu.memory_space<smem>>
    %660 = vector.broadcast %659 : f32 to vector<8x256xf32>
    %661 = arith.addf %658, %660 : vector<8x256xf32>
    %cst_511 = arith.constant 0.000000e+00 : f32
    %662 = vector.broadcast %cst_511 : f32 to vector<8x256xf32>
    %663 = arith.maximumf %661, %662 : vector<8x256xf32>
    %664 = arith.truncf %663 : vector<8x256xf32> to vector<8x256xbf16>
    %c0_512 = arith.constant 0 : index
    %c512 = arith.constant 512 : index
    %665 = vector.load %arg9[%c0_512, %c512] : memref<8x2048xbf16, #tpu.memory_space<vmem>>, vector<8x256xbf16>
    tpu.vector_store %arg9[%c0_512, %c512], %664 {strides = array<i32>} : memref<8x2048xbf16, #tpu.memory_space<vmem>>, vector<8x256xbf16>,
    %c3_513 = arith.constant 3 : index
    %c0_514 = arith.constant 0 : index
    %666 = memref.load %arg1[%c3_513, %c0_514] : memref<8x36xf32, #tpu.memory_space<smem>>
    %c0_515 = arith.constant 0 : index
    %c0_516 = arith.constant 0 : index
    %c0_517 = arith.constant 0 : index
    %667 = vector.load %arg3[%c0_515, %c0_516, %c0_517] : memref<36x8x256xf32, #tpu.memory_space<vmem>>, vector<1x8x256xf32>
    %668 = vector.shape_cast %667 : vector<1x8x256xf32> to vector<8x256xf32>
    %669 = vector.broadcast %666 : f32 to vector<8x256xf32>
    %670 = arith.mulf %669, %668 : vector<8x256xf32>
    %c3_518 = arith.constant 3 : index
    %c1_519 = arith.constant 1 : index
    %671 = memref.load %arg1[%c3_518, %c1_519] : memref<8x36xf32, #tpu.memory_space<smem>>
    %c1_520 = arith.constant 1 : index
    %c0_521 = arith.constant 0 : index
    %c0_522 = arith.constant 0 : index
    %672 = vector.load %arg3[%c1_520, %c0_521, %c0_522] : memref<36x8x256xf32, #tpu.memory_space<vmem>>, vector<1x8x256xf32>
    %673 = vector.shape_cast %672 : vector<1x8x256xf32> to vector<8x256xf32>
    %674 = vector.broadcast %671 : f32 to vector<8x256xf32>
    %675 = arith.mulf %674, %673 : vector<8x256xf32>
    %676 = arith.addf %670, %675 : vector<8x256xf32>
    %c3_523 = arith.constant 3 : index
    %c2_524 = arith.constant 2 : index
    %677 = memref.load %arg1[%c3_523, %c2_524] : memref<8x36xf32, #tpu.memory_space<smem>>
    %c2_525 = arith.constant 2 : index
    %c0_526 = arith.constant 0 : index
    %c0_527 = arith.constant 0 : index
    %678 = vector.load %arg3[%c2_525, %c0_526, %c0_527] : memref<36x8x256xf32, #tpu.memory_space<vmem>>, vector<1x8x256xf32>
    %679 = vector.shape_cast %678 : vector<1x8x256xf32> to vector<8x256xf32>
    %680 = vector.broadcast %677 : f32 to vector<8x256xf32>
    %681 = arith.mulf %680, %679 : vector<8x256xf32>
    %682 = arith.addf %676, %681 : vector<8x256xf32>
    %c3_528 = arith.constant 3 : index
    %c3_529 = arith.constant 3 : index
    %683 = memref.load %arg1[%c3_528, %c3_529] : memref<8x36xf32, #tpu.memory_space<smem>>
    %c3_530 = arith.constant 3 : index
    %c0_531 = arith.constant 0 : index
    %c0_532 = arith.constant 0 : index
    %684 = vector.load %arg3[%c3_530, %c0_531, %c0_532] : memref<36x8x256xf32, #tpu.memory_space<vmem>>, vector<1x8x256xf32>
    %685 = vector.shape_cast %684 : vector<1x8x256xf32> to vector<8x256xf32>
    %686 = vector.broadcast %683 : f32 to vector<8x256xf32>
    %687 = arith.mulf %686, %685 : vector<8x256xf32>
    %688 = arith.addf %682, %687 : vector<8x256xf32>
    %c3_533 = arith.constant 3 : index
    %c4_534 = arith.constant 4 : index
    %689 = memref.load %arg1[%c3_533, %c4_534] : memref<8x36xf32, #tpu.memory_space<smem>>
    %c4_535 = arith.constant 4 : index
    %c0_536 = arith.constant 0 : index
    %c0_537 = arith.constant 0 : index
    %690 = vector.load %arg3[%c4_535, %c0_536, %c0_537] : memref<36x8x256xf32, #tpu.memory_space<vmem>>, vector<1x8x256xf32>
    %691 = vector.shape_cast %690 : vector<1x8x256xf32> to vector<8x256xf32>
    %692 = vector.broadcast %689 : f32 to vector<8x256xf32>
    %693 = arith.mulf %692, %691 : vector<8x256xf32>
    %694 = arith.addf %688, %693 : vector<8x256xf32>
    %c3_538 = arith.constant 3 : index
    %c5_539 = arith.constant 5 : index
    %695 = memref.load %arg1[%c3_538, %c5_539] : memref<8x36xf32, #tpu.memory_space<smem>>
    %c5_540 = arith.constant 5 : index
    %c0_541 = arith.constant 0 : index
    %c0_542 = arith.constant 0 : index
    %696 = vector.load %arg3[%c5_540, %c0_541, %c0_542] : memref<36x8x256xf32, #tpu.memory_space<vmem>>, vector<1x8x256xf32>
    %697 = vector.shape_cast %696 : vector<1x8x256xf32> to vector<8x256xf32>
    %698 = vector.broadcast %695 : f32 to vector<8x256xf32>
    %699 = arith.mulf %698, %697 : vector<8x256xf32>
    %700 = arith.addf %694, %699 : vector<8x256xf32>
    %c3_543 = arith.constant 3 : index
    %c6_544 = arith.constant 6 : index
    %701 = memref.load %arg1[%c3_543, %c6_544] : memref<8x36xf32, #tpu.memory_space<smem>>
    %c6_545 = arith.constant 6 : index
    %c0_546 = arith.constant 0 : index
    %c0_547 = arith.constant 0 : index
    %702 = vector.load %arg3[%c6_545, %c0_546, %c0_547] : memref<36x8x256xf32, #tpu.memory_space<vmem>>, vector<1x8x256xf32>
    %703 = vector.shape_cast %702 : vector<1x8x256xf32> to vector<8x256xf32>
    %704 = vector.broadcast %701 : f32 to vector<8x256xf32>
    %705 = arith.mulf %704, %703 : vector<8x256xf32>
    %706 = arith.addf %700, %705 : vector<8x256xf32>
    %c3_548 = arith.constant 3 : index
    %c7_549 = arith.constant 7 : index
    %707 = memref.load %arg1[%c3_548, %c7_549] : memref<8x36xf32, #tpu.memory_space<smem>>
    %c7_550 = arith.constant 7 : index
    %c0_551 = arith.constant 0 : index
    %c0_552 = arith.constant 0 : index
    %708 = vector.load %arg3[%c7_550, %c0_551, %c0_552] : memref<36x8x256xf32, #tpu.memory_space<vmem>>, vector<1x8x256xf32>
    %709 = vector.shape_cast %708 : vector<1x8x256xf32> to vector<8x256xf32>
    %710 = vector.broadcast %707 : f32 to vector<8x256xf32>
    %711 = arith.mulf %710, %709 : vector<8x256xf32>
    %712 = arith.addf %706, %711 : vector<8x256xf32>
    %c3_553 = arith.constant 3 : index
    %c8_554 = arith.constant 8 : index
    %713 = memref.load %arg1[%c3_553, %c8_554] : memref<8x36xf32, #tpu.memory_space<smem>>
    %c8_555 = arith.constant 8 : index
    %c0_556 = arith.constant 0 : index
    %c0_557 = arith.constant 0 : index
    %714 = vector.load %arg3[%c8_555, %c0_556, %c0_557] : memref<36x8x256xf32, #tpu.memory_space<vmem>>, vector<1x8x256xf32>
    %715 = vector.shape_cast %714 : vector<1x8x256xf32> to vector<8x256xf32>
    %716 = vector.broadcast %713 : f32 to vector<8x256xf32>
    %717 = arith.mulf %716, %715 : vector<8x256xf32>
    %718 = arith.addf %712, %717 : vector<8x256xf32>
    %c3_558 = arith.constant 3 : index
    %c9_559 = arith.constant 9 : index
    %719 = memref.load %arg1[%c3_558, %c9_559] : memref<8x36xf32, #tpu.memory_space<smem>>
    %c9_560 = arith.constant 9 : index
    %c0_561 = arith.constant 0 : index
    %c0_562 = arith.constant 0 : index
    %720 = vector.load %arg3[%c9_560, %c0_561, %c0_562] : memref<36x8x256xf32, #tpu.memory_space<vmem>>, vector<1x8x256xf32>
    %721 = vector.shape_cast %720 : vector<1x8x256xf32> to vector<8x256xf32>
    %722 = vector.broadcast %719 : f32 to vector<8x256xf32>
    %723 = arith.mulf %722, %721 : vector<8x256xf32>
    %724 = arith.addf %718, %723 : vector<8x256xf32>
    %c3_563 = arith.constant 3 : index
    %c10_564 = arith.constant 10 : index
    %725 = memref.load %arg1[%c3_563, %c10_564] : memref<8x36xf32, #tpu.memory_space<smem>>
    %c10_565 = arith.constant 10 : index
    %c0_566 = arith.constant 0 : index
    %c0_567 = arith.constant 0 : index
    %726 = vector.load %arg3[%c10_565, %c0_566, %c0_567] : memref<36x8x256xf32, #tpu.memory_space<vmem>>, vector<1x8x256xf32>
    %727 = vector.shape_cast %726 : vector<1x8x256xf32> to vector<8x256xf32>
    %728 = vector.broadcast %725 : f32 to vector<8x256xf32>
    %729 = arith.mulf %728, %727 : vector<8x256xf32>
    %730 = arith.addf %724, %729 : vector<8x256xf32>
    %c3_568 = arith.constant 3 : index
    %c11_569 = arith.constant 11 : index
    %731 = memref.load %arg1[%c3_568, %c11_569] : memref<8x36xf32, #tpu.memory_space<smem>>
    %c11_570 = arith.constant 11 : index
    %c0_571 = arith.constant 0 : index
    %c0_572 = arith.constant 0 : index
    %732 = vector.load %arg3[%c11_570, %c0_571, %c0_572] : memref<36x8x256xf32, #tpu.memory_space<vmem>>, vector<1x8x256xf32>
    %733 = vector.shape_cast %732 : vector<1x8x256xf32> to vector<8x256xf32>
    %734 = vector.broadcast %731 : f32 to vector<8x256xf32>
    %735 = arith.mulf %734, %733 : vector<8x256xf32>
    %736 = arith.addf %730, %735 : vector<8x256xf32>
    %c3_573 = arith.constant 3 : index
    %c12_574 = arith.constant 12 : index
    %737 = memref.load %arg1[%c3_573, %c12_574] : memref<8x36xf32, #tpu.memory_space<smem>>
    %c12_575 = arith.constant 12 : index
    %c0_576 = arith.constant 0 : index
    %c0_577 = arith.constant 0 : index
    %738 = vector.load %arg3[%c12_575, %c0_576, %c0_577] : memref<36x8x256xf32, #tpu.memory_space<vmem>>, vector<1x8x256xf32>
    %739 = vector.shape_cast %738 : vector<1x8x256xf32> to vector<8x256xf32>
    %740 = vector.broadcast %737 : f32 to vector<8x256xf32>
    %741 = arith.mulf %740, %739 : vector<8x256xf32>
    %742 = arith.addf %736, %741 : vector<8x256xf32>
    %c3_578 = arith.constant 3 : index
    %c13_579 = arith.constant 13 : index
    %743 = memref.load %arg1[%c3_578, %c13_579] : memref<8x36xf32, #tpu.memory_space<smem>>
    %c13_580 = arith.constant 13 : index
    %c0_581 = arith.constant 0 : index
    %c0_582 = arith.constant 0 : index
    %744 = vector.load %arg3[%c13_580, %c0_581, %c0_582] : memref<36x8x256xf32, #tpu.memory_space<vmem>>, vector<1x8x256xf32>
    %745 = vector.shape_cast %744 : vector<1x8x256xf32> to vector<8x256xf32>
    %746 = vector.broadcast %743 : f32 to vector<8x256xf32>
    %747 = arith.mulf %746, %745 : vector<8x256xf32>
    %748 = arith.addf %742, %747 : vector<8x256xf32>
    %c3_583 = arith.constant 3 : index
    %c14_584 = arith.constant 14 : index
    %749 = memref.load %arg1[%c3_583, %c14_584] : memref<8x36xf32, #tpu.memory_space<smem>>
    %c14_585 = arith.constant 14 : index
    %c0_586 = arith.constant 0 : index
    %c0_587 = arith.constant 0 : index
    %750 = vector.load %arg3[%c14_585, %c0_586, %c0_587] : memref<36x8x256xf32, #tpu.memory_space<vmem>>, vector<1x8x256xf32>
    %751 = vector.shape_cast %750 : vector<1x8x256xf32> to vector<8x256xf32>
    %752 = vector.broadcast %749 : f32 to vector<8x256xf32>
    %753 = arith.mulf %752, %751 : vector<8x256xf32>
    %754 = arith.addf %748, %753 : vector<8x256xf32>
    %c3_588 = arith.constant 3 : index
    %c15_589 = arith.constant 15 : index
    %755 = memref.load %arg1[%c3_588, %c15_589] : memref<8x36xf32, #tpu.memory_space<smem>>
    %c15_590 = arith.constant 15 : index
    %c0_591 = arith.constant 0 : index
    %c0_592 = arith.constant 0 : index
    %756 = vector.load %arg3[%c15_590, %c0_591, %c0_592] : memref<36x8x256xf32, #tpu.memory_space<vmem>>, vector<1x8x256xf32>
    %757 = vector.shape_cast %756 : vector<1x8x256xf32> to vector<8x256xf32>
    %758 = vector.broadcast %755 : f32 to vector<8x256xf32>
    %759 = arith.mulf %758, %757 : vector<8x256xf32>
    %760 = arith.addf %754, %759 : vector<8x256xf32>
    %c3_593 = arith.constant 3 : index
    %c16_594 = arith.constant 16 : index
    %761 = memref.load %arg1[%c3_593, %c16_594] : memref<8x36xf32, #tpu.memory_space<smem>>
    %c16_595 = arith.constant 16 : index
    %c0_596 = arith.constant 0 : index
    %c0_597 = arith.constant 0 : index
    %762 = vector.load %arg3[%c16_595, %c0_596, %c0_597] : memref<36x8x256xf32, #tpu.memory_space<vmem>>, vector<1x8x256xf32>
    %763 = vector.shape_cast %762 : vector<1x8x256xf32> to vector<8x256xf32>
    %764 = vector.broadcast %761 : f32 to vector<8x256xf32>
    %765 = arith.mulf %764, %763 : vector<8x256xf32>
    %766 = arith.addf %760, %765 : vector<8x256xf32>
    %c3_598 = arith.constant 3 : index
    %c17_599 = arith.constant 17 : index
    %767 = memref.load %arg1[%c3_598, %c17_599] : memref<8x36xf32, #tpu.memory_space<smem>>
    %c17_600 = arith.constant 17 : index
    %c0_601 = arith.constant 0 : index
    %c0_602 = arith.constant 0 : index
    %768 = vector.load %arg3[%c17_600, %c0_601, %c0_602] : memref<36x8x256xf32, #tpu.memory_space<vmem>>, vector<1x8x256xf32>
    %769 = vector.shape_cast %768 : vector<1x8x256xf32> to vector<8x256xf32>
    %770 = vector.broadcast %767 : f32 to vector<8x256xf32>
    %771 = arith.mulf %770, %769 : vector<8x256xf32>
    %772 = arith.addf %766, %771 : vector<8x256xf32>
    %c3_603 = arith.constant 3 : index
    %c18_604 = arith.constant 18 : index
    %773 = memref.load %arg1[%c3_603, %c18_604] : memref<8x36xf32, #tpu.memory_space<smem>>
    %c18_605 = arith.constant 18 : index
    %c0_606 = arith.constant 0 : index
    %c0_607 = arith.constant 0 : index
    %774 = vector.load %arg3[%c18_605, %c0_606, %c0_607] : memref<36x8x256xf32, #tpu.memory_space<vmem>>, vector<1x8x256xf32>
    %775 = vector.shape_cast %774 : vector<1x8x256xf32> to vector<8x256xf32>
    %776 = vector.broadcast %773 : f32 to vector<8x256xf32>
    %777 = arith.mulf %776, %775 : vector<8x256xf32>
    %778 = arith.addf %772, %777 : vector<8x256xf32>
    %c3_608 = arith.constant 3 : index
    %c19_609 = arith.constant 19 : index
    %779 = memref.load %arg1[%c3_608, %c19_609] : memref<8x36xf32, #tpu.memory_space<smem>>
    %c19_610 = arith.constant 19 : index
    %c0_611 = arith.constant 0 : index
    %c0_612 = arith.constant 0 : index
    %780 = vector.load %arg3[%c19_610, %c0_611, %c0_612] : memref<36x8x256xf32, #tpu.memory_space<vmem>>, vector<1x8x256xf32>
    %781 = vector.shape_cast %780 : vector<1x8x256xf32> to vector<8x256xf32>
    %782 = vector.broadcast %779 : f32 to vector<8x256xf32>
    %783 = arith.mulf %782, %781 : vector<8x256xf32>
    %784 = arith.addf %778, %783 : vector<8x256xf32>
    %c3_613 = arith.constant 3 : index
    %c20_614 = arith.constant 20 : index
    %785 = memref.load %arg1[%c3_613, %c20_614] : memref<8x36xf32, #tpu.memory_space<smem>>
    %c20_615 = arith.constant 20 : index
    %c0_616 = arith.constant 0 : index
    %c0_617 = arith.constant 0 : index
    %786 = vector.load %arg3[%c20_615, %c0_616, %c0_617] : memref<36x8x256xf32, #tpu.memory_space<vmem>>, vector<1x8x256xf32>
    %787 = vector.shape_cast %786 : vector<1x8x256xf32> to vector<8x256xf32>
    %788 = vector.broadcast %785 : f32 to vector<8x256xf32>
    %789 = arith.mulf %788, %787 : vector<8x256xf32>
    %790 = arith.addf %784, %789 : vector<8x256xf32>
    %c3_618 = arith.constant 3 : index
    %c21_619 = arith.constant 21 : index
    %791 = memref.load %arg1[%c3_618, %c21_619] : memref<8x36xf32, #tpu.memory_space<smem>>
    %c21_620 = arith.constant 21 : index
    %c0_621 = arith.constant 0 : index
    %c0_622 = arith.constant 0 : index
    %792 = vector.load %arg3[%c21_620, %c0_621, %c0_622] : memref<36x8x256xf32, #tpu.memory_space<vmem>>, vector<1x8x256xf32>
    %793 = vector.shape_cast %792 : vector<1x8x256xf32> to vector<8x256xf32>
    %794 = vector.broadcast %791 : f32 to vector<8x256xf32>
    %795 = arith.mulf %794, %793 : vector<8x256xf32>
    %796 = arith.addf %790, %795 : vector<8x256xf32>
    %c3_623 = arith.constant 3 : index
    %c22_624 = arith.constant 22 : index
    %797 = memref.load %arg1[%c3_623, %c22_624] : memref<8x36xf32, #tpu.memory_space<smem>>
    %c22_625 = arith.constant 22 : index
    %c0_626 = arith.constant 0 : index
    %c0_627 = arith.constant 0 : index
    %798 = vector.load %arg3[%c22_625, %c0_626, %c0_627] : memref<36x8x256xf32, #tpu.memory_space<vmem>>, vector<1x8x256xf32>
    %799 = vector.shape_cast %798 : vector<1x8x256xf32> to vector<8x256xf32>
    %800 = vector.broadcast %797 : f32 to vector<8x256xf32>
    %801 = arith.mulf %800, %799 : vector<8x256xf32>
    %802 = arith.addf %796, %801 : vector<8x256xf32>
    %c3_628 = arith.constant 3 : index
    %c23_629 = arith.constant 23 : index
    %803 = memref.load %arg1[%c3_628, %c23_629] : memref<8x36xf32, #tpu.memory_space<smem>>
    %c23_630 = arith.constant 23 : index
    %c0_631 = arith.constant 0 : index
    %c0_632 = arith.constant 0 : index
    %804 = vector.load %arg3[%c23_630, %c0_631, %c0_632] : memref<36x8x256xf32, #tpu.memory_space<vmem>>, vector<1x8x256xf32>
    %805 = vector.shape_cast %804 : vector<1x8x256xf32> to vector<8x256xf32>
    %806 = vector.broadcast %803 : f32 to vector<8x256xf32>
    %807 = arith.mulf %806, %805 : vector<8x256xf32>
    %808 = arith.addf %802, %807 : vector<8x256xf32>
    %c3_633 = arith.constant 3 : index
    %c24_634 = arith.constant 24 : index
    %809 = memref.load %arg1[%c3_633, %c24_634] : memref<8x36xf32, #tpu.memory_space<smem>>
    %c24_635 = arith.constant 24 : index
    %c0_636 = arith.constant 0 : index
    %c0_637 = arith.constant 0 : index
    %810 = vector.load %arg3[%c24_635, %c0_636, %c0_637] : memref<36x8x256xf32, #tpu.memory_space<vmem>>, vector<1x8x256xf32>
    %811 = vector.shape_cast %810 : vector<1x8x256xf32> to vector<8x256xf32>
    %812 = vector.broadcast %809 : f32 to vector<8x256xf32>
    %813 = arith.mulf %812, %811 : vector<8x256xf32>
    %814 = arith.addf %808, %813 : vector<8x256xf32>
    %c3_638 = arith.constant 3 : index
    %c25_639 = arith.constant 25 : index
    %815 = memref.load %arg1[%c3_638, %c25_639] : memref<8x36xf32, #tpu.memory_space<smem>>
    %c25_640 = arith.constant 25 : index
    %c0_641 = arith.constant 0 : index
    %c0_642 = arith.constant 0 : index
    %816 = vector.load %arg3[%c25_640, %c0_641, %c0_642] : memref<36x8x256xf32, #tpu.memory_space<vmem>>, vector<1x8x256xf32>
    %817 = vector.shape_cast %816 : vector<1x8x256xf32> to vector<8x256xf32>
    %818 = vector.broadcast %815 : f32 to vector<8x256xf32>
    %819 = arith.mulf %818, %817 : vector<8x256xf32>
    %820 = arith.addf %814, %819 : vector<8x256xf32>
    %c3_643 = arith.constant 3 : index
    %c26_644 = arith.constant 26 : index
    %821 = memref.load %arg1[%c3_643, %c26_644] : memref<8x36xf32, #tpu.memory_space<smem>>
    %c26_645 = arith.constant 26 : index
    %c0_646 = arith.constant 0 : index
    %c0_647 = arith.constant 0 : index
    %822 = vector.load %arg3[%c26_645, %c0_646, %c0_647] : memref<36x8x256xf32, #tpu.memory_space<vmem>>, vector<1x8x256xf32>
    %823 = vector.shape_cast %822 : vector<1x8x256xf32> to vector<8x256xf32>
    %824 = vector.broadcast %821 : f32 to vector<8x256xf32>
    %825 = arith.mulf %824, %823 : vector<8x256xf32>
    %826 = arith.addf %820, %825 : vector<8x256xf32>
    %c3_648 = arith.constant 3 : index
    %c27_649 = arith.constant 27 : index
    %827 = memref.load %arg1[%c3_648, %c27_649] : memref<8x36xf32, #tpu.memory_space<smem>>
    %c27_650 = arith.constant 27 : index
    %c0_651 = arith.constant 0 : index
    %c0_652 = arith.constant 0 : index
    %828 = vector.load %arg3[%c27_650, %c0_651, %c0_652] : memref<36x8x256xf32, #tpu.memory_space<vmem>>, vector<1x8x256xf32>
    %829 = vector.shape_cast %828 : vector<1x8x256xf32> to vector<8x256xf32>
    %830 = vector.broadcast %827 : f32 to vector<8x256xf32>
    %831 = arith.mulf %830, %829 : vector<8x256xf32>
    %832 = arith.addf %826, %831 : vector<8x256xf32>
    %c3_653 = arith.constant 3 : index
    %c28_654 = arith.constant 28 : index
    %833 = memref.load %arg1[%c3_653, %c28_654] : memref<8x36xf32, #tpu.memory_space<smem>>
    %c28_655 = arith.constant 28 : index
    %c0_656 = arith.constant 0 : index
    %c0_657 = arith.constant 0 : index
    %834 = vector.load %arg3[%c28_655, %c0_656, %c0_657] : memref<36x8x256xf32, #tpu.memory_space<vmem>>, vector<1x8x256xf32>
    %835 = vector.shape_cast %834 : vector<1x8x256xf32> to vector<8x256xf32>
    %836 = vector.broadcast %833 : f32 to vector<8x256xf32>
    %837 = arith.mulf %836, %835 : vector<8x256xf32>
    %838 = arith.addf %832, %837 : vector<8x256xf32>
    %c3_658 = arith.constant 3 : index
    %c29_659 = arith.constant 29 : index
    %839 = memref.load %arg1[%c3_658, %c29_659] : memref<8x36xf32, #tpu.memory_space<smem>>
    %c29_660 = arith.constant 29 : index
    %c0_661 = arith.constant 0 : index
    %c0_662 = arith.constant 0 : index
    %840 = vector.load %arg3[%c29_660, %c0_661, %c0_662] : memref<36x8x256xf32, #tpu.memory_space<vmem>>, vector<1x8x256xf32>
    %841 = vector.shape_cast %840 : vector<1x8x256xf32> to vector<8x256xf32>
    %842 = vector.broadcast %839 : f32 to vector<8x256xf32>
    %843 = arith.mulf %842, %841 : vector<8x256xf32>
    %844 = arith.addf %838, %843 : vector<8x256xf32>
    %c3_663 = arith.constant 3 : index
    %c30_664 = arith.constant 30 : index
    %845 = memref.load %arg1[%c3_663, %c30_664] : memref<8x36xf32, #tpu.memory_space<smem>>
    %c30_665 = arith.constant 30 : index
    %c0_666 = arith.constant 0 : index
    %c0_667 = arith.constant 0 : index
    %846 = vector.load %arg3[%c30_665, %c0_666, %c0_667] : memref<36x8x256xf32, #tpu.memory_space<vmem>>, vector<1x8x256xf32>
    %847 = vector.shape_cast %846 : vector<1x8x256xf32> to vector<8x256xf32>
    %848 = vector.broadcast %845 : f32 to vector<8x256xf32>
    %849 = arith.mulf %848, %847 : vector<8x256xf32>
    %850 = arith.addf %844, %849 : vector<8x256xf32>
    %c3_668 = arith.constant 3 : index
    %c31_669 = arith.constant 31 : index
    %851 = memref.load %arg1[%c3_668, %c31_669] : memref<8x36xf32, #tpu.memory_space<smem>>
    %c31_670 = arith.constant 31 : index
    %c0_671 = arith.constant 0 : index
    %c0_672 = arith.constant 0 : index
    %852 = vector.load %arg3[%c31_670, %c0_671, %c0_672] : memref<36x8x256xf32, #tpu.memory_space<vmem>>, vector<1x8x256xf32>
    %853 = vector.shape_cast %852 : vector<1x8x256xf32> to vector<8x256xf32>
    %854 = vector.broadcast %851 : f32 to vector<8x256xf32>
    %855 = arith.mulf %854, %853 : vector<8x256xf32>
    %856 = arith.addf %850, %855 : vector<8x256xf32>
    %c3_673 = arith.constant 3 : index
    %c32_674 = arith.constant 32 : index
    %857 = memref.load %arg1[%c3_673, %c32_674] : memref<8x36xf32, #tpu.memory_space<smem>>
    %c32_675 = arith.constant 32 : index
    %c0_676 = arith.constant 0 : index
    %c0_677 = arith.constant 0 : index
    %858 = vector.load %arg3[%c32_675, %c0_676, %c0_677] : memref<36x8x256xf32, #tpu.memory_space<vmem>>, vector<1x8x256xf32>
    %859 = vector.shape_cast %858 : vector<1x8x256xf32> to vector<8x256xf32>
    %860 = vector.broadcast %857 : f32 to vector<8x256xf32>
    %861 = arith.mulf %860, %859 : vector<8x256xf32>
    %862 = arith.addf %856, %861 : vector<8x256xf32>
    %c3_678 = arith.constant 3 : index
    %c33_679 = arith.constant 33 : index
    %863 = memref.load %arg1[%c3_678, %c33_679] : memref<8x36xf32, #tpu.memory_space<smem>>
    %c33_680 = arith.constant 33 : index
    %c0_681 = arith.constant 0 : index
    %c0_682 = arith.constant 0 : index
    %864 = vector.load %arg3[%c33_680, %c0_681, %c0_682] : memref<36x8x256xf32, #tpu.memory_space<vmem>>, vector<1x8x256xf32>
    %865 = vector.shape_cast %864 : vector<1x8x256xf32> to vector<8x256xf32>
    %866 = vector.broadcast %863 : f32 to vector<8x256xf32>
    %867 = arith.mulf %866, %865 : vector<8x256xf32>
    %868 = arith.addf %862, %867 : vector<8x256xf32>
    %c3_683 = arith.constant 3 : index
    %c34_684 = arith.constant 34 : index
    %869 = memref.load %arg1[%c3_683, %c34_684] : memref<8x36xf32, #tpu.memory_space<smem>>
    %c34_685 = arith.constant 34 : index
    %c0_686 = arith.constant 0 : index
    %c0_687 = arith.constant 0 : index
    %870 = vector.load %arg3[%c34_685, %c0_686, %c0_687] : memref<36x8x256xf32, #tpu.memory_space<vmem>>, vector<1x8x256xf32>
    %871 = vector.shape_cast %870 : vector<1x8x256xf32> to vector<8x256xf32>
    %872 = vector.broadcast %869 : f32 to vector<8x256xf32>
    %873 = arith.mulf %872, %871 : vector<8x256xf32>
    %874 = arith.addf %868, %873 : vector<8x256xf32>
    %c3_688 = arith.constant 3 : index
    %c35_689 = arith.constant 35 : index
    %875 = memref.load %arg1[%c3_688, %c35_689] : memref<8x36xf32, #tpu.memory_space<smem>>
    %c35_690 = arith.constant 35 : index
    %c0_691 = arith.constant 0 : index
    %c0_692 = arith.constant 0 : index
    %876 = vector.load %arg3[%c35_690, %c0_691, %c0_692] : memref<36x8x256xf32, #tpu.memory_space<vmem>>, vector<1x8x256xf32>
    %877 = vector.shape_cast %876 : vector<1x8x256xf32> to vector<8x256xf32>
    %878 = vector.broadcast %875 : f32 to vector<8x256xf32>
    %879 = arith.mulf %878, %877 : vector<8x256xf32>
    %880 = arith.addf %874, %879 : vector<8x256xf32>
    %c3_693 = arith.constant 3 : index
    %881 = memref.load %arg2[%c3_693] : memref<8xf32, #tpu.memory_space<smem>>
    %882 = vector.broadcast %881 : f32 to vector<8x256xf32>
    %883 = arith.addf %880, %882 : vector<8x256xf32>
    %cst_694 = arith.constant 0.000000e+00 : f32
    %884 = vector.broadcast %cst_694 : f32 to vector<8x256xf32>
    %885 = arith.maximumf %883, %884 : vector<8x256xf32>
    %886 = arith.truncf %885 : vector<8x256xf32> to vector<8x256xbf16>
    %c0_695 = arith.constant 0 : index
    %c768 = arith.constant 768 : index
    %887 = vector.load %arg9[%c0_695, %c768] : memref<8x2048xbf16, #tpu.memory_space<vmem>>, vector<8x256xbf16>
    tpu.vector_store %arg9[%c0_695, %c768], %886 {strides = array<i32>} : memref<8x2048xbf16, #tpu.memory_space<vmem>>, vector<8x256xbf16>,
    %c4_696 = arith.constant 4 : index
    %c0_697 = arith.constant 0 : index
    %888 = memref.load %arg1[%c4_696, %c0_697] : memref<8x36xf32, #tpu.memory_space<smem>>
    %c0_698 = arith.constant 0 : index
    %c0_699 = arith.constant 0 : index
    %c0_700 = arith.constant 0 : index
    %889 = vector.load %arg3[%c0_698, %c0_699, %c0_700] : memref<36x8x256xf32, #tpu.memory_space<vmem>>, vector<1x8x256xf32>
    %890 = vector.shape_cast %889 : vector<1x8x256xf32> to vector<8x256xf32>
    %891 = vector.broadcast %888 : f32 to vector<8x256xf32>
    %892 = arith.mulf %891, %890 : vector<8x256xf32>
    %c4_701 = arith.constant 4 : index
    %c1_702 = arith.constant 1 : index
    %893 = memref.load %arg1[%c4_701, %c1_702] : memref<8x36xf32, #tpu.memory_space<smem>>
    %c1_703 = arith.constant 1 : index
    %c0_704 = arith.constant 0 : index
    %c0_705 = arith.constant 0 : index
    %894 = vector.load %arg3[%c1_703, %c0_704, %c0_705] : memref<36x8x256xf32, #tpu.memory_space<vmem>>, vector<1x8x256xf32>
    %895 = vector.shape_cast %894 : vector<1x8x256xf32> to vector<8x256xf32>
    %896 = vector.broadcast %893 : f32 to vector<8x256xf32>
    %897 = arith.mulf %896, %895 : vector<8x256xf32>
    %898 = arith.addf %892, %897 : vector<8x256xf32>
    %c4_706 = arith.constant 4 : index
    %c2_707 = arith.constant 2 : index
    %899 = memref.load %arg1[%c4_706, %c2_707] : memref<8x36xf32, #tpu.memory_space<smem>>
    %c2_708 = arith.constant 2 : index
    %c0_709 = arith.constant 0 : index
    %c0_710 = arith.constant 0 : index
    %900 = vector.load %arg3[%c2_708, %c0_709, %c0_710] : memref<36x8x256xf32, #tpu.memory_space<vmem>>, vector<1x8x256xf32>
    %901 = vector.shape_cast %900 : vector<1x8x256xf32> to vector<8x256xf32>
    %902 = vector.broadcast %899 : f32 to vector<8x256xf32>
    %903 = arith.mulf %902, %901 : vector<8x256xf32>
    %904 = arith.addf %898, %903 : vector<8x256xf32>
    %c4_711 = arith.constant 4 : index
    %c3_712 = arith.constant 3 : index
    %905 = memref.load %arg1[%c4_711, %c3_712] : memref<8x36xf32, #tpu.memory_space<smem>>
    %c3_713 = arith.constant 3 : index
    %c0_714 = arith.constant 0 : index
    %c0_715 = arith.constant 0 : index
    %906 = vector.load %arg3[%c3_713, %c0_714, %c0_715] : memref<36x8x256xf32, #tpu.memory_space<vmem>>, vector<1x8x256xf32>
    %907 = vector.shape_cast %906 : vector<1x8x256xf32> to vector<8x256xf32>
    %908 = vector.broadcast %905 : f32 to vector<8x256xf32>
    %909 = arith.mulf %908, %907 : vector<8x256xf32>
    %910 = arith.addf %904, %909 : vector<8x256xf32>
    %c4_716 = arith.constant 4 : index
    %c4_717 = arith.constant 4 : index
    %911 = memref.load %arg1[%c4_716, %c4_717] : memref<8x36xf32, #tpu.memory_space<smem>>
    %c4_718 = arith.constant 4 : index
    %c0_719 = arith.constant 0 : index
    %c0_720 = arith.constant 0 : index
    %912 = vector.load %arg3[%c4_718, %c0_719, %c0_720] : memref<36x8x256xf32, #tpu.memory_space<vmem>>, vector<1x8x256xf32>
    %913 = vector.shape_cast %912 : vector<1x8x256xf32> to vector<8x256xf32>
    %914 = vector.broadcast %911 : f32 to vector<8x256xf32>
    %915 = arith.mulf %914, %913 : vector<8x256xf32>
    %916 = arith.addf %910, %915 : vector<8x256xf32>
    %c4_721 = arith.constant 4 : index
    %c5_722 = arith.constant 5 : index
    %917 = memref.load %arg1[%c4_721, %c5_722] : memref<8x36xf32, #tpu.memory_space<smem>>
    %c5_723 = arith.constant 5 : index
    %c0_724 = arith.constant 0 : index
    %c0_725 = arith.constant 0 : index
    %918 = vector.load %arg3[%c5_723, %c0_724, %c0_725] : memref<36x8x256xf32, #tpu.memory_space<vmem>>, vector<1x8x256xf32>
    %919 = vector.shape_cast %918 : vector<1x8x256xf32> to vector<8x256xf32>
    %920 = vector.broadcast %917 : f32 to vector<8x256xf32>
    %921 = arith.mulf %920, %919 : vector<8x256xf32>
    %922 = arith.addf %916, %921 : vector<8x256xf32>
    %c4_726 = arith.constant 4 : index
    %c6_727 = arith.constant 6 : index
    %923 = memref.load %arg1[%c4_726, %c6_727] : memref<8x36xf32, #tpu.memory_space<smem>>
    %c6_728 = arith.constant 6 : index
    %c0_729 = arith.constant 0 : index
    %c0_730 = arith.constant 0 : index
    %924 = vector.load %arg3[%c6_728, %c0_729, %c0_730] : memref<36x8x256xf32, #tpu.memory_space<vmem>>, vector<1x8x256xf32>
    %925 = vector.shape_cast %924 : vector<1x8x256xf32> to vector<8x256xf32>
    %926 = vector.broadcast %923 : f32 to vector<8x256xf32>
    %927 = arith.mulf %926, %925 : vector<8x256xf32>
    %928 = arith.addf %922, %927 : vector<8x256xf32>
    %c4_731 = arith.constant 4 : index
    %c7_732 = arith.constant 7 : index
    %929 = memref.load %arg1[%c4_731, %c7_732] : memref<8x36xf32, #tpu.memory_space<smem>>
    %c7_733 = arith.constant 7 : index
    %c0_734 = arith.constant 0 : index
    %c0_735 = arith.constant 0 : index
    %930 = vector.load %arg3[%c7_733, %c0_734, %c0_735] : memref<36x8x256xf32, #tpu.memory_space<vmem>>, vector<1x8x256xf32>
    %931 = vector.shape_cast %930 : vector<1x8x256xf32> to vector<8x256xf32>
    %932 = vector.broadcast %929 : f32 to vector<8x256xf32>
    %933 = arith.mulf %932, %931 : vector<8x256xf32>
    %934 = arith.addf %928, %933 : vector<8x256xf32>
    %c4_736 = arith.constant 4 : index
    %c8_737 = arith.constant 8 : index
    %935 = memref.load %arg1[%c4_736, %c8_737] : memref<8x36xf32, #tpu.memory_space<smem>>
    %c8_738 = arith.constant 8 : index
    %c0_739 = arith.constant 0 : index
    %c0_740 = arith.constant 0 : index
    %936 = vector.load %arg3[%c8_738, %c0_739, %c0_740] : memref<36x8x256xf32, #tpu.memory_space<vmem>>, vector<1x8x256xf32>
    %937 = vector.shape_cast %936 : vector<1x8x256xf32> to vector<8x256xf32>
    %938 = vector.broadcast %935 : f32 to vector<8x256xf32>
    %939 = arith.mulf %938, %937 : vector<8x256xf32>
    %940 = arith.addf %934, %939 : vector<8x256xf32>
    %c4_741 = arith.constant 4 : index
    %c9_742 = arith.constant 9 : index
    %941 = memref.load %arg1[%c4_741, %c9_742] : memref<8x36xf32, #tpu.memory_space<smem>>
    %c9_743 = arith.constant 9 : index
    %c0_744 = arith.constant 0 : index
    %c0_745 = arith.constant 0 : index
    %942 = vector.load %arg3[%c9_743, %c0_744, %c0_745] : memref<36x8x256xf32, #tpu.memory_space<vmem>>, vector<1x8x256xf32>
    %943 = vector.shape_cast %942 : vector<1x8x256xf32> to vector<8x256xf32>
    %944 = vector.broadcast %941 : f32 to vector<8x256xf32>
    %945 = arith.mulf %944, %943 : vector<8x256xf32>
    %946 = arith.addf %940, %945 : vector<8x256xf32>
    %c4_746 = arith.constant 4 : index
    %c10_747 = arith.constant 10 : index
    %947 = memref.load %arg1[%c4_746, %c10_747] : memref<8x36xf32, #tpu.memory_space<smem>>
    %c10_748 = arith.constant 10 : index
    %c0_749 = arith.constant 0 : index
    %c0_750 = arith.constant 0 : index
    %948 = vector.load %arg3[%c10_748, %c0_749, %c0_750] : memref<36x8x256xf32, #tpu.memory_space<vmem>>, vector<1x8x256xf32>
    %949 = vector.shape_cast %948 : vector<1x8x256xf32> to vector<8x256xf32>
    %950 = vector.broadcast %947 : f32 to vector<8x256xf32>
    %951 = arith.mulf %950, %949 : vector<8x256xf32>
    %952 = arith.addf %946, %951 : vector<8x256xf32>
    %c4_751 = arith.constant 4 : index
    %c11_752 = arith.constant 11 : index
    %953 = memref.load %arg1[%c4_751, %c11_752] : memref<8x36xf32, #tpu.memory_space<smem>>
    %c11_753 = arith.constant 11 : index
    %c0_754 = arith.constant 0 : index
    %c0_755 = arith.constant 0 : index
    %954 = vector.load %arg3[%c11_753, %c0_754, %c0_755] : memref<36x8x256xf32, #tpu.memory_space<vmem>>, vector<1x8x256xf32>
    %955 = vector.shape_cast %954 : vector<1x8x256xf32> to vector<8x256xf32>
    %956 = vector.broadcast %953 : f32 to vector<8x256xf32>
    %957 = arith.mulf %956, %955 : vector<8x256xf32>
    %958 = arith.addf %952, %957 : vector<8x256xf32>
    %c4_756 = arith.constant 4 : index
    %c12_757 = arith.constant 12 : index
    %959 = memref.load %arg1[%c4_756, %c12_757] : memref<8x36xf32, #tpu.memory_space<smem>>
    %c12_758 = arith.constant 12 : index
    %c0_759 = arith.constant 0 : index
    %c0_760 = arith.constant 0 : index
    %960 = vector.load %arg3[%c12_758, %c0_759, %c0_760] : memref<36x8x256xf32, #tpu.memory_space<vmem>>, vector<1x8x256xf32>
    %961 = vector.shape_cast %960 : vector<1x8x256xf32> to vector<8x256xf32>
    %962 = vector.broadcast %959 : f32 to vector<8x256xf32>
    %963 = arith.mulf %962, %961 : vector<8x256xf32>
    %964 = arith.addf %958, %963 : vector<8x256xf32>
    %c4_761 = arith.constant 4 : index
    %c13_762 = arith.constant 13 : index
    %965 = memref.load %arg1[%c4_761, %c13_762] : memref<8x36xf32, #tpu.memory_space<smem>>
    %c13_763 = arith.constant 13 : index
    %c0_764 = arith.constant 0 : index
    %c0_765 = arith.constant 0 : index
    %966 = vector.load %arg3[%c13_763, %c0_764, %c0_765] : memref<36x8x256xf32, #tpu.memory_space<vmem>>, vector<1x8x256xf32>
    %967 = vector.shape_cast %966 : vector<1x8x256xf32> to vector<8x256xf32>
    %968 = vector.broadcast %965 : f32 to vector<8x256xf32>
    %969 = arith.mulf %968, %967 : vector<8x256xf32>
    %970 = arith.addf %964, %969 : vector<8x256xf32>
    %c4_766 = arith.constant 4 : index
    %c14_767 = arith.constant 14 : index
    %971 = memref.load %arg1[%c4_766, %c14_767] : memref<8x36xf32, #tpu.memory_space<smem>>
    %c14_768 = arith.constant 14 : index
    %c0_769 = arith.constant 0 : index
    %c0_770 = arith.constant 0 : index
    %972 = vector.load %arg3[%c14_768, %c0_769, %c0_770] : memref<36x8x256xf32, #tpu.memory_space<vmem>>, vector<1x8x256xf32>
    %973 = vector.shape_cast %972 : vector<1x8x256xf32> to vector<8x256xf32>
    %974 = vector.broadcast %971 : f32 to vector<8x256xf32>
    %975 = arith.mulf %974, %973 : vector<8x256xf32>
    %976 = arith.addf %970, %975 : vector<8x256xf32>
    %c4_771 = arith.constant 4 : index
    %c15_772 = arith.constant 15 : index
    %977 = memref.load %arg1[%c4_771, %c15_772] : memref<8x36xf32, #tpu.memory_space<smem>>
    %c15_773 = arith.constant 15 : index
    %c0_774 = arith.constant 0 : index
    %c0_775 = arith.constant 0 : index
    %978 = vector.load %arg3[%c15_773, %c0_774, %c0_775] : memref<36x8x256xf32, #tpu.memory_space<vmem>>, vector<1x8x256xf32>
    %979 = vector.shape_cast %978 : vector<1x8x256xf32> to vector<8x256xf32>
    %980 = vector.broadcast %977 : f32 to vector<8x256xf32>
    %981 = arith.mulf %980, %979 : vector<8x256xf32>
    %982 = arith.addf %976, %981 : vector<8x256xf32>
    %c4_776 = arith.constant 4 : index
    %c16_777 = arith.constant 16 : index
    %983 = memref.load %arg1[%c4_776, %c16_777] : memref<8x36xf32, #tpu.memory_space<smem>>
    %c16_778 = arith.constant 16 : index
    %c0_779 = arith.constant 0 : index
    %c0_780 = arith.constant 0 : index
    %984 = vector.load %arg3[%c16_778, %c0_779, %c0_780] : memref<36x8x256xf32, #tpu.memory_space<vmem>>, vector<1x8x256xf32>
    %985 = vector.shape_cast %984 : vector<1x8x256xf32> to vector<8x256xf32>
    %986 = vector.broadcast %983 : f32 to vector<8x256xf32>
    %987 = arith.mulf %986, %985 : vector<8x256xf32>
    %988 = arith.addf %982, %987 : vector<8x256xf32>
    %c4_781 = arith.constant 4 : index
    %c17_782 = arith.constant 17 : index
    %989 = memref.load %arg1[%c4_781, %c17_782] : memref<8x36xf32, #tpu.memory_space<smem>>
    %c17_783 = arith.constant 17 : index
    %c0_784 = arith.constant 0 : index
    %c0_785 = arith.constant 0 : index
    %990 = vector.load %arg3[%c17_783, %c0_784, %c0_785] : memref<36x8x256xf32, #tpu.memory_space<vmem>>, vector<1x8x256xf32>
    %991 = vector.shape_cast %990 : vector<1x8x256xf32> to vector<8x256xf32>
    %992 = vector.broadcast %989 : f32 to vector<8x256xf32>
    %993 = arith.mulf %992, %991 : vector<8x256xf32>
    %994 = arith.addf %988, %993 : vector<8x256xf32>
    %c4_786 = arith.constant 4 : index
    %c18_787 = arith.constant 18 : index
    %995 = memref.load %arg1[%c4_786, %c18_787] : memref<8x36xf32, #tpu.memory_space<smem>>
    %c18_788 = arith.constant 18 : index
    %c0_789 = arith.constant 0 : index
    %c0_790 = arith.constant 0 : index
    %996 = vector.load %arg3[%c18_788, %c0_789, %c0_790] : memref<36x8x256xf32, #tpu.memory_space<vmem>>, vector<1x8x256xf32>
    %997 = vector.shape_cast %996 : vector<1x8x256xf32> to vector<8x256xf32>
    %998 = vector.broadcast %995 : f32 to vector<8x256xf32>
    %999 = arith.mulf %998, %997 : vector<8x256xf32>
    %1000 = arith.addf %994, %999 : vector<8x256xf32>
    %c4_791 = arith.constant 4 : index
    %c19_792 = arith.constant 19 : index
    %1001 = memref.load %arg1[%c4_791, %c19_792] : memref<8x36xf32, #tpu.memory_space<smem>>
    %c19_793 = arith.constant 19 : index
    %c0_794 = arith.constant 0 : index
    %c0_795 = arith.constant 0 : index
    %1002 = vector.load %arg3[%c19_793, %c0_794, %c0_795] : memref<36x8x256xf32, #tpu.memory_space<vmem>>, vector<1x8x256xf32>
    %1003 = vector.shape_cast %1002 : vector<1x8x256xf32> to vector<8x256xf32>
    %1004 = vector.broadcast %1001 : f32 to vector<8x256xf32>
    %1005 = arith.mulf %1004, %1003 : vector<8x256xf32>
    %1006 = arith.addf %1000, %1005 : vector<8x256xf32>
    %c4_796 = arith.constant 4 : index
    %c20_797 = arith.constant 20 : index
    %1007 = memref.load %arg1[%c4_796, %c20_797] : memref<8x36xf32, #tpu.memory_space<smem>>
    %c20_798 = arith.constant 20 : index
    %c0_799 = arith.constant 0 : index
    %c0_800 = arith.constant 0 : index
    %1008 = vector.load %arg3[%c20_798, %c0_799, %c0_800] : memref<36x8x256xf32, #tpu.memory_space<vmem>>, vector<1x8x256xf32>
    %1009 = vector.shape_cast %1008 : vector<1x8x256xf32> to vector<8x256xf32>
    %1010 = vector.broadcast %1007 : f32 to vector<8x256xf32>
    %1011 = arith.mulf %1010, %1009 : vector<8x256xf32>
    %1012 = arith.addf %1006, %1011 : vector<8x256xf32>
    %c4_801 = arith.constant 4 : index
    %c21_802 = arith.constant 21 : index
    %1013 = memref.load %arg1[%c4_801, %c21_802] : memref<8x36xf32, #tpu.memory_space<smem>>
    %c21_803 = arith.constant 21 : index
    %c0_804 = arith.constant 0 : index
    %c0_805 = arith.constant 0 : index
    %1014 = vector.load %arg3[%c21_803, %c0_804, %c0_805] : memref<36x8x256xf32, #tpu.memory_space<vmem>>, vector<1x8x256xf32>
    %1015 = vector.shape_cast %1014 : vector<1x8x256xf32> to vector<8x256xf32>
    %1016 = vector.broadcast %1013 : f32 to vector<8x256xf32>
    %1017 = arith.mulf %1016, %1015 : vector<8x256xf32>
    %1018 = arith.addf %1012, %1017 : vector<8x256xf32>
    %c4_806 = arith.constant 4 : index
    %c22_807 = arith.constant 22 : index
    %1019 = memref.load %arg1[%c4_806, %c22_807] : memref<8x36xf32, #tpu.memory_space<smem>>
    %c22_808 = arith.constant 22 : index
    %c0_809 = arith.constant 0 : index
    %c0_810 = arith.constant 0 : index
    %1020 = vector.load %arg3[%c22_808, %c0_809, %c0_810] : memref<36x8x256xf32, #tpu.memory_space<vmem>>, vector<1x8x256xf32>
    %1021 = vector.shape_cast %1020 : vector<1x8x256xf32> to vector<8x256xf32>
    %1022 = vector.broadcast %1019 : f32 to vector<8x256xf32>
    %1023 = arith.mulf %1022, %1021 : vector<8x256xf32>
    %1024 = arith.addf %1018, %1023 : vector<8x256xf32>
    %c4_811 = arith.constant 4 : index
    %c23_812 = arith.constant 23 : index
    %1025 = memref.load %arg1[%c4_811, %c23_812] : memref<8x36xf32, #tpu.memory_space<smem>>
    %c23_813 = arith.constant 23 : index
    %c0_814 = arith.constant 0 : index
    %c0_815 = arith.constant 0 : index
    %1026 = vector.load %arg3[%c23_813, %c0_814, %c0_815] : memref<36x8x256xf32, #tpu.memory_space<vmem>>, vector<1x8x256xf32>
    %1027 = vector.shape_cast %1026 : vector<1x8x256xf32> to vector<8x256xf32>
    %1028 = vector.broadcast %1025 : f32 to vector<8x256xf32>
    %1029 = arith.mulf %1028, %1027 : vector<8x256xf32>
    %1030 = arith.addf %1024, %1029 : vector<8x256xf32>
    %c4_816 = arith.constant 4 : index
    %c24_817 = arith.constant 24 : index
    %1031 = memref.load %arg1[%c4_816, %c24_817] : memref<8x36xf32, #tpu.memory_space<smem>>
    %c24_818 = arith.constant 24 : index
    %c0_819 = arith.constant 0 : index
    %c0_820 = arith.constant 0 : index
    %1032 = vector.load %arg3[%c24_818, %c0_819, %c0_820] : memref<36x8x256xf32, #tpu.memory_space<vmem>>, vector<1x8x256xf32>
    %1033 = vector.shape_cast %1032 : vector<1x8x256xf32> to vector<8x256xf32>
    %1034 = vector.broadcast %1031 : f32 to vector<8x256xf32>
    %1035 = arith.mulf %1034, %1033 : vector<8x256xf32>
    %1036 = arith.addf %1030, %1035 : vector<8x256xf32>
    %c4_821 = arith.constant 4 : index
    %c25_822 = arith.constant 25 : index
    %1037 = memref.load %arg1[%c4_821, %c25_822] : memref<8x36xf32, #tpu.memory_space<smem>>
    %c25_823 = arith.constant 25 : index
    %c0_824 = arith.constant 0 : index
    %c0_825 = arith.constant 0 : index
    %1038 = vector.load %arg3[%c25_823, %c0_824, %c0_825] : memref<36x8x256xf32, #tpu.memory_space<vmem>>, vector<1x8x256xf32>
    %1039 = vector.shape_cast %1038 : vector<1x8x256xf32> to vector<8x256xf32>
    %1040 = vector.broadcast %1037 : f32 to vector<8x256xf32>
    %1041 = arith.mulf %1040, %1039 : vector<8x256xf32>
    %1042 = arith.addf %1036, %1041 : vector<8x256xf32>
    %c4_826 = arith.constant 4 : index
    %c26_827 = arith.constant 26 : index
    %1043 = memref.load %arg1[%c4_826, %c26_827] : memref<8x36xf32, #tpu.memory_space<smem>>
    %c26_828 = arith.constant 26 : index
    %c0_829 = arith.constant 0 : index
    %c0_830 = arith.constant 0 : index
    %1044 = vector.load %arg3[%c26_828, %c0_829, %c0_830] : memref<36x8x256xf32, #tpu.memory_space<vmem>>, vector<1x8x256xf32>
    %1045 = vector.shape_cast %1044 : vector<1x8x256xf32> to vector<8x256xf32>
    %1046 = vector.broadcast %1043 : f32 to vector<8x256xf32>
    %1047 = arith.mulf %1046, %1045 : vector<8x256xf32>
    %1048 = arith.addf %1042, %1047 : vector<8x256xf32>
    %c4_831 = arith.constant 4 : index
    %c27_832 = arith.constant 27 : index
    %1049 = memref.load %arg1[%c4_831, %c27_832] : memref<8x36xf32, #tpu.memory_space<smem>>
    %c27_833 = arith.constant 27 : index
    %c0_834 = arith.constant 0 : index
    %c0_835 = arith.constant 0 : index
    %1050 = vector.load %arg3[%c27_833, %c0_834, %c0_835] : memref<36x8x256xf32, #tpu.memory_space<vmem>>, vector<1x8x256xf32>
    %1051 = vector.shape_cast %1050 : vector<1x8x256xf32> to vector<8x256xf32>
    %1052 = vector.broadcast %1049 : f32 to vector<8x256xf32>
    %1053 = arith.mulf %1052, %1051 : vector<8x256xf32>
    %1054 = arith.addf %1048, %1053 : vector<8x256xf32>
    %c4_836 = arith.constant 4 : index
    %c28_837 = arith.constant 28 : index
    %1055 = memref.load %arg1[%c4_836, %c28_837] : memref<8x36xf32, #tpu.memory_space<smem>>
    %c28_838 = arith.constant 28 : index
    %c0_839 = arith.constant 0 : index
    %c0_840 = arith.constant 0 : index
    %1056 = vector.load %arg3[%c28_838, %c0_839, %c0_840] : memref<36x8x256xf32, #tpu.memory_space<vmem>>, vector<1x8x256xf32>
    %1057 = vector.shape_cast %1056 : vector<1x8x256xf32> to vector<8x256xf32>
    %1058 = vector.broadcast %1055 : f32 to vector<8x256xf32>
    %1059 = arith.mulf %1058, %1057 : vector<8x256xf32>
    %1060 = arith.addf %1054, %1059 : vector<8x256xf32>
    %c4_841 = arith.constant 4 : index
    %c29_842 = arith.constant 29 : index
    %1061 = memref.load %arg1[%c4_841, %c29_842] : memref<8x36xf32, #tpu.memory_space<smem>>
    %c29_843 = arith.constant 29 : index
    %c0_844 = arith.constant 0 : index
    %c0_845 = arith.constant 0 : index
    %1062 = vector.load %arg3[%c29_843, %c0_844, %c0_845] : memref<36x8x256xf32, #tpu.memory_space<vmem>>, vector<1x8x256xf32>
    %1063 = vector.shape_cast %1062 : vector<1x8x256xf32> to vector<8x256xf32>
    %1064 = vector.broadcast %1061 : f32 to vector<8x256xf32>
    %1065 = arith.mulf %1064, %1063 : vector<8x256xf32>
    %1066 = arith.addf %1060, %1065 : vector<8x256xf32>
    %c4_846 = arith.constant 4 : index
    %c30_847 = arith.constant 30 : index
    %1067 = memref.load %arg1[%c4_846, %c30_847] : memref<8x36xf32, #tpu.memory_space<smem>>
    %c30_848 = arith.constant 30 : index
    %c0_849 = arith.constant 0 : index
    %c0_850 = arith.constant 0 : index
    %1068 = vector.load %arg3[%c30_848, %c0_849, %c0_850] : memref<36x8x256xf32, #tpu.memory_space<vmem>>, vector<1x8x256xf32>
    %1069 = vector.shape_cast %1068 : vector<1x8x256xf32> to vector<8x256xf32>
    %1070 = vector.broadcast %1067 : f32 to vector<8x256xf32>
    %1071 = arith.mulf %1070, %1069 : vector<8x256xf32>
    %1072 = arith.addf %1066, %1071 : vector<8x256xf32>
    %c4_851 = arith.constant 4 : index
    %c31_852 = arith.constant 31 : index
    %1073 = memref.load %arg1[%c4_851, %c31_852] : memref<8x36xf32, #tpu.memory_space<smem>>
    %c31_853 = arith.constant 31 : index
    %c0_854 = arith.constant 0 : index
    %c0_855 = arith.constant 0 : index
    %1074 = vector.load %arg3[%c31_853, %c0_854, %c0_855] : memref<36x8x256xf32, #tpu.memory_space<vmem>>, vector<1x8x256xf32>
    %1075 = vector.shape_cast %1074 : vector<1x8x256xf32> to vector<8x256xf32>
    %1076 = vector.broadcast %1073 : f32 to vector<8x256xf32>
    %1077 = arith.mulf %1076, %1075 : vector<8x256xf32>
    %1078 = arith.addf %1072, %1077 : vector<8x256xf32>
    %c4_856 = arith.constant 4 : index
    %c32_857 = arith.constant 32 : index
    %1079 = memref.load %arg1[%c4_856, %c32_857] : memref<8x36xf32, #tpu.memory_space<smem>>
    %c32_858 = arith.constant 32 : index
    %c0_859 = arith.constant 0 : index
    %c0_860 = arith.constant 0 : index
    %1080 = vector.load %arg3[%c32_858, %c0_859, %c0_860] : memref<36x8x256xf32, #tpu.memory_space<vmem>>, vector<1x8x256xf32>
    %1081 = vector.shape_cast %1080 : vector<1x8x256xf32> to vector<8x256xf32>
    %1082 = vector.broadcast %1079 : f32 to vector<8x256xf32>
    %1083 = arith.mulf %1082, %1081 : vector<8x256xf32>
    %1084 = arith.addf %1078, %1083 : vector<8x256xf32>
    %c4_861 = arith.constant 4 : index
    %c33_862 = arith.constant 33 : index
    %1085 = memref.load %arg1[%c4_861, %c33_862] : memref<8x36xf32, #tpu.memory_space<smem>>
    %c33_863 = arith.constant 33 : index
    %c0_864 = arith.constant 0 : index
    %c0_865 = arith.constant 0 : index
    %1086 = vector.load %arg3[%c33_863, %c0_864, %c0_865] : memref<36x8x256xf32, #tpu.memory_space<vmem>>, vector<1x8x256xf32>
    %1087 = vector.shape_cast %1086 : vector<1x8x256xf32> to vector<8x256xf32>
    %1088 = vector.broadcast %1085 : f32 to vector<8x256xf32>
    %1089 = arith.mulf %1088, %1087 : vector<8x256xf32>
    %1090 = arith.addf %1084, %1089 : vector<8x256xf32>
    %c4_866 = arith.constant 4 : index
    %c34_867 = arith.constant 34 : index
    %1091 = memref.load %arg1[%c4_866, %c34_867] : memref<8x36xf32, #tpu.memory_space<smem>>
    %c34_868 = arith.constant 34 : index
    %c0_869 = arith.constant 0 : index
    %c0_870 = arith.constant 0 : index
    %1092 = vector.load %arg3[%c34_868, %c0_869, %c0_870] : memref<36x8x256xf32, #tpu.memory_space<vmem>>, vector<1x8x256xf32>
    %1093 = vector.shape_cast %1092 : vector<1x8x256xf32> to vector<8x256xf32>
    %1094 = vector.broadcast %1091 : f32 to vector<8x256xf32>
    %1095 = arith.mulf %1094, %1093 : vector<8x256xf32>
    %1096 = arith.addf %1090, %1095 : vector<8x256xf32>
    %c4_871 = arith.constant 4 : index
    %c35_872 = arith.constant 35 : index
    %1097 = memref.load %arg1[%c4_871, %c35_872] : memref<8x36xf32, #tpu.memory_space<smem>>
    %c35_873 = arith.constant 35 : index
    %c0_874 = arith.constant 0 : index
    %c0_875 = arith.constant 0 : index
    %1098 = vector.load %arg3[%c35_873, %c0_874, %c0_875] : memref<36x8x256xf32, #tpu.memory_space<vmem>>, vector<1x8x256xf32>
    %1099 = vector.shape_cast %1098 : vector<1x8x256xf32> to vector<8x256xf32>
    %1100 = vector.broadcast %1097 : f32 to vector<8x256xf32>
    %1101 = arith.mulf %1100, %1099 : vector<8x256xf32>
    %1102 = arith.addf %1096, %1101 : vector<8x256xf32>
    %c4_876 = arith.constant 4 : index
    %1103 = memref.load %arg2[%c4_876] : memref<8xf32, #tpu.memory_space<smem>>
    %1104 = vector.broadcast %1103 : f32 to vector<8x256xf32>
    %1105 = arith.addf %1102, %1104 : vector<8x256xf32>
    %cst_877 = arith.constant 0.000000e+00 : f32
    %1106 = vector.broadcast %cst_877 : f32 to vector<8x256xf32>
    %1107 = arith.maximumf %1105, %1106 : vector<8x256xf32>
    %1108 = arith.truncf %1107 : vector<8x256xf32> to vector<8x256xbf16>
    %c0_878 = arith.constant 0 : index
    %c1024 = arith.constant 1024 : index
    %1109 = vector.load %arg9[%c0_878, %c1024] : memref<8x2048xbf16, #tpu.memory_space<vmem>>, vector<8x256xbf16>
    tpu.vector_store %arg9[%c0_878, %c1024], %1108 {strides = array<i32>} : memref<8x2048xbf16, #tpu.memory_space<vmem>>, vector<8x256xbf16>,
    %c5_879 = arith.constant 5 : index
    %c0_880 = arith.constant 0 : index
    %1110 = memref.load %arg1[%c5_879, %c0_880] : memref<8x36xf32, #tpu.memory_space<smem>>
    %c0_881 = arith.constant 0 : index
    %c0_882 = arith.constant 0 : index
    %c0_883 = arith.constant 0 : index
    %1111 = vector.load %arg3[%c0_881, %c0_882, %c0_883] : memref<36x8x256xf32, #tpu.memory_space<vmem>>, vector<1x8x256xf32>
    %1112 = vector.shape_cast %1111 : vector<1x8x256xf32> to vector<8x256xf32>
    %1113 = vector.broadcast %1110 : f32 to vector<8x256xf32>
    %1114 = arith.mulf %1113, %1112 : vector<8x256xf32>
    %c5_884 = arith.constant 5 : index
    %c1_885 = arith.constant 1 : index
    %1115 = memref.load %arg1[%c5_884, %c1_885] : memref<8x36xf32, #tpu.memory_space<smem>>
    %c1_886 = arith.constant 1 : index
    %c0_887 = arith.constant 0 : index
    %c0_888 = arith.constant 0 : index
    %1116 = vector.load %arg3[%c1_886, %c0_887, %c0_888] : memref<36x8x256xf32, #tpu.memory_space<vmem>>, vector<1x8x256xf32>
    %1117 = vector.shape_cast %1116 : vector<1x8x256xf32> to vector<8x256xf32>
    %1118 = vector.broadcast %1115 : f32 to vector<8x256xf32>
    %1119 = arith.mulf %1118, %1117 : vector<8x256xf32>
    %1120 = arith.addf %1114, %1119 : vector<8x256xf32>
    %c5_889 = arith.constant 5 : index
    %c2_890 = arith.constant 2 : index
    %1121 = memref.load %arg1[%c5_889, %c2_890] : memref<8x36xf32, #tpu.memory_space<smem>>
    %c2_891 = arith.constant 2 : index
    %c0_892 = arith.constant 0 : index
    %c0_893 = arith.constant 0 : index
    %1122 = vector.load %arg3[%c2_891, %c0_892, %c0_893] : memref<36x8x256xf32, #tpu.memory_space<vmem>>, vector<1x8x256xf32>
    %1123 = vector.shape_cast %1122 : vector<1x8x256xf32> to vector<8x256xf32>
    %1124 = vector.broadcast %1121 : f32 to vector<8x256xf32>
    %1125 = arith.mulf %1124, %1123 : vector<8x256xf32>
    %1126 = arith.addf %1120, %1125 : vector<8x256xf32>
    %c5_894 = arith.constant 5 : index
    %c3_895 = arith.constant 3 : index
    %1127 = memref.load %arg1[%c5_894, %c3_895] : memref<8x36xf32, #tpu.memory_space<smem>>
    %c3_896 = arith.constant 3 : index
    %c0_897 = arith.constant 0 : index
    %c0_898 = arith.constant 0 : index
    %1128 = vector.load %arg3[%c3_896, %c0_897, %c0_898] : memref<36x8x256xf32, #tpu.memory_space<vmem>>, vector<1x8x256xf32>
    %1129 = vector.shape_cast %1128 : vector<1x8x256xf32> to vector<8x256xf32>
    %1130 = vector.broadcast %1127 : f32 to vector<8x256xf32>
    %1131 = arith.mulf %1130, %1129 : vector<8x256xf32>
    %1132 = arith.addf %1126, %1131 : vector<8x256xf32>
    %c5_899 = arith.constant 5 : index
    %c4_900 = arith.constant 4 : index
    %1133 = memref.load %arg1[%c5_899, %c4_900] : memref<8x36xf32, #tpu.memory_space<smem>>
    %c4_901 = arith.constant 4 : index
    %c0_902 = arith.constant 0 : index
    %c0_903 = arith.constant 0 : index
    %1134 = vector.load %arg3[%c4_901, %c0_902, %c0_903] : memref<36x8x256xf32, #tpu.memory_space<vmem>>, vector<1x8x256xf32>
    %1135 = vector.shape_cast %1134 : vector<1x8x256xf32> to vector<8x256xf32>
    %1136 = vector.broadcast %1133 : f32 to vector<8x256xf32>
    %1137 = arith.mulf %1136, %1135 : vector<8x256xf32>
    %1138 = arith.addf %1132, %1137 : vector<8x256xf32>
    %c5_904 = arith.constant 5 : index
    %c5_905 = arith.constant 5 : index
    %1139 = memref.load %arg1[%c5_904, %c5_905] : memref<8x36xf32, #tpu.memory_space<smem>>
    %c5_906 = arith.constant 5 : index
    %c0_907 = arith.constant 0 : index
    %c0_908 = arith.constant 0 : index
    %1140 = vector.load %arg3[%c5_906, %c0_907, %c0_908] : memref<36x8x256xf32, #tpu.memory_space<vmem>>, vector<1x8x256xf32>
    %1141 = vector.shape_cast %1140 : vector<1x8x256xf32> to vector<8x256xf32>
    %1142 = vector.broadcast %1139 : f32 to vector<8x256xf32>
    %1143 = arith.mulf %1142, %1141 : vector<8x256xf32>
    %1144 = arith.addf %1138, %1143 : vector<8x256xf32>
    %c5_909 = arith.constant 5 : index
    %c6_910 = arith.constant 6 : index
    %1145 = memref.load %arg1[%c5_909, %c6_910] : memref<8x36xf32, #tpu.memory_space<smem>>
    %c6_911 = arith.constant 6 : index
    %c0_912 = arith.constant 0 : index
    %c0_913 = arith.constant 0 : index
    %1146 = vector.load %arg3[%c6_911, %c0_912, %c0_913] : memref<36x8x256xf32, #tpu.memory_space<vmem>>, vector<1x8x256xf32>
    %1147 = vector.shape_cast %1146 : vector<1x8x256xf32> to vector<8x256xf32>
    %1148 = vector.broadcast %1145 : f32 to vector<8x256xf32>
    %1149 = arith.mulf %1148, %1147 : vector<8x256xf32>
    %1150 = arith.addf %1144, %1149 : vector<8x256xf32>
    %c5_914 = arith.constant 5 : index
    %c7_915 = arith.constant 7 : index
    %1151 = memref.load %arg1[%c5_914, %c7_915] : memref<8x36xf32, #tpu.memory_space<smem>>
    %c7_916 = arith.constant 7 : index
    %c0_917 = arith.constant 0 : index
    %c0_918 = arith.constant 0 : index
    %1152 = vector.load %arg3[%c7_916, %c0_917, %c0_918] : memref<36x8x256xf32, #tpu.memory_space<vmem>>, vector<1x8x256xf32>
    %1153 = vector.shape_cast %1152 : vector<1x8x256xf32> to vector<8x256xf32>
    %1154 = vector.broadcast %1151 : f32 to vector<8x256xf32>
    %1155 = arith.mulf %1154, %1153 : vector<8x256xf32>
    %1156 = arith.addf %1150, %1155 : vector<8x256xf32>
    %c5_919 = arith.constant 5 : index
    %c8_920 = arith.constant 8 : index
    %1157 = memref.load %arg1[%c5_919, %c8_920] : memref<8x36xf32, #tpu.memory_space<smem>>
    %c8_921 = arith.constant 8 : index
    %c0_922 = arith.constant 0 : index
    %c0_923 = arith.constant 0 : index
    %1158 = vector.load %arg3[%c8_921, %c0_922, %c0_923] : memref<36x8x256xf32, #tpu.memory_space<vmem>>, vector<1x8x256xf32>
    %1159 = vector.shape_cast %1158 : vector<1x8x256xf32> to vector<8x256xf32>
    %1160 = vector.broadcast %1157 : f32 to vector<8x256xf32>
    %1161 = arith.mulf %1160, %1159 : vector<8x256xf32>
    %1162 = arith.addf %1156, %1161 : vector<8x256xf32>
    %c5_924 = arith.constant 5 : index
    %c9_925 = arith.constant 9 : index
    %1163 = memref.load %arg1[%c5_924, %c9_925] : memref<8x36xf32, #tpu.memory_space<smem>>
    %c9_926 = arith.constant 9 : index
    %c0_927 = arith.constant 0 : index
    %c0_928 = arith.constant 0 : index
    %1164 = vector.load %arg3[%c9_926, %c0_927, %c0_928] : memref<36x8x256xf32, #tpu.memory_space<vmem>>, vector<1x8x256xf32>
    %1165 = vector.shape_cast %1164 : vector<1x8x256xf32> to vector<8x256xf32>
    %1166 = vector.broadcast %1163 : f32 to vector<8x256xf32>
    %1167 = arith.mulf %1166, %1165 : vector<8x256xf32>
    %1168 = arith.addf %1162, %1167 : vector<8x256xf32>
    %c5_929 = arith.constant 5 : index
    %c10_930 = arith.constant 10 : index
    %1169 = memref.load %arg1[%c5_929, %c10_930] : memref<8x36xf32, #tpu.memory_space<smem>>
    %c10_931 = arith.constant 10 : index
    %c0_932 = arith.constant 0 : index
    %c0_933 = arith.constant 0 : index
    %1170 = vector.load %arg3[%c10_931, %c0_932, %c0_933] : memref<36x8x256xf32, #tpu.memory_space<vmem>>, vector<1x8x256xf32>
    %1171 = vector.shape_cast %1170 : vector<1x8x256xf32> to vector<8x256xf32>
    %1172 = vector.broadcast %1169 : f32 to vector<8x256xf32>
    %1173 = arith.mulf %1172, %1171 : vector<8x256xf32>
    %1174 = arith.addf %1168, %1173 : vector<8x256xf32>
    %c5_934 = arith.constant 5 : index
    %c11_935 = arith.constant 11 : index
    %1175 = memref.load %arg1[%c5_934, %c11_935] : memref<8x36xf32, #tpu.memory_space<smem>>
    %c11_936 = arith.constant 11 : index
    %c0_937 = arith.constant 0 : index
    %c0_938 = arith.constant 0 : index
    %1176 = vector.load %arg3[%c11_936, %c0_937, %c0_938] : memref<36x8x256xf32, #tpu.memory_space<vmem>>, vector<1x8x256xf32>
    %1177 = vector.shape_cast %1176 : vector<1x8x256xf32> to vector<8x256xf32>
    %1178 = vector.broadcast %1175 : f32 to vector<8x256xf32>
    %1179 = arith.mulf %1178, %1177 : vector<8x256xf32>
    %1180 = arith.addf %1174, %1179 : vector<8x256xf32>
    %c5_939 = arith.constant 5 : index
    %c12_940 = arith.constant 12 : index
    %1181 = memref.load %arg1[%c5_939, %c12_940] : memref<8x36xf32, #tpu.memory_space<smem>>
    %c12_941 = arith.constant 12 : index
    %c0_942 = arith.constant 0 : index
    %c0_943 = arith.constant 0 : index
    %1182 = vector.load %arg3[%c12_941, %c0_942, %c0_943] : memref<36x8x256xf32, #tpu.memory_space<vmem>>, vector<1x8x256xf32>
    %1183 = vector.shape_cast %1182 : vector<1x8x256xf32> to vector<8x256xf32>
    %1184 = vector.broadcast %1181 : f32 to vector<8x256xf32>
    %1185 = arith.mulf %1184, %1183 : vector<8x256xf32>
    %1186 = arith.addf %1180, %1185 : vector<8x256xf32>
    %c5_944 = arith.constant 5 : index
    %c13_945 = arith.constant 13 : index
    %1187 = memref.load %arg1[%c5_944, %c13_945] : memref<8x36xf32, #tpu.memory_space<smem>>
    %c13_946 = arith.constant 13 : index
    %c0_947 = arith.constant 0 : index
    %c0_948 = arith.constant 0 : index
    %1188 = vector.load %arg3[%c13_946, %c0_947, %c0_948] : memref<36x8x256xf32, #tpu.memory_space<vmem>>, vector<1x8x256xf32>
    %1189 = vector.shape_cast %1188 : vector<1x8x256xf32> to vector<8x256xf32>
    %1190 = vector.broadcast %1187 : f32 to vector<8x256xf32>
    %1191 = arith.mulf %1190, %1189 : vector<8x256xf32>
    %1192 = arith.addf %1186, %1191 : vector<8x256xf32>
    %c5_949 = arith.constant 5 : index
    %c14_950 = arith.constant 14 : index
    %1193 = memref.load %arg1[%c5_949, %c14_950] : memref<8x36xf32, #tpu.memory_space<smem>>
    %c14_951 = arith.constant 14 : index
    %c0_952 = arith.constant 0 : index
    %c0_953 = arith.constant 0 : index
    %1194 = vector.load %arg3[%c14_951, %c0_952, %c0_953] : memref<36x8x256xf32, #tpu.memory_space<vmem>>, vector<1x8x256xf32>
    %1195 = vector.shape_cast %1194 : vector<1x8x256xf32> to vector<8x256xf32>
    %1196 = vector.broadcast %1193 : f32 to vector<8x256xf32>
    %1197 = arith.mulf %1196, %1195 : vector<8x256xf32>
    %1198 = arith.addf %1192, %1197 : vector<8x256xf32>
    %c5_954 = arith.constant 5 : index
    %c15_955 = arith.constant 15 : index
    %1199 = memref.load %arg1[%c5_954, %c15_955] : memref<8x36xf32, #tpu.memory_space<smem>>
    %c15_956 = arith.constant 15 : index
    %c0_957 = arith.constant 0 : index
    %c0_958 = arith.constant 0 : index
    %1200 = vector.load %arg3[%c15_956, %c0_957, %c0_958] : memref<36x8x256xf32, #tpu.memory_space<vmem>>, vector<1x8x256xf32>
    %1201 = vector.shape_cast %1200 : vector<1x8x256xf32> to vector<8x256xf32>
    %1202 = vector.broadcast %1199 : f32 to vector<8x256xf32>
    %1203 = arith.mulf %1202, %1201 : vector<8x256xf32>
    %1204 = arith.addf %1198, %1203 : vector<8x256xf32>
    %c5_959 = arith.constant 5 : index
    %c16_960 = arith.constant 16 : index
    %1205 = memref.load %arg1[%c5_959, %c16_960] : memref<8x36xf32, #tpu.memory_space<smem>>
    %c16_961 = arith.constant 16 : index
    %c0_962 = arith.constant 0 : index
    %c0_963 = arith.constant 0 : index
    %1206 = vector.load %arg3[%c16_961, %c0_962, %c0_963] : memref<36x8x256xf32, #tpu.memory_space<vmem>>, vector<1x8x256xf32>
    %1207 = vector.shape_cast %1206 : vector<1x8x256xf32> to vector<8x256xf32>
    %1208 = vector.broadcast %1205 : f32 to vector<8x256xf32>
    %1209 = arith.mulf %1208, %1207 : vector<8x256xf32>
    %1210 = arith.addf %1204, %1209 : vector<8x256xf32>
    %c5_964 = arith.constant 5 : index
    %c17_965 = arith.constant 17 : index
    %1211 = memref.load %arg1[%c5_964, %c17_965] : memref<8x36xf32, #tpu.memory_space<smem>>
    %c17_966 = arith.constant 17 : index
    %c0_967 = arith.constant 0 : index
    %c0_968 = arith.constant 0 : index
    %1212 = vector.load %arg3[%c17_966, %c0_967, %c0_968] : memref<36x8x256xf32, #tpu.memory_space<vmem>>, vector<1x8x256xf32>
    %1213 = vector.shape_cast %1212 : vector<1x8x256xf32> to vector<8x256xf32>
    %1214 = vector.broadcast %1211 : f32 to vector<8x256xf32>
    %1215 = arith.mulf %1214, %1213 : vector<8x256xf32>
    %1216 = arith.addf %1210, %1215 : vector<8x256xf32>
    %c5_969 = arith.constant 5 : index
    %c18_970 = arith.constant 18 : index
    %1217 = memref.load %arg1[%c5_969, %c18_970] : memref<8x36xf32, #tpu.memory_space<smem>>
    %c18_971 = arith.constant 18 : index
    %c0_972 = arith.constant 0 : index
    %c0_973 = arith.constant 0 : index
    %1218 = vector.load %arg3[%c18_971, %c0_972, %c0_973] : memref<36x8x256xf32, #tpu.memory_space<vmem>>, vector<1x8x256xf32>
    %1219 = vector.shape_cast %1218 : vector<1x8x256xf32> to vector<8x256xf32>
    %1220 = vector.broadcast %1217 : f32 to vector<8x256xf32>
    %1221 = arith.mulf %1220, %1219 : vector<8x256xf32>
    %1222 = arith.addf %1216, %1221 : vector<8x256xf32>
    %c5_974 = arith.constant 5 : index
    %c19_975 = arith.constant 19 : index
    %1223 = memref.load %arg1[%c5_974, %c19_975] : memref<8x36xf32, #tpu.memory_space<smem>>
    %c19_976 = arith.constant 19 : index
    %c0_977 = arith.constant 0 : index
    %c0_978 = arith.constant 0 : index
    %1224 = vector.load %arg3[%c19_976, %c0_977, %c0_978] : memref<36x8x256xf32, #tpu.memory_space<vmem>>, vector<1x8x256xf32>
    %1225 = vector.shape_cast %1224 : vector<1x8x256xf32> to vector<8x256xf32>
    %1226 = vector.broadcast %1223 : f32 to vector<8x256xf32>
    %1227 = arith.mulf %1226, %1225 : vector<8x256xf32>
    %1228 = arith.addf %1222, %1227 : vector<8x256xf32>
    %c5_979 = arith.constant 5 : index
    %c20_980 = arith.constant 20 : index
    %1229 = memref.load %arg1[%c5_979, %c20_980] : memref<8x36xf32, #tpu.memory_space<smem>>
    %c20_981 = arith.constant 20 : index
    %c0_982 = arith.constant 0 : index
    %c0_983 = arith.constant 0 : index
    %1230 = vector.load %arg3[%c20_981, %c0_982, %c0_983] : memref<36x8x256xf32, #tpu.memory_space<vmem>>, vector<1x8x256xf32>
    %1231 = vector.shape_cast %1230 : vector<1x8x256xf32> to vector<8x256xf32>
    %1232 = vector.broadcast %1229 : f32 to vector<8x256xf32>
    %1233 = arith.mulf %1232, %1231 : vector<8x256xf32>
    %1234 = arith.addf %1228, %1233 : vector<8x256xf32>
    %c5_984 = arith.constant 5 : index
    %c21_985 = arith.constant 21 : index
    %1235 = memref.load %arg1[%c5_984, %c21_985] : memref<8x36xf32, #tpu.memory_space<smem>>
    %c21_986 = arith.constant 21 : index
    %c0_987 = arith.constant 0 : index
    %c0_988 = arith.constant 0 : index
    %1236 = vector.load %arg3[%c21_986, %c0_987, %c0_988] : memref<36x8x256xf32, #tpu.memory_space<vmem>>, vector<1x8x256xf32>
    %1237 = vector.shape_cast %1236 : vector<1x8x256xf32> to vector<8x256xf32>
    %1238 = vector.broadcast %1235 : f32 to vector<8x256xf32>
    %1239 = arith.mulf %1238, %1237 : vector<8x256xf32>
    %1240 = arith.addf %1234, %1239 : vector<8x256xf32>
    %c5_989 = arith.constant 5 : index
    %c22_990 = arith.constant 22 : index
    %1241 = memref.load %arg1[%c5_989, %c22_990] : memref<8x36xf32, #tpu.memory_space<smem>>
    %c22_991 = arith.constant 22 : index
    %c0_992 = arith.constant 0 : index
    %c0_993 = arith.constant 0 : index
    %1242 = vector.load %arg3[%c22_991, %c0_992, %c0_993] : memref<36x8x256xf32, #tpu.memory_space<vmem>>, vector<1x8x256xf32>
    %1243 = vector.shape_cast %1242 : vector<1x8x256xf32> to vector<8x256xf32>
    %1244 = vector.broadcast %1241 : f32 to vector<8x256xf32>
    %1245 = arith.mulf %1244, %1243 : vector<8x256xf32>
    %1246 = arith.addf %1240, %1245 : vector<8x256xf32>
    %c5_994 = arith.constant 5 : index
    %c23_995 = arith.constant 23 : index
    %1247 = memref.load %arg1[%c5_994, %c23_995] : memref<8x36xf32, #tpu.memory_space<smem>>
    %c23_996 = arith.constant 23 : index
    %c0_997 = arith.constant 0 : index
    %c0_998 = arith.constant 0 : index
    %1248 = vector.load %arg3[%c23_996, %c0_997, %c0_998] : memref<36x8x256xf32, #tpu.memory_space<vmem>>, vector<1x8x256xf32>
    %1249 = vector.shape_cast %1248 : vector<1x8x256xf32> to vector<8x256xf32>
    %1250 = vector.broadcast %1247 : f32 to vector<8x256xf32>
    %1251 = arith.mulf %1250, %1249 : vector<8x256xf32>
    %1252 = arith.addf %1246, %1251 : vector<8x256xf32>
    %c5_999 = arith.constant 5 : index
    %c24_1000 = arith.constant 24 : index
    %1253 = memref.load %arg1[%c5_999, %c24_1000] : memref<8x36xf32, #tpu.memory_space<smem>>
    %c24_1001 = arith.constant 24 : index
    %c0_1002 = arith.constant 0 : index
    %c0_1003 = arith.constant 0 : index
    %1254 = vector.load %arg3[%c24_1001, %c0_1002, %c0_1003] : memref<36x8x256xf32, #tpu.memory_space<vmem>>, vector<1x8x256xf32>
    %1255 = vector.shape_cast %1254 : vector<1x8x256xf32> to vector<8x256xf32>
    %1256 = vector.broadcast %1253 : f32 to vector<8x256xf32>
    %1257 = arith.mulf %1256, %1255 : vector<8x256xf32>
    %1258 = arith.addf %1252, %1257 : vector<8x256xf32>
    %c5_1004 = arith.constant 5 : index
    %c25_1005 = arith.constant 25 : index
    %1259 = memref.load %arg1[%c5_1004, %c25_1005] : memref<8x36xf32, #tpu.memory_space<smem>>
    %c25_1006 = arith.constant 25 : index
    %c0_1007 = arith.constant 0 : index
    %c0_1008 = arith.constant 0 : index
    %1260 = vector.load %arg3[%c25_1006, %c0_1007, %c0_1008] : memref<36x8x256xf32, #tpu.memory_space<vmem>>, vector<1x8x256xf32>
    %1261 = vector.shape_cast %1260 : vector<1x8x256xf32> to vector<8x256xf32>
    %1262 = vector.broadcast %1259 : f32 to vector<8x256xf32>
    %1263 = arith.mulf %1262, %1261 : vector<8x256xf32>
    %1264 = arith.addf %1258, %1263 : vector<8x256xf32>
    %c5_1009 = arith.constant 5 : index
    %c26_1010 = arith.constant 26 : index
    %1265 = memref.load %arg1[%c5_1009, %c26_1010] : memref<8x36xf32, #tpu.memory_space<smem>>
    %c26_1011 = arith.constant 26 : index
    %c0_1012 = arith.constant 0 : index
    %c0_1013 = arith.constant 0 : index
    %1266 = vector.load %arg3[%c26_1011, %c0_1012, %c0_1013] : memref<36x8x256xf32, #tpu.memory_space<vmem>>, vector<1x8x256xf32>
    %1267 = vector.shape_cast %1266 : vector<1x8x256xf32> to vector<8x256xf32>
    %1268 = vector.broadcast %1265 : f32 to vector<8x256xf32>
    %1269 = arith.mulf %1268, %1267 : vector<8x256xf32>
    %1270 = arith.addf %1264, %1269 : vector<8x256xf32>
    %c5_1014 = arith.constant 5 : index
    %c27_1015 = arith.constant 27 : index
    %1271 = memref.load %arg1[%c5_1014, %c27_1015] : memref<8x36xf32, #tpu.memory_space<smem>>
    %c27_1016 = arith.constant 27 : index
    %c0_1017 = arith.constant 0 : index
    %c0_1018 = arith.constant 0 : index
    %1272 = vector.load %arg3[%c27_1016, %c0_1017, %c0_1018] : memref<36x8x256xf32, #tpu.memory_space<vmem>>, vector<1x8x256xf32>
    %1273 = vector.shape_cast %1272 : vector<1x8x256xf32> to vector<8x256xf32>
    %1274 = vector.broadcast %1271 : f32 to vector<8x256xf32>
    %1275 = arith.mulf %1274, %1273 : vector<8x256xf32>
    %1276 = arith.addf %1270, %1275 : vector<8x256xf32>
    %c5_1019 = arith.constant 5 : index
    %c28_1020 = arith.constant 28 : index
    %1277 = memref.load %arg1[%c5_1019, %c28_1020] : memref<8x36xf32, #tpu.memory_space<smem>>
    %c28_1021 = arith.constant 28 : index
    %c0_1022 = arith.constant 0 : index
    %c0_1023 = arith.constant 0 : index
    %1278 = vector.load %arg3[%c28_1021, %c0_1022, %c0_1023] : memref<36x8x256xf32, #tpu.memory_space<vmem>>, vector<1x8x256xf32>
    %1279 = vector.shape_cast %1278 : vector<1x8x256xf32> to vector<8x256xf32>
    %1280 = vector.broadcast %1277 : f32 to vector<8x256xf32>
    %1281 = arith.mulf %1280, %1279 : vector<8x256xf32>
    %1282 = arith.addf %1276, %1281 : vector<8x256xf32>
    %c5_1024 = arith.constant 5 : index
    %c29_1025 = arith.constant 29 : index
    %1283 = memref.load %arg1[%c5_1024, %c29_1025] : memref<8x36xf32, #tpu.memory_space<smem>>
    %c29_1026 = arith.constant 29 : index
    %c0_1027 = arith.constant 0 : index
    %c0_1028 = arith.constant 0 : index
    %1284 = vector.load %arg3[%c29_1026, %c0_1027, %c0_1028] : memref<36x8x256xf32, #tpu.memory_space<vmem>>, vector<1x8x256xf32>
    %1285 = vector.shape_cast %1284 : vector<1x8x256xf32> to vector<8x256xf32>
    %1286 = vector.broadcast %1283 : f32 to vector<8x256xf32>
    %1287 = arith.mulf %1286, %1285 : vector<8x256xf32>
    %1288 = arith.addf %1282, %1287 : vector<8x256xf32>
    %c5_1029 = arith.constant 5 : index
    %c30_1030 = arith.constant 30 : index
    %1289 = memref.load %arg1[%c5_1029, %c30_1030] : memref<8x36xf32, #tpu.memory_space<smem>>
    %c30_1031 = arith.constant 30 : index
    %c0_1032 = arith.constant 0 : index
    %c0_1033 = arith.constant 0 : index
    %1290 = vector.load %arg3[%c30_1031, %c0_1032, %c0_1033] : memref<36x8x256xf32, #tpu.memory_space<vmem>>, vector<1x8x256xf32>
    %1291 = vector.shape_cast %1290 : vector<1x8x256xf32> to vector<8x256xf32>
    %1292 = vector.broadcast %1289 : f32 to vector<8x256xf32>
    %1293 = arith.mulf %1292, %1291 : vector<8x256xf32>
    %1294 = arith.addf %1288, %1293 : vector<8x256xf32>
    %c5_1034 = arith.constant 5 : index
    %c31_1035 = arith.constant 31 : index
    %1295 = memref.load %arg1[%c5_1034, %c31_1035] : memref<8x36xf32, #tpu.memory_space<smem>>
    %c31_1036 = arith.constant 31 : index
    %c0_1037 = arith.constant 0 : index
    %c0_1038 = arith.constant 0 : index
    %1296 = vector.load %arg3[%c31_1036, %c0_1037, %c0_1038] : memref<36x8x256xf32, #tpu.memory_space<vmem>>, vector<1x8x256xf32>
    %1297 = vector.shape_cast %1296 : vector<1x8x256xf32> to vector<8x256xf32>
    %1298 = vector.broadcast %1295 : f32 to vector<8x256xf32>
    %1299 = arith.mulf %1298, %1297 : vector<8x256xf32>
    %1300 = arith.addf %1294, %1299 : vector<8x256xf32>
    %c5_1039 = arith.constant 5 : index
    %c32_1040 = arith.constant 32 : index
    %1301 = memref.load %arg1[%c5_1039, %c32_1040] : memref<8x36xf32, #tpu.memory_space<smem>>
    %c32_1041 = arith.constant 32 : index
    %c0_1042 = arith.constant 0 : index
    %c0_1043 = arith.constant 0 : index
    %1302 = vector.load %arg3[%c32_1041, %c0_1042, %c0_1043] : memref<36x8x256xf32, #tpu.memory_space<vmem>>, vector<1x8x256xf32>
    %1303 = vector.shape_cast %1302 : vector<1x8x256xf32> to vector<8x256xf32>
    %1304 = vector.broadcast %1301 : f32 to vector<8x256xf32>
    %1305 = arith.mulf %1304, %1303 : vector<8x256xf32>
    %1306 = arith.addf %1300, %1305 : vector<8x256xf32>
    %c5_1044 = arith.constant 5 : index
    %c33_1045 = arith.constant 33 : index
    %1307 = memref.load %arg1[%c5_1044, %c33_1045] : memref<8x36xf32, #tpu.memory_space<smem>>
    %c33_1046 = arith.constant 33 : index
    %c0_1047 = arith.constant 0 : index
    %c0_1048 = arith.constant 0 : index
    %1308 = vector.load %arg3[%c33_1046, %c0_1047, %c0_1048] : memref<36x8x256xf32, #tpu.memory_space<vmem>>, vector<1x8x256xf32>
    %1309 = vector.shape_cast %1308 : vector<1x8x256xf32> to vector<8x256xf32>
    %1310 = vector.broadcast %1307 : f32 to vector<8x256xf32>
    %1311 = arith.mulf %1310, %1309 : vector<8x256xf32>
    %1312 = arith.addf %1306, %1311 : vector<8x256xf32>
    %c5_1049 = arith.constant 5 : index
    %c34_1050 = arith.constant 34 : index
    %1313 = memref.load %arg1[%c5_1049, %c34_1050] : memref<8x36xf32, #tpu.memory_space<smem>>
    %c34_1051 = arith.constant 34 : index
    %c0_1052 = arith.constant 0 : index
    %c0_1053 = arith.constant 0 : index
    %1314 = vector.load %arg3[%c34_1051, %c0_1052, %c0_1053] : memref<36x8x256xf32, #tpu.memory_space<vmem>>, vector<1x8x256xf32>
    %1315 = vector.shape_cast %1314 : vector<1x8x256xf32> to vector<8x256xf32>
    %1316 = vector.broadcast %1313 : f32 to vector<8x256xf32>
    %1317 = arith.mulf %1316, %1315 : vector<8x256xf32>
    %1318 = arith.addf %1312, %1317 : vector<8x256xf32>
    %c5_1054 = arith.constant 5 : index
    %c35_1055 = arith.constant 35 : index
    %1319 = memref.load %arg1[%c5_1054, %c35_1055] : memref<8x36xf32, #tpu.memory_space<smem>>
    %c35_1056 = arith.constant 35 : index
    %c0_1057 = arith.constant 0 : index
    %c0_1058 = arith.constant 0 : index
    %1320 = vector.load %arg3[%c35_1056, %c0_1057, %c0_1058] : memref<36x8x256xf32, #tpu.memory_space<vmem>>, vector<1x8x256xf32>
    %1321 = vector.shape_cast %1320 : vector<1x8x256xf32> to vector<8x256xf32>
    %1322 = vector.broadcast %1319 : f32 to vector<8x256xf32>
    %1323 = arith.mulf %1322, %1321 : vector<8x256xf32>
    %1324 = arith.addf %1318, %1323 : vector<8x256xf32>
    %c5_1059 = arith.constant 5 : index
    %1325 = memref.load %arg2[%c5_1059] : memref<8xf32, #tpu.memory_space<smem>>
    %1326 = vector.broadcast %1325 : f32 to vector<8x256xf32>
    %1327 = arith.addf %1324, %1326 : vector<8x256xf32>
    %cst_1060 = arith.constant 0.000000e+00 : f32
    %1328 = vector.broadcast %cst_1060 : f32 to vector<8x256xf32>
    %1329 = arith.maximumf %1327, %1328 : vector<8x256xf32>
    %1330 = arith.truncf %1329 : vector<8x256xf32> to vector<8x256xbf16>
    %c0_1061 = arith.constant 0 : index
    %c1280 = arith.constant 1280 : index
    %1331 = vector.load %arg9[%c0_1061, %c1280] : memref<8x2048xbf16, #tpu.memory_space<vmem>>, vector<8x256xbf16>
    tpu.vector_store %arg9[%c0_1061, %c1280], %1330 {strides = array<i32>} : memref<8x2048xbf16, #tpu.memory_space<vmem>>, vector<8x256xbf16>,
    %c6_1062 = arith.constant 6 : index
    %c0_1063 = arith.constant 0 : index
    %1332 = memref.load %arg1[%c6_1062, %c0_1063] : memref<8x36xf32, #tpu.memory_space<smem>>
    %c0_1064 = arith.constant 0 : index
    %c0_1065 = arith.constant 0 : index
    %c0_1066 = arith.constant 0 : index
    %1333 = vector.load %arg3[%c0_1064, %c0_1065, %c0_1066] : memref<36x8x256xf32, #tpu.memory_space<vmem>>, vector<1x8x256xf32>
    %1334 = vector.shape_cast %1333 : vector<1x8x256xf32> to vector<8x256xf32>
    %1335 = vector.broadcast %1332 : f32 to vector<8x256xf32>
    %1336 = arith.mulf %1335, %1334 : vector<8x256xf32>
    %c6_1067 = arith.constant 6 : index
    %c1_1068 = arith.constant 1 : index
    %1337 = memref.load %arg1[%c6_1067, %c1_1068] : memref<8x36xf32, #tpu.memory_space<smem>>
    %c1_1069 = arith.constant 1 : index
    %c0_1070 = arith.constant 0 : index
    %c0_1071 = arith.constant 0 : index
    %1338 = vector.load %arg3[%c1_1069, %c0_1070, %c0_1071] : memref<36x8x256xf32, #tpu.memory_space<vmem>>, vector<1x8x256xf32>
    %1339 = vector.shape_cast %1338 : vector<1x8x256xf32> to vector<8x256xf32>
    %1340 = vector.broadcast %1337 : f32 to vector<8x256xf32>
    %1341 = arith.mulf %1340, %1339 : vector<8x256xf32>
    %1342 = arith.addf %1336, %1341 : vector<8x256xf32>
    %c6_1072 = arith.constant 6 : index
    %c2_1073 = arith.constant 2 : index
    %1343 = memref.load %arg1[%c6_1072, %c2_1073] : memref<8x36xf32, #tpu.memory_space<smem>>
    %c2_1074 = arith.constant 2 : index
    %c0_1075 = arith.constant 0 : index
    %c0_1076 = arith.constant 0 : index
    %1344 = vector.load %arg3[%c2_1074, %c0_1075, %c0_1076] : memref<36x8x256xf32, #tpu.memory_space<vmem>>, vector<1x8x256xf32>
    %1345 = vector.shape_cast %1344 : vector<1x8x256xf32> to vector<8x256xf32>
    %1346 = vector.broadcast %1343 : f32 to vector<8x256xf32>
    %1347 = arith.mulf %1346, %1345 : vector<8x256xf32>
    %1348 = arith.addf %1342, %1347 : vector<8x256xf32>
    %c6_1077 = arith.constant 6 : index
    %c3_1078 = arith.constant 3 : index
    %1349 = memref.load %arg1[%c6_1077, %c3_1078] : memref<8x36xf32, #tpu.memory_space<smem>>
    %c3_1079 = arith.constant 3 : index
    %c0_1080 = arith.constant 0 : index
    %c0_1081 = arith.constant 0 : index
    %1350 = vector.load %arg3[%c3_1079, %c0_1080, %c0_1081] : memref<36x8x256xf32, #tpu.memory_space<vmem>>, vector<1x8x256xf32>
    %1351 = vector.shape_cast %1350 : vector<1x8x256xf32> to vector<8x256xf32>
    %1352 = vector.broadcast %1349 : f32 to vector<8x256xf32>
    %1353 = arith.mulf %1352, %1351 : vector<8x256xf32>
    %1354 = arith.addf %1348, %1353 : vector<8x256xf32>
    %c6_1082 = arith.constant 6 : index
    %c4_1083 = arith.constant 4 : index
    %1355 = memref.load %arg1[%c6_1082, %c4_1083] : memref<8x36xf32, #tpu.memory_space<smem>>
    %c4_1084 = arith.constant 4 : index
    %c0_1085 = arith.constant 0 : index
    %c0_1086 = arith.constant 0 : index
    %1356 = vector.load %arg3[%c4_1084, %c0_1085, %c0_1086] : memref<36x8x256xf32, #tpu.memory_space<vmem>>, vector<1x8x256xf32>
    %1357 = vector.shape_cast %1356 : vector<1x8x256xf32> to vector<8x256xf32>
    %1358 = vector.broadcast %1355 : f32 to vector<8x256xf32>
    %1359 = arith.mulf %1358, %1357 : vector<8x256xf32>
    %1360 = arith.addf %1354, %1359 : vector<8x256xf32>
    %c6_1087 = arith.constant 6 : index
    %c5_1088 = arith.constant 5 : index
    %1361 = memref.load %arg1[%c6_1087, %c5_1088] : memref<8x36xf32, #tpu.memory_space<smem>>
    %c5_1089 = arith.constant 5 : index
    %c0_1090 = arith.constant 0 : index
    %c0_1091 = arith.constant 0 : index
    %1362 = vector.load %arg3[%c5_1089, %c0_1090, %c0_1091] : memref<36x8x256xf32, #tpu.memory_space<vmem>>, vector<1x8x256xf32>
    %1363 = vector.shape_cast %1362 : vector<1x8x256xf32> to vector<8x256xf32>
    %1364 = vector.broadcast %1361 : f32 to vector<8x256xf32>
    %1365 = arith.mulf %1364, %1363 : vector<8x256xf32>
    %1366 = arith.addf %1360, %1365 : vector<8x256xf32>
    %c6_1092 = arith.constant 6 : index
    %c6_1093 = arith.constant 6 : index
    %1367 = memref.load %arg1[%c6_1092, %c6_1093] : memref<8x36xf32, #tpu.memory_space<smem>>
    %c6_1094 = arith.constant 6 : index
    %c0_1095 = arith.constant 0 : index
    %c0_1096 = arith.constant 0 : index
    %1368 = vector.load %arg3[%c6_1094, %c0_1095, %c0_1096] : memref<36x8x256xf32, #tpu.memory_space<vmem>>, vector<1x8x256xf32>
    %1369 = vector.shape_cast %1368 : vector<1x8x256xf32> to vector<8x256xf32>
    %1370 = vector.broadcast %1367 : f32 to vector<8x256xf32>
    %1371 = arith.mulf %1370, %1369 : vector<8x256xf32>
    %1372 = arith.addf %1366, %1371 : vector<8x256xf32>
    %c6_1097 = arith.constant 6 : index
    %c7_1098 = arith.constant 7 : index
    %1373 = memref.load %arg1[%c6_1097, %c7_1098] : memref<8x36xf32, #tpu.memory_space<smem>>
    %c7_1099 = arith.constant 7 : index
    %c0_1100 = arith.constant 0 : index
    %c0_1101 = arith.constant 0 : index
    %1374 = vector.load %arg3[%c7_1099, %c0_1100, %c0_1101] : memref<36x8x256xf32, #tpu.memory_space<vmem>>, vector<1x8x256xf32>
    %1375 = vector.shape_cast %1374 : vector<1x8x256xf32> to vector<8x256xf32>
    %1376 = vector.broadcast %1373 : f32 to vector<8x256xf32>
    %1377 = arith.mulf %1376, %1375 : vector<8x256xf32>
    %1378 = arith.addf %1372, %1377 : vector<8x256xf32>
    %c6_1102 = arith.constant 6 : index
    %c8_1103 = arith.constant 8 : index
    %1379 = memref.load %arg1[%c6_1102, %c8_1103] : memref<8x36xf32, #tpu.memory_space<smem>>
    %c8_1104 = arith.constant 8 : index
    %c0_1105 = arith.constant 0 : index
    %c0_1106 = arith.constant 0 : index
    %1380 = vector.load %arg3[%c8_1104, %c0_1105, %c0_1106] : memref<36x8x256xf32, #tpu.memory_space<vmem>>, vector<1x8x256xf32>
    %1381 = vector.shape_cast %1380 : vector<1x8x256xf32> to vector<8x256xf32>
    %1382 = vector.broadcast %1379 : f32 to vector<8x256xf32>
    %1383 = arith.mulf %1382, %1381 : vector<8x256xf32>
    %1384 = arith.addf %1378, %1383 : vector<8x256xf32>
    %c6_1107 = arith.constant 6 : index
    %c9_1108 = arith.constant 9 : index
    %1385 = memref.load %arg1[%c6_1107, %c9_1108] : memref<8x36xf32, #tpu.memory_space<smem>>
    %c9_1109 = arith.constant 9 : index
    %c0_1110 = arith.constant 0 : index
    %c0_1111 = arith.constant 0 : index
    %1386 = vector.load %arg3[%c9_1109, %c0_1110, %c0_1111] : memref<36x8x256xf32, #tpu.memory_space<vmem>>, vector<1x8x256xf32>
    %1387 = vector.shape_cast %1386 : vector<1x8x256xf32> to vector<8x256xf32>
    %1388 = vector.broadcast %1385 : f32 to vector<8x256xf32>
    %1389 = arith.mulf %1388, %1387 : vector<8x256xf32>
    %1390 = arith.addf %1384, %1389 : vector<8x256xf32>
    %c6_1112 = arith.constant 6 : index
    %c10_1113 = arith.constant 10 : index
    %1391 = memref.load %arg1[%c6_1112, %c10_1113] : memref<8x36xf32, #tpu.memory_space<smem>>
    %c10_1114 = arith.constant 10 : index
    %c0_1115 = arith.constant 0 : index
    %c0_1116 = arith.constant 0 : index
    %1392 = vector.load %arg3[%c10_1114, %c0_1115, %c0_1116] : memref<36x8x256xf32, #tpu.memory_space<vmem>>, vector<1x8x256xf32>
    %1393 = vector.shape_cast %1392 : vector<1x8x256xf32> to vector<8x256xf32>
    %1394 = vector.broadcast %1391 : f32 to vector<8x256xf32>
    %1395 = arith.mulf %1394, %1393 : vector<8x256xf32>
    %1396 = arith.addf %1390, %1395 : vector<8x256xf32>
    %c6_1117 = arith.constant 6 : index
    %c11_1118 = arith.constant 11 : index
    %1397 = memref.load %arg1[%c6_1117, %c11_1118] : memref<8x36xf32, #tpu.memory_space<smem>>
    %c11_1119 = arith.constant 11 : index
    %c0_1120 = arith.constant 0 : index
    %c0_1121 = arith.constant 0 : index
    %1398 = vector.load %arg3[%c11_1119, %c0_1120, %c0_1121] : memref<36x8x256xf32, #tpu.memory_space<vmem>>, vector<1x8x256xf32>
    %1399 = vector.shape_cast %1398 : vector<1x8x256xf32> to vector<8x256xf32>
    %1400 = vector.broadcast %1397 : f32 to vector<8x256xf32>
    %1401 = arith.mulf %1400, %1399 : vector<8x256xf32>
    %1402 = arith.addf %1396, %1401 : vector<8x256xf32>
    %c6_1122 = arith.constant 6 : index
    %c12_1123 = arith.constant 12 : index
    %1403 = memref.load %arg1[%c6_1122, %c12_1123] : memref<8x36xf32, #tpu.memory_space<smem>>
    %c12_1124 = arith.constant 12 : index
    %c0_1125 = arith.constant 0 : index
    %c0_1126 = arith.constant 0 : index
    %1404 = vector.load %arg3[%c12_1124, %c0_1125, %c0_1126] : memref<36x8x256xf32, #tpu.memory_space<vmem>>, vector<1x8x256xf32>
    %1405 = vector.shape_cast %1404 : vector<1x8x256xf32> to vector<8x256xf32>
    %1406 = vector.broadcast %1403 : f32 to vector<8x256xf32>
    %1407 = arith.mulf %1406, %1405 : vector<8x256xf32>
    %1408 = arith.addf %1402, %1407 : vector<8x256xf32>
    %c6_1127 = arith.constant 6 : index
    %c13_1128 = arith.constant 13 : index
    %1409 = memref.load %arg1[%c6_1127, %c13_1128] : memref<8x36xf32, #tpu.memory_space<smem>>
    %c13_1129 = arith.constant 13 : index
    %c0_1130 = arith.constant 0 : index
    %c0_1131 = arith.constant 0 : index
    %1410 = vector.load %arg3[%c13_1129, %c0_1130, %c0_1131] : memref<36x8x256xf32, #tpu.memory_space<vmem>>, vector<1x8x256xf32>
    %1411 = vector.shape_cast %1410 : vector<1x8x256xf32> to vector<8x256xf32>
    %1412 = vector.broadcast %1409 : f32 to vector<8x256xf32>
    %1413 = arith.mulf %1412, %1411 : vector<8x256xf32>
    %1414 = arith.addf %1408, %1413 : vector<8x256xf32>
    %c6_1132 = arith.constant 6 : index
    %c14_1133 = arith.constant 14 : index
    %1415 = memref.load %arg1[%c6_1132, %c14_1133] : memref<8x36xf32, #tpu.memory_space<smem>>
    %c14_1134 = arith.constant 14 : index
    %c0_1135 = arith.constant 0 : index
    %c0_1136 = arith.constant 0 : index
    %1416 = vector.load %arg3[%c14_1134, %c0_1135, %c0_1136] : memref<36x8x256xf32, #tpu.memory_space<vmem>>, vector<1x8x256xf32>
    %1417 = vector.shape_cast %1416 : vector<1x8x256xf32> to vector<8x256xf32>
    %1418 = vector.broadcast %1415 : f32 to vector<8x256xf32>
    %1419 = arith.mulf %1418, %1417 : vector<8x256xf32>
    %1420 = arith.addf %1414, %1419 : vector<8x256xf32>
    %c6_1137 = arith.constant 6 : index
    %c15_1138 = arith.constant 15 : index
    %1421 = memref.load %arg1[%c6_1137, %c15_1138] : memref<8x36xf32, #tpu.memory_space<smem>>
    %c15_1139 = arith.constant 15 : index
    %c0_1140 = arith.constant 0 : index
    %c0_1141 = arith.constant 0 : index
    %1422 = vector.load %arg3[%c15_1139, %c0_1140, %c0_1141] : memref<36x8x256xf32, #tpu.memory_space<vmem>>, vector<1x8x256xf32>
    %1423 = vector.shape_cast %1422 : vector<1x8x256xf32> to vector<8x256xf32>
    %1424 = vector.broadcast %1421 : f32 to vector<8x256xf32>
    %1425 = arith.mulf %1424, %1423 : vector<8x256xf32>
    %1426 = arith.addf %1420, %1425 : vector<8x256xf32>
    %c6_1142 = arith.constant 6 : index
    %c16_1143 = arith.constant 16 : index
    %1427 = memref.load %arg1[%c6_1142, %c16_1143] : memref<8x36xf32, #tpu.memory_space<smem>>
    %c16_1144 = arith.constant 16 : index
    %c0_1145 = arith.constant 0 : index
    %c0_1146 = arith.constant 0 : index
    %1428 = vector.load %arg3[%c16_1144, %c0_1145, %c0_1146] : memref<36x8x256xf32, #tpu.memory_space<vmem>>, vector<1x8x256xf32>
    %1429 = vector.shape_cast %1428 : vector<1x8x256xf32> to vector<8x256xf32>
    %1430 = vector.broadcast %1427 : f32 to vector<8x256xf32>
    %1431 = arith.mulf %1430, %1429 : vector<8x256xf32>
    %1432 = arith.addf %1426, %1431 : vector<8x256xf32>
    %c6_1147 = arith.constant 6 : index
    %c17_1148 = arith.constant 17 : index
    %1433 = memref.load %arg1[%c6_1147, %c17_1148] : memref<8x36xf32, #tpu.memory_space<smem>>
    %c17_1149 = arith.constant 17 : index
    %c0_1150 = arith.constant 0 : index
    %c0_1151 = arith.constant 0 : index
    %1434 = vector.load %arg3[%c17_1149, %c0_1150, %c0_1151] : memref<36x8x256xf32, #tpu.memory_space<vmem>>, vector<1x8x256xf32>
    %1435 = vector.shape_cast %1434 : vector<1x8x256xf32> to vector<8x256xf32>
    %1436 = vector.broadcast %1433 : f32 to vector<8x256xf32>
    %1437 = arith.mulf %1436, %1435 : vector<8x256xf32>
    %1438 = arith.addf %1432, %1437 : vector<8x256xf32>
    %c6_1152 = arith.constant 6 : index
    %c18_1153 = arith.constant 18 : index
    %1439 = memref.load %arg1[%c6_1152, %c18_1153] : memref<8x36xf32, #tpu.memory_space<smem>>
    %c18_1154 = arith.constant 18 : index
    %c0_1155 = arith.constant 0 : index
    %c0_1156 = arith.constant 0 : index
    %1440 = vector.load %arg3[%c18_1154, %c0_1155, %c0_1156] : memref<36x8x256xf32, #tpu.memory_space<vmem>>, vector<1x8x256xf32>
    %1441 = vector.shape_cast %1440 : vector<1x8x256xf32> to vector<8x256xf32>
    %1442 = vector.broadcast %1439 : f32 to vector<8x256xf32>
    %1443 = arith.mulf %1442, %1441 : vector<8x256xf32>
    %1444 = arith.addf %1438, %1443 : vector<8x256xf32>
    %c6_1157 = arith.constant 6 : index
    %c19_1158 = arith.constant 19 : index
    %1445 = memref.load %arg1[%c6_1157, %c19_1158] : memref<8x36xf32, #tpu.memory_space<smem>>
    %c19_1159 = arith.constant 19 : index
    %c0_1160 = arith.constant 0 : index
    %c0_1161 = arith.constant 0 : index
    %1446 = vector.load %arg3[%c19_1159, %c0_1160, %c0_1161] : memref<36x8x256xf32, #tpu.memory_space<vmem>>, vector<1x8x256xf32>
    %1447 = vector.shape_cast %1446 : vector<1x8x256xf32> to vector<8x256xf32>
    %1448 = vector.broadcast %1445 : f32 to vector<8x256xf32>
    %1449 = arith.mulf %1448, %1447 : vector<8x256xf32>
    %1450 = arith.addf %1444, %1449 : vector<8x256xf32>
    %c6_1162 = arith.constant 6 : index
    %c20_1163 = arith.constant 20 : index
    %1451 = memref.load %arg1[%c6_1162, %c20_1163] : memref<8x36xf32, #tpu.memory_space<smem>>
    %c20_1164 = arith.constant 20 : index
    %c0_1165 = arith.constant 0 : index
    %c0_1166 = arith.constant 0 : index
    %1452 = vector.load %arg3[%c20_1164, %c0_1165, %c0_1166] : memref<36x8x256xf32, #tpu.memory_space<vmem>>, vector<1x8x256xf32>
    %1453 = vector.shape_cast %1452 : vector<1x8x256xf32> to vector<8x256xf32>
    %1454 = vector.broadcast %1451 : f32 to vector<8x256xf32>
    %1455 = arith.mulf %1454, %1453 : vector<8x256xf32>
    %1456 = arith.addf %1450, %1455 : vector<8x256xf32>
    %c6_1167 = arith.constant 6 : index
    %c21_1168 = arith.constant 21 : index
    %1457 = memref.load %arg1[%c6_1167, %c21_1168] : memref<8x36xf32, #tpu.memory_space<smem>>
    %c21_1169 = arith.constant 21 : index
    %c0_1170 = arith.constant 0 : index
    %c0_1171 = arith.constant 0 : index
    %1458 = vector.load %arg3[%c21_1169, %c0_1170, %c0_1171] : memref<36x8x256xf32, #tpu.memory_space<vmem>>, vector<1x8x256xf32>
    %1459 = vector.shape_cast %1458 : vector<1x8x256xf32> to vector<8x256xf32>
    %1460 = vector.broadcast %1457 : f32 to vector<8x256xf32>
    %1461 = arith.mulf %1460, %1459 : vector<8x256xf32>
    %1462 = arith.addf %1456, %1461 : vector<8x256xf32>
    %c6_1172 = arith.constant 6 : index
    %c22_1173 = arith.constant 22 : index
    %1463 = memref.load %arg1[%c6_1172, %c22_1173] : memref<8x36xf32, #tpu.memory_space<smem>>
    %c22_1174 = arith.constant 22 : index
    %c0_1175 = arith.constant 0 : index
    %c0_1176 = arith.constant 0 : index
    %1464 = vector.load %arg3[%c22_1174, %c0_1175, %c0_1176] : memref<36x8x256xf32, #tpu.memory_space<vmem>>, vector<1x8x256xf32>
    %1465 = vector.shape_cast %1464 : vector<1x8x256xf32> to vector<8x256xf32>
    %1466 = vector.broadcast %1463 : f32 to vector<8x256xf32>
    %1467 = arith.mulf %1466, %1465 : vector<8x256xf32>
    %1468 = arith.addf %1462, %1467 : vector<8x256xf32>
    %c6_1177 = arith.constant 6 : index
    %c23_1178 = arith.constant 23 : index
    %1469 = memref.load %arg1[%c6_1177, %c23_1178] : memref<8x36xf32, #tpu.memory_space<smem>>
    %c23_1179 = arith.constant 23 : index
    %c0_1180 = arith.constant 0 : index
    %c0_1181 = arith.constant 0 : index
    %1470 = vector.load %arg3[%c23_1179, %c0_1180, %c0_1181] : memref<36x8x256xf32, #tpu.memory_space<vmem>>, vector<1x8x256xf32>
    %1471 = vector.shape_cast %1470 : vector<1x8x256xf32> to vector<8x256xf32>
    %1472 = vector.broadcast %1469 : f32 to vector<8x256xf32>
    %1473 = arith.mulf %1472, %1471 : vector<8x256xf32>
    %1474 = arith.addf %1468, %1473 : vector<8x256xf32>
    %c6_1182 = arith.constant 6 : index
    %c24_1183 = arith.constant 24 : index
    %1475 = memref.load %arg1[%c6_1182, %c24_1183] : memref<8x36xf32, #tpu.memory_space<smem>>
    %c24_1184 = arith.constant 24 : index
    %c0_1185 = arith.constant 0 : index
    %c0_1186 = arith.constant 0 : index
    %1476 = vector.load %arg3[%c24_1184, %c0_1185, %c0_1186] : memref<36x8x256xf32, #tpu.memory_space<vmem>>, vector<1x8x256xf32>
    %1477 = vector.shape_cast %1476 : vector<1x8x256xf32> to vector<8x256xf32>
    %1478 = vector.broadcast %1475 : f32 to vector<8x256xf32>
    %1479 = arith.mulf %1478, %1477 : vector<8x256xf32>
    %1480 = arith.addf %1474, %1479 : vector<8x256xf32>
    %c6_1187 = arith.constant 6 : index
    %c25_1188 = arith.constant 25 : index
    %1481 = memref.load %arg1[%c6_1187, %c25_1188] : memref<8x36xf32, #tpu.memory_space<smem>>
    %c25_1189 = arith.constant 25 : index
    %c0_1190 = arith.constant 0 : index
    %c0_1191 = arith.constant 0 : index
    %1482 = vector.load %arg3[%c25_1189, %c0_1190, %c0_1191] : memref<36x8x256xf32, #tpu.memory_space<vmem>>, vector<1x8x256xf32>
    %1483 = vector.shape_cast %1482 : vector<1x8x256xf32> to vector<8x256xf32>
    %1484 = vector.broadcast %1481 : f32 to vector<8x256xf32>
    %1485 = arith.mulf %1484, %1483 : vector<8x256xf32>
    %1486 = arith.addf %1480, %1485 : vector<8x256xf32>
    %c6_1192 = arith.constant 6 : index
    %c26_1193 = arith.constant 26 : index
    %1487 = memref.load %arg1[%c6_1192, %c26_1193] : memref<8x36xf32, #tpu.memory_space<smem>>
    %c26_1194 = arith.constant 26 : index
    %c0_1195 = arith.constant 0 : index
    %c0_1196 = arith.constant 0 : index
    %1488 = vector.load %arg3[%c26_1194, %c0_1195, %c0_1196] : memref<36x8x256xf32, #tpu.memory_space<vmem>>, vector<1x8x256xf32>
    %1489 = vector.shape_cast %1488 : vector<1x8x256xf32> to vector<8x256xf32>
    %1490 = vector.broadcast %1487 : f32 to vector<8x256xf32>
    %1491 = arith.mulf %1490, %1489 : vector<8x256xf32>
    %1492 = arith.addf %1486, %1491 : vector<8x256xf32>
    %c6_1197 = arith.constant 6 : index
    %c27_1198 = arith.constant 27 : index
    %1493 = memref.load %arg1[%c6_1197, %c27_1198] : memref<8x36xf32, #tpu.memory_space<smem>>
    %c27_1199 = arith.constant 27 : index
    %c0_1200 = arith.constant 0 : index
    %c0_1201 = arith.constant 0 : index
    %1494 = vector.load %arg3[%c27_1199, %c0_1200, %c0_1201] : memref<36x8x256xf32, #tpu.memory_space<vmem>>, vector<1x8x256xf32>
    %1495 = vector.shape_cast %1494 : vector<1x8x256xf32> to vector<8x256xf32>
    %1496 = vector.broadcast %1493 : f32 to vector<8x256xf32>
    %1497 = arith.mulf %1496, %1495 : vector<8x256xf32>
    %1498 = arith.addf %1492, %1497 : vector<8x256xf32>
    %c6_1202 = arith.constant 6 : index
    %c28_1203 = arith.constant 28 : index
    %1499 = memref.load %arg1[%c6_1202, %c28_1203] : memref<8x36xf32, #tpu.memory_space<smem>>
    %c28_1204 = arith.constant 28 : index
    %c0_1205 = arith.constant 0 : index
    %c0_1206 = arith.constant 0 : index
    %1500 = vector.load %arg3[%c28_1204, %c0_1205, %c0_1206] : memref<36x8x256xf32, #tpu.memory_space<vmem>>, vector<1x8x256xf32>
    %1501 = vector.shape_cast %1500 : vector<1x8x256xf32> to vector<8x256xf32>
    %1502 = vector.broadcast %1499 : f32 to vector<8x256xf32>
    %1503 = arith.mulf %1502, %1501 : vector<8x256xf32>
    %1504 = arith.addf %1498, %1503 : vector<8x256xf32>
    %c6_1207 = arith.constant 6 : index
    %c29_1208 = arith.constant 29 : index
    %1505 = memref.load %arg1[%c6_1207, %c29_1208] : memref<8x36xf32, #tpu.memory_space<smem>>
    %c29_1209 = arith.constant 29 : index
    %c0_1210 = arith.constant 0 : index
    %c0_1211 = arith.constant 0 : index
    %1506 = vector.load %arg3[%c29_1209, %c0_1210, %c0_1211] : memref<36x8x256xf32, #tpu.memory_space<vmem>>, vector<1x8x256xf32>
    %1507 = vector.shape_cast %1506 : vector<1x8x256xf32> to vector<8x256xf32>
    %1508 = vector.broadcast %1505 : f32 to vector<8x256xf32>
    %1509 = arith.mulf %1508, %1507 : vector<8x256xf32>
    %1510 = arith.addf %1504, %1509 : vector<8x256xf32>
    %c6_1212 = arith.constant 6 : index
    %c30_1213 = arith.constant 30 : index
    %1511 = memref.load %arg1[%c6_1212, %c30_1213] : memref<8x36xf32, #tpu.memory_space<smem>>
    %c30_1214 = arith.constant 30 : index
    %c0_1215 = arith.constant 0 : index
    %c0_1216 = arith.constant 0 : index
    %1512 = vector.load %arg3[%c30_1214, %c0_1215, %c0_1216] : memref<36x8x256xf32, #tpu.memory_space<vmem>>, vector<1x8x256xf32>
    %1513 = vector.shape_cast %1512 : vector<1x8x256xf32> to vector<8x256xf32>
    %1514 = vector.broadcast %1511 : f32 to vector<8x256xf32>
    %1515 = arith.mulf %1514, %1513 : vector<8x256xf32>
    %1516 = arith.addf %1510, %1515 : vector<8x256xf32>
    %c6_1217 = arith.constant 6 : index
    %c31_1218 = arith.constant 31 : index
    %1517 = memref.load %arg1[%c6_1217, %c31_1218] : memref<8x36xf32, #tpu.memory_space<smem>>
    %c31_1219 = arith.constant 31 : index
    %c0_1220 = arith.constant 0 : index
    %c0_1221 = arith.constant 0 : index
    %1518 = vector.load %arg3[%c31_1219, %c0_1220, %c0_1221] : memref<36x8x256xf32, #tpu.memory_space<vmem>>, vector<1x8x256xf32>
    %1519 = vector.shape_cast %1518 : vector<1x8x256xf32> to vector<8x256xf32>
    %1520 = vector.broadcast %1517 : f32 to vector<8x256xf32>
    %1521 = arith.mulf %1520, %1519 : vector<8x256xf32>
    %1522 = arith.addf %1516, %1521 : vector<8x256xf32>
    %c6_1222 = arith.constant 6 : index
    %c32_1223 = arith.constant 32 : index
    %1523 = memref.load %arg1[%c6_1222, %c32_1223] : memref<8x36xf32, #tpu.memory_space<smem>>
    %c32_1224 = arith.constant 32 : index
    %c0_1225 = arith.constant 0 : index
    %c0_1226 = arith.constant 0 : index
    %1524 = vector.load %arg3[%c32_1224, %c0_1225, %c0_1226] : memref<36x8x256xf32, #tpu.memory_space<vmem>>, vector<1x8x256xf32>
    %1525 = vector.shape_cast %1524 : vector<1x8x256xf32> to vector<8x256xf32>
    %1526 = vector.broadcast %1523 : f32 to vector<8x256xf32>
    %1527 = arith.mulf %1526, %1525 : vector<8x256xf32>
    %1528 = arith.addf %1522, %1527 : vector<8x256xf32>
    %c6_1227 = arith.constant 6 : index
    %c33_1228 = arith.constant 33 : index
    %1529 = memref.load %arg1[%c6_1227, %c33_1228] : memref<8x36xf32, #tpu.memory_space<smem>>
    %c33_1229 = arith.constant 33 : index
    %c0_1230 = arith.constant 0 : index
    %c0_1231 = arith.constant 0 : index
    %1530 = vector.load %arg3[%c33_1229, %c0_1230, %c0_1231] : memref<36x8x256xf32, #tpu.memory_space<vmem>>, vector<1x8x256xf32>
    %1531 = vector.shape_cast %1530 : vector<1x8x256xf32> to vector<8x256xf32>
    %1532 = vector.broadcast %1529 : f32 to vector<8x256xf32>
    %1533 = arith.mulf %1532, %1531 : vector<8x256xf32>
    %1534 = arith.addf %1528, %1533 : vector<8x256xf32>
    %c6_1232 = arith.constant 6 : index
    %c34_1233 = arith.constant 34 : index
    %1535 = memref.load %arg1[%c6_1232, %c34_1233] : memref<8x36xf32, #tpu.memory_space<smem>>
    %c34_1234 = arith.constant 34 : index
    %c0_1235 = arith.constant 0 : index
    %c0_1236 = arith.constant 0 : index
    %1536 = vector.load %arg3[%c34_1234, %c0_1235, %c0_1236] : memref<36x8x256xf32, #tpu.memory_space<vmem>>, vector<1x8x256xf32>
    %1537 = vector.shape_cast %1536 : vector<1x8x256xf32> to vector<8x256xf32>
    %1538 = vector.broadcast %1535 : f32 to vector<8x256xf32>
    %1539 = arith.mulf %1538, %1537 : vector<8x256xf32>
    %1540 = arith.addf %1534, %1539 : vector<8x256xf32>
    %c6_1237 = arith.constant 6 : index
    %c35_1238 = arith.constant 35 : index
    %1541 = memref.load %arg1[%c6_1237, %c35_1238] : memref<8x36xf32, #tpu.memory_space<smem>>
    %c35_1239 = arith.constant 35 : index
    %c0_1240 = arith.constant 0 : index
    %c0_1241 = arith.constant 0 : index
    %1542 = vector.load %arg3[%c35_1239, %c0_1240, %c0_1241] : memref<36x8x256xf32, #tpu.memory_space<vmem>>, vector<1x8x256xf32>
    %1543 = vector.shape_cast %1542 : vector<1x8x256xf32> to vector<8x256xf32>
    %1544 = vector.broadcast %1541 : f32 to vector<8x256xf32>
    %1545 = arith.mulf %1544, %1543 : vector<8x256xf32>
    %1546 = arith.addf %1540, %1545 : vector<8x256xf32>
    %c6_1242 = arith.constant 6 : index
    %1547 = memref.load %arg2[%c6_1242] : memref<8xf32, #tpu.memory_space<smem>>
    %1548 = vector.broadcast %1547 : f32 to vector<8x256xf32>
    %1549 = arith.addf %1546, %1548 : vector<8x256xf32>
    %cst_1243 = arith.constant 0.000000e+00 : f32
    %1550 = vector.broadcast %cst_1243 : f32 to vector<8x256xf32>
    %1551 = arith.maximumf %1549, %1550 : vector<8x256xf32>
    %1552 = arith.truncf %1551 : vector<8x256xf32> to vector<8x256xbf16>
    %c0_1244 = arith.constant 0 : index
    %c1536 = arith.constant 1536 : index
    %1553 = vector.load %arg9[%c0_1244, %c1536] : memref<8x2048xbf16, #tpu.memory_space<vmem>>, vector<8x256xbf16>
    tpu.vector_store %arg9[%c0_1244, %c1536], %1552 {strides = array<i32>} : memref<8x2048xbf16, #tpu.memory_space<vmem>>, vector<8x256xbf16>,
    %c7_1245 = arith.constant 7 : index
    %c0_1246 = arith.constant 0 : index
    %1554 = memref.load %arg1[%c7_1245, %c0_1246] : memref<8x36xf32, #tpu.memory_space<smem>>
    %c0_1247 = arith.constant 0 : index
    %c0_1248 = arith.constant 0 : index
    %c0_1249 = arith.constant 0 : index
    %1555 = vector.load %arg3[%c0_1247, %c0_1248, %c0_1249] : memref<36x8x256xf32, #tpu.memory_space<vmem>>, vector<1x8x256xf32>
    %1556 = vector.shape_cast %1555 : vector<1x8x256xf32> to vector<8x256xf32>
    %1557 = vector.broadcast %1554 : f32 to vector<8x256xf32>
    %1558 = arith.mulf %1557, %1556 : vector<8x256xf32>
    %c7_1250 = arith.constant 7 : index
    %c1_1251 = arith.constant 1 : index
    %1559 = memref.load %arg1[%c7_1250, %c1_1251] : memref<8x36xf32, #tpu.memory_space<smem>>
    %c1_1252 = arith.constant 1 : index
    %c0_1253 = arith.constant 0 : index
    %c0_1254 = arith.constant 0 : index
    %1560 = vector.load %arg3[%c1_1252, %c0_1253, %c0_1254] : memref<36x8x256xf32, #tpu.memory_space<vmem>>, vector<1x8x256xf32>
    %1561 = vector.shape_cast %1560 : vector<1x8x256xf32> to vector<8x256xf32>
    %1562 = vector.broadcast %1559 : f32 to vector<8x256xf32>
    %1563 = arith.mulf %1562, %1561 : vector<8x256xf32>
    %1564 = arith.addf %1558, %1563 : vector<8x256xf32>
    %c7_1255 = arith.constant 7 : index
    %c2_1256 = arith.constant 2 : index
    %1565 = memref.load %arg1[%c7_1255, %c2_1256] : memref<8x36xf32, #tpu.memory_space<smem>>
    %c2_1257 = arith.constant 2 : index
    %c0_1258 = arith.constant 0 : index
    %c0_1259 = arith.constant 0 : index
    %1566 = vector.load %arg3[%c2_1257, %c0_1258, %c0_1259] : memref<36x8x256xf32, #tpu.memory_space<vmem>>, vector<1x8x256xf32>
    %1567 = vector.shape_cast %1566 : vector<1x8x256xf32> to vector<8x256xf32>
    %1568 = vector.broadcast %1565 : f32 to vector<8x256xf32>
    %1569 = arith.mulf %1568, %1567 : vector<8x256xf32>
    %1570 = arith.addf %1564, %1569 : vector<8x256xf32>
    %c7_1260 = arith.constant 7 : index
    %c3_1261 = arith.constant 3 : index
    %1571 = memref.load %arg1[%c7_1260, %c3_1261] : memref<8x36xf32, #tpu.memory_space<smem>>
    %c3_1262 = arith.constant 3 : index
    %c0_1263 = arith.constant 0 : index
    %c0_1264 = arith.constant 0 : index
    %1572 = vector.load %arg3[%c3_1262, %c0_1263, %c0_1264] : memref<36x8x256xf32, #tpu.memory_space<vmem>>, vector<1x8x256xf32>
    %1573 = vector.shape_cast %1572 : vector<1x8x256xf32> to vector<8x256xf32>
    %1574 = vector.broadcast %1571 : f32 to vector<8x256xf32>
    %1575 = arith.mulf %1574, %1573 : vector<8x256xf32>
    %1576 = arith.addf %1570, %1575 : vector<8x256xf32>
    %c7_1265 = arith.constant 7 : index
    %c4_1266 = arith.constant 4 : index
    %1577 = memref.load %arg1[%c7_1265, %c4_1266] : memref<8x36xf32, #tpu.memory_space<smem>>
    %c4_1267 = arith.constant 4 : index
    %c0_1268 = arith.constant 0 : index
    %c0_1269 = arith.constant 0 : index
    %1578 = vector.load %arg3[%c4_1267, %c0_1268, %c0_1269] : memref<36x8x256xf32, #tpu.memory_space<vmem>>, vector<1x8x256xf32>
    %1579 = vector.shape_cast %1578 : vector<1x8x256xf32> to vector<8x256xf32>
    %1580 = vector.broadcast %1577 : f32 to vector<8x256xf32>
    %1581 = arith.mulf %1580, %1579 : vector<8x256xf32>
    %1582 = arith.addf %1576, %1581 : vector<8x256xf32>
    %c7_1270 = arith.constant 7 : index
    %c5_1271 = arith.constant 5 : index
    %1583 = memref.load %arg1[%c7_1270, %c5_1271] : memref<8x36xf32, #tpu.memory_space<smem>>
    %c5_1272 = arith.constant 5 : index
    %c0_1273 = arith.constant 0 : index
    %c0_1274 = arith.constant 0 : index
    %1584 = vector.load %arg3[%c5_1272, %c0_1273, %c0_1274] : memref<36x8x256xf32, #tpu.memory_space<vmem>>, vector<1x8x256xf32>
    %1585 = vector.shape_cast %1584 : vector<1x8x256xf32> to vector<8x256xf32>
    %1586 = vector.broadcast %1583 : f32 to vector<8x256xf32>
    %1587 = arith.mulf %1586, %1585 : vector<8x256xf32>
    %1588 = arith.addf %1582, %1587 : vector<8x256xf32>
    %c7_1275 = arith.constant 7 : index
    %c6_1276 = arith.constant 6 : index
    %1589 = memref.load %arg1[%c7_1275, %c6_1276] : memref<8x36xf32, #tpu.memory_space<smem>>
    %c6_1277 = arith.constant 6 : index
    %c0_1278 = arith.constant 0 : index
    %c0_1279 = arith.constant 0 : index
    %1590 = vector.load %arg3[%c6_1277, %c0_1278, %c0_1279] : memref<36x8x256xf32, #tpu.memory_space<vmem>>, vector<1x8x256xf32>
    %1591 = vector.shape_cast %1590 : vector<1x8x256xf32> to vector<8x256xf32>
    %1592 = vector.broadcast %1589 : f32 to vector<8x256xf32>
    %1593 = arith.mulf %1592, %1591 : vector<8x256xf32>
    %1594 = arith.addf %1588, %1593 : vector<8x256xf32>
    %c7_1280 = arith.constant 7 : index
    %c7_1281 = arith.constant 7 : index
    %1595 = memref.load %arg1[%c7_1280, %c7_1281] : memref<8x36xf32, #tpu.memory_space<smem>>
    %c7_1282 = arith.constant 7 : index
    %c0_1283 = arith.constant 0 : index
    %c0_1284 = arith.constant 0 : index
    %1596 = vector.load %arg3[%c7_1282, %c0_1283, %c0_1284] : memref<36x8x256xf32, #tpu.memory_space<vmem>>, vector<1x8x256xf32>
    %1597 = vector.shape_cast %1596 : vector<1x8x256xf32> to vector<8x256xf32>
    %1598 = vector.broadcast %1595 : f32 to vector<8x256xf32>
    %1599 = arith.mulf %1598, %1597 : vector<8x256xf32>
    %1600 = arith.addf %1594, %1599 : vector<8x256xf32>
    %c7_1285 = arith.constant 7 : index
    %c8_1286 = arith.constant 8 : index
    %1601 = memref.load %arg1[%c7_1285, %c8_1286] : memref<8x36xf32, #tpu.memory_space<smem>>
    %c8_1287 = arith.constant 8 : index
    %c0_1288 = arith.constant 0 : index
    %c0_1289 = arith.constant 0 : index
    %1602 = vector.load %arg3[%c8_1287, %c0_1288, %c0_1289] : memref<36x8x256xf32, #tpu.memory_space<vmem>>, vector<1x8x256xf32>
    %1603 = vector.shape_cast %1602 : vector<1x8x256xf32> to vector<8x256xf32>
    %1604 = vector.broadcast %1601 : f32 to vector<8x256xf32>
    %1605 = arith.mulf %1604, %1603 : vector<8x256xf32>
    %1606 = arith.addf %1600, %1605 : vector<8x256xf32>
    %c7_1290 = arith.constant 7 : index
    %c9_1291 = arith.constant 9 : index
    %1607 = memref.load %arg1[%c7_1290, %c9_1291] : memref<8x36xf32, #tpu.memory_space<smem>>
    %c9_1292 = arith.constant 9 : index
    %c0_1293 = arith.constant 0 : index
    %c0_1294 = arith.constant 0 : index
    %1608 = vector.load %arg3[%c9_1292, %c0_1293, %c0_1294] : memref<36x8x256xf32, #tpu.memory_space<vmem>>, vector<1x8x256xf32>
    %1609 = vector.shape_cast %1608 : vector<1x8x256xf32> to vector<8x256xf32>
    %1610 = vector.broadcast %1607 : f32 to vector<8x256xf32>
    %1611 = arith.mulf %1610, %1609 : vector<8x256xf32>
    %1612 = arith.addf %1606, %1611 : vector<8x256xf32>
    %c7_1295 = arith.constant 7 : index
    %c10_1296 = arith.constant 10 : index
    %1613 = memref.load %arg1[%c7_1295, %c10_1296] : memref<8x36xf32, #tpu.memory_space<smem>>
    %c10_1297 = arith.constant 10 : index
    %c0_1298 = arith.constant 0 : index
    %c0_1299 = arith.constant 0 : index
    %1614 = vector.load %arg3[%c10_1297, %c0_1298, %c0_1299] : memref<36x8x256xf32, #tpu.memory_space<vmem>>, vector<1x8x256xf32>
    %1615 = vector.shape_cast %1614 : vector<1x8x256xf32> to vector<8x256xf32>
    %1616 = vector.broadcast %1613 : f32 to vector<8x256xf32>
    %1617 = arith.mulf %1616, %1615 : vector<8x256xf32>
    %1618 = arith.addf %1612, %1617 : vector<8x256xf32>
    %c7_1300 = arith.constant 7 : index
    %c11_1301 = arith.constant 11 : index
    %1619 = memref.load %arg1[%c7_1300, %c11_1301] : memref<8x36xf32, #tpu.memory_space<smem>>
    %c11_1302 = arith.constant 11 : index
    %c0_1303 = arith.constant 0 : index
    %c0_1304 = arith.constant 0 : index
    %1620 = vector.load %arg3[%c11_1302, %c0_1303, %c0_1304] : memref<36x8x256xf32, #tpu.memory_space<vmem>>, vector<1x8x256xf32>
    %1621 = vector.shape_cast %1620 : vector<1x8x256xf32> to vector<8x256xf32>
    %1622 = vector.broadcast %1619 : f32 to vector<8x256xf32>
    %1623 = arith.mulf %1622, %1621 : vector<8x256xf32>
    %1624 = arith.addf %1618, %1623 : vector<8x256xf32>
    %c7_1305 = arith.constant 7 : index
    %c12_1306 = arith.constant 12 : index
    %1625 = memref.load %arg1[%c7_1305, %c12_1306] : memref<8x36xf32, #tpu.memory_space<smem>>
    %c12_1307 = arith.constant 12 : index
    %c0_1308 = arith.constant 0 : index
    %c0_1309 = arith.constant 0 : index
    %1626 = vector.load %arg3[%c12_1307, %c0_1308, %c0_1309] : memref<36x8x256xf32, #tpu.memory_space<vmem>>, vector<1x8x256xf32>
    %1627 = vector.shape_cast %1626 : vector<1x8x256xf32> to vector<8x256xf32>
    %1628 = vector.broadcast %1625 : f32 to vector<8x256xf32>
    %1629 = arith.mulf %1628, %1627 : vector<8x256xf32>
    %1630 = arith.addf %1624, %1629 : vector<8x256xf32>
    %c7_1310 = arith.constant 7 : index
    %c13_1311 = arith.constant 13 : index
    %1631 = memref.load %arg1[%c7_1310, %c13_1311] : memref<8x36xf32, #tpu.memory_space<smem>>
    %c13_1312 = arith.constant 13 : index
    %c0_1313 = arith.constant 0 : index
    %c0_1314 = arith.constant 0 : index
    %1632 = vector.load %arg3[%c13_1312, %c0_1313, %c0_1314] : memref<36x8x256xf32, #tpu.memory_space<vmem>>, vector<1x8x256xf32>
    %1633 = vector.shape_cast %1632 : vector<1x8x256xf32> to vector<8x256xf32>
    %1634 = vector.broadcast %1631 : f32 to vector<8x256xf32>
    %1635 = arith.mulf %1634, %1633 : vector<8x256xf32>
    %1636 = arith.addf %1630, %1635 : vector<8x256xf32>
    %c7_1315 = arith.constant 7 : index
    %c14_1316 = arith.constant 14 : index
    %1637 = memref.load %arg1[%c7_1315, %c14_1316] : memref<8x36xf32, #tpu.memory_space<smem>>
    %c14_1317 = arith.constant 14 : index
    %c0_1318 = arith.constant 0 : index
    %c0_1319 = arith.constant 0 : index
    %1638 = vector.load %arg3[%c14_1317, %c0_1318, %c0_1319] : memref<36x8x256xf32, #tpu.memory_space<vmem>>, vector<1x8x256xf32>
    %1639 = vector.shape_cast %1638 : vector<1x8x256xf32> to vector<8x256xf32>
    %1640 = vector.broadcast %1637 : f32 to vector<8x256xf32>
    %1641 = arith.mulf %1640, %1639 : vector<8x256xf32>
    %1642 = arith.addf %1636, %1641 : vector<8x256xf32>
    %c7_1320 = arith.constant 7 : index
    %c15_1321 = arith.constant 15 : index
    %1643 = memref.load %arg1[%c7_1320, %c15_1321] : memref<8x36xf32, #tpu.memory_space<smem>>
    %c15_1322 = arith.constant 15 : index
    %c0_1323 = arith.constant 0 : index
    %c0_1324 = arith.constant 0 : index
    %1644 = vector.load %arg3[%c15_1322, %c0_1323, %c0_1324] : memref<36x8x256xf32, #tpu.memory_space<vmem>>, vector<1x8x256xf32>
    %1645 = vector.shape_cast %1644 : vector<1x8x256xf32> to vector<8x256xf32>
    %1646 = vector.broadcast %1643 : f32 to vector<8x256xf32>
    %1647 = arith.mulf %1646, %1645 : vector<8x256xf32>
    %1648 = arith.addf %1642, %1647 : vector<8x256xf32>
    %c7_1325 = arith.constant 7 : index
    %c16_1326 = arith.constant 16 : index
    %1649 = memref.load %arg1[%c7_1325, %c16_1326] : memref<8x36xf32, #tpu.memory_space<smem>>
    %c16_1327 = arith.constant 16 : index
    %c0_1328 = arith.constant 0 : index
    %c0_1329 = arith.constant 0 : index
    %1650 = vector.load %arg3[%c16_1327, %c0_1328, %c0_1329] : memref<36x8x256xf32, #tpu.memory_space<vmem>>, vector<1x8x256xf32>
    %1651 = vector.shape_cast %1650 : vector<1x8x256xf32> to vector<8x256xf32>
    %1652 = vector.broadcast %1649 : f32 to vector<8x256xf32>
    %1653 = arith.mulf %1652, %1651 : vector<8x256xf32>
    %1654 = arith.addf %1648, %1653 : vector<8x256xf32>
    %c7_1330 = arith.constant 7 : index
    %c17_1331 = arith.constant 17 : index
    %1655 = memref.load %arg1[%c7_1330, %c17_1331] : memref<8x36xf32, #tpu.memory_space<smem>>
    %c17_1332 = arith.constant 17 : index
    %c0_1333 = arith.constant 0 : index
    %c0_1334 = arith.constant 0 : index
    %1656 = vector.load %arg3[%c17_1332, %c0_1333, %c0_1334] : memref<36x8x256xf32, #tpu.memory_space<vmem>>, vector<1x8x256xf32>
    %1657 = vector.shape_cast %1656 : vector<1x8x256xf32> to vector<8x256xf32>
    %1658 = vector.broadcast %1655 : f32 to vector<8x256xf32>
    %1659 = arith.mulf %1658, %1657 : vector<8x256xf32>
    %1660 = arith.addf %1654, %1659 : vector<8x256xf32>
    %c7_1335 = arith.constant 7 : index
    %c18_1336 = arith.constant 18 : index
    %1661 = memref.load %arg1[%c7_1335, %c18_1336] : memref<8x36xf32, #tpu.memory_space<smem>>
    %c18_1337 = arith.constant 18 : index
    %c0_1338 = arith.constant 0 : index
    %c0_1339 = arith.constant 0 : index
    %1662 = vector.load %arg3[%c18_1337, %c0_1338, %c0_1339] : memref<36x8x256xf32, #tpu.memory_space<vmem>>, vector<1x8x256xf32>
    %1663 = vector.shape_cast %1662 : vector<1x8x256xf32> to vector<8x256xf32>
    %1664 = vector.broadcast %1661 : f32 to vector<8x256xf32>
    %1665 = arith.mulf %1664, %1663 : vector<8x256xf32>
    %1666 = arith.addf %1660, %1665 : vector<8x256xf32>
    %c7_1340 = arith.constant 7 : index
    %c19_1341 = arith.constant 19 : index
    %1667 = memref.load %arg1[%c7_1340, %c19_1341] : memref<8x36xf32, #tpu.memory_space<smem>>
    %c19_1342 = arith.constant 19 : index
    %c0_1343 = arith.constant 0 : index
    %c0_1344 = arith.constant 0 : index
    %1668 = vector.load %arg3[%c19_1342, %c0_1343, %c0_1344] : memref<36x8x256xf32, #tpu.memory_space<vmem>>, vector<1x8x256xf32>
    %1669 = vector.shape_cast %1668 : vector<1x8x256xf32> to vector<8x256xf32>
    %1670 = vector.broadcast %1667 : f32 to vector<8x256xf32>
    %1671 = arith.mulf %1670, %1669 : vector<8x256xf32>
    %1672 = arith.addf %1666, %1671 : vector<8x256xf32>
    %c7_1345 = arith.constant 7 : index
    %c20_1346 = arith.constant 20 : index
    %1673 = memref.load %arg1[%c7_1345, %c20_1346] : memref<8x36xf32, #tpu.memory_space<smem>>
    %c20_1347 = arith.constant 20 : index
    %c0_1348 = arith.constant 0 : index
    %c0_1349 = arith.constant 0 : index
    %1674 = vector.load %arg3[%c20_1347, %c0_1348, %c0_1349] : memref<36x8x256xf32, #tpu.memory_space<vmem>>, vector<1x8x256xf32>
    %1675 = vector.shape_cast %1674 : vector<1x8x256xf32> to vector<8x256xf32>
    %1676 = vector.broadcast %1673 : f32 to vector<8x256xf32>
    %1677 = arith.mulf %1676, %1675 : vector<8x256xf32>
    %1678 = arith.addf %1672, %1677 : vector<8x256xf32>
    %c7_1350 = arith.constant 7 : index
    %c21_1351 = arith.constant 21 : index
    %1679 = memref.load %arg1[%c7_1350, %c21_1351] : memref<8x36xf32, #tpu.memory_space<smem>>
    %c21_1352 = arith.constant 21 : index
    %c0_1353 = arith.constant 0 : index
    %c0_1354 = arith.constant 0 : index
    %1680 = vector.load %arg3[%c21_1352, %c0_1353, %c0_1354] : memref<36x8x256xf32, #tpu.memory_space<vmem>>, vector<1x8x256xf32>
    %1681 = vector.shape_cast %1680 : vector<1x8x256xf32> to vector<8x256xf32>
    %1682 = vector.broadcast %1679 : f32 to vector<8x256xf32>
    %1683 = arith.mulf %1682, %1681 : vector<8x256xf32>
    %1684 = arith.addf %1678, %1683 : vector<8x256xf32>
    %c7_1355 = arith.constant 7 : index
    %c22_1356 = arith.constant 22 : index
    %1685 = memref.load %arg1[%c7_1355, %c22_1356] : memref<8x36xf32, #tpu.memory_space<smem>>
    %c22_1357 = arith.constant 22 : index
    %c0_1358 = arith.constant 0 : index
    %c0_1359 = arith.constant 0 : index
    %1686 = vector.load %arg3[%c22_1357, %c0_1358, %c0_1359] : memref<36x8x256xf32, #tpu.memory_space<vmem>>, vector<1x8x256xf32>
    %1687 = vector.shape_cast %1686 : vector<1x8x256xf32> to vector<8x256xf32>
    %1688 = vector.broadcast %1685 : f32 to vector<8x256xf32>
    %1689 = arith.mulf %1688, %1687 : vector<8x256xf32>
    %1690 = arith.addf %1684, %1689 : vector<8x256xf32>
    %c7_1360 = arith.constant 7 : index
    %c23_1361 = arith.constant 23 : index
    %1691 = memref.load %arg1[%c7_1360, %c23_1361] : memref<8x36xf32, #tpu.memory_space<smem>>
    %c23_1362 = arith.constant 23 : index
    %c0_1363 = arith.constant 0 : index
    %c0_1364 = arith.constant 0 : index
    %1692 = vector.load %arg3[%c23_1362, %c0_1363, %c0_1364] : memref<36x8x256xf32, #tpu.memory_space<vmem>>, vector<1x8x256xf32>
    %1693 = vector.shape_cast %1692 : vector<1x8x256xf32> to vector<8x256xf32>
    %1694 = vector.broadcast %1691 : f32 to vector<8x256xf32>
    %1695 = arith.mulf %1694, %1693 : vector<8x256xf32>
    %1696 = arith.addf %1690, %1695 : vector<8x256xf32>
    %c7_1365 = arith.constant 7 : index
    %c24_1366 = arith.constant 24 : index
    %1697 = memref.load %arg1[%c7_1365, %c24_1366] : memref<8x36xf32, #tpu.memory_space<smem>>
    %c24_1367 = arith.constant 24 : index
    %c0_1368 = arith.constant 0 : index
    %c0_1369 = arith.constant 0 : index
    %1698 = vector.load %arg3[%c24_1367, %c0_1368, %c0_1369] : memref<36x8x256xf32, #tpu.memory_space<vmem>>, vector<1x8x256xf32>
    %1699 = vector.shape_cast %1698 : vector<1x8x256xf32> to vector<8x256xf32>
    %1700 = vector.broadcast %1697 : f32 to vector<8x256xf32>
    %1701 = arith.mulf %1700, %1699 : vector<8x256xf32>
    %1702 = arith.addf %1696, %1701 : vector<8x256xf32>
    %c7_1370 = arith.constant 7 : index
    %c25_1371 = arith.constant 25 : index
    %1703 = memref.load %arg1[%c7_1370, %c25_1371] : memref<8x36xf32, #tpu.memory_space<smem>>
    %c25_1372 = arith.constant 25 : index
    %c0_1373 = arith.constant 0 : index
    %c0_1374 = arith.constant 0 : index
    %1704 = vector.load %arg3[%c25_1372, %c0_1373, %c0_1374] : memref<36x8x256xf32, #tpu.memory_space<vmem>>, vector<1x8x256xf32>
    %1705 = vector.shape_cast %1704 : vector<1x8x256xf32> to vector<8x256xf32>
    %1706 = vector.broadcast %1703 : f32 to vector<8x256xf32>
    %1707 = arith.mulf %1706, %1705 : vector<8x256xf32>
    %1708 = arith.addf %1702, %1707 : vector<8x256xf32>
    %c7_1375 = arith.constant 7 : index
    %c26_1376 = arith.constant 26 : index
    %1709 = memref.load %arg1[%c7_1375, %c26_1376] : memref<8x36xf32, #tpu.memory_space<smem>>
    %c26_1377 = arith.constant 26 : index
    %c0_1378 = arith.constant 0 : index
    %c0_1379 = arith.constant 0 : index
    %1710 = vector.load %arg3[%c26_1377, %c0_1378, %c0_1379] : memref<36x8x256xf32, #tpu.memory_space<vmem>>, vector<1x8x256xf32>
    %1711 = vector.shape_cast %1710 : vector<1x8x256xf32> to vector<8x256xf32>
    %1712 = vector.broadcast %1709 : f32 to vector<8x256xf32>
    %1713 = arith.mulf %1712, %1711 : vector<8x256xf32>
    %1714 = arith.addf %1708, %1713 : vector<8x256xf32>
    %c7_1380 = arith.constant 7 : index
    %c27_1381 = arith.constant 27 : index
    %1715 = memref.load %arg1[%c7_1380, %c27_1381] : memref<8x36xf32, #tpu.memory_space<smem>>
    %c27_1382 = arith.constant 27 : index
    %c0_1383 = arith.constant 0 : index
    %c0_1384 = arith.constant 0 : index
    %1716 = vector.load %arg3[%c27_1382, %c0_1383, %c0_1384] : memref<36x8x256xf32, #tpu.memory_space<vmem>>, vector<1x8x256xf32>
    %1717 = vector.shape_cast %1716 : vector<1x8x256xf32> to vector<8x256xf32>
    %1718 = vector.broadcast %1715 : f32 to vector<8x256xf32>
    %1719 = arith.mulf %1718, %1717 : vector<8x256xf32>
    %1720 = arith.addf %1714, %1719 : vector<8x256xf32>
    %c7_1385 = arith.constant 7 : index
    %c28_1386 = arith.constant 28 : index
    %1721 = memref.load %arg1[%c7_1385, %c28_1386] : memref<8x36xf32, #tpu.memory_space<smem>>
    %c28_1387 = arith.constant 28 : index
    %c0_1388 = arith.constant 0 : index
    %c0_1389 = arith.constant 0 : index
    %1722 = vector.load %arg3[%c28_1387, %c0_1388, %c0_1389] : memref<36x8x256xf32, #tpu.memory_space<vmem>>, vector<1x8x256xf32>
    %1723 = vector.shape_cast %1722 : vector<1x8x256xf32> to vector<8x256xf32>
    %1724 = vector.broadcast %1721 : f32 to vector<8x256xf32>
    %1725 = arith.mulf %1724, %1723 : vector<8x256xf32>
    %1726 = arith.addf %1720, %1725 : vector<8x256xf32>
    %c7_1390 = arith.constant 7 : index
    %c29_1391 = arith.constant 29 : index
    %1727 = memref.load %arg1[%c7_1390, %c29_1391] : memref<8x36xf32, #tpu.memory_space<smem>>
    %c29_1392 = arith.constant 29 : index
    %c0_1393 = arith.constant 0 : index
    %c0_1394 = arith.constant 0 : index
    %1728 = vector.load %arg3[%c29_1392, %c0_1393, %c0_1394] : memref<36x8x256xf32, #tpu.memory_space<vmem>>, vector<1x8x256xf32>
    %1729 = vector.shape_cast %1728 : vector<1x8x256xf32> to vector<8x256xf32>
    %1730 = vector.broadcast %1727 : f32 to vector<8x256xf32>
    %1731 = arith.mulf %1730, %1729 : vector<8x256xf32>
    %1732 = arith.addf %1726, %1731 : vector<8x256xf32>
    %c7_1395 = arith.constant 7 : index
    %c30_1396 = arith.constant 30 : index
    %1733 = memref.load %arg1[%c7_1395, %c30_1396] : memref<8x36xf32, #tpu.memory_space<smem>>
    %c30_1397 = arith.constant 30 : index
    %c0_1398 = arith.constant 0 : index
    %c0_1399 = arith.constant 0 : index
    %1734 = vector.load %arg3[%c30_1397, %c0_1398, %c0_1399] : memref<36x8x256xf32, #tpu.memory_space<vmem>>, vector<1x8x256xf32>
    %1735 = vector.shape_cast %1734 : vector<1x8x256xf32> to vector<8x256xf32>
    %1736 = vector.broadcast %1733 : f32 to vector<8x256xf32>
    %1737 = arith.mulf %1736, %1735 : vector<8x256xf32>
    %1738 = arith.addf %1732, %1737 : vector<8x256xf32>
    %c7_1400 = arith.constant 7 : index
    %c31_1401 = arith.constant 31 : index
    %1739 = memref.load %arg1[%c7_1400, %c31_1401] : memref<8x36xf32, #tpu.memory_space<smem>>
    %c31_1402 = arith.constant 31 : index
    %c0_1403 = arith.constant 0 : index
    %c0_1404 = arith.constant 0 : index
    %1740 = vector.load %arg3[%c31_1402, %c0_1403, %c0_1404] : memref<36x8x256xf32, #tpu.memory_space<vmem>>, vector<1x8x256xf32>
    %1741 = vector.shape_cast %1740 : vector<1x8x256xf32> to vector<8x256xf32>
    %1742 = vector.broadcast %1739 : f32 to vector<8x256xf32>
    %1743 = arith.mulf %1742, %1741 : vector<8x256xf32>
    %1744 = arith.addf %1738, %1743 : vector<8x256xf32>
    %c7_1405 = arith.constant 7 : index
    %c32_1406 = arith.constant 32 : index
    %1745 = memref.load %arg1[%c7_1405, %c32_1406] : memref<8x36xf32, #tpu.memory_space<smem>>
    %c32_1407 = arith.constant 32 : index
    %c0_1408 = arith.constant 0 : index
    %c0_1409 = arith.constant 0 : index
    %1746 = vector.load %arg3[%c32_1407, %c0_1408, %c0_1409] : memref<36x8x256xf32, #tpu.memory_space<vmem>>, vector<1x8x256xf32>
    %1747 = vector.shape_cast %1746 : vector<1x8x256xf32> to vector<8x256xf32>
    %1748 = vector.broadcast %1745 : f32 to vector<8x256xf32>
    %1749 = arith.mulf %1748, %1747 : vector<8x256xf32>
    %1750 = arith.addf %1744, %1749 : vector<8x256xf32>
    %c7_1410 = arith.constant 7 : index
    %c33_1411 = arith.constant 33 : index
    %1751 = memref.load %arg1[%c7_1410, %c33_1411] : memref<8x36xf32, #tpu.memory_space<smem>>
    %c33_1412 = arith.constant 33 : index
    %c0_1413 = arith.constant 0 : index
    %c0_1414 = arith.constant 0 : index
    %1752 = vector.load %arg3[%c33_1412, %c0_1413, %c0_1414] : memref<36x8x256xf32, #tpu.memory_space<vmem>>, vector<1x8x256xf32>
    %1753 = vector.shape_cast %1752 : vector<1x8x256xf32> to vector<8x256xf32>
    %1754 = vector.broadcast %1751 : f32 to vector<8x256xf32>
    %1755 = arith.mulf %1754, %1753 : vector<8x256xf32>
    %1756 = arith.addf %1750, %1755 : vector<8x256xf32>
    %c7_1415 = arith.constant 7 : index
    %c34_1416 = arith.constant 34 : index
    %1757 = memref.load %arg1[%c7_1415, %c34_1416] : memref<8x36xf32, #tpu.memory_space<smem>>
    %c34_1417 = arith.constant 34 : index
    %c0_1418 = arith.constant 0 : index
    %c0_1419 = arith.constant 0 : index
    %1758 = vector.load %arg3[%c34_1417, %c0_1418, %c0_1419] : memref<36x8x256xf32, #tpu.memory_space<vmem>>, vector<1x8x256xf32>
    %1759 = vector.shape_cast %1758 : vector<1x8x256xf32> to vector<8x256xf32>
    %1760 = vector.broadcast %1757 : f32 to vector<8x256xf32>
    %1761 = arith.mulf %1760, %1759 : vector<8x256xf32>
    %1762 = arith.addf %1756, %1761 : vector<8x256xf32>
    %c7_1420 = arith.constant 7 : index
    %c35_1421 = arith.constant 35 : index
    %1763 = memref.load %arg1[%c7_1420, %c35_1421] : memref<8x36xf32, #tpu.memory_space<smem>>
    %c35_1422 = arith.constant 35 : index
    %c0_1423 = arith.constant 0 : index
    %c0_1424 = arith.constant 0 : index
    %1764 = vector.load %arg3[%c35_1422, %c0_1423, %c0_1424] : memref<36x8x256xf32, #tpu.memory_space<vmem>>, vector<1x8x256xf32>
    %1765 = vector.shape_cast %1764 : vector<1x8x256xf32> to vector<8x256xf32>
    %1766 = vector.broadcast %1763 : f32 to vector<8x256xf32>
    %1767 = arith.mulf %1766, %1765 : vector<8x256xf32>
    %1768 = arith.addf %1762, %1767 : vector<8x256xf32>
    %c7_1425 = arith.constant 7 : index
    %1769 = memref.load %arg2[%c7_1425] : memref<8xf32, #tpu.memory_space<smem>>
    %1770 = vector.broadcast %1769 : f32 to vector<8x256xf32>
    %1771 = arith.addf %1768, %1770 : vector<8x256xf32>
    %cst_1426 = arith.constant 0.000000e+00 : f32
    %1772 = vector.broadcast %cst_1426 : f32 to vector<8x256xf32>
    %1773 = arith.maximumf %1771, %1772 : vector<8x256xf32>
    %1774 = arith.truncf %1773 : vector<8x256xf32> to vector<8x256xbf16>
    %c0_1427 = arith.constant 0 : index
    %c1792 = arith.constant 1792 : index
    %1775 = vector.load %arg9[%c0_1427, %c1792] : memref<8x2048xbf16, #tpu.memory_space<vmem>>, vector<8x256xbf16>
    tpu.vector_store %arg9[%c0_1427, %c1792], %1774 {strides = array<i32>} : memref<8x2048xbf16, #tpu.memory_space<vmem>>, vector<8x256xbf16>,
    %c0_1428 = arith.constant 0 : index
    %c0_1429 = arith.constant 0 : index
    %1776 = vector.load %arg9[%c0_1428, %c0_1429] : memref<8x2048xbf16, #tpu.memory_space<vmem>>, vector<8x2048xbf16>
    %c0_1430 = arith.constant 0 : index
    %c0_1431 = arith.constant 0 : index
    %1777 = vector.load %arg4[%c0_1430, %c0_1431] : memref<2048x128xbf16, #tpu.memory_space<vmem>>, vector<2048x128xbf16>
    %cst_1432 = arith.constant dense<0.000000e+00> : vector<8x128xf32>
    %1778 = tpu.matmul %1776, %1777, %cst_1432 {dimension_numbers = #tpu.dot_dimension_numbers<[1], [0], [0], [1], [0, 0, 1, 1], [], []>} : vector<8x2048xbf16>, vector<2048x128xbf16>, vector<8x128xf32> -> vector<8x128xf32>
    %c0_1433 = arith.constant 0 : index
    %c0_1434 = arith.constant 0 : index
    %1779 = vector.load %arg5[%c0_1433, %c0_1434] : memref<1x128xf32, #tpu.memory_space<vmem>>, vector<1x128xf32>
    %1780 = vector.broadcast %1779 : vector<1x128xf32> to vector<8x128xf32>
    %1781 = arith.addf %1778, %1780 : vector<8x128xf32>
    %cst_1435 = arith.constant 0.000000e+00 : f32
    %1782 = vector.broadcast %cst_1435 : f32 to vector<8x128xf32>
    %1783 = arith.maximumf %1781, %1782 : vector<8x128xf32>
    %1784 = arith.truncf %1783 : vector<8x128xf32> to vector<8x128xbf16>
    %c0_1436 = arith.constant 0 : index
    %c0_1437 = arith.constant 0 : index
    %1785 = vector.load %arg6[%c0_1436, %c0_1437] : memref<128x128xbf16, #tpu.memory_space<vmem>>, vector<128x128xbf16>
    %cst_1438 = arith.constant dense<0.000000e+00> : vector<8x128xf32>
    %1786 = tpu.matmul %1784, %1785, %cst_1438 {dimension_numbers = #tpu.dot_dimension_numbers<[1], [0], [0], [1], [0, 0, 1, 1], [], []>} : vector<8x128xbf16>, vector<128x128xbf16>, vector<8x128xf32> -> vector<8x128xf32>
    %c0_1439 = arith.constant 0 : index
    %c0_1440 = arith.constant 0 : index
    %1787 = vector.load %arg7[%c0_1439, %c0_1440] : memref<1x128xf32, #tpu.memory_space<vmem>>, vector<1x128xf32>
    %1788 = vector.broadcast %1787 : vector<1x128xf32> to vector<8x128xf32>
    %1789 = arith.addf %1786, %1788 : vector<8x128xf32>
    %c0_1441 = arith.constant 0 : index
    %c0_1442 = arith.constant 0 : index
    %1790 = vector.load %arg8[%c0_1441, %c0_1442] : memref<8x128xf32, #tpu.memory_space<vmem>>, vector<8x128xf32>
    tpu.vector_store %arg8[%c0_1441, %c0_1442], %1789 {strides = array<i32>} : memref<8x128xf32, #tpu.memory_space<vmem>>, vector<8x128xf32>,
    return
  }
  func.func @transform_0(%arg0: i32) -> (i32, i32) {
    %c0_i32 = arith.constant 0 : i32
    %c0_i32_0 = arith.constant 0 : i32
    %c0_i32_1 = arith.constant 0 : i32
    return %c0_i32, %c0_i32_0 : i32, i32
  }
  func.func @transform_1(%arg0: i32) -> i32 {
    %c0_i32 = arith.constant 0 : i32
    %c0_i32_0 = arith.constant 0 : i32
    return %c0_i32 : i32
  }
  func.func @transform_2(%arg0: i32) -> (i32, i32, i32) {
    %c0_i32 = arith.constant 0 : i32
    %c0_i32_0 = arith.constant 0 : i32
    %c0_i32_1 = arith.constant 0 : i32
    return %c0_i32, %arg0, %c0_i32_0 : i32, i32, i32
  }
  func.func @transform_3(%arg0: i32) -> (i32, i32) {
    %c0_i32 = arith.constant 0 : i32
    %c0_i32_0 = arith.constant 0 : i32
    %c0_i32_1 = arith.constant 0 : i32
    return %c0_i32, %c0_i32_0 : i32, i32
  }
  func.func @transform_4(%arg0: i32) -> (i32, i32) {
    %c0_i32 = arith.constant 0 : i32
    %c0_i32_0 = arith.constant 0 : i32
    %c0_i32_1 = arith.constant 0 : i32
    return %c0_i32, %c0_i32_0 : i32, i32
  }
  func.func @transform_5(%arg0: i32) -> (i32, i32) {
    %c0_i32 = arith.constant 0 : i32
    %c0_i32_0 = arith.constant 0 : i32
    %c0_i32_1 = arith.constant 0 : i32
    return %c0_i32, %c0_i32_0 : i32, i32
  }
  func.func @transform_6(%arg0: i32) -> (i32, i32) {
    %c0_i32 = arith.constant 0 : i32
    %c0_i32_0 = arith.constant 0 : i32
    %c0_i32_1 = arith.constant 0 : i32
    return %c0_i32, %c0_i32_0 : i32, i32
  }
  func.func @transform_7(%arg0: i32) -> (i32, i32) {
    %c0_i32 = arith.constant 0 : i32
    %c0_i32_0 = arith.constant 0 : i32
    return %arg0, %c0_i32 : i32, i32
  }
}

</mosaic_0001>

<bundles_post_ra>
// kernel: squeeze.52
= control target key start
LH: loop header
LB: loop body
LE: loop exit
PB: predicated region body
PF: predicated region fallthrough
CT: control target
= control target key end

     0   :  { %s7_s6 = smov 3  ;;  %s10_s7 = smov 3  ;;  %vm12_vm0 = vcmask 15360   ;;  %vm4_vm1 = vcmask 113664   ;;  %vm16_vm2 = vcmask 97280   ;;  %vm19_vm3 = vcmask 1048560   ;;  %s222_s0 = inlined_call_operand.vmem [shape: f32[2,1,14,14], index: 0, kind: input, shape index: {}]   ;;  %s223_s1 = inlined_call_operand.vmem [shape: f32[1,2,196], index: 1, kind: output, shape index: {}]  }
   0x1   :  { %v120_v0 = vld [vmem:[%s222_s0 + $0x9] ss:$16 sm:%s7_s6]   ;;  %s29_s12 = smov 3  ;;  %s22_s15 = smov 3  ;;  %vm26_vm4 = vcmask 1032064   ;;  %vm33_vm5 = vcmask 917264  }
   0x2   :  { %v121_v1 = vld [vmem:[%s222_s0 + $0x9] ss:$16 sm:%s10_s7]   ;;  %v123_v3 = vld [vmem:[%s222_s0 + $0x7] ss:$16 sm:%s29_s12]   ;;  %s148_s16 = smov 126   ;;  %s149_s17 = smov 98  }
   0x3   :  { %v13_v2 = vsel %vm12_vm0, %v121_v1, %v120_v0  ;;  %31 = vrot.lane.b32.xlu1 %v123_v3, %s149_s17  ;;  %s36_s18 = smov 3  ;;  %v122_v4 = vld [vmem:[%s222_s0 + $0x8] ss:$16 sm:%s22_s15]   ;;  %s43_s23 = smov 3  ;;  %vm40_vm6 = vcmask 802464   ;;  %vm47_vm7 = vcmask 687664  }
   0x4   :  { %14 = vrot.lane.b32.xlu0 %v13_v2, %s148_s16  ;;  %v124_v5 = vld [vmem:[%s222_s0 + $0x6] ss:$16 sm:%s36_s18]   ;;  %s50_s24 = smov 3  ;;  %s150_s25 = smov 112   ;;  %vm54_vm8 = vcmask 572864   ;;  %vm61_vm9 = vcmask 556464  }
   0x5   :  { %s151_s26 = smov 84   ;;  %v125_v6 = vld [vmem:[%s222_s0 + $0x5] ss:$16 sm:%s43_s23]   ;;  %v126_v7 = vld [vmem:[%s222_s0 + $0x4] ss:$16 sm:%s50_s24]   ;;  %s57_s2 = smov 3 }
   0x6   :  { %s65_s3 = smov 3  ;;  %s152_s4 = smov 70   ;;  %v127_v8 = vld [vmem:[%s222_s0 + $0xd] ss:$16 sm:%s57_s2]   ;;  %vm69_vm10 = vcmask 458064   ;;  %vm76_vm11 = vcmask 441664  }
   0x7   :  { %38 = vrot.lane.b32.xlu1 %v124_v5, %s151_s26  ;;  %s153_s5 = smov 56   ;;  %v128_v9 = vld [vmem:[%s222_s0 + $0x3] ss:$16 sm:%s65_s3]   ;;  %s72_s10 = smov 3  ;;  %vm84_vm12 = vcmask 343264   ;;  %vm91_vm13 = vcmask 326864  }
   0x8   :  { %24 = vrot.lane.b32.xlu0 %v122_v4, %s150_s25  ;;  %s80_s11 = smov 3  ;;  %s2_s12 = smov 3  ;;  %v129_v11 = vld [vmem:[%s222_s0 + $0xc] ss:$16 sm:%s72_s10]   ;;  %vm99_vm14 = vcmask 228464   ;;  %vm106_vm15 = vcmask 212064  }
   0x9   :  { %v3_v10 = vld [vmem:[%s222_s0] ss:$16 sm:%s2_s12]   ;;  %s154_s15 = smov 54   ;;  %s155_s16 = smov 42   ;;  %v130_v12 = vld [vmem:[%s222_s0 + $0x2] ss:$16 sm:%s80_s11]  }
   0xa   :  { %5 = vst.msk [vmem:[#allocation0] sm:$0x3] %vm4_vm1, %v3_v10   ;;  %s87_s21 = smov 3  ;;  %s95_s22 = smov 3 }
   0xb   :  { %52 = vrot.lane.b32.xlu1 %v126_v7, %s153_s5  ;;  %s156_s23 = smov 40   ;;  %s157_s24 = smov 28   ;;  %v131_v13 = vld [vmem:[%s222_s0 + $0xb] ss:$16 sm:%s87_s21]  }
   0xc   :  { %45 = vrot.lane.b32.xlu0 %v125_v6, %s152_s4  ;;  %v132_v14 = vld [vmem:[%s222_s0 + $0x1] ss:$16 sm:%s95_s22]   ;;  %s102_s29 = smov 3  ;;  %s158_s30 = smov 26  }
   0xd   :  { %s159_s2 = smov 14   ;;  %v133_v15 = vld [vmem:[%s222_s0 + $0xa] ss:$16 sm:%s102_s29]   ;;  %s160_s0 = smov 12  }
   0xf   :  { %67 = vrot.lane.b32.xlu1 %v128_v9, %s155_s16 }
  0x10   :  { %59 = vrot.lane.b32.xlu0 %v127_v8, %s154_s15 }
  0x13   :  { %82 = vrot.lane.b32.xlu1 %v130_v12, %s157_s24 }
  0x14   :  { %74 = vrot.lane.b32.xlu0 %v129_v11, %s156_s23 }
  0x17   :  { %97 = vrot.lane.b32.xlu1 %v132_v14, %s159_s2 }
  0x18   :  { %89 = vrot.lane.b32.xlu0 %v131_v13, %s158_s30 }
  0x1c   :  { %104 = vrot.lane.b32.xlu0 %v133_v15, %s160_s0 }
  0x75   :  { %v32_v17 = vpop.permute.xlu1 %31  }
  0x76   :  { %v15_v16 = vpop.permute.xlu0 %14  }
  0x77   :  { %18 = vst.msk [vmem:[#allocation0 + $0x8] sm:$0x3] %vm16_vm2, %v15_v16  }
  0x78   :  { %20 = vst.msk [vmem:[#allocation0] sm:$0x3] %vm19_vm3, %v15_v16  }
  0x79   :  { %v39_v19 = vpop.permute.xlu1 %38  }
  0x7a   :  { %v25_v18 = vpop.permute.xlu0 %24  }
  0x7b   :  { %27 = vst.msk [vmem:[#allocation0] sm:$0x3] %vm26_vm4, %v25_v18  }
  0x7c   :  { %34 = vst.msk [vmem:[#allocation0] sm:$0x3] %vm33_vm5, %v32_v17  }
  0x7d   :  { %41 = vst.msk [vmem:[#allocation0] sm:$0x3] %vm40_vm6, %v39_v19   ;;  %v53_v21 = vpop.permute.xlu1 %52  }
  0x7e   :  { %v46_v20 = vpop.permute.xlu0 %45  }
  0x7f   :  { %48 = vst.msk [vmem:[#allocation0] sm:$0x3] %vm47_vm7, %v46_v20  }
  0x80   :  { %55 = vst.msk [vmem:[#allocation0] sm:$0x3] %vm54_vm8, %v53_v21  }
  0x81   :  { %v68_v23 = vpop.permute.xlu1 %67  }
  0x82   :  { %v60_v22 = vpop.permute.xlu0 %59   ;;  %70 = vst.msk [vmem:[#allocation0] sm:$0x3] %vm69_vm10, %v68_v23  }
  0x83   :  { %63 = vst.msk [vmem:[#allocation0 + $0x8] sm:$0x3] %vm61_vm9, %v60_v22  }
  0x85   :  { %v83_v25 = vpop.permute.xlu1 %82  }
  0x86   :  { %v75_v24 = vpop.permute.xlu0 %74   ;;  %85 = vst.msk [vmem:[#allocation0] sm:$0x3] %vm84_vm12, %v83_v25  }
  0x87   :  { %78 = vst.msk [vmem:[#allocation0 + $0x8] sm:$0x3] %vm76_vm11, %v75_v24  }
  0x89   :  { %v98_v27 = vpop.permute.xlu1 %97  }
  0x8a   :  { %v90_v26 = vpop.permute.xlu0 %89   ;;  %100 = vst.msk [vmem:[#allocation0] sm:$0x3] %vm99_vm14, %v98_v27  }
  0x8b   :  { %93 = vst.msk [vmem:[#allocation0 + $0x8] sm:$0x3] %vm91_vm13, %v90_v26  }
  0x8e   :  { %v105_v28 = vpop.permute.xlu0 %104  }
  0x8f   :  { %108 = vst.msk [vmem:[#allocation0 + $0x8] sm:$0x3] %vm106_vm15, %v105_v28  }
  0x91   :  { %v112_v29 = vld [vmem:[#allocation0] sm:$0x3] }
  0x92   :  { %114 = vst [vmem:[%s223_s1] sm:$0x3] %v112_v29 }
  0x96   :  { %v116_v30 = vld [vmem:[#allocation0 + $0x8] sm:$0x3] }
  0x97   :  { %134 = vst [vmem:[%s223_s1 + $0x2] sm:$0x3] %v116_v30 }

// kernel: dqn_forward.1
= control target key start
LH: loop header
LB: loop body
LE: loop exit
PB: predicated region body
PF: predicated region fallthrough
CT: control target
= control target key end

     0   :  { %12 = vsyncpa [#allocation4], 0  ;;  %s9462_s0 = inlined_call_operand.vmem [shape: f32[8,36], index: 0, kind: input, shape index: {}]   ;;  %s9463_s1 = inlined_call_operand.vmem [shape: f32[8], index: 1, kind: input, shape index: {}]   ;;  %s9464_s2 = inlined_call_operand.vmem [shape: f32[36,8,256], index: 2, kind: input, shape index: {}]   ;;  %s9465_s3 = inlined_call_operand.vmem [shape: bf16[2048,128], index: 3, kind: input, shape index: {}]   ;;  %s9466_s4 = inlined_call_operand.vmem [shape: f32[1,128], index: 4, kind: input, shape index: {}]   ;;  %s9467_s5 = inlined_call_operand.vmem [shape: bf16[128,128], index: 5, kind: input, shape index: {}]   ;;  %s9468_s6 = inlined_call_operand.vmem [shape: f32[1,128], index: 6, kind: input, shape index: {}]   ;;  %s9469_s7 = inlined_call_operand.vmem [shape: f32[8,128], index: 7, kind: output, shape index: {}]  }
   0x1   :  { %s20_s26 = sshll.u32 %s9462_s0, 4  ;;  %s21_s26 = int_to_ptr.vmem [resolvable:$true] %s20_s26 }
   0x2   :  { %13 = vsyncpa [#allocation6], 0  ;;  %s30_s29 = sshll.u32 %s9463_s1, 4  ;;  %s5415_s30 = scalar_lea.vmem %s21_s26, 128  ;;  %s31_s29 = int_to_ptr.vmem [resolvable:$true] %s30_s29 }
   0x3   :  { %p5416_p0 = scmp.ne.s32.totalorder %s21_s26, %s5415_s30  ;;  %p5420_p1 = scmp.lt.s32.totalorder %s21_s26, %s21_s26 }
   0x4   :  { %p5421_p2 = scmp.lt.s32.totalorder %s5415_s30, %s5415_s30 }
   0x6   :  { %p5422_p3 = por %p5421_p2, %p5420_p1 }
   0x8   :  { %p5423_p4 = pnand %p5422_p3, %p5416_p0 }
   0xa   :  { %5426 = shalt.err (!%p5423_p4)
}
   0xb   :  { %s5443_s8 = smov [#allocation3]   ;;  %s5427_s9 = scalar_lea.vmem %s31_s29, 16 }
   0xc   :  { %23 = dma.vmem_to_smem %s21_s26, 128, %s5443_s8, [#allocation4]  }
   0xd   :  { %p5428_p5 = scmp.ne.s32.totalorder %s31_s29, %s5427_s9  ;;  %p5432_p6 = scmp.lt.s32.totalorder %s31_s29, %s31_s29 }
   0xe   :  { %p5433_p7 = scmp.lt.s32.totalorder %s5427_s9, %s5427_s9 }
  0x10   :  { %p5434_p8 = por %p5433_p7, %p5432_p6 }
  0x12   :  { %p5435_p9 = pnand %p5434_p8, %p5428_p5 }
  0x14   :  { %5438 = shalt.err (!%p5435_p9)
}
  0x15   :  { %s5444_s0 = smov [#allocation5]  }
  0x16   :  { %33 = dma.vmem_to_smem %s31_s29, 16, %s5444_s0, [#allocation6]  }
  0x17   :  { %5439 = dma.done.wait [#allocation4], 128  }
  0x18   :  { %5440 = vsyncadd [#allocation4], 4294967168 }
  0x19   :  { %5441 = dma.done.wait [#allocation6], 16  }
  0x1a   :  { %5442 = vsyncadd [#allocation6], 4294967280 }
  0x1b   :  { %50 = sfence }
  0x1c   :  { %v5279_v0 = vld [vmem:[%s9465_s3 + $0x40] sm:$0xff]   ;;  %v5283_v4 = vld [vmem:[%s9465_s3 + $0x48] sm:$0xff]   ;;  %v5287_v8 = vld [vmem:[%s9465_s3 + $0x50] sm:$0xff]   ;;  %s52_s23 = sld [smem:[#allocation3]]  ;;  %s4030_s24 = sld [smem:[#allocation3 + $0x1]]  ;;  %vm5446_vm0 = vmmov 0  }
  0x1d   :  { %v5280_v1 = vld [vmem:[%s9465_s3 + $0xc0] sm:$0xff]   ;;  %5070 = vmatprep.subr.bf16.mxu0 %v5279_v0  ;;  %v5284_v5 = vld [vmem:[%s9465_s3 + $0xc8] sm:$0xff]   ;;  %v5288_v9 = vld [vmem:[%s9465_s3 + $0xd0] sm:$0xff]   ;;  %s4033_s25 = sld [smem:[#allocation3 + $0x2]]  ;;  %s5589_s26 = sld [smem:[#allocation3 + $0x3]] }
  0x1e   :  { %v5281_v2 = vld [vmem:[%s9465_s3] sm:$0xff]   ;;  %5092 = vmatprep.subr.bf16.mxu1 %v5280_v1  ;;  %v5285_v6 = vld [vmem:[%s9465_s3 + $0x8] sm:$0xff]   ;;  %v5289_v10 = vld [vmem:[%s9465_s3 + $0x10] sm:$0xff]   ;;  %s5596_s29 = sld [smem:[#allocation3 + $0x4]]  ;;  %s5598_s30 = sld [smem:[#allocation3 + $0x5]] }
  0x1f   :  { %v5282_v3 = vld [vmem:[%s9465_s3 + $0x80] sm:$0xff]   ;;  %5071 = vmatpush3.bf16.msra.mxu0 %v5281_v2  ;;  %v5286_v7 = vld [vmem:[%s9465_s3 + $0x88] sm:$0xff]   ;;  %v5290_v11 = vld [vmem:[%s9465_s3 + $0x90] sm:$0xff]   ;;  %s5615_s12 = sld [smem:[#allocation3 + $0x6]]  ;;  %s5617_s13 = sld [smem:[#allocation3 + $0x7]] }
  0x20   :  { %5093 = vmatpush3.bf16.msra.mxu1 %v5282_v3  ;;  %5072 = vmatprep.subr.bf16.mxu0 %v5283_v4  ;;  %v5291_v12 = vld [vmem:[%s9465_s3 + $0x58] sm:$0xff]   ;;  %v5295_v16 = vld [vmem:[%s9465_s3 + $0x60] sm:$0xff]   ;;  %v5299_v20 = vld [vmem:[%s9465_s3 + $0x68] sm:$0xff]   ;;  %s5643_s22 = sld [smem:[#allocation3 + $0x8]]  ;;  %s5690_s16 = sld [smem:[#allocation3 + $0xc]] }
  0x21   :  { %5094 = vmatprep.subr.bf16.mxu1 %v5284_v5  ;;  %v5292_v13 = vld [vmem:[%s9465_s3 + $0xd8] sm:$0xff]   ;;  %v5296_v17 = vld [vmem:[%s9465_s3 + $0xe0] sm:$0xff]   ;;  %v5300_v21 = vld [vmem:[%s9465_s3 + $0xe8] sm:$0xff]   ;;  %s5708_s21 = sld [smem:[#allocation3 + $0xe]]  ;;  %s5731_s0 = sld [smem:[#allocation3 + $0x10]] }
  0x22   :  { %v5293_v14 = vld [vmem:[%s9465_s3 + $0x18] sm:$0xff]   ;;  %v5297_v18 = vld [vmem:[%s9465_s3 + $0x20] sm:$0xff]   ;;  %v5301_v22 = vld [vmem:[%s9465_s3 + $0x28] sm:$0xff]   ;;  %v55_v36 = vstv %s52_s23  ;;  %s5645_s23 = sld [smem:[#allocation3 + $0x9]]  ;;  %s5759_s18 = sld [smem:[#allocation3 + $0x12]] }
  0x23   :  { %5073 = vmatpush3.bf16.msra.mxu0 %v5285_v6  ;;  %v5294_v15 = vld [vmem:[%s9465_s3 + $0x98] sm:$0xff]   ;;  %v5298_v19 = vld [vmem:[%s9465_s3 + $0xa0] sm:$0xff]   ;;  %v5302_v23 = vld [vmem:[%s9465_s3 + $0xa8] sm:$0xff]   ;;  %v62_v37 = vstv %s4030_s24  ;;  %s5710_s24 = sld [smem:[#allocation3 + $0xf]]  ;;  %s5733_s1 = sld [smem:[#allocation3 + $0x11]] }
  0x24   :  { %5095 = vmatpush3.bf16.msra.mxu1 %v5286_v7  ;;  %5074 = vmatprep.subr.bf16.mxu0 %v5287_v8  ;;  %v5303_v24 = vld [vmem:[%s9465_s3 + $0x70] sm:$0xff]   ;;  %v5307_v28 = vld [vmem:[%s9465_s3 + $0x78] sm:$0xff]   ;;  %v5594_v32 = vld [vmem:[%s9464_s2] sm:$0xff]  ;;  %v71_v46 = vstv %s4033_s25  ;;  %s5665_s25 = sld [smem:[#allocation3 + $0xa]]  ;;  %s5761_s19 = sld [smem:[#allocation3 + $0x13]] }
  0x25   :  { %5096 = vmatprep.subr.bf16.mxu1 %v5288_v9  ;;  %v5304_v25 = vld [vmem:[%s9465_s3 + $0xf0] sm:$0xff]   ;;  %v5308_v29 = vld [vmem:[%s9465_s3 + $0xf8] sm:$0xff]   ;;  %v5603_v33 = vld [vmem:[%s9464_s2 + $0x8] sm:$0xff]  ;;  %v56_v40 = vmul.f32 %v55_v36, %v5594_v32  ;;  %v80_v47 = vstv %s5589_s26  ;;  %s5667_s26 = sld [smem:[#allocation3 + $0xb]]  ;;  %s5788_s9 = sld [smem:[#allocation3 + $0x14]] }
  0x26   :  { %v5305_v26 = vld [vmem:[%s9465_s3 + $0x30] sm:$0xff]   ;;  %v5309_v30 = vld [vmem:[%s9465_s3 + $0x38] sm:$0xff]   ;;  %v5622_v38 = vld [vmem:[%s9464_s2 + $0x20] sm:$0xff]  ;;  %v57_v41 = vmul.f32 %v55_v36, %v5603_v33  ;;  %v89_v57 = vstv %s5596_s29  ;;  %s5790_s10 = sld [smem:[#allocation3 + $0x15]]  ;;  %s5818_s17 = sld [smem:[#allocation3 + $0x16]] }
  0x27   :  { %5075 = vmatpush3.bf16.msra.mxu0 %v5289_v10  ;;  %v5306_v27 = vld [vmem:[%s9465_s3 + $0xb0] sm:$0xff]   ;;  %v5310_v31 = vld [vmem:[%s9465_s3 + $0xb8] sm:$0xff]   ;;  %v5627_v39 = vld [vmem:[%s9464_s2 + $0x28] sm:$0xff]  ;;  %v72_v52 = vmul.f32 %v5622_v38, %v71_v46  ;;  %v98_v59 = vstv %s5598_s30  ;;  %s5692_s30 = sld [smem:[#allocation3 + $0xd]]  ;;  %s5820_s20 = sld [smem:[#allocation3 + $0x17]] }
  0x28   :  { %5097 = vmatpush3.bf16.msra.mxu1 %v5290_v11  ;;  %5076 = vmatprep.subr.bf16.mxu0 %v5291_v12  ;;  %v5608_v34 = vld [vmem:[%s9464_s2 + $0x10] sm:$0xff]  ;;  %v5613_v35 = vld [vmem:[%s9464_s2 + $0x18] sm:$0xff]  ;;  %v5651_v48 = vld [vmem:[%s9464_s2 + $0x40] sm:$0xff]  ;;  %v73_v53 = vmul.f32 %v5627_v39, %v71_v46  ;;  %v107_v3 = vstv %s5615_s12  ;;  %s5897_s12 = sld [smem:[#allocation3 + $0x1a]]  ;;  %s5986_s28 = sld [smem:[#allocation3 + $0x1e]] }
  0x29   :  { %5098 = vmatprep.subr.bf16.mxu1 %v5292_v13  ;;  %v63_v42 = vmul.f32 %v5608_v34, %v62_v37  ;;  %v64_v43 = vmul.f32 %v5613_v35, %v62_v37  ;;  %v5636_v44 = vld [vmem:[%s9464_s2 + $0x30] sm:$0xff]  ;;  %v5641_v45 = vld [vmem:[%s9464_s2 + $0x38] sm:$0xff]  ;;  %v5656_v49 = vld [vmem:[%s9464_s2 + $0x48] sm:$0xff]  ;;  %v90_v62 = vmul.f32 %v5651_v48, %v89_v57  ;;  %v116_v9 = vstv %s5617_s13  ;;  %s5854_s13 = sld [smem:[#allocation3 + $0x18]]  ;;  %s6023_s14 = sld [smem:[#allocation3 + $0x21]] }
  0x2a   :  { %v5663_v54 = vld [vmem:[%s9464_s2 + $0x50] sm:$0xff]  ;;  %v81_v55 = vmul.f32 %v5636_v44, %v80_v47  ;;  %v82_v56 = vmul.f32 %v5641_v45, %v80_v47  ;;  %v5675_v58 = vld [vmem:[%s9464_s2 + $0x58] sm:$0xff]  ;;  %v91_v63 = vmul.f32 %v5656_v49, %v89_v57  ;;  %v5683_v0 = vld [vmem:[%s9464_s2 + $0x60] sm:$0xff]  ;;  %s6086_s8 = sld [smem:[#allocation3 + $0x80]]  ;;  %s6111_s15 = sld [smem:[#allocation3 + $0x82]] }
  0x2b   :  { %5077 = vmatpush3.bf16.msra.mxu0 %v5293_v14  ;;  %v65_v50 = vadd.f32 %v63_v42, %v56_v40  ;;  %v66_v51 = vadd.f32 %v64_v43, %v57_v41  ;;  %v5688_v1 = vld [vmem:[%s9464_s2 + $0x68] sm:$0xff]  ;;  %v99_v2 = vmul.f32 %v5663_v54, %v98_v59  ;;  %v100_v6 = vmul.f32 %v5675_v58, %v98_v59  ;;  %v5700_v7 = vld [vmem:[%s9464_s2 + $0x70] sm:$0xff]  ;;  %v5705_v8 = vld [vmem:[%s9464_s2 + $0x78] sm:$0xff]  ;;  %s6125_s29 = sld [smem:[#allocation3 + $0x84]]  ;;  %s6212_s11 = sld [smem:[#allocation3 + $0x23]] }
  0x2c   :  { %5099 = vmatpush3.bf16.msra.mxu1 %v5294_v15  ;;  %5078 = vmatprep.subr.bf16.mxu0 %v5295_v16  ;;  %v108_v10 = vmul.f32 %v5683_v0, %v107_v3  ;;  %v109_v11 = vmul.f32 %v5688_v1, %v107_v3  ;;  %v5717_v12 = vld [vmem:[%s9464_s2 + $0x80] sm:$0xff]  ;;  %v5722_v15 = vld [vmem:[%s9464_s2 + $0x88] sm:$0xff]  ;;  %v125_v16 = vstv %s5643_s22  ;;  %v5769_v36 = vld [vmem:[%s9464_s2 + $0xb8] sm:$0xff]  ;;  %s5940_s22 = sld [smem:[#allocation3 + $0x1c]] }
  0x2d   :  { %5100 = vmatprep.subr.bf16.mxu1 %v5296_v17  ;;  %v74_v60 = vadd.f32 %v72_v52, %v65_v50  ;;  %v75_v61 = vadd.f32 %v73_v53, %v66_v51  ;;  %v5728_v17 = vld [vmem:[%s9464_s2 + $0x90] sm:$0xff]  ;;  %9635 = vst [vmem:[#allocation12_spill] sm:$0xff] %v5769_v36  ;;  %v5774_v37 = vld [vmem:[%s9464_s2 + $0xc0] sm:$0xff]  ;;  %v5779_v42 = vld [vmem:[%s9464_s2 + $0xc8] sm:$0xff]  ;;  %v161_v43 = vstv %s5690_s16  ;;  %s5856_s16 = sld [smem:[#allocation3 + $0x19]]  ;;  %s6863_s27 = sld [smem:[#allocation3 + $0x11c]] }
  0x2e   :  { %9636 = vst [vmem:[#allocation13_spill] sm:$0xff] %v5774_v37  ;;  %9637 = vst [vmem:[#allocation14_spill] sm:$0xff] %v5779_v42  ;;  %v5785_v46 = vld [vmem:[%s9464_s2 + $0xd0] sm:$0xff]  ;;  %v170_v47 = vstv %s5692_s30  ;;  %v5824_v3 = vmul.f32 %v5774_v37, %v161_v43  ;;  %v6010_v37 = vld [vmem:[%s9464_s2 + $0x198] sm:$0xff]  ;;  %s6109_s30 = sld [smem:[#allocation3 + $0x81]] }
  0x2f   :  { %5079 = vmatpush3.bf16.msra.mxu0 %v5297_v18  ;;  %v83_v4 = vadd.f32 %v81_v55, %v74_v60  ;;  %v84_v5 = vadd.f32 %v82_v56, %v75_v61  ;;  %v134_v18 = vstv %s5645_s23  ;;  %9638 = vst [vmem:[#allocation15_spill] sm:$0xff] %v5785_v46  ;;  %v5799_v55 = vld [vmem:[%s9464_s2 + $0xd8] sm:$0xff]  ;;  %v5804_v56 = vld [vmem:[%s9464_s2 + $0xe0] sm:$0xff]  ;;  %v5809_v60 = vld [vmem:[%s9464_s2 + $0xe8] sm:$0xff]  ;;  %s5964_s23 = sld [smem:[#allocation3 + $0x1d]] }
  0x30   :  { %5101 = vmatpush3.bf16.msra.mxu1 %v5298_v19  ;;  %5080 = vmatprep.subr.bf16.mxu0 %v5299_v20  ;;  %v117_v19 = vmul.f32 %v5700_v7, %v116_v9  ;;  %v118_v20 = vmul.f32 %v5705_v8, %v116_v9  ;;  %9639 = vst [vmem:[#allocation16_spill] sm:$0xff] %v5799_v55  ;;  %9640 = vst [vmem:[#allocation17_spill] sm:$0xff] %v5804_v56  ;;  %v179_v61 = vstv %s5708_s21  ;;  %v5840_v9 = vld [vmem:[%s9464_s2 + $0x100] sm:$0xff]  ;;  %s6265_s21 = sld [smem:[#allocation5]] }
  0x31   :  { %5102 = vmatprep.subr.bf16.mxu1 %v5300_v21  ;;  %v92_v13 = vadd.f32 %v90_v62, %v83_v4  ;;  %v93_v14 = vadd.f32 %v91_v63, %v84_v5  ;;  %v5740_v21 = vld [vmem:[%s9464_s2 + $0x98] sm:$0xff]  ;;  %9641 = vst [vmem:[#allocation18_spill] sm:$0xff] %v5809_v60  ;;  %v5815_v62 = vld [vmem:[%s9464_s2 + $0xf0] sm:$0xff]  ;;  %v188_v63 = vstv %s5710_s24  ;;  %v5827_v4 = vmul.f32 %v5779_v42, %v161_v43  ;;  %s5899_s24 = sld [smem:[#allocation3 + $0x1b]] }
  0x32   :  { %v136_v50 = vmul.f32 %v5740_v21, %v134_v18  ;;  %9642 = vst [vmem:[#allocation19_spill] sm:$0xff] %v5815_v62  ;;  %v5830_v5 = vmul.f32 %v5785_v46, %v170_v47  ;;  %9644 = vst [vmem:[#allocation21_spill] sm:$0xff] %v5840_v9  ;;  %v5889_v43 = vld [vmem:[%s9464_s2 + $0x130] sm:$0xff]  ;;  %v5984_v46 = vld [vmem:[%s9464_s2 + $0x188] sm:$0xff] }
  0x33   :  { %5081 = vmatpush3.bf16.msra.mxu0 %v5301_v22  ;;  %v5745_v22 = vld [vmem:[%s9464_s2 + $0xa0] sm:$0xff]  ;;  %9650 = vst [vmem:[#allocation27_spill] sm:$0xff] %v5889_v43  ;;  %9661 = vst [vmem:[#allocation38_spill] sm:$0xff] %v5984_v46  ;;  %v6005_v42 = vld [vmem:[%s9464_s2 + $0x190] sm:$0xff] }
  0x34   :  { %5103 = vmatpush3.bf16.msra.mxu1 %v5302_v23  ;;  %5082 = vmatprep.subr.bf16.mxu0 %v5303_v24  ;;  %9632 = vst [vmem:[#allocation9_spill] sm:$0xff] %v5745_v22  ;;  %v101_v23 = vadd.f32 %v99_v2, %v92_v13  ;;  %v102_v24 = vadd.f32 %v100_v6, %v93_v14  ;;  %v5835_v6 = vld [vmem:[%s9464_s2 + $0xf8] sm:$0xff]  ;;  %v5845_v13 = vld [vmem:[%s9464_s2 + $0x108] sm:$0xff]  ;;  %v197_v14 = vstv %s5731_s0  ;;  %9662 = vst [vmem:[#allocation39_spill] sm:$0xff] %v6005_v42  ;;  %s6191_s0 = sld [smem:[#allocation3 + $0x86]] }
  0x35   :  { %5104 = vmatprep.subr.bf16.mxu1 %v5304_v25  ;;  %v5750_v25 = vld [vmem:[%s9464_s2 + $0xa8] sm:$0xff]  ;;  %9643 = vst [vmem:[#allocation20_spill] sm:$0xff] %v5835_v6  ;;  %9645 = vst [vmem:[#allocation22_spill] sm:$0xff] %v5845_v13 }
  0x36   :  { %9633 = vst [vmem:[#allocation10_spill] sm:$0xff] %v5750_v25  ;;  %v110_v40 = vadd.f32 %v108_v10, %v101_v23  ;;  %v111_v41 = vadd.f32 %v109_v11, %v102_v24  ;;  %v5865_v23 = vmul.f32 %v5809_v60, %v179_v61  ;;  %v5868_v24 = vmul.f32 %v5815_v62, %v188_v63  ;;  %v5938_v62 = vld [vmem:[%s9464_s2 + $0x160] sm:$0xff] }
  0x37   :  { %5083 = vmatpush3.bf16.msra.mxu0 %v5305_v26  ;;  %v143_v26 = vstv %s5665_s25  ;;  %9656 = vst [vmem:[#allocation33_spill] sm:$0xff] %v5938_v62  ;;  %9663 = vst [vmem:[#allocation40_spill] sm:$0xff] %v6010_v37  ;;  %s6283_s25 = sld [smem:[#allocation3 + $0x8e]] }
  0x38   :  { %5105 = vmatpush3.bf16.msra.mxu1 %v5306_v27  ;;  %5084 = vmatprep.subr.bf16.mxu0 %v5307_v28  ;;  %v5756_v27 = vld [vmem:[%s9464_s2 + $0xb0] sm:$0xff]  ;;  %v152_v28 = vstv %s5667_s26  ;;  %v144_v51 = vmul.f32 %v5745_v22, %v143_v26  ;;  %v145_v52 = vmul.f32 %v5750_v25, %v143_v26  ;;  %v119_v57 = vadd.f32 %v117_v19, %v110_v40  ;;  %v5873_v26 = vld [vmem:[%s9464_s2 + $0x118] sm:$0xff]  ;;  %v6102_v25 = vld [vmem:[%s9464_s2 + $0x1e0] sm:$0xff]  ;;  %s6317_s26 = sld [smem:[#allocation3 + $0x91]] }
  0x39   :  { %5106 = vmatprep.subr.bf16.mxu1 %v5308_v29  ;;  %9634 = vst [vmem:[#allocation11_spill] sm:$0xff] %v5756_v27  ;;  %v126_v29 = vmul.f32 %v5717_v12, %v125_v16  ;;  %v153_v53 = vmul.f32 %v5756_v27, %v152_v28  ;;  %v120_v59 = vadd.f32 %v118_v20, %v111_v41  ;;  %9647 = vst [vmem:[#allocation24_spill] sm:$0xff] %v5873_v26  ;;  %v6079_v27 = vld [vmem:[%s9464_s2 + $0x1c8] sm:$0xff] }
  0x3a   :  { %v154_v2 = vmul.f32 %v5769_v36, %v152_v28  ;;  %v5859_v19 = vmul.f32 %v5799_v55, %v170_v47  ;;  %v5862_v20 = vmul.f32 %v5804_v56, %v179_v61  ;;  %v5878_v28 = vld [vmem:[%s9464_s2 + $0x120] sm:$0xff]  ;;  %v215_v41 = vstv %s5759_s18  ;;  %v5894_v47 = vld [vmem:[%s9464_s2 + $0x138] sm:$0xff]  ;;  %v5962_v56 = vld [vmem:[%s9464_s2 + $0x170] sm:$0xff]  ;;  %9669 = vst [vmem:[#allocation46_spill] sm:$0xff] %v6079_v27  ;;  %s6271_s18 = sld [smem:[#allocation3 + $0x8c]] }
  0x3b   :  { %5085 = vmatpush3.bf16.msra.mxu0 %v5309_v30  ;;  %v127_v30 = vmul.f32 %v5722_v15, %v125_v16  ;;  %v128_v10 = vadd.f32 %v126_v29, %v119_v57  ;;  %v5851_v16 = vld [vmem:[%s9464_s2 + $0x110] sm:$0xff]  ;;  %9648 = vst [vmem:[#allocation25_spill] sm:$0xff] %v5878_v28  ;;  %v5883_v29 = vld [vmem:[%s9464_s2 + $0x128] sm:$0xff]  ;;  %9651 = vst [vmem:[#allocation28_spill] sm:$0xff] %v5894_v47  ;;  %v224_v57 = vstv %s5761_s19  ;;  %s6449_s19 = sld [smem:[#allocation3 + $0x103]] }
  0x3c   :  { %5107 = vmatpush3.bf16.msra.mxu1 %v5310_v31  ;;  %v135_v31 = vmul.f32 %v5728_v17, %v134_v18  ;;  %9646 = vst [vmem:[#allocation23_spill] sm:$0xff] %v5851_v16  ;;  %v206_v18 = vstv %s5733_s1  ;;  %9649 = vst [vmem:[#allocation26_spill] sm:$0xff] %v5883_v29  ;;  %v5979_v55 = vld [vmem:[%s9464_s2 + $0x180] sm:$0xff]  ;;  %s6012_s1 = sld [smem:[#allocation3 + $0x20]] }
  0x3d   :  { %v129_v11 = vadd.f32 %v127_v30, %v120_v59  ;;  %v5908_v59 = vmul.f32 %v5845_v13, %v197_v14  ;;  %v5911_v61 = vmul.f32 %v5851_v16, %v206_v18  ;;  %v233_v16 = vstv %s5788_s9  ;;  %9658 = vst [vmem:[#allocation35_spill] sm:$0xff] %v5962_v56  ;;  %9660 = vst [vmem:[#allocation37_spill] sm:$0xff] %v5979_v55  ;;  %s6223_s9 = sld [smem:[#allocation3 + $0x87]] }
  0x3e   :  { %v137_v30 = vadd.f32 %v135_v31, %v128_v10  ;;  %v5902_v31 = vmul.f32 %v5835_v6, %v188_v63  ;;  %v5916_v10 = vld [vmem:[%s9464_s2 + $0x140] sm:$0xff]  ;;  %v5926_v63 = vld [vmem:[%s9464_s2 + $0x150] sm:$0xff]  ;;  %v242_v6 = vstv %s5790_s10  ;;  %v5943_v60 = vmul.f32 %v5873_v26, %v206_v18  ;;  %9671 = vst [vmem:[#allocation48_spill] sm:$0xff] %v6102_v25  ;;  %s6225_s10 = sld [smem:[#allocation3 + $0x88]] }
  0x3f   :  { %v138_v40 = vadd.f32 %v136_v50, %v129_v11  ;;  %v5905_v50 = vmul.f32 %v5840_v9, %v197_v14  ;;  %9652 = vst [vmem:[#allocation29_spill] sm:$0xff] %v5916_v10  ;;  %v5921_v11 = vld [vmem:[%s9464_s2 + $0x148] sm:$0xff]  ;;  %9654 = vst [vmem:[#allocation31_spill] sm:$0xff] %v5926_v63  ;;  %v5932_v9 = vld [vmem:[%s9464_s2 + $0x158] sm:$0xff]  ;;  %v260_v26 = vstv %s5820_s20  ;;  %s6325_s20 = sld [smem:[#allocation3 + $0x92]] }
  0x40   :  { %9653 = vst [vmem:[#allocation30_spill] sm:$0xff] %v5921_v11  ;;  %v146_v14 = vadd.f32 %v144_v51, %v137_v30  ;;  %9655 = vst [vmem:[#allocation32_spill] sm:$0xff] %v5932_v9  ;;  %v5946_v51 = vmul.f32 %v5878_v28, %v215_v41  ;;  %v5952_v30 = vmul.f32 %v5889_v43, %v224_v57  ;;  %v5311_v18 = vld [vmem:[%s9465_s3 + $0x140] sm:$0xff]   ;;  %v251_v43 = vstv %s5818_s17  ;;  %v5973_v28 = vld [vmem:[%s9464_s2 + $0x178] sm:$0xff]  ;;  %s5988_s17 = sld [smem:[#allocation3 + $0x1f]] }
  0x41   :  { %v147_v13 = vadd.f32 %v145_v52, %v138_v40  ;;  %v5949_v52 = vmul.f32 %v5883_v29, %v215_v41  ;;  %v5957_v40 = vld [vmem:[%s9464_s2 + $0x168] sm:$0xff]  ;;  %9659 = vst [vmem:[#allocation36_spill] sm:$0xff] %v5973_v28  ;;  %5114 = vmatprep.subr.bf16.mxu0 %v5311_v18  ;;  %v6029_v36 = vmul.f32 %v5938_v62, %v251_v43  ;;  %v6045_v18 = vld [vmem:[%s9464_s2 + $0x1b0] sm:$0xff]  ;;  %v6059_v62 = vld [vmem:[%s9464_s2 + $0x1c0] sm:$0xff] }
  0x42   :  { %9657 = vst [vmem:[#allocation34_spill] sm:$0xff] %v5957_v40  ;;  %v155_v41 = vadd.f32 %v153_v53, %v146_v14  ;;  %v5991_v53 = vmul.f32 %v5894_v47, %v224_v57  ;;  %v6000_v14 = vmul.f32 %v5926_v63, %v242_v6  ;;  %v269_v63 = vstv %s5854_s13  ;;  %9666 = vst [vmem:[#allocation43_spill] sm:$0xff] %v6045_v18  ;;  %s6243_s13 = sld [smem:[#allocation3 + $0x8a]] }
  0x43   :  { %v156_v29 = vadd.f32 %v154_v2, %v147_v13  ;;  %v5994_v2 = vmul.f32 %v5916_v10, %v233_v16  ;;  %v5997_v13 = vmul.f32 %v5921_v11, %v233_v16  ;;  %v278_v11 = vstv %s5856_s16  ;;  %v6021_v10 = vld [vmem:[%s9464_s2 + $0x1a0] sm:$0xff]  ;;  %9668 = vst [vmem:[#allocation45_spill] sm:$0xff] %v6059_v62  ;;  %s6251_s16 = sld [smem:[#allocation3 + $0x8b]] }
  0x44   :  { %v164_v16 = vadd.f32 %v5824_v3, %v155_v41  ;;  %9664 = vst [vmem:[#allocation41_spill] sm:$0xff] %v6021_v10  ;;  %v6026_v47 = vmul.f32 %v5932_v9, %v242_v6  ;;  %v6032_v3 = vmul.f32 %v5957_v40, %v251_v43  ;;  %v287_v43 = vstv %s5897_s12  ;;  %v5312_v9 = vld [vmem:[%s9465_s3 + $0x1c0] sm:$0xff]   ;;  %s6480_s12 = sld [smem:[#allocation3 + $0x104]] }
  0x45   :  { %v165_v57 = vadd.f32 %v5827_v4, %v156_v29  ;;  %v6035_v4 = vmul.f32 %v5962_v56, %v260_v26  ;;  %v6040_v29 = vld [vmem:[%s9464_s2 + $0x1a8] sm:$0xff]  ;;  %v6053_v56 = vld [vmem:[%s9464_s2 + $0x1b8] sm:$0xff]  ;;  %v296_v40 = vstv %s5899_s24  ;;  %5136 = vmatprep.subr.bf16.mxu1 %v5312_v9  ;;  %v323_v9 = vstv %s5986_s28  ;;  %s6313_s24 = sld [smem:[#allocation3 + $0x90]]  ;;  %s6447_s28 = sld [smem:[#allocation3 + $0x102]] }
  0x46   :  { %9665 = vst [vmem:[#allocation42_spill] sm:$0xff] %v6040_v29  ;;  %v173_v6 = vadd.f32 %v5830_v5, %v164_v16  ;;  %9667 = vst [vmem:[#allocation44_spill] sm:$0xff] %v6053_v56  ;;  %v6065_v5 = vmul.f32 %v5973_v28, %v260_v26  ;;  %v6071_v16 = vmul.f32 %v5984_v46, %v269_v63  ;;  %v6084_v26 = vld [vmem:[%s9464_s2 + $0x1d0] sm:$0xff]  ;;  %v305_v46 = vstv %s5940_s22  ;;  %v6097_v28 = vld [vmem:[%s9464_s2 + $0x1d8] sm:$0xff]  ;;  %s6123_s22 = sld [smem:[#allocation3 + $0x83]] }
  0x47   :  { %v174_v41 = vadd.f32 %v5859_v19, %v165_v57  ;;  %v6068_v19 = vmul.f32 %v5979_v55, %v269_v63  ;;  %v6074_v57 = vmul.f32 %v6005_v42, %v278_v11  ;;  %v6091_v42 = vmul.f32 %v6010_v37, %v278_v11  ;;  %9670 = vst [vmem:[#allocation47_spill] sm:$0xff] %v6097_v28 }
  0x48   :  { %v182_v55 = vadd.f32 %v5862_v20, %v173_v6  ;;  %v6107_v20 = vld [vmem:[%s9464_s2 + $0x1e8] sm:$0xff]  ;;  %v6117_v11 = vmul.f32 %v6040_v29, %v287_v43  ;;  %v6120_v6 = vmul.f32 %v6045_v18, %v296_v40  ;;  %v332_v29 = vstv %s5988_s17  ;;  %s6298_s17 = sld [smem:[#allocation3 + $0x8f]] }
  0x49   :  { %v183_v63 = vadd.f32 %v5865_v23, %v174_v41  ;;  %9672 = vst [vmem:[#allocation49_spill] sm:$0xff] %v6107_v20  ;;  %v6114_v23 = vmul.f32 %v6021_v10, %v287_v43  ;;  %v314_v41 = vstv %s5964_s23  ;;  %v6133_v43 = vld [vmem:[%s9464_s2 + $0x1f0] sm:$0xff]  ;;  %v6137_v18 = vmul.f32 %v6053_v56, %v296_v40  ;;  %v6174_v56 = vld [vmem:[%s9464_s2 + $0x218] sm:$0xff]  ;;  %s6275_s23 = sld [smem:[#allocation3 + $0x8d]] }
  0x4a   :  { %9673 = vst [vmem:[#allocation50_spill] sm:$0xff] %v6120_v6  ;;  %v191_v37 = vadd.f32 %v5868_v24, %v182_v55  ;;  %9674 = vst [vmem:[#allocation51_spill] sm:$0xff] %v6133_v43  ;;  %v6140_v10 = vmul.f32 %v6059_v62, %v305_v46  ;;  %v6143_v6 = vmul.f32 %v6079_v27, %v305_v46  ;;  %v6148_v55 = vld [vmem:[%s9464_s2 + $0x1f8] sm:$0xff]  ;;  %v6153_v24 = vld [vmem:[%s9464_s2 + $0x200] sm:$0xff]  ;;  %v341_v40 = vstv %s6012_s1  ;;  %s6189_s1 = sld [smem:[#allocation3 + $0x85]] }
  0x4b   :  { %v192_v22 = vadd.f32 %v5902_v31, %v183_v63  ;;  %9677 = vst [vmem:[#allocation54_spill] sm:$0xff] %v6153_v24  ;;  %v6158_v31 = vld [vmem:[%s9464_s2 + $0x208] sm:$0xff]  ;;  %v6164_v27 = vmul.f32 %v6084_v26, %v314_v41  ;;  %v6169_v62 = vld [vmem:[%s9464_s2 + $0x210] sm:$0xff] }
  0x4c   :  { %9675 = vst [vmem:[#allocation52_spill] sm:$0xff] %v6140_v10  ;;  %9676 = vst [vmem:[#allocation53_spill] sm:$0xff] %v6143_v6  ;;  %v200_v63 = vadd.f32 %v5905_v50, %v191_v37  ;;  %v350_v6 = vstv %s6023_s14  ;;  %v6178_v10 = vmul.f32 %v6097_v28, %v314_v41  ;;  %v6184_v37 = vmul.f32 %v6107_v20, %v323_v9  ;;  %s6210_s14 = sld [smem:[#allocation3 + $0x22]] }
  0x4d   :  { %9678 = vst [vmem:[#allocation55_spill] sm:$0xff] %v6158_v31  ;;  %v201_v46 = vadd.f32 %v5908_v59, %v192_v22  ;;  %9679 = vst [vmem:[#allocation56_spill] sm:$0xff] %v6169_v62  ;;  %v6181_v22 = vmul.f32 %v6102_v25, %v323_v9  ;;  %v6187_v50 = vmul.f32 %v6133_v43, %v332_v29 }
  0x4e   :  { %v209_v59 = vadd.f32 %v5911_v61, %v200_v63  ;;  %v6196_v25 = vmul.f32 %v6148_v55, %v332_v29  ;;  %v6199_v9 = vmul.f32 %v6153_v24, %v341_v40  ;;  %v6202_v43 = vmul.f32 %v6158_v31, %v341_v40 }
  0x4f   :  { %v210_v41 = vadd.f32 %v5943_v60, %v201_v46  ;;  %v6205_v20 = vmul.f32 %v6169_v62, %v350_v6  ;;  %v6208_v28 = vmul.f32 %v6174_v56, %v350_v6  ;;  %v391_v60 = vstv %s6086_s8  ;;  %s6235_s8 = sld [smem:[#allocation3 + $0x89]] }
  0x50   :  { %v218_v61 = vadd.f32 %v5946_v51, %v209_v59  ;;  %v392_v63 = vmul.f32 %v391_v60, %v5594_v32  ;;  %v393_v40 = vmul.f32 %v391_v60, %v5603_v33  ;;  %v397_v46 = vstv %s6109_s30  ;;  %s6389_s30 = sld [smem:[#allocation3 + $0x9c]] }
  0x51   :  { %v219_v29 = vadd.f32 %v5949_v52, %v210_v41  ;;  %v405_v31 = vstv %s6111_s15  ;;  %v413_v62 = vstv %s6123_s22  ;;  %v421_v24 = vstv %s6125_s29  ;;  %s6397_s15 = sld [smem:[#allocation3 + $0x9d]]  ;;  %s6399_s22 = sld [smem:[#allocation3 + $0x9e]] }
  0x52   :  { %v227_v6 = vadd.f32 %v5952_v30, %v218_v61  ;;  %v398_v52 = vmul.f32 %v5608_v34, %v397_v46  ;;  %v399_v32 = vmul.f32 %v5613_v35, %v397_v46  ;;  %v406_v33 = vmul.f32 %v5622_v38, %v405_v31  ;;  %s6405_s29 = sld [smem:[#allocation3 + $0x9f]] }
  0x53   :  { %v228_v51 = vadd.f32 %v5991_v53, %v219_v29  ;;  %v407_v59 = vmul.f32 %v5627_v39, %v405_v31  ;;  %v414_v41 = vmul.f32 %v5636_v44, %v413_v62  ;;  %v415_v60 = vmul.f32 %v5641_v45, %v413_v62 }
  0x54   :  { %v236_v30 = vadd.f32 %v5994_v2, %v227_v6  ;;  %v400_v61 = vadd.f32 %v398_v52, %v392_v63  ;;  %v401_v34 = vadd.f32 %v399_v32, %v393_v40  ;;  %v422_v35 = vmul.f32 %v5651_v48, %v421_v24 }
  0x55   :  { %v237_v53 = vadd.f32 %v5997_v13, %v228_v51  ;;  %v423_v38 = vmul.f32 %v5656_v49, %v421_v24  ;;  %v429_v29 = vstv %s6189_s1  ;;  %v437_v39 = vstv %s6191_s0  ;;  %s6333_s1 = sld [smem:[#allocation3 + $0x93]]  ;;  %s6341_s0 = sld [smem:[#allocation3 + $0x94]] }
  0x56   :  { %v245_v44 = vadd.f32 %v6000_v14, %v236_v30  ;;  %v408_v62 = vadd.f32 %v406_v33, %v400_v61  ;;  %v409_v31 = vadd.f32 %v407_v59, %v401_v34  ;;  %v359_v2 = vstv %s6210_s14  ;;  %v6305_v34 = vld [vmem:[%s9464_s2 + $0x238] sm:$0xff]  ;;  %s6345_s14 = sld [smem:[#allocation3 + $0x95]] }
  0x57   :  { %v246_v45 = vadd.f32 %v6026_v47, %v237_v53  ;;  %v368_v13 = vstv %s6212_s11  ;;  %v430_v63 = vmul.f32 %v5663_v54, %v429_v29  ;;  %v431_v48 = vmul.f32 %v5675_v58, %v429_v29  ;;  %v6258_v47 = vld [vmem:[%s9464_s2 + $0x220] sm:$0xff]  ;;  %v6263_v54 = vld [vmem:[%s9464_s2 + $0x228] sm:$0xff]  ;;  %s6351_s11 = sld [smem:[#allocation3 + $0x96]] }
  0x58   :  { %v254_v49 = vadd.f32 %v6029_v36, %v245_v44  ;;  %v416_v14 = vadd.f32 %v414_v41, %v408_v62  ;;  %v417_v40 = vadd.f32 %v415_v60, %v409_v31  ;;  %v438_v58 = vmul.f32 %v5683_v0, %v437_v39  ;;  %v9680_v31 = vld [vmem:[#allocation9_spill] sm:$0xff] }
  0x59   :  { %v255_v24 = vadd.f32 %v6032_v3, %v246_v45  ;;  %v439_v36 = vmul.f32 %v5688_v1, %v437_v39  ;;  %v445_v3 = vstv %s6223_s9  ;;  %v453_v46 = vstv %s6225_s10  ;;  %s6359_s9 = sld [smem:[#allocation3 + $0x97]]  ;;  %s6367_s10 = sld [smem:[#allocation3 + $0x98]] }
  0x5a   :  { %v263_v6 = vadd.f32 %v6035_v4, %v254_v49  ;;  %v424_v52 = vadd.f32 %v422_v35, %v416_v14  ;;  %v425_v32 = vadd.f32 %v423_v38, %v417_v40  ;;  %v6278_v33 = vmul.f32 %v6258_v47, %v359_v2  ;;  %v9683_v14 = vld [vmem:[#allocation11_spill] sm:$0xff] }
  0x5b   :  { %v264_v51 = vadd.f32 %v6065_v5, %v255_v24  ;;  %v446_v0 = vmul.f32 %v5700_v7, %v445_v3  ;;  %v447_v1 = vmul.f32 %v5705_v8, %v445_v3  ;;  %v461_v59 = vstv %s6235_s8  ;;  %v6290_v5 = vld [vmem:[%s9464_s2 + $0x230] sm:$0xff]  ;;  %s6371_s8 = sld [smem:[#allocation3 + $0x99]] }
  0x5c   :  { %v272_v41 = vadd.f32 %v6068_v19, %v263_v6  ;;  %v432_v60 = vadd.f32 %v430_v63, %v424_v52  ;;  %v433_v30 = vadd.f32 %v431_v48, %v425_v32  ;;  %v6293_v53 = vmul.f32 %v6263_v54, %v359_v2  ;;  %v9681_v2 = vld [vmem:[#allocation10_spill] sm:$0xff] }
  0x5d   :  { %v273_v4 = vadd.f32 %v6071_v16, %v264_v51  ;;  %v454_v7 = vmul.f32 %v5717_v12, %v453_v46  ;;  %v455_v8 = vmul.f32 %v5722_v15, %v453_v46  ;;  %v469_v61 = vstv %s6243_s13  ;;  %v9685_v46 = vld [vmem:[#allocation52_spill] sm:$0xff]  ;;  %v9686_v51 = vld [vmem:[#allocation53_spill] sm:$0xff]  ;;  %s6377_s13 = sld [smem:[#allocation3 + $0x9a]] }
  0x5e   :  { %v281_v19 = vadd.f32 %v6074_v57, %v272_v41  ;;  %v440_v35 = vadd.f32 %v438_v58, %v432_v60  ;;  %v441_v38 = vadd.f32 %v439_v36, %v433_v30  ;;  %v6308_v29 = vmul.f32 %v6290_v5, %v368_v13  ;;  %v9684_v58 = vld [vmem:[#allocation12_spill] sm:$0xff]  ;;  %v9688_v41 = vld [vmem:[#allocation14_spill] sm:$0xff] }
  0x5f   :  { %v282_v16 = vadd.f32 %v6091_v42, %v273_v4  ;;  %v462_v12 = vmul.f32 %v5728_v17, %v461_v59  ;;  %v463_v15 = vmul.f32 %v5740_v21, %v461_v59  ;;  %v477_v39 = vstv %s6251_s16  ;;  %v9687_v59 = vld [vmem:[#allocation13_spill] sm:$0xff]  ;;  %s6385_s16 = sld [smem:[#allocation3 + $0x9b]] }
  0x60   :  { %v290_v42 = vadd.f32 %v6114_v23, %v281_v19  ;;  %v448_v44 = vadd.f32 %v446_v0, %v440_v35  ;;  %v449_v45 = vadd.f32 %v447_v1, %v441_v38  ;;  %v6320_v62 = vmul.f32 %v6305_v34, %v368_v13  ;;  %v9682_v23 = vld [vmem:[#allocation50_spill] sm:$0xff]  ;;  %v9689_v19 = vld [vmem:[#allocation15_spill] sm:$0xff]  ;;  %v9690_v35 = vld [vmem:[#allocation16_spill] sm:$0xff] }
  0x61   :  { %v291_v57 = vadd.f32 %v6117_v11, %v282_v16  ;;  %v470_v17 = vmul.f32 %v9680_v31, %v469_v61  ;;  %v471_v21 = vmul.f32 %v9681_v2, %v469_v61  ;;  %v485_v63 = vstv %s6271_s18  ;;  %v9693_v31 = vld [vmem:[#allocation19_spill] sm:$0xff]  ;;  %s6410_s18 = sld [smem:[#allocation3 + $0xa0]] }
  0x62   :  { %v299_v48 = vadd.f32 %v9682_v23, %v290_v42  ;;  %v456_v49 = vadd.f32 %v454_v7, %v448_v44  ;;  %v457_v24 = vadd.f32 %v455_v8, %v449_v45  ;;  %v478_v40 = vmul.f32 %v9683_v14, %v477_v39  ;;  %v9692_v44 = vld [vmem:[#allocation18_spill] sm:$0xff] }
  0x63   :  { %v300_v11 = vadd.f32 %v6137_v18, %v291_v57  ;;  %v479_v13 = vmul.f32 %v9684_v58, %v477_v39  ;;  %v493_v36 = vstv %s6275_s23  ;;  %v501_v3 = vstv %s6283_s25  ;;  %v9696_v14 = vld [vmem:[#allocation22_spill] sm:$0xff]  ;;  %s6412_s23 = sld [smem:[#allocation3 + $0xa1]] }
  0x64   :  { %v308_v6 = vadd.f32 %v9685_v46, %v299_v48  ;;  %v464_v32 = vadd.f32 %v462_v12, %v456_v49  ;;  %v465_v0 = vadd.f32 %v463_v15, %v457_v24  ;;  %v374_v1 = vstv %s6265_s21  ;;  %v9691_v12 = vld [vmem:[#allocation17_spill] sm:$0xff]  ;;  %s6433_s21 = sld [smem:[#allocation3 + $0x100]]  ;;  %s6435_s25 = sld [smem:[#allocation3 + $0x101]] }
  0x65   :  { %v309_v52 = vadd.f32 %v9686_v51, %v300_v11  ;;  %v486_v18 = vmul.f32 %v9687_v59, %v485_v63  ;;  %v487_v4 = vmul.f32 %v9688_v41, %v485_v63  ;;  %v509_v60 = vstv %s6298_s17  ;;  %v9694_v11 = vld [vmem:[#allocation20_spill] sm:$0xff]  ;;  %v9700_v41 = vld [vmem:[#allocation26_spill] sm:$0xff]  ;;  %s7187_s17 = sld [smem:[#allocation3 + $0x186]] }
  0x66   :  { %v317_v30 = vadd.f32 %v6164_v27, %v308_v6  ;;  %v472_v8 = vadd.f32 %v470_v17, %v464_v32  ;;  %v473_v61 = vadd.f32 %v471_v21, %v465_v0  ;;  %v494_v16 = vmul.f32 %v9689_v19, %v493_v36  ;;  %v9698_v6 = vld [vmem:[#allocation24_spill] sm:$0xff] }
  0x67   :  { %v318_v7 = vadd.f32 %v6178_v10, %v309_v52  ;;  %v495_v38 = vmul.f32 %v9690_v35, %v493_v36  ;;  %v502_v15 = vmul.f32 %v9691_v12, %v501_v3  ;;  %v517_v39 = vstv %s6313_s24  ;;  %v9699_v52 = vld [vmem:[#allocation25_spill] sm:$0xff]  ;;  %s6482_s24 = sld [smem:[#allocation3 + $0x105]] }
  0x68   :  { %v326_v42 = vadd.f32 %v6181_v22, %v317_v30  ;;  %v480_v10 = vadd.f32 %v478_v40, %v472_v8  ;;  %v481_v57 = vadd.f32 %v479_v13, %v473_v61  ;;  %v503_v45 = vmul.f32 %v9692_v44, %v501_v3  ;;  %v9697_v3 = vld [vmem:[#allocation23_spill] sm:$0xff] }
  0x69   :  { %v327_v27 = vadd.f32 %v6184_v37, %v318_v7  ;;  %v510_v17 = vmul.f32 %v9693_v31, %v509_v60  ;;  %v525_v2 = vstv %s6317_s26  ;;  %v533_v21 = vstv %s6325_s20  ;;  %v9695_v37 = vld [vmem:[#allocation21_spill] sm:$0xff]  ;;  %s6490_s26 = sld [smem:[#allocation3 + $0xa2]]  ;;  %s6492_s20 = sld [smem:[#allocation3 + $0xa3]] }
  0x6a   :  { %v335_v63 = vadd.f32 %v6187_v50, %v326_v42  ;;  %v488_v48 = vadd.f32 %v486_v18, %v480_v10  ;;  %v489_v22 = vadd.f32 %v487_v4, %v481_v57  ;;  %v511_v49 = vmul.f32 %v9694_v11, %v509_v60  ;;  %v9701_v60 = vld [vmem:[#allocation27_spill] sm:$0xff] }
  0x6b   :  { %v336_v23 = vadd.f32 %v6196_v25, %v327_v27  ;;  %v518_v24 = vmul.f32 %v9695_v37, %v517_v39  ;;  %v519_v40 = vmul.f32 %v9696_v14, %v517_v39  ;;  %v541_v58 = vstv %s6333_s1  ;;  %v9705_v57 = vld [vmem:[#allocation31_spill] sm:$0xff]  ;;  %s6630_s1 = sld [smem:[#allocation3 + $0x10a]] }
  0x6c   :  { %v344_v13 = vadd.f32 %v6199_v9, %v335_v63  ;;  %v496_v50 = vadd.f32 %v494_v16, %v488_v48  ;;  %v497_v25 = vadd.f32 %v495_v38, %v489_v22  ;;  %v526_v46 = vmul.f32 %v9697_v3, %v525_v2  ;;  %v9703_v38 = vld [vmem:[#allocation29_spill] sm:$0xff]  ;;  %v9708_v22 = vld [vmem:[#allocation34_spill] sm:$0xff] }
  0x6d   :  { %v345_v36 = vadd.f32 %v6202_v43, %v336_v23  ;;  %v527_v51 = vmul.f32 %v9698_v6, %v525_v2  ;;  %v534_v32 = vmul.f32 %v9699_v52, %v533_v21  ;;  %v549_v0 = vstv %s6341_s0  ;;  %v9712_v3 = vld [vmem:[#allocation38_spill] sm:$0xff]  ;;  %v9713_v6 = vld [vmem:[#allocation39_spill] sm:$0xff]  ;;  %s6552_s0 = sld [smem:[#allocation3 + $0x106]] }
  0x6e   :  { %v353_v59 = vadd.f32 %v6205_v20, %v344_v13  ;;  %v504_v43 = vadd.f32 %v502_v15, %v496_v50  ;;  %v505_v18 = vadd.f32 %v503_v45, %v497_v25  ;;  %v535_v4 = vmul.f32 %v9700_v41, %v533_v21  ;;  %v9704_v15 = vld [vmem:[#allocation30_spill] sm:$0xff]  ;;  %v9706_v45 = vld [vmem:[#allocation32_spill] sm:$0xff]  ;;  %v9711_v50 = vld [vmem:[#allocation37_spill] sm:$0xff] }
  0x6f   :  { %v354_v9 = vadd.f32 %v6208_v28, %v345_v36  ;;  %v542_v30 = vmul.f32 %v9701_v60, %v541_v58  ;;  %v557_v7 = vstv %s6345_s14  ;;  %v565_v8 = vstv %s6351_s11  ;;  %v9702_v28 = vld [vmem:[#allocation28_spill] sm:$0xff]  ;;  %v9715_v41 = vld [vmem:[#allocation41_spill] sm:$0xff]  ;;  %v9716_v60 = vld [vmem:[#allocation42_spill] sm:$0xff]  ;;  %s6558_s14 = sld [smem:[#allocation3 + $0x107]] }
  0x70   :  { %v362_v61 = vadd.f32 %v6278_v33, %v353_v59  ;;  %v512_v16 = vadd.f32 %v510_v17, %v504_v43  ;;  %v513_v20 = vadd.f32 %v511_v49, %v505_v18  ;;  %v543_v35 = vmul.f32 %v9702_v28, %v541_v58  ;;  %v9707_v17 = vld [vmem:[#allocation33_spill] sm:$0xff]  ;;  %v9709_v49 = vld [vmem:[#allocation35_spill] sm:$0xff]  ;;  %v9710_v13 = vld [vmem:[#allocation36_spill] sm:$0xff]  ;;  %s7217_s11 = sld [smem:[#allocation3 + $0x187]] }
  0x71   :  { %v363_v19 = vadd.f32 %v6293_v53, %v354_v9  ;;  %v550_v12 = vmul.f32 %v9703_v38, %v549_v0  ;;  %v551_v39 = vmul.f32 %v9704_v15, %v549_v0  ;;  %v573_v42 = vstv %s6359_s9  ;;  %v9714_v43 = vld [vmem:[#allocation40_spill] sm:$0xff]  ;;  %v9719_v38 = vld [vmem:[#allocation45_spill] sm:$0xff]  ;;  %s6712_s9 = sld [smem:[#allocation3 + $0x10f]] }
  0x72   :  { %v371_v27 = vadd.f32 %v6308_v29, %v362_v61  ;;  %v520_v53 = vadd.f32 %v518_v24, %v512_v16  ;;  %v521_v10 = vadd.f32 %v519_v40, %v513_v20  ;;  %v558_v44 = vmul.f32 %v9705_v57, %v557_v7  ;;  %v9717_v16 = vld [vmem:[#allocation43_spill] sm:$0xff]  ;;  %v9718_v28 = vld [vmem:[#allocation44_spill] sm:$0xff]  ;;  %v9720_v57 = vld [vmem:[#allocation46_spill] sm:$0xff] }
  0x73   :  { %v372_v33 = vadd.f32 %v6320_v62, %v363_v19  ;;  %v559_v31 = vmul.f32 %v9706_v45, %v557_v7  ;;  %v566_v2 = vmul.f32 %v9707_v17, %v565_v8  ;;  %v581_v21 = vstv %s6367_s10  ;;  %s7050_s10 = sld [smem:[#allocation3 + $0x180]] }
  0x74   :  { %v528_v62 = vadd.f32 %v526_v46, %v520_v53  ;;  %v529_v63 = vadd.f32 %v527_v51, %v521_v10  ;;  %v589_v23 = vstv %s6371_s8  ;;  %v6416_v48 = vadd.f32 %v374_v1, %v371_v27  ;;  %s6786_s8 = sld [smem:[#allocation3 + $0x115]] }
  0x75   :  { %v376_v29 = vadd.f32 %v374_v1, %v372_v33  ;;  %v567_v11 = vmul.f32 %v9708_v22, %v565_v8  ;;  %v574_v37 = vmul.f32 %v9709_v49, %v573_v42  ;;  %v597_v24 = vstv %s6377_s13  ;;  %v5315_v22 = vld [vmem:[%s9465_s3 + $0x148] sm:$0xff]   ;;  %v6500_v49 = vld [vmem:[%s9464_s2] sm:$0xff]  ;;  %s6588_s13 = sld [smem:[#allocation3 + $0x108]] }
  0x76   :  { %v536_v40 = vadd.f32 %v534_v32, %v528_v62  ;;  %v537_v58 = vadd.f32 %v535_v4, %v529_v63  ;;  %v575_v36 = vmul.f32 %v9710_v13, %v573_v42  ;;  %v6423_v25 = vmul.f32 %v9711_v50, %v581_v21  ;;  %v5313_v62 = vld [vmem:[%s9465_s3 + $0x100] sm:$0xff]   ;;  %v9727_v13 = vld [vmem:[#allocation56_spill] sm:$0xff] }
  0x77   :  { %v378_v14 = vmax.f32 %v376_v29, 0.0  ;;  %v6426_v46 = vmul.f32 %v9712_v3, %v581_v21  ;;  %v6429_v51 = vmul.f32 %v9713_v6, %v589_v23  ;;  %v605_v1 = vstv %s6385_s16  ;;  %v9722_v21 = vld [vmem:[#allocation48_spill] sm:$0xff]  ;;  %v9723_v63 = vld [vmem:[#allocation49_spill] sm:$0xff]  ;;  %v6522_v3 = vld [vmem:[%s9464_s2 + $0x10] sm:$0xff]  ;;  %s6730_s16 = sld [smem:[#allocation3 + $0x111]] }
  0x78   :  { %v544_v0 = vadd.f32 %v542_v30, %v536_v40  ;;  %v545_v59 = vadd.f32 %v543_v35, %v537_v58  ;;  %v613_v9 = vstv %s6389_s30  ;;  %v377_v32 = vmax.f32 %v6416_v48, 0.0  ;;  %v9726_v40 = vld [vmem:[#allocation55_spill] sm:$0xff]  ;;  %v6532_v6 = vld [vmem:[%s9464_s2 + $0x20] sm:$0xff]  ;;  %s6788_s30 = sld [smem:[#allocation3 + $0x116]] }
  0x79   :  { %v5055_v52 = vpack.c.bf16 %v378_v14, %v378_v14  ;;  %v6439_v18 = vmul.f32 %v9714_v43, %v589_v23  ;;  %v6442_v4 = vmul.f32 %v9715_v41, %v597_v24  ;;  %v6445_v7 = vmul.f32 %v9716_v60, %v597_v24  ;;  %v9725_v24 = vld [vmem:[#allocation54_spill] sm:$0xff]  ;;  %v6545_v43 = vld [vmem:[%s9464_s2 + $0x30] sm:$0xff]  ;;  %v6550_v41 = vld [vmem:[%s9464_s2 + $0x38] sm:$0xff] }
  0x7a   :  { %v552_v30 = vadd.f32 %v550_v12, %v544_v0  ;;  %v553_v8 = vadd.f32 %v551_v39, %v545_v59  ;;  %v621_v61 = vstv %s6397_s15  ;;  %v629_v19 = vstv %s6399_s22  ;;  %v9721_v39 = vld [vmem:[#allocation47_spill] sm:$0xff]  ;;  %s6597_s15 = sld [smem:[#allocation3 + $0x109]]  ;;  %s7453_s22 = sld [smem:[#allocation3 + $0x202]] }
  0x7b   :  { %3622 = vmatprep.mubr.bf16.mxu0 %v5055_v52  ;;  %v6454_v20 = vmul.f32 %v9717_v16, %v605_v1  ;;  %v6457_v35 = vmul.f32 %v9718_v28, %v605_v1  ;;  %v6460_v15 = vmul.f32 %v9719_v38, %v613_v9  ;;  %v637_v42 = vstv %s6405_s29  ;;  %s6838_s29 = sld [smem:[#allocation3 + $0x119]] }
  0x7c   :  { %v560_v27 = vadd.f32 %v558_v44, %v552_v30  ;;  %v561_v33 = vadd.f32 %v559_v31, %v553_v8  ;;  %v645_v53 = vstv %s6410_s18  ;;  %v653_v10 = vstv %s6412_s23  ;;  %s6680_s18 = sld [smem:[#allocation3 + $0x10d]]  ;;  %s6702_s23 = sld [smem:[#allocation3 + $0x10e]] }
  0x7d   :  { %v6466_v45 = vmul.f32 %v9720_v57, %v613_v9  ;;  %v6469_v12 = vmul.f32 %v6084_v26, %v621_v61  ;;  %v6472_v17 = vmul.f32 %v9721_v39, %v621_v61  ;;  %v6475_v29 = vmul.f32 %v9722_v21, %v629_v19  ;;  %v9724_v26 = vld [vmem:[#allocation51_spill] sm:$0xff]  ;;  %v6540_v9 = vld [vmem:[%s9464_s2 + $0x28] sm:$0xff] }
  0x7e   :  { %v568_v44 = vadd.f32 %v566_v2, %v560_v27  ;;  %v569_v31 = vadd.f32 %v567_v11, %v561_v33  ;;  %v6485_v23 = vmul.f32 %v9723_v63, %v629_v19  ;;  %v6488_v48 = vmul.f32 %v9724_v26, %v637_v42  ;;  %v6505_v2 = vld [vmem:[%s9464_s2 + $0x8] sm:$0xff]  ;;  %v5319_v27 = vld [vmem:[%s9465_s3 + $0x150] sm:$0xff]  }
  0x7f   :  { %v6508_v11 = vmul.f32 %v6148_v55, %v637_v42  ;;  %v6511_v14 = vmul.f32 %v9725_v24, %v645_v53  ;;  %v6514_v58 = vmul.f32 %v9726_v40, %v645_v53  ;;  %v6517_v50 = vmul.f32 %v9727_v13, %v653_v10  ;;  %v6527_v55 = vld [vmem:[%s9464_s2 + $0x18] sm:$0xff]  ;;  %v5317_v19 = vld [vmem:[%s9465_s3 + $0x108] sm:$0xff]   ;;  %v6594_v21 = vld [vmem:[%s9464_s2 + $0x50] sm:$0xff] }
  0x80   :  { %v576_v1 = vadd.f32 %v574_v37, %v568_v44  ;;  %v577_v52 = vadd.f32 %v575_v36, %v569_v31  ;;  %v6535_v0 = vmul.f32 %v6174_v56, %v653_v10  ;;  %v5054_v59 = vpack.c.bf16 %v377_v32, %v377_v32  ;;  %v6581_v10 = vld [vmem:[%s9464_s2 + $0x40] sm:$0xff]  ;;  %v5321_v24 = vld [vmem:[%s9465_s3 + $0x110] sm:$0xff]  }
  0x81   :  { %v692_v56 = vstv %s6433_s21  ;;  %v698_v37 = vstv %s6435_s25  ;;  %v706_v36 = vstv %s6447_s28  ;;  %v714_v32 = vstv %s6449_s19  ;;  %s6639_s21 = sld [smem:[#allocation3 + $0x10b]]  ;;  %s6714_s25 = sld [smem:[#allocation3 + $0x110]] }
  0x82   :  { %v584_v60 = vadd.f32 %v6423_v25, %v576_v1  ;;  %v585_v30 = vadd.f32 %v6426_v46, %v577_v52  ;;  %3623 = vmatmul.mubr.bf16.vlgmr.msra.gmra.mrb[0].mxu0 %v5054_v59  ;;  %v693_v8 = vmul.f32 %v692_v56, %v6500_v49  ;;  %v694_v61 = vmul.f32 %v692_v56, %v6505_v2  ;;  %v5323_v59 = vld [vmem:[%s9465_s3 + $0x158] sm:$0xff]   ;;  %s6824_s28 = sld [smem:[#allocation3 + $0x118]]  ;;  %s6876_s19 = sld [smem:[#allocation3 + $0x11f]] }
  0x83   :  { %5115 = vmatpush3.bf16.msra.mxu0 %v5313_v62  ;;  %v699_v16 = vmul.f32 %v6522_v3, %v698_v37  ;;  %v700_v28 = vmul.f32 %v6527_v55, %v698_v37  ;;  %v707_v25 = vmul.f32 %v6532_v6, %v706_v36  ;;  %v708_v46 = vmul.f32 %v6540_v9, %v706_v36  ;;  %v6622_v37 = vld [vmem:[%s9464_s2 + $0x60] sm:$0xff]  ;;  %v6627_v36 = vld [vmem:[%s9464_s2 + $0x68] sm:$0xff] }
  0x84   :  { %v592_v38 = vadd.f32 %v6429_v51, %v584_v60  ;;  %v593_v42 = vadd.f32 %v6439_v18, %v585_v30  ;;  %5116 = vmatprep.subr.bf16.mxu0 %v5315_v22  ;;  %v715_v33 = vmul.f32 %v6545_v43, %v714_v32  ;;  %v716_v53 = vmul.f32 %v6550_v41, %v714_v32  ;;  %v6586_v51 = vld [vmem:[%s9464_s2 + $0x48] sm:$0xff]  ;;  %v6606_v22 = vld [vmem:[%s9464_s2 + $0x58] sm:$0xff]  ;;  %v6636_v30 = vld [vmem:[%s9464_s2 + $0x70] sm:$0xff] }
  0x85   :  { %v701_v18 = vadd.f32 %v699_v16, %v693_v8  ;;  %v702_v57 = vadd.f32 %v700_v28, %v694_v61  ;;  %v722_v39 = vstv %s6480_s12  ;;  %v730_v62 = vstv %s6482_s24  ;;  %s6846_s12 = sld [smem:[#allocation3 + $0x11b]]  ;;  %s7250_s24 = sld [smem:[#allocation3 + $0x18a]] }
  0x86   :  { %v600_v44 = vadd.f32 %v6442_v4, %v592_v38  ;;  %v601_v31 = vadd.f32 %v6445_v7, %v593_v42  ;;  %v661_v63 = vstv %s6490_s26  ;;  %v669_v26 = vstv %s6492_s20  ;;  %s6972_s20 = sld [smem:[#allocation3 + $0x121]] }
  0x87   :  { %5117 = vmatpush3.bf16.msra.mxu0 %v5317_v19  ;;  %v709_v40 = vadd.f32 %v707_v25, %v701_v18  ;;  %v710_v13 = vadd.f32 %v708_v46, %v702_v57  ;;  %v723_v4 = vmul.f32 %v6581_v10, %v722_v39  ;;  %v724_v7 = vmul.f32 %v6586_v51, %v722_v39  ;;  %v6654_v25 = vld [vmem:[%s9464_s2 + $0x78] sm:$0xff]  ;;  %v6677_v18 = vld [vmem:[%s9464_s2 + $0x88] sm:$0xff]  ;;  %s7375_s26 = sld [smem:[#allocation3 + $0x199]] }
  0x88   :  { %v608_v1 = vadd.f32 %v6454_v20, %v600_v44  ;;  %v609_v52 = vadd.f32 %v6457_v35, %v601_v31  ;;  %5118 = vmatprep.subr.bf16.mxu0 %v5319_v27  ;;  %v731_v56 = vmul.f32 %v6594_v21, %v730_v62  ;;  %v738_v20 = vstv %s6552_s0  ;;  %s6649_s0 = sld [smem:[#allocation5 + $0x1]]  ;;  %v5327_v27 = vld [vmem:[%s9465_s3 + $0x160] sm:$0xff]  }
  0x89   :  { %v717_v35 = vadd.f32 %v715_v33, %v709_v40  ;;  %v718_v32 = vadd.f32 %v716_v53, %v710_v13  ;;  %v732_v60 = vmul.f32 %v6606_v22, %v730_v62  ;;  %v746_v8 = vstv %s6558_s14  ;;  %s6656_s14 = sld [smem:[#allocation3 + $0x10c]]  ;;  %v6672_v53 = vld [vmem:[%s9464_s2 + $0x80] sm:$0xff]  ;;  %v6686_v62 = vld [vmem:[%s9464_s2 + $0x90] sm:$0xff]  ;;  %v6700_v13 = vld [vmem:[%s9464_s2 + $0x98] sm:$0xff] }
  0x8a   :  { %v616_v61 = vadd.f32 %v6460_v15, %v608_v1  ;;  %v617_v19 = vadd.f32 %v6466_v45, %v609_v52  ;;  %v6644_v16 = vmul.f32 %v6258_v47, %v661_v63  ;;  %v6647_v28 = vmul.f32 %v6263_v54, %v661_v63  ;;  %v5325_v15 = vld [vmem:[%s9465_s3 + $0x118] sm:$0xff]  }
  0x8b   :  { %5119 = vmatpush3.bf16.msra.mxu0 %v5321_v24  ;;  %v725_v47 = vadd.f32 %v723_v4, %v717_v35  ;;  %v726_v45 = vadd.f32 %v724_v7, %v718_v32  ;;  %v739_v54 = vmul.f32 %v6622_v37, %v738_v20  ;;  %v740_v46 = vmul.f32 %v6627_v36, %v738_v20 }
  0x8c   :  { %v624_v38 = vadd.f32 %v6469_v12, %v616_v61  ;;  %v625_v42 = vadd.f32 %v6472_v17, %v617_v19  ;;  %5120 = vmatprep.subr.bf16.mxu0 %v5323_v59  ;;  %v747_v33 = vmul.f32 %v6636_v30, %v746_v8  ;;  %v754_v12 = vstv %s6588_s13  ;;  %v6722_v59 = vld [vmem:[%s9464_s2 + $0xa0] sm:$0xff]  ;;  %s6805_s13 = sld [smem:[#allocation3 + $0x117]] }
  0x8d   :  { %v733_v17 = vadd.f32 %v731_v56, %v725_v47  ;;  %v734_v57 = vadd.f32 %v732_v60, %v726_v45  ;;  %v748_v39 = vmul.f32 %v6654_v25, %v746_v8  ;;  %v762_v44 = vstv %s6597_s15  ;;  %v6727_v56 = vld [vmem:[%s9464_s2 + $0xa8] sm:$0xff]  ;;  %v6739_v60 = vld [vmem:[%s9464_s2 + $0xb0] sm:$0xff]  ;;  %v6744_v8 = vld [vmem:[%s9464_s2 + $0xb8] sm:$0xff]  ;;  %s6758_s15 = sld [smem:[#allocation3 + $0x113]] }
  0x8e   :  { %v632_v31 = vadd.f32 %v6475_v29, %v624_v38  ;;  %v633_v63 = vadd.f32 %v6485_v23, %v625_v42  ;;  %v6692_v24 = vmul.f32 %v6290_v5, %v669_v26  ;;  %v6695_v40 = vmul.f32 %v6305_v34, %v669_v26  ;;  %v5329_v29 = vld [vmem:[%s9465_s3 + $0x120] sm:$0xff]   ;;  %v5331_v5 = vld [vmem:[%s9465_s3 + $0x168] sm:$0xff]   ;;  %9728 = vst [vmem:[#allocation9_spill] sm:$0xff] %v6727_v56 }
  0x8f   :  { %5121 = vmatpush3.bf16.msra.mxu0 %v5325_v15  ;;  %v741_v23 = vadd.f32 %v739_v54, %v733_v17  ;;  %v742_v34 = vadd.f32 %v740_v46, %v734_v57  ;;  %v755_v26 = vmul.f32 %v6672_v53, %v754_v12  ;;  %v756_v4 = vmul.f32 %v6677_v18, %v754_v12  ;;  %v6755_v45 = vld [vmem:[%s9464_s2 + $0xc0] sm:$0xff]  ;;  %v5335_v46 = vld [vmem:[%s9465_s3 + $0x170] sm:$0xff]  }
  0x90   :  { %v640_v7 = vadd.f32 %v6488_v48, %v632_v31  ;;  %v641_v1 = vadd.f32 %v6508_v11, %v633_v63  ;;  %5122 = vmatprep.subr.bf16.mxu0 %v5327_v27  ;;  %v763_v52 = vmul.f32 %v6686_v62, %v762_v44  ;;  %v770_v20 = vstv %s6630_s1  ;;  %v5333_v48 = vld [vmem:[%s9465_s3 + $0x128] sm:$0xff]   ;;  %9729 = vst [vmem:[#allocation10_spill] sm:$0xff] %v6739_v60  ;;  %s6747_s1 = sld [smem:[#allocation3 + $0x112]]  ;;  %v6778_v57 = vld [vmem:[%s9464_s2 + $0xd0] sm:$0xff] }
  0x91   :  { %v749_v11 = vadd.f32 %v747_v33, %v741_v23  ;;  %v750_v35 = vadd.f32 %v748_v39, %v742_v34  ;;  %v764_v32 = vmul.f32 %v6700_v13, %v762_v44  ;;  %9730 = vst [vmem:[#allocation50_spill] sm:$0xff] %v6744_v8  ;;  %v778_v61 = vstv %s6639_s21  ;;  %9731 = vst [vmem:[#allocation11_spill] sm:$0xff] %v6755_v45  ;;  %v6768_v27 = vld [vmem:[%s9464_s2 + $0xc8] sm:$0xff]  ;;  %v6783_v39 = vld [vmem:[%s9464_s2 + $0xd8] sm:$0xff]  ;;  %s6865_s21 = sld [smem:[#allocation3 + $0x11d]] }
  0x92   :  { %v648_v19 = vadd.f32 %v6511_v14, %v640_v7  ;;  %v649_v15 = vadd.f32 %v6514_v58, %v641_v1  ;;  %v675_v47 = vstv %s6649_s0  ;;  %v786_v54 = vstv %s6656_s14  ;;  %9732 = vst [vmem:[#allocation12_spill] sm:$0xff] %v6768_v27  ;;  %s6770_s14 = sld [smem:[#allocation3 + $0x114]]  ;;  %9733 = vst [vmem:[#allocation52_spill] sm:$0xff] %v6778_v57  ;;  %v6803_v23 = vld [vmem:[%s9464_s2 + $0xe8] sm:$0xff]  ;;  %s6935_s0 = sld [smem:[#allocation3 + $0x120]] }
  0x93   :  { %5123 = vmatpush3.bf16.msra.mxu0 %v5329_v29  ;;  %v757_v38 = vadd.f32 %v755_v26, %v749_v11  ;;  %v758_v42 = vadd.f32 %v756_v4, %v750_v35  ;;  %v771_v14 = vmul.f32 %v6722_v59, %v770_v20  ;;  %v772_v58 = vmul.f32 %v6727_v56, %v770_v20  ;;  %v5339_v4 = vld [vmem:[%s9465_s3 + $0x178] sm:$0xff]  }
  0x94   :  { %v656_v33 = vadd.f32 %v6517_v50, %v648_v19  ;;  %v657_v12 = vadd.f32 %v6535_v0, %v649_v15  ;;  %5124 = vmatprep.subr.bf16.mxu0 %v5331_v5  ;;  %v779_v17 = vmul.f32 %v6739_v60, %v778_v61  ;;  %9734 = vst [vmem:[#allocation53_spill] sm:$0xff] %v6783_v39  ;;  %v794_v44 = vstv %s6680_s18  ;;  %v5337_v50 = vld [vmem:[%s9465_s3 + $0x130] sm:$0xff]   ;;  %v6798_v5 = vld [vmem:[%s9464_s2 + $0xe0] sm:$0xff]  ;;  %v6822_v20 = vld [vmem:[%s9464_s2 + $0xf8] sm:$0xff]  ;;  %s7361_s18 = sld [smem:[#allocation3 + $0x196]] }
  0x95   :  { %v765_v0 = vadd.f32 %v763_v52, %v757_v38  ;;  %v766_v31 = vadd.f32 %v764_v32, %v758_v42  ;;  %v780_v63 = vmul.f32 %v6744_v8, %v778_v61  ;;  %v787_v29 = vmul.f32 %v6755_v45, %v786_v54  ;;  %9735 = vst [vmem:[#allocation13_spill] sm:$0xff] %v6798_v5  ;;  %v6817_v52 = vld [vmem:[%s9464_s2 + $0xf0] sm:$0xff]  ;;  %v6831_v32 = vld [vmem:[%s9464_s2 + $0x100] sm:$0xff]  ;;  %v6836_v61 = vld [vmem:[%s9464_s2 + $0x108] sm:$0xff] }
  0x96   :  { %9736 = vst [vmem:[#allocation14_spill] sm:$0xff] %v6803_v23  ;;  %v664_v34 = vadd.f32 %v6644_v16, %v656_v33  ;;  %v665_v26 = vadd.f32 %v6647_v28, %v657_v12  ;;  %v788_v7 = vmul.f32 %v6768_v27, %v786_v54  ;;  %v802_v1 = vstv %s6702_s23  ;;  %9737 = vst [vmem:[#allocation15_spill] sm:$0xff] %v6817_v52  ;;  %v5341_v38 = vld [vmem:[%s9465_s3 + $0x138] sm:$0xff]   ;;  %s6874_s23 = sld [smem:[#allocation3 + $0x11e]]  ;;  %v7091_v27 = vld [vmem:[%s9464_s2 + $0x1e0] sm:$0xff] }
  0x97   :  { %9738 = vst [vmem:[#allocation16_spill] sm:$0xff] %v6822_v20  ;;  %5125 = vmatpush3.bf16.msra.mxu0 %v5333_v48  ;;  %v773_v16 = vadd.f32 %v771_v14, %v765_v0  ;;  %v774_v28 = vadd.f32 %v772_v58, %v766_v31  ;;  %v795_v11 = vmul.f32 %v6778_v57, %v794_v44  ;;  %v810_v35 = vstv %s6712_s9  ;;  %s6844_s9 = sld [smem:[#allocation3 + $0x11a]]  ;;  %v6872_v0 = vld [vmem:[%s9464_s2 + $0x120] sm:$0xff]  ;;  %v7069_v57 = vld [vmem:[%s9464_s2 + $0x1d0] sm:$0xff]  ;;  %v7147_v8 = vld [vmem:[%s9464_s2 + $0x208] sm:$0xff] }
  0x98   :  { %9739 = vst [vmem:[#allocation17_spill] sm:$0xff] %v6831_v32  ;;  %9740 = vst [vmem:[#allocation18_spill] sm:$0xff] %v6836_v61  ;;  %v672_v19 = vadd.f32 %v6692_v24, %v664_v34  ;;  %v673_v48 = vadd.f32 %v6695_v40, %v665_v26  ;;  %5126 = vmatprep.subr.bf16.mxu0 %v5335_v46  ;;  %v796_v15 = vmul.f32 %v6783_v39, %v794_v44  ;;  %v6856_v40 = vld [vmem:[%s9464_s2 + $0x110] sm:$0xff]  ;;  %v6861_v46 = vld [vmem:[%s9464_s2 + $0x118] sm:$0xff] }
  0x99   :  { %v818_v54 = vstv %s6714_s25  ;;  %v781_v42 = vadd.f32 %v779_v17, %v773_v16  ;;  %v782_v14 = vadd.f32 %v780_v63, %v774_v28  ;;  %v803_v58 = vmul.f32 %v6798_v5, %v802_v1  ;;  %9741 = vst [vmem:[#allocation19_spill] sm:$0xff] %v6856_v40  ;;  %9742 = vst [vmem:[#allocation20_spill] sm:$0xff] %v6861_v46  ;;  %v6883_v26 = vld [vmem:[%s9464_s2 + $0x128] sm:$0xff]  ;;  %v5314_v16 = vld [vmem:[%s9465_s3 + $0x180] sm:$0xff]   ;;  %s6974_s25 = sld [smem:[#allocation3 + $0x122]] }
  0x9a   :  { %v804_v24 = vmul.f32 %v6803_v23, %v802_v1  ;;  %v676_v33 = vadd.f32 %v675_v47, %v672_v19  ;;  %v677_v12 = vadd.f32 %v675_v47, %v673_v48  ;;  %v811_v17 = vmul.f32 %v6817_v52, %v810_v35  ;;  %9743 = vst [vmem:[#allocation21_spill] sm:$0xff] %v6872_v0  ;;  %v6888_v1 = vld [vmem:[%s9464_s2 + $0x130] sm:$0xff]  ;;  %v6903_v19 = vld [vmem:[%s9464_s2 + $0x140] sm:$0xff] }
  0x9b   :  { %v826_v44 = vstv %s6730_s16  ;;  %5127 = vmatpush3.bf16.msra.mxu0 %v5337_v50  ;;  %v789_v31 = vadd.f32 %v787_v29, %v781_v42  ;;  %v790_v63 = vadd.f32 %v788_v7, %v782_v14  ;;  %v812_v34 = vmul.f32 %v6822_v20, %v810_v35  ;;  %9744 = vst [vmem:[#allocation22_spill] sm:$0xff] %v6883_v26  ;;  %v6893_v50 = vld [vmem:[%s9464_s2 + $0x138] sm:$0xff]  ;;  %v5343_v48 = vld [vmem:[%s9465_s3 + $0x240] sm:$0xff]   ;;  %v5316_v42 = vld [vmem:[%s9465_s3 + $0x1c8] sm:$0xff]   ;;  %s7455_s16 = sld [smem:[#allocation3 + $0x203]] }
  0x9c   :  { %v819_v47 = vmul.f32 %v6831_v32, %v818_v54  ;;  %9745 = vst [vmem:[#allocation23_spill] sm:$0xff] %v6888_v1  ;;  %9746 = vst [vmem:[#allocation24_spill] sm:$0xff] %v6893_v50  ;;  %v678_v29 = vmax.f32 %v676_v33, 0.0  ;;  %v679_v7 = vmax.f32 %v677_v12, 0.0  ;;  %5128 = vmatprep.subr.bf16.mxu0 %v5339_v4  ;;  %v820_v28 = vmul.f32 %v6836_v61, %v818_v54  ;;  %v6916_v12 = vld [vmem:[%s9464_s2 + $0x148] sm:$0xff]  ;;  %v6921_v61 = vld [vmem:[%s9464_s2 + $0x150] sm:$0xff] }
  0x9d   :  { %v834_v35 = vstv %s6747_s1  ;;  %9747 = vst [vmem:[#allocation25_spill] sm:$0xff] %v6903_v19  ;;  %v797_v14 = vadd.f32 %v795_v11, %v789_v31  ;;  %v798_v33 = vadd.f32 %v796_v15, %v790_v63  ;;  %v827_v4 = vmul.f32 %v6856_v40, %v826_v44  ;;  %9748 = vst [vmem:[#allocation26_spill] sm:$0xff] %v6916_v12  ;;  %v6926_v32 = vld [vmem:[%s9464_s2 + $0x158] sm:$0xff]  ;;  %v6933_v40 = vld [vmem:[%s9464_s2 + $0x160] sm:$0xff]  ;;  %s7133_s1 = sld [smem:[#allocation3 + $0x184]] }
  0x9e   :  { %v842_v54 = vstv %s6758_s15  ;;  %9749 = vst [vmem:[#allocation27_spill] sm:$0xff] %v6921_v61  ;;  %9750 = vst [vmem:[#allocation28_spill] sm:$0xff] %v6926_v32  ;;  %v5057_v11 = vpack.c.bf16 %v679_v7, %v679_v7  ;;  %v5056_v15 = vpack.c.bf16 %v678_v29, %v678_v29  ;;  %v828_v31 = vmul.f32 %v6861_v46, %v826_v44  ;;  %v6944_v44 = vld [vmem:[%s9464_s2 + $0x168] sm:$0xff]  ;;  %v6949_v29 = vld [vmem:[%s9464_s2 + $0x170] sm:$0xff]  ;;  %s7093_s15 = sld [smem:[#allocation3 + $0x183]] }
  0x9f   :  { %v850_v63 = vstv %s6770_s14  ;;  %9751 = vst [vmem:[#allocation29_spill] sm:$0xff] %v6933_v40  ;;  %5129 = vmatpush3.bf16.msra.mxu0 %v5341_v38  ;;  %v805_v20 = vadd.f32 %v803_v58, %v797_v14  ;;  %v806_v52 = vadd.f32 %v804_v24, %v798_v33  ;;  %v6938_v23 = vmul.f32 %v6872_v0, %v834_v35  ;;  %v5318_v38 = vld [vmem:[%s9465_s3 + $0x188] sm:$0xff]   ;;  %v6965_v33 = vld [vmem:[%s9464_s2 + $0x178] sm:$0xff]  ;;  %s7052_s14 = sld [smem:[#allocation3 + $0x181]] }
  0xa0   :  { %v858_v5 = vstv %s6786_s8  ;;  %9752 = vst [vmem:[#allocation30_spill] sm:$0xff] %v6944_v44  ;;  %9753 = vst [vmem:[#allocation31_spill] sm:$0xff] %v6949_v29  ;;  %3662 = vmatprep.mubr.bf16.mxu1 %v5057_v11  ;;  %v836_v58 = vmul.f32 %v6883_v26, %v834_v35  ;;  %v6956_v24 = vmul.f32 %v6888_v1, %v842_v54  ;;  %v866_v14 = vstv %s6788_s30  ;;  %v6970_v11 = vld [vmem:[%s9464_s2 + $0x180] sm:$0xff]  ;;  %v5320_v35 = vld [vmem:[%s9465_s3 + $0x1d0] sm:$0xff]   ;;  %s7296_s30 = sld [smem:[#allocation3 + $0x18e]]  ;;  %s7321_s8 = sld [smem:[#allocation3 + $0x190]] }
  0xa1   :  { %v6959_v7 = vmul.f32 %v6893_v50, %v842_v54  ;;  %9754 = vst [vmem:[#allocation32_spill] sm:$0xff] %v6965_v33  ;;  %9755 = vst [vmem:[#allocation33_spill] sm:$0xff] %v6970_v11  ;;  %5158 = vmatprep.subr.bf16.mxu0 %v5343_v48  ;;  %3663 = vmatmul.mubr.bf16.vlgmr.msra.gmra.mrb[0].mxu1 %v5056_v15  ;;  %v813_v54 = vadd.f32 %v811_v17, %v805_v20  ;;  %v874_v26 = vstv %s6805_s13  ;;  %v6986_v0 = vld [vmem:[%s9464_s2 + $0x188] sm:$0xff]  ;;  %v6991_v48 = vld [vmem:[%s9464_s2 + $0x190] sm:$0xff]  ;;  %s7473_s13 = sld [smem:[#allocation5 + $0x3]] }
  0xa2   :  { %v814_v50 = vadd.f32 %v812_v34, %v806_v52  ;;  %v6980_v1 = vmul.f32 %v6903_v19, %v850_v63  ;;  %9756 = vst [vmem:[#allocation34_spill] sm:$0xff] %v6986_v0  ;;  %9757 = vst [vmem:[#allocation35_spill] sm:$0xff] %v6991_v48  ;;  %v6996_v20 = vld [vmem:[%s9464_s2 + $0x198] sm:$0xff]  ;;  %5137 = vmatpush3.bf16.msra.mxu1 %v5314_v16  ;;  %v6999_v52 = vmul.f32 %v6916_v12, %v850_v63  ;;  %v7011_v19 = vld [vmem:[%s9464_s2 + $0x1a0] sm:$0xff] }
  0xa3   :  { %9758 = vst [vmem:[#allocation36_spill] sm:$0xff] %v6996_v20  ;;  %v7002_v17 = vmul.f32 %v6921_v61, %v858_v5  ;;  %v7005_v34 = vmul.f32 %v6926_v32, %v858_v5  ;;  %v882_v15 = vstv %s6824_s28  ;;  %9759 = vst [vmem:[#allocation37_spill] sm:$0xff] %v7011_v19  ;;  %5138 = vmatprep.subr.bf16.mxu1 %v5316_v42  ;;  %v890_v63 = vstv %s6838_s29  ;;  %v7020_v61 = vld [vmem:[%s9464_s2 + $0x1a8] sm:$0xff]  ;;  %v7025_v5 = vld [vmem:[%s9464_s2 + $0x1b0] sm:$0xff]  ;;  %s7076_s28 = sld [smem:[#allocation3 + $0x182]]  ;;  %s7389_s29 = sld [smem:[#allocation3 + $0x19b]] }
  0xa4   :  { %v821_v46 = vadd.f32 %v819_v47, %v813_v54  ;;  %v822_v39 = vadd.f32 %v820_v28, %v814_v50  ;;  %v7014_v16 = vmul.f32 %v6933_v40, %v866_v14  ;;  %9760 = vst [vmem:[#allocation38_spill] sm:$0xff] %v7020_v61  ;;  %9761 = vst [vmem:[#allocation39_spill] sm:$0xff] %v7025_v5  ;;  %v5322_v47 = vld [vmem:[%s9465_s3 + $0x190] sm:$0xff]   ;;  %v898_v54 = vstv %s6844_s9  ;;  %v7043_v40 = vld [vmem:[%s9464_s2 + $0x1b8] sm:$0xff]  ;;  %s7226_s9 = sld [smem:[#allocation3 + $0x188]] }
  0xa5   :  { %v7031_v50 = vmul.f32 %v6944_v44, %v866_v14  ;;  %v7034_v28 = vmul.f32 %v6949_v29, %v874_v26  ;;  %v7037_v42 = vmul.f32 %v6965_v33, %v874_v26  ;;  %9762 = vst [vmem:[#allocation40_spill] sm:$0xff] %v7043_v40  ;;  %v7048_v32 = vld [vmem:[%s9464_s2 + $0x1c0] sm:$0xff]  ;;  %v5324_v26 = vld [vmem:[%s9465_s3 + $0x1d8] sm:$0xff]   ;;  %v7058_v29 = vmul.f32 %v6970_v11, %v882_v15  ;;  %v7064_v12 = vld [vmem:[%s9464_s2 + $0x1c8] sm:$0xff] }
  0xa6   :  { %v829_v14 = vadd.f32 %v827_v4, %v821_v46  ;;  %v830_v33 = vadd.f32 %v828_v31, %v822_v39  ;;  %v906_v44 = vstv %s6846_s12  ;;  %9763 = vst [vmem:[#allocation41_spill] sm:$0xff] %v7064_v12  ;;  %9764 = vst [vmem:[#allocation42_spill] sm:$0xff] %v7069_v57  ;;  %v7074_v46 = vld [vmem:[%s9464_s2 + $0x1d8] sm:$0xff]  ;;  %5139 = vmatpush3.bf16.msra.mxu1 %v5318_v38  ;;  %v914_v11 = vstv %s6863_s27  ;;  %s7290_s27 = sld [smem:[#allocation3 + $0x18d]]  ;;  %s7367_s12 = sld [smem:[#allocation3 + $0x197]] }
  0xa7   :  { %9765 = vst [vmem:[#allocation43_spill] sm:$0xff] %v7074_v46  ;;  %v7079_v39 = vmul.f32 %v6986_v0, %v882_v15  ;;  %v7082_v4 = vmul.f32 %v6991_v48, %v890_v63  ;;  %v7085_v31 = vmul.f32 %v6996_v20, %v890_v63  ;;  %5140 = vmatprep.subr.bf16.mxu1 %v5320_v35  ;;  %v922_v48 = vstv %s6865_s21  ;;  %v7103_v63 = vld [vmem:[%s9464_s2 + $0x1e8] sm:$0xff]  ;;  %v5326_v20 = vld [vmem:[%s9465_s3 + $0x198] sm:$0xff]   ;;  %v7121_v35 = vld [vmem:[%s9464_s2 + $0x1f0] sm:$0xff]  ;;  %s7437_s21 = sld [smem:[#allocation3 + $0x200]] }
  0xa8   :  { %v837_v38 = vadd.f32 %v6938_v23, %v829_v14  ;;  %v838_v15 = vadd.f32 %v836_v58, %v830_v33  ;;  %v7097_v0 = vmul.f32 %v7011_v19, %v898_v54  ;;  %v7109_v45 = vmul.f32 %v7020_v61, %v898_v54  ;;  %v7126_v14 = vld [vmem:[%s9464_s2 + $0x1f8] sm:$0xff]  ;;  %v7131_v54 = vld [vmem:[%s9464_s2 + $0x200] sm:$0xff]  ;;  %9767 = vst [vmem:[#allocation45_spill] sm:$0xff] %v7147_v8 }
  0xa9   :  { %v7112_v23 = vmul.f32 %v7025_v5, %v906_v44  ;;  %v7115_v58 = vmul.f32 %v7043_v40, %v906_v44  ;;  %v930_v33 = vstv %s6874_s23  ;;  %9766 = vst [vmem:[#allocation44_spill] sm:$0xff] %v7126_v14  ;;  %v5328_v44 = vld [vmem:[%s9465_s3 + $0x1e0] sm:$0xff]   ;;  %v7141_v61 = vmul.f32 %v7048_v32, %v914_v11  ;;  %s7258_s23 = sld [smem:[#allocation3 + $0x18b]] }
  0xaa   :  { %v845_v40 = vadd.f32 %v6956_v24, %v837_v38  ;;  %v846_v5 = vadd.f32 %v6959_v7, %v838_v15  ;;  %v938_v19 = vstv %s6876_s19  ;;  %5141 = vmatpush3.bf16.msra.mxu1 %v5322_v47  ;;  %v7150_v60 = vmul.f32 %v7064_v12, %v914_v11  ;;  %v7162_v38 = vld [vmem:[%s9464_s2 + $0x210] sm:$0xff]  ;;  %s7377_s19 = sld [smem:[#allocation3 + $0x19a]] }
  0xab   :  { %v7153_v56 = vmul.f32 %v7069_v57, %v922_v48  ;;  %v7156_v24 = vmul.f32 %v7074_v46, %v922_v48  ;;  %v946_v7 = vstv %s6935_s0  ;;  %9768 = vst [vmem:[#allocation46_spill] sm:$0xff] %v7162_v38  ;;  %5142 = vmatprep.subr.bf16.mxu1 %v5324_v26  ;;  %v7167_v11 = vmul.f32 %v7091_v27, %v930_v33  ;;  %v7172_v57 = vld [vmem:[%s9464_s2 + $0x218] sm:$0xff]  ;;  %s7185_s0 = sld [smem:[#allocation3 + $0x185]] }
  0xac   :  { %v853_v15 = vadd.f32 %v6980_v1, %v845_v40  ;;  %v854_v47 = vadd.f32 %v6999_v52, %v846_v5  ;;  %9769 = vst [vmem:[#allocation47_spill] sm:$0xff] %v7172_v57  ;;  %v954_v48 = vstv %s6972_s20  ;;  %v7176_v46 = vmul.f32 %v7103_v63, %v930_v33  ;;  %s7197_s20 = sld [smem:[#allocation3 + $0x123]] }
  0xad   :  { %v7179_v12 = vmul.f32 %v7121_v35, %v938_v19  ;;  %v7182_v26 = vmul.f32 %v7126_v14, %v938_v19  ;;  %v993_v40 = vstv %s7050_s10  ;;  %v7192_v5 = vmul.f32 %v7131_v54, %v946_v7  ;;  %v5330_v19 = vld [vmem:[%s9465_s3 + $0x1a0] sm:$0xff]   ;;  %s7405_s10 = sld [smem:[#allocation3 + $0x19f]] }
  0xae   :  { %v861_v1 = vadd.f32 %v7002_v17, %v853_v15  ;;  %v862_v52 = vadd.f32 %v7005_v34, %v854_v47  ;;  %v7195_v33 = vmul.f32 %v7147_v8, %v946_v7  ;;  %5143 = vmatpush3.bf16.msra.mxu1 %v5326_v20  ;;  %v7203_v14 = vmul.f32 %v7162_v38, %v954_v48  ;;  %v5332_v20 = vld [vmem:[%s9465_s3 + $0x1e8] sm:$0xff]  }
  0xaf   :  { %v7206_v17 = vmul.f32 %v7172_v57, %v954_v48  ;;  %v994_v34 = vmul.f32 %v993_v40, %v6500_v49  ;;  %v995_v15 = vmul.f32 %v993_v40, %v6505_v2  ;;  %5144 = vmatprep.subr.bf16.mxu1 %v5328_v44  ;;  %v999_v38 = vstv %s7052_s14  ;;  %v5334_v49 = vld [vmem:[%s9465_s3 + $0x1a8] sm:$0xff]   ;;  %s7230_s14 = sld [smem:[#allocation5 + $0x2]] }
  0xb0   :  { %v869_v7 = vadd.f32 %v7014_v16, %v861_v1  ;;  %v870_v47 = vadd.f32 %v7031_v50, %v862_v52  ;;  %v1007_v8 = vstv %s7076_s28  ;;  %v1000_v2 = vmul.f32 %v6522_v3, %v999_v38  ;;  %s7236_s28 = sld [smem:[#allocation3 + $0x189]] }
  0xb1   :  { %v1001_v44 = vmul.f32 %v6527_v55, %v999_v38  ;;  %v1008_v48 = vmul.f32 %v6532_v6, %v1007_v8  ;;  %v1009_v40 = vmul.f32 %v6540_v9, %v1007_v8  ;;  %v1015_v1 = vstv %s7093_s15  ;;  %v5336_v9 = vld [vmem:[%s9465_s3 + $0x1f0] sm:$0xff]   ;;  %s7331_s15 = sld [smem:[#allocation3 + $0x191]] }
  0xb2   :  { %v877_v16 = vadd.f32 %v7034_v28, %v869_v7  ;;  %v878_v50 = vadd.f32 %v7037_v42, %v870_v47  ;;  %v1023_v52 = vstv %s7133_s1  ;;  %5145 = vmatpush3.bf16.msra.mxu1 %v5330_v19  ;;  %v1002_v3 = vadd.f32 %v1000_v2, %v994_v34  ;;  %s7339_s1 = sld [smem:[#allocation3 + $0x192]] }
  0xb3   :  { %v1003_v57 = vadd.f32 %v1001_v44, %v995_v15  ;;  %v1016_v55 = vmul.f32 %v6545_v43, %v1015_v1  ;;  %v1017_v6 = vmul.f32 %v6550_v41, %v1015_v1  ;;  %5146 = vmatprep.subr.bf16.mxu1 %v5332_v20  ;;  %v1024_v42 = vmul.f32 %v6581_v10, %v1023_v52  ;;  %v5338_v43 = vld [vmem:[%s9465_s3 + $0x1b0] sm:$0xff]   ;;  %v5342_v44 = vld [vmem:[%s9465_s3 + $0x1b8] sm:$0xff]  }
  0xb4   :  { %v885_v8 = vadd.f32 %v7058_v29, %v877_v16  ;;  %v886_v28 = vadd.f32 %v7079_v39, %v878_v50  ;;  %v1025_v38 = vmul.f32 %v6586_v51, %v1023_v52  ;;  %v1010_v41 = vadd.f32 %v1008_v48, %v1002_v3 }
  0xb5   :  { %v1011_v19 = vadd.f32 %v1009_v40, %v1003_v57  ;;  %v1031_v34 = vstv %s7185_s0  ;;  %v1039_v15 = vstv %s7187_s17  ;;  %v962_v39 = vstv %s6974_s25  ;;  %v5340_v57 = vld [vmem:[%s9465_s3 + $0x1f8] sm:$0xff]   ;;  %s7277_s0 = sld [smem:[#allocation3 + $0x18c]]  ;;  %s7369_s25 = sld [smem:[#allocation3 + $0x198]] }
  0xb6   :  { %v893_v20 = vadd.f32 %v7082_v4, %v885_v8  ;;  %v894_v29 = vadd.f32 %v7085_v31, %v886_v28  ;;  %v970_v7 = vstv %s7197_s20  ;;  %5147 = vmatpush3.bf16.msra.mxu1 %v5334_v49  ;;  %v1018_v10 = vadd.f32 %v1016_v55, %v1010_v41  ;;  %v7268_v49 = vld [vmem:[%s9464_s2 + $0x220] sm:$0xff]  ;;  %s7351_s20 = sld [smem:[#allocation3 + $0x194]]  ;;  %s7400_s17 = sld [smem:[#allocation3 + $0x19e]] }
  0xb7   :  { %v1019_v51 = vadd.f32 %v1017_v6, %v1011_v19  ;;  %v1032_v47 = vmul.f32 %v6594_v21, %v1031_v34  ;;  %v1033_v2 = vmul.f32 %v6606_v22, %v1031_v34  ;;  %5148 = vmatprep.subr.bf16.mxu1 %v5336_v9  ;;  %v1040_v21 = vmul.f32 %v6622_v37, %v1039_v15  ;;  %v7284_v37 = vld [vmem:[%s9464_s2 + $0x228] sm:$0xff]  ;;  %v7317_v19 = vld [vmem:[%s9464_s2 + $0x238] sm:$0xff] }
  0xb8   :  { %v901_v4 = vadd.f32 %v7097_v0, %v893_v20  ;;  %v902_v31 = vadd.f32 %v7109_v45, %v894_v29  ;;  %v1047_v22 = vstv %s7217_s11  ;;  %v1026_v48 = vadd.f32 %v1024_v42, %v1018_v10  ;;  %s7439_s11 = sld [smem:[#allocation3 + $0x201]] }
  0xb9   :  { %v1027_v40 = vadd.f32 %v1025_v38, %v1019_v51  ;;  %v1041_v16 = vmul.f32 %v6627_v36, %v1039_v15  ;;  %v1055_v0 = vstv %s7226_s9  ;;  %v976_v1 = vstv %s7230_s14  ;;  %s7308_s9 = sld [smem:[#allocation3 + $0x18f]]  ;;  %v9770_v51 = vld [vmem:[#allocation9_spill] sm:$0xff]  ;;  %s7398_s14 = sld [smem:[#allocation3 + $0x19d]] }
  0xba   :  { %v909_v45 = vadd.f32 %v7112_v23, %v901_v4  ;;  %v910_v50 = vadd.f32 %v7115_v58, %v902_v31  ;;  %v1048_v52 = vmul.f32 %v6636_v30, %v1047_v22  ;;  %5149 = vmatpush3.bf16.msra.mxu1 %v5338_v43  ;;  %v1034_v3 = vadd.f32 %v1032_v47, %v1026_v48  ;;  %v5344_v30 = vld [vmem:[%s9465_s3 + $0x2c0] sm:$0xff]  }
  0xbb   :  { %v1035_v55 = vadd.f32 %v1033_v2, %v1027_v40  ;;  %v1049_v36 = vmul.f32 %v6654_v25, %v1047_v22  ;;  %v1063_v6 = vstv %s7236_s28  ;;  %5150 = vmatprep.subr.bf16.mxu1 %v5340_v57  ;;  %v963_v9 = vmul.f32 %v7268_v49, %v962_v39  ;;  %v7304_v25 = vld [vmem:[%s9464_s2 + $0x230] sm:$0xff]  ;;  %v9771_v57 = vld [vmem:[#allocation10_spill] sm:$0xff]  ;;  %s7461_s28 = sld [smem:[#allocation3 + $0x1a3]] }
  0xbc   :  { %v917_v23 = vadd.f32 %v7141_v61, %v909_v45  ;;  %v918_v58 = vadd.f32 %v7150_v60, %v910_v50  ;;  %v1056_v8 = vmul.f32 %v6672_v53, %v1055_v0  ;;  %v1042_v28 = vadd.f32 %v1040_v21, %v1034_v3  ;;  %v9772_v21 = vld [vmem:[#allocation50_spill] sm:$0xff]  ;;  %v9774_v45 = vld [vmem:[#allocation12_spill] sm:$0xff] }
  0xbd   :  { %v1043_v61 = vadd.f32 %v1041_v16, %v1035_v55  ;;  %v1057_v60 = vmul.f32 %v6677_v18, %v1055_v0  ;;  %v1071_v42 = vstv %s7250_s24  ;;  %v964_v43 = vmul.f32 %v7284_v37, %v962_v39  ;;  %s7343_s24 = sld [smem:[#allocation3 + $0x193]] }
  0xbe   :  { %v925_v53 = vadd.f32 %v7153_v56, %v917_v23  ;;  %v926_v38 = vadd.f32 %v7156_v24, %v918_v58  ;;  %v1064_v41 = vmul.f32 %v6686_v62, %v1063_v6  ;;  %5151 = vmatpush3.bf16.msra.mxu1 %v5342_v44  ;;  %v1050_v18 = vadd.f32 %v1048_v52, %v1042_v28 }
  0xbf   :  { %v1051_v34 = vadd.f32 %v1049_v36, %v1043_v61  ;;  %v1065_v15 = vmul.f32 %v6700_v13, %v1063_v6  ;;  %v1079_v20 = vstv %s7258_s23  ;;  %v971_v62 = vmul.f32 %v7304_v25, %v970_v7  ;;  %5180 = vmatprep.subr.bf16.mxu1 %v5344_v30  ;;  %v9775_v36 = vld [vmem:[#allocation52_spill] sm:$0xff]  ;;  %v9776_v6 = vld [vmem:[#allocation53_spill] sm:$0xff]  ;;  %s7359_s23 = sld [smem:[#allocation3 + $0x195]] }
  0xc0   :  { %v933_v56 = vadd.f32 %v7167_v11, %v925_v53  ;;  %v934_v24 = vadd.f32 %v7176_v46, %v926_v38  ;;  %v1072_v29 = vmul.f32 %v6722_v59, %v1071_v42  ;;  %v1058_v39 = vadd.f32 %v1056_v8, %v1050_v18  ;;  %v9777_v8 = vld [vmem:[#allocation13_spill] sm:$0xff]  ;;  %v9780_v18 = vld [vmem:[#allocation16_spill] sm:$0xff] }
  0xc1   :  { %v1059_v10 = vadd.f32 %v1057_v60, %v1051_v34  ;;  %v1073_v47 = vmul.f32 %v9770_v51, %v1071_v42  ;;  %v1087_v13 = vstv %s7277_s0  ;;  %v972_v46 = vmul.f32 %v7317_v19, %v970_v7  ;;  %v9779_v42 = vld [vmem:[#allocation15_spill] sm:$0xff]  ;;  %s7391_s0 = sld [smem:[#allocation3 + $0x19c]] }
  0xc2   :  { %v941_v2 = vadd.f32 %v7179_v12, %v933_v56  ;;  %v942_v11 = vadd.f32 %v7182_v26, %v934_v24  ;;  %v1080_v4 = vmul.f32 %v9771_v57, %v1079_v20  ;;  %v1066_v59 = vadd.f32 %v1064_v41, %v1058_v39  ;;  %v9773_v26 = vld [vmem:[#allocation11_spill] sm:$0xff] }
  0xc3   :  { %v1067_v31 = vadd.f32 %v1065_v15, %v1059_v10  ;;  %v1081_v22 = vmul.f32 %v9772_v21, %v1079_v20  ;;  %v1095_v44 = vstv %s7290_s27  ;;  %v1088_v40 = vmul.f32 %v9773_v26, %v1087_v13  ;;  %v9782_v10 = vld [vmem:[#allocation18_spill] sm:$0xff]  ;;  %v9787_v26 = vld [vmem:[#allocation23_spill] sm:$0xff]  ;;  %s7409_s27 = sld [smem:[#allocation3 + $0x1a0]] }
  0xc4   :  { %v949_v48 = vadd.f32 %v7192_v5, %v941_v2  ;;  %v950_v12 = vadd.f32 %v7195_v33, %v942_v11  ;;  %v1103_v16 = vstv %s7296_s30  ;;  %v1074_v7 = vadd.f32 %v1072_v29, %v1066_v59  ;;  %v9783_v2 = vld [vmem:[#allocation19_spill] sm:$0xff]  ;;  %s7411_s30 = sld [smem:[#allocation3 + $0x1a1]] }
  0xc5   :  { %v1075_v0 = vadd.f32 %v1073_v47, %v1067_v31  ;;  %v1089_v50 = vmul.f32 %v9774_v45, %v1087_v13  ;;  %v1111_v52 = vstv %s7308_s9  ;;  %v1096_v5 = vmul.f32 %v9775_v36, %v1095_v44  ;;  %v9785_v31 = vld [vmem:[#allocation21_spill] sm:$0xff]  ;;  %s7459_s9 = sld [smem:[#allocation3 + $0x1a2]] }
  0xc6   :  { %v957_v3 = vadd.f32 %v7203_v14, %v949_v48  ;;  %v958_v55 = vadd.f32 %v7206_v17, %v950_v12  ;;  %v1097_v23 = vmul.f32 %v9776_v6, %v1095_v44  ;;  %v1082_v33 = vadd.f32 %v1080_v4, %v1074_v7  ;;  %v9778_v14 = vld [vmem:[#allocation14_spill] sm:$0xff] }
  0xc7   :  { %v1083_v58 = vadd.f32 %v1081_v22, %v1075_v0  ;;  %v1104_v30 = vmul.f32 %v9777_v8, %v1103_v16  ;;  %v1119_v28 = vstv %s7321_s8  ;;  %v1105_v17 = vmul.f32 %v9778_v14, %v1103_v16  ;;  %v9786_v48 = vld [vmem:[#allocation22_spill] sm:$0xff]  ;;  %v9793_v14 = vld [vmem:[#allocation29_spill] sm:$0xff]  ;;  %s7475_s8 = sld [smem:[#allocation3 + $0x204]] }
  0xc8   :  { %v965_v61 = vadd.f32 %v963_v9, %v957_v3  ;;  %v966_v60 = vadd.f32 %v964_v43, %v958_v55  ;;  %v1112_v53 = vmul.f32 %v9779_v42, %v1111_v52  ;;  %v1090_v38 = vadd.f32 %v1088_v40, %v1082_v33  ;;  %v9781_v9 = vld [vmem:[#allocation17_spill] sm:$0xff]  ;;  %v9788_v40 = vld [vmem:[#allocation24_spill] sm:$0xff]  ;;  %v9794_v42 = vld [vmem:[#allocation30_spill] sm:$0xff] }
  0xc9   :  { %v1091_v41 = vadd.f32 %v1089_v50, %v1083_v58  ;;  %v1113_v34 = vmul.f32 %v9780_v18, %v1111_v52  ;;  %v1127_v15 = vstv %s7331_s15  ;;  %v1120_v43 = vmul.f32 %v9781_v9, %v1119_v28  ;;  %v9789_v55 = vld [vmem:[#allocation25_spill] sm:$0xff]  ;;  %s7479_s15 = sld [smem:[#allocation3 + $0x205]] }
  0xca   :  { %v973_v20 = vadd.f32 %v971_v62, %v965_v61  ;;  %v974_v56 = vadd.f32 %v972_v46, %v966_v60  ;;  %v1135_v24 = vstv %s7339_s1  ;;  %v1098_v29 = vadd.f32 %v1096_v5, %v1090_v38  ;;  %v9784_v46 = vld [vmem:[#allocation20_spill] sm:$0xff]  ;;  %v9790_v5 = vld [vmem:[#allocation26_spill] sm:$0xff]  ;;  %s7481_s1 = sld [smem:[#allocation3 + $0x206]] }
  0xcb   :  { %v1099_v39 = vadd.f32 %v1097_v23, %v1091_v41  ;;  %v1121_v51 = vmul.f32 %v9782_v10, %v1119_v28  ;;  %v1143_v47 = vstv %s7343_s24  ;;  %v1128_v11 = vmul.f32 %v9783_v2, %v1127_v15  ;;  %v9792_v61 = vld [vmem:[#allocation28_spill] sm:$0xff]  ;;  %v9799_v2 = vld [vmem:[#allocation35_spill] sm:$0xff]  ;;  %s7655_s24 = sld [smem:[#allocation3 + $0x213]] }
  0xcc   :  { %v7381_v13 = vadd.f32 %v976_v1, %v973_v20  ;;  %v978_v62 = vadd.f32 %v976_v1, %v974_v56  ;;  %v1129_v57 = vmul.f32 %v9784_v46, %v1127_v15  ;;  %v1106_v4 = vadd.f32 %v1104_v30, %v1098_v29  ;;  %v9791_v30 = vld [vmem:[#allocation27_spill] sm:$0xff]  ;;  %v9796_v56 = vld [vmem:[#allocation32_spill] sm:$0xff]  ;;  %v9798_v29 = vld [vmem:[#allocation34_spill] sm:$0xff] }
  0xcd   :  { %v1107_v59 = vadd.f32 %v1105_v17, %v1099_v39  ;;  %v1136_v21 = vmul.f32 %v9785_v31, %v1135_v24  ;;  %v1151_v22 = vstv %s7351_s20  ;;  %v1137_v12 = vmul.f32 %v9786_v48, %v1135_v24  ;;  %v9795_v15 = vld [vmem:[#allocation31_spill] sm:$0xff]  ;;  %v9800_v46 = vld [vmem:[#allocation36_spill] sm:$0xff]  ;;  %v9802_v31 = vld [vmem:[#allocation38_spill] sm:$0xff]  ;;  %s7629_s20 = sld [smem:[#allocation3 + $0x211]] }
  0xce   :  { %v980_v44 = vmax.f32 %v978_v62, 0.0  ;;  %v1144_v1 = vmul.f32 %v9787_v26, %v1143_v47  ;;  %v1145_v16 = vmul.f32 %v9788_v40, %v1143_v47  ;;  %v1114_v7 = vadd.f32 %v1112_v53, %v1106_v4  ;;  %v9801_v4 = vld [vmem:[#allocation37_spill] sm:$0xff]  ;;  %v9803_v26 = vld [vmem:[#allocation39_spill] sm:$0xff] }
  0xcf   :  { %v1115_v0 = vadd.f32 %v1113_v34, %v1107_v59  ;;  %v1159_v45 = vstv %s7359_s23  ;;  %v1167_v50 = vstv %s7361_s18  ;;  %v979_v52 = vmax.f32 %v7381_v13, 0.0  ;;  %s7553_s18 = sld [smem:[#allocation3 + $0x209]]  ;;  %s7670_s23 = sld [smem:[#allocation3 + $0x215]] }
  0xd0   :  { %v5059_v3 = vpack.c.bf16 %v980_v44, %v980_v44  ;;  %v1152_v36 = vmul.f32 %v9789_v55, %v1151_v22  ;;  %v1153_v6 = vmul.f32 %v9790_v5, %v1151_v22  ;;  %v1122_v23 = vadd.f32 %v1120_v43, %v1114_v7  ;;  %v9797_v43 = vld [vmem:[#allocation33_spill] sm:$0xff]  ;;  %v9804_v7 = vld [vmem:[#allocation40_spill] sm:$0xff] }
  0xd1   :  { %v1123_v33 = vadd.f32 %v1121_v51, %v1115_v0  ;;  %v1175_v58 = vstv %s7367_s12  ;;  %v1183_v8 = vstv %s7369_s25  ;;  %v1160_v28 = vmul.f32 %v9791_v30, %v1159_v45  ;;  %v9805_v5 = vld [vmem:[#allocation41_spill] sm:$0xff]  ;;  %s7503_s12 = sld [smem:[#allocation3 + $0x207]] }
  0xd2   :  { %3702 = vmatprep.mubr.bf16.mxu0 %v5059_v3  ;;  %v1161_v60 = vmul.f32 %v9792_v61, %v1159_v45  ;;  %v7416_v17 = vmul.f32 %v9793_v14, %v1167_v50  ;;  %v7419_v53 = vmul.f32 %v9794_v42, %v1167_v50  ;;  %v1130_v38 = vadd.f32 %v1128_v11, %v1122_v23  ;;  %s7731_s25 = sld [smem:[#allocation3 + $0x217]] }
  0xd3   :  { %v1131_v41 = vadd.f32 %v1129_v57, %v1123_v33  ;;  %v1191_v18 = vstv %s7375_s26  ;;  %v1199_v34 = vstv %s7377_s19  ;;  %v7424_v20 = vmul.f32 %v9795_v15, %v1175_v58  ;;  %v9806_v33 = vld [vmem:[#allocation42_spill] sm:$0xff]  ;;  %s7611_s26 = sld [smem:[#allocation3 + $0x20f]]  ;;  %s7613_s19 = sld [smem:[#allocation3 + $0x210]] }
  0xd4   :  { %v7427_v9 = vmul.f32 %v9796_v56, %v1175_v58  ;;  %v7430_v24 = vmul.f32 %v9797_v43, %v1183_v8  ;;  %v7433_v39 = vmul.f32 %v9798_v29, %v1183_v8  ;;  %v1138_v10 = vadd.f32 %v1136_v21, %v1130_v38  ;;  %v9810_v56 = vld [vmem:[#allocation46_spill] sm:$0xff]  ;;  %v7546_v29 = vld [vmem:[%s9464_s2 + $0x20] sm:$0xff] }
  0xd5   :  { %v1139_v51 = vadd.f32 %v1137_v12, %v1131_v41  ;;  %v1207_v47 = vstv %s7389_s29  ;;  %v1215_v62 = vstv %s7391_s0  ;;  %v7442_v11 = vmul.f32 %v9799_v2, %v1191_v18  ;;  %v7517_v41 = vld [vmem:[%s9464_s2 + $0x8] sm:$0xff]  ;;  %s7573_s0 = sld [smem:[#allocation3 + $0x20a]] }
  0xd6   :  { %v7445_v57 = vmul.f32 %v9800_v46, %v1191_v18  ;;  %v7448_v59 = vmul.f32 %v9801_v4, %v1199_v34  ;;  %v7451_v22 = vmul.f32 %v9802_v31, %v1199_v34  ;;  %v1146_v21 = vadd.f32 %v1144_v1, %v1138_v10  ;;  %v9809_v34 = vld [vmem:[#allocation45_spill] sm:$0xff]  ;;  %v7551_v10 = vld [vmem:[%s9464_s2 + $0x28] sm:$0xff]  ;;  %v7566_v46 = vld [vmem:[%s9464_s2 + $0x30] sm:$0xff]  ;;  %s7641_s29 = sld [smem:[#allocation3 + $0x212]] }
  0xd7   :  { %v1147_v44 = vadd.f32 %v1145_v16, %v1139_v51  ;;  %v1223_v48 = vstv %s7398_s14  ;;  %v1231_v12 = vstv %s7400_s17  ;;  %v7464_v40 = vmul.f32 %v9803_v26, %v1207_v47  ;;  %v7571_v4 = vld [vmem:[%s9464_s2 + $0x38] sm:$0xff]  ;;  %s7885_s14 = sld [smem:[#allocation3 + $0x21b]]  ;;  %s8343_s17 = sld [smem:[#allocation3 + $0x291]] }
  0xd8   :  { %v7467_v0 = vmul.f32 %v9804_v7, %v1207_v47  ;;  %v7470_v45 = vmul.f32 %v7048_v32, %v1215_v62  ;;  %v1239_v50 = vstv %s7405_s10  ;;  %v1154_v1 = vadd.f32 %v1152_v36, %v1146_v21  ;;  %v9807_v32 = vld [vmem:[#allocation43_spill] sm:$0xff]  ;;  %v5345_v36 = vld [vmem:[%s9465_s3 + $0x200] sm:$0xff]   ;;  %s7582_s10 = sld [smem:[#allocation3 + $0x20b]] }
  0xd9   :  { %v1155_v16 = vadd.f32 %v1153_v6, %v1147_v44  ;;  %v1247_v3 = vstv %s7409_s27  ;;  %v1255_v55 = vstv %s7411_s30  ;;  %v7484_v23 = vmul.f32 %v9805_v5, %v1215_v62  ;;  %v7501_v6 = vld [vmem:[%s9464_s2] sm:$0xff]  ;;  %s7529_s27 = sld [smem:[#allocation3 + $0x208]]  ;;  %v9811_v47 = vld [vmem:[#allocation47_spill] sm:$0xff]  ;;  %s7584_s30 = sld [smem:[#allocation3 + $0x20c]] }
  0xda   :  { %v7487_v58 = vmul.f32 %v9806_v33, %v1223_v48  ;;  %v7490_v8 = vmul.f32 %v9807_v32, %v1223_v48  ;;  %v7493_v30 = vmul.f32 %v7091_v27, %v1231_v12  ;;  %v1162_v61 = vadd.f32 %v1160_v28, %v1154_v1  ;;  %v5347_v27 = vld [vmem:[%s9465_s3 + $0x248] sm:$0xff]   ;;  %v7522_v28 = vld [vmem:[%s9464_s2 + $0x10] sm:$0xff]  ;;  %v7604_v1 = vld [vmem:[%s9464_s2 + $0x40] sm:$0xff] }
  0xdb   :  { %v1163_v14 = vadd.f32 %v1161_v60, %v1155_v16  ;;  %v7506_v42 = vmul.f32 %v7103_v63, %v1231_v12  ;;  %v7509_v38 = vmul.f32 %v7121_v35, %v1239_v50  ;;  %v7527_v63 = vld [vmem:[%s9464_s2 + $0x18] sm:$0xff]  ;;  %v7535_v18 = vmul.f32 %v7131_v54, %v1247_v3  ;;  %v5351_v48 = vld [vmem:[%s9465_s3 + $0x250] sm:$0xff]   ;;  %v7609_v16 = vld [vmem:[%s9464_s2 + $0x48] sm:$0xff] }
  0xdc   :  { %v9808_v35 = vld [vmem:[#allocation44_spill] sm:$0xff]  ;;  %v7538_v15 = vmul.f32 %v9809_v34, %v1247_v3  ;;  %v7541_v43 = vmul.f32 %v9810_v56, %v1255_v55  ;;  %v1170_v54 = vadd.f32 %v7416_v17, %v1162_v61  ;;  %v7558_v62 = vmul.f32 %v9811_v47, %v1255_v55  ;;  %v5349_v17 = vld [vmem:[%s9465_s3 + $0x208] sm:$0xff]   ;;  %v7622_v32 = vld [vmem:[%s9464_s2 + $0x50] sm:$0xff] }
  0xdd   :  { %v7532_v60 = vmul.f32 %v9808_v35, %v1239_v50  ;;  %v1171_v51 = vadd.f32 %v7419_v53, %v1163_v14  ;;  %v5058_v2 = vpack.c.bf16 %v979_v52, %v979_v52  ;;  %v1294_v53 = vstv %s7437_s21  ;;  %s7593_s21 = sld [smem:[#allocation3 + $0x20d]]  ;;  %v7639_v35 = vld [vmem:[%s9464_s2 + $0x60] sm:$0xff]  ;;  %v5355_v47 = vld [vmem:[%s9465_s3 + $0x258] sm:$0xff]  }
  0xde   :  { %v1300_v13 = vstv %s7439_s11  ;;  %v1308_v31 = vstv %s7453_s22  ;;  %v1316_v52 = vstv %s7455_s16  ;;  %v1178_v21 = vadd.f32 %v7424_v20, %v1170_v54  ;;  %s7595_s11 = sld [smem:[#allocation3 + $0x20e]]  ;;  %s7668_s16 = sld [smem:[#allocation3 + $0x214]] }
  0xdf   :  { %v1179_v44 = vadd.f32 %v7427_v9, %v1171_v51  ;;  %3703 = vmatmul.mubr.bf16.vlgmr.msra.gmra.mrb[4].mxu0 %v5058_v2  ;;  %v1295_v12 = vmul.f32 %v1294_v53, %v7501_v6  ;;  %v1296_v26 = vmul.f32 %v1294_v53, %v7517_v41  ;;  %v1301_v7 = vmul.f32 %v7522_v28, %v1300_v13  ;;  %v7653_v2 = vld [vmem:[%s9464_s2 + $0x68] sm:$0xff]  ;;  %s8052_s22 = sld [smem:[#allocation3 + $0x280]] }
  0xe0   :  { %5159 = vmatpush3.bf16.msra.mxu0 %v5345_v36  ;;  %v1302_v20 = vmul.f32 %v7527_v63, %v1300_v13  ;;  %v1309_v9 = vmul.f32 %v7546_v29, %v1308_v31  ;;  %v1310_v50 = vmul.f32 %v7551_v10, %v1308_v31  ;;  %v1186_v3 = vadd.f32 %v7430_v24, %v1178_v21  ;;  %v7627_v36 = vld [vmem:[%s9464_s2 + $0x58] sm:$0xff]  ;;  %v5353_v24 = vld [vmem:[%s9465_s3 + $0x210] sm:$0xff]  }
  0xe1   :  { %v1187_v55 = vadd.f32 %v7433_v39, %v1179_v44  ;;  %5160 = vmatprep.subr.bf16.mxu0 %v5347_v27  ;;  %v1317_v5 = vmul.f32 %v7566_v46, %v1316_v52  ;;  %v1318_v33 = vmul.f32 %v7571_v4, %v1316_v52  ;;  %v1303_v39 = vadd.f32 %v1301_v7, %v1295_v12  ;;  %v7662_v31 = vld [vmem:[%s9464_s2 + $0x70] sm:$0xff]  ;;  %v5357_v12 = vld [vmem:[%s9465_s3 + $0x218] sm:$0xff]  }
  0xe2   :  { %v1304_v61 = vadd.f32 %v1302_v20, %v1296_v26  ;;  %v1324_v14 = vstv %s7475_s8  ;;  %v1332_v27 = vstv %s7479_s15  ;;  %v1194_v34 = vadd.f32 %v7442_v11, %v1186_v3  ;;  %v5359_v3 = vld [vmem:[%s9465_s3 + $0x260] sm:$0xff]   ;;  %s7708_s8 = sld [smem:[#allocation3 + $0x216]] }
  0xe3   :  { %v1195_v56 = vadd.f32 %v7445_v57, %v1187_v55  ;;  %v1263_v54 = vstv %s7459_s9  ;;  %v1271_v51 = vstv %s7461_s28  ;;  %v1311_v53 = vadd.f32 %v1309_v9, %v1303_v39  ;;  %s7756_s9 = sld [smem:[#allocation3 + $0x218]]  ;;  %s7970_s15 = sld [smem:[#allocation3 + $0x21e]] }
  0xe4   :  { %5161 = vmatpush3.bf16.msra.mxu0 %v5349_v17  ;;  %v1312_v13 = vadd.f32 %v1310_v50, %v1304_v61  ;;  %v1325_v11 = vmul.f32 %v7604_v1, %v1324_v14  ;;  %v1326_v57 = vmul.f32 %v7609_v16, %v1324_v14  ;;  %v1202_v52 = vadd.f32 %v7448_v59, %v1194_v34  ;;  %v7679_v59 = vld [vmem:[%s9464_s2 + $0x78] sm:$0xff]  ;;  %v7706_v61 = vld [vmem:[%s9464_s2 + $0x90] sm:$0xff]  ;;  %s7989_s28 = sld [smem:[#allocation3 + $0x21f]] }
  0xe5   :  { %v1203_v21 = vadd.f32 %v7451_v22, %v1195_v56  ;;  %5162 = vmatprep.subr.bf16.mxu0 %v5351_v48  ;;  %v1333_v44 = vmul.f32 %v7622_v32, %v1332_v27  ;;  %v1340_v17 = vstv %s7481_s1  ;;  %v1319_v26 = vadd.f32 %v1317_v5, %v1311_v53  ;;  %v7694_v5 = vld [vmem:[%s9464_s2 + $0x80] sm:$0xff]  ;;  %v7719_v56 = vld [vmem:[%s9464_s2 + $0x98] sm:$0xff]  ;;  %s7821_s1 = sld [smem:[#allocation3 + $0x21a]] }
  0xe6   :  { %v1320_v7 = vadd.f32 %v1318_v33, %v1312_v13  ;;  %v1334_v20 = vmul.f32 %v7627_v36, %v1332_v27  ;;  %v1348_v22 = vstv %s7503_s12  ;;  %v1210_v48 = vadd.f32 %v7464_v40, %v1202_v52  ;;  %v5361_v53 = vld [vmem:[%s9465_s3 + $0x220] sm:$0xff]   ;;  %v5363_v52 = vld [vmem:[%s9465_s3 + $0x268] sm:$0xff]   ;;  %s8218_s12 = sld [smem:[#allocation3 + $0x222]] }
  0xe7   :  { %v1211_v9 = vadd.f32 %v7467_v0, %v1203_v21  ;;  %v7685_v50 = vmul.f32 %v7268_v49, %v1263_v54  ;;  %v1341_v55 = vmul.f32 %v7639_v35, %v1340_v17  ;;  %v1327_v33 = vadd.f32 %v1325_v11, %v1319_v26  ;;  %v7700_v49 = vld [vmem:[%s9464_s2 + $0x88] sm:$0xff] }
  0xe8   :  { %5163 = vmatpush3.bf16.msra.mxu0 %v5353_v24  ;;  %v1328_v39 = vadd.f32 %v1326_v57, %v1320_v7  ;;  %v1342_v40 = vmul.f32 %v7653_v2, %v1340_v17  ;;  %v1356_v0 = vstv %s7529_s27  ;;  %v1218_v24 = vadd.f32 %v7470_v45, %v1210_v48  ;;  %v7769_v48 = vld [vmem:[%s9464_s2 + $0xb8] sm:$0xff]  ;;  %s7786_s27 = sld [smem:[#allocation3 + $0x219]] }
  0xe9   :  { %v1219_v14 = vadd.f32 %v7484_v23, %v1211_v9  ;;  %v7713_v27 = vmul.f32 %v7284_v37, %v1263_v54  ;;  %5164 = vmatprep.subr.bf16.mxu0 %v5355_v47  ;;  %v1349_v34 = vmul.f32 %v7662_v31, %v1348_v22  ;;  %v1335_v13 = vadd.f32 %v1333_v44, %v1327_v33  ;;  %v7729_v37 = vld [vmem:[%s9464_s2 + $0xa0] sm:$0xff]  ;;  %v7747_v44 = vld [vmem:[%s9464_s2 + $0xa8] sm:$0xff] }
  0xea   :  { %v1336_v45 = vadd.f32 %v1334_v20, %v1328_v39  ;;  %v1350_v23 = vmul.f32 %v7679_v59, %v1348_v22  ;;  %v1364_v11 = vstv %s7553_s18  ;;  %v1226_v54 = vadd.f32 %v7487_v58, %v1218_v24  ;;  %v5365_v9 = vld [vmem:[%s9465_s3 + $0x228] sm:$0xff]   ;;  %s8271_s18 = sld [smem:[#allocation3 + $0x28b]] }
  0xeb   :  { %v1227_v47 = vadd.f32 %v7490_v8, %v1219_v14  ;;  %v7738_v57 = vmul.f32 %v7304_v25, %v1271_v51  ;;  %v1357_v21 = vmul.f32 %v7694_v5, %v1356_v0  ;;  %v1343_v17 = vadd.f32 %v1341_v55, %v1335_v13  ;;  %v7754_v25 = vld [vmem:[%s9464_s2 + $0xb0] sm:$0xff] }
  0xec   :  { %5165 = vmatpush3.bf16.msra.mxu0 %v5357_v12  ;;  %v1344_v58 = vadd.f32 %v1342_v40, %v1336_v45  ;;  %v1358_v8 = vmul.f32 %v7700_v49, %v1356_v0  ;;  %v1372_v26 = vstv %s7573_s0  ;;  %v1234_v7 = vadd.f32 %v7493_v30, %v1226_v54  ;;  %v5367_v0 = vld [vmem:[%s9465_s3 + $0x270] sm:$0xff]   ;;  %s8031_s0 = sld [smem:[#allocation3 + $0x221]] }
  0xed   :  { %v1235_v20 = vadd.f32 %v7506_v42, %v1227_v47  ;;  %v7763_v12 = vmul.f32 %v7317_v19, %v1271_v51  ;;  %5166 = vmatprep.subr.bf16.mxu0 %v5359_v3  ;;  %v1365_v22 = vmul.f32 %v7706_v61, %v1364_v11  ;;  %v1351_v30 = vadd.f32 %v1349_v34, %v1343_v17  ;;  %v7779_v19 = vld [vmem:[%s9464_s2 + $0xc0] sm:$0xff]  ;;  %v7784_v51 = vld [vmem:[%s9464_s2 + $0xc8] sm:$0xff]  ;;  %v7798_v14 = vld [vmem:[%s9464_s2 + $0xd0] sm:$0xff] }
  0xee   :  { %v1352_v55 = vadd.f32 %v1350_v23, %v1344_v58  ;;  %v1366_v42 = vmul.f32 %v7719_v56, %v1364_v11  ;;  %v1380_v33 = vstv %s7582_s10  ;;  %9812 = vst [vmem:[#allocation48_spill] sm:$0xff] %v7779_v19  ;;  %9813 = vst [vmem:[#allocation49_spill] sm:$0xff] %v7784_v51  ;;  %v1242_v3 = vadd.f32 %v7509_v38, %v1234_v7  ;;  %s8380_s10 = sld [smem:[#allocation3 + $0x297]] }
  0xef   :  { %v1243_v39 = vadd.f32 %v7532_v60, %v1235_v20  ;;  %v1277_v40 = vstv %s7473_s13  ;;  %v1373_v24 = vmul.f32 %v7729_v37, %v1372_v26  ;;  %9814 = vst [vmem:[#allocation51_spill] sm:$0xff] %v7798_v14  ;;  %v1359_v34 = vadd.f32 %v1357_v21, %v1351_v30  ;;  %v7805_v60 = vld [vmem:[%s9464_s2 + $0xd8] sm:$0xff]  ;;  %v7819_v21 = vld [vmem:[%s9464_s2 + $0xe8] sm:$0xff]  ;;  %s8377_s13 = sld [smem:[#allocation3 + $0x296]] }
  0xf0   :  { %5167 = vmatpush3.bf16.msra.mxu0 %v5361_v53  ;;  %v1360_v13 = vadd.f32 %v1358_v8, %v1352_v55  ;;  %v1374_v38 = vmul.f32 %v7747_v44, %v1372_v26  ;;  %v1388_v45 = vstv %s7584_s30  ;;  %9815 = vst [vmem:[#allocation54_spill] sm:$0xff] %v7805_v60  ;;  %v1250_v23 = vadd.f32 %v7535_v18, %v1242_v3  ;;  %v7814_v53 = vld [vmem:[%s9464_s2 + $0xe0] sm:$0xff]  ;;  %v5369_v18 = vld [vmem:[%s9465_s3 + $0x230] sm:$0xff]   ;;  %v5371_v20 = vld [vmem:[%s9465_s3 + $0x278] sm:$0xff]   ;;  %s8014_s30 = sld [smem:[#allocation3 + $0x220]] }
  0xf1   :  { %v1251_v11 = vadd.f32 %v7538_v15, %v1243_v39  ;;  %5168 = vmatprep.subr.bf16.mxu0 %v5363_v52  ;;  %v1381_v54 = vmul.f32 %v7754_v25, %v1380_v33  ;;  %v1396_v47 = vstv %s7593_s21  ;;  %9816 = vst [vmem:[#allocation55_spill] sm:$0xff] %v7814_v53  ;;  %9817 = vst [vmem:[#allocation56_spill] sm:$0xff] %v7819_v21  ;;  %v1404_v58 = vstv %s7595_s11  ;;  %v7831_v8 = vld [vmem:[%s9464_s2 + $0xf0] sm:$0xff]  ;;  %v7843_v55 = vld [vmem:[%s9464_s2 + $0xf8] sm:$0xff]  ;;  %s8388_s21 = sld [smem:[#allocation3 + $0x299]]  ;;  %s8417_s11 = sld [smem:[#allocation3 + $0x2a0]] }
  0xf2   :  { %v1367_v15 = vadd.f32 %v1365_v22, %v1359_v34  ;;  %v1368_v52 = vadd.f32 %v1366_v42, %v1360_v13  ;;  %v1382_v17 = vmul.f32 %v7769_v48, %v1380_v33  ;;  %9818 = vst [vmem:[#allocation9_spill] sm:$0xff] %v7831_v8  ;;  %v1258_v26 = vadd.f32 %v7541_v43, %v1250_v23  ;;  %v7850_v3 = vld [vmem:[%s9464_s2 + $0x100] sm:$0xff] }
  0xf3   :  { %v1259_v7 = vadd.f32 %v7558_v62, %v1251_v11  ;;  %v1389_v30 = vmul.f32 %v7779_v19, %v1388_v45  ;;  %v1390_v22 = vmul.f32 %v7784_v51, %v1388_v45  ;;  %9819 = vst [vmem:[#allocation10_spill] sm:$0xff] %v7843_v55  ;;  %v1397_v43 = vmul.f32 %v7798_v14, %v1396_v47  ;;  %v8176_v51 = vld [vmem:[%s9464_s2 + $0x218] sm:$0xff] }
  0xf4   :  { %5169 = vmatpush3.bf16.msra.mxu0 %v5365_v9  ;;  %v1375_v42 = vadd.f32 %v1373_v24, %v1367_v15  ;;  %v1376_v33 = vadd.f32 %v1374_v38, %v1368_v52  ;;  %v1412_v62 = vstv %s7611_s26  ;;  %9820 = vst [vmem:[#allocation50_spill] sm:$0xff] %v7850_v3  ;;  %v1266_v39 = vadd.f32 %v7685_v50, %v1258_v26  ;;  %v7859_v24 = vld [vmem:[%s9464_s2 + $0x108] sm:$0xff]  ;;  %v5373_v38 = vld [vmem:[%s9465_s3 + $0x238] sm:$0xff]   ;;  %s8375_s26 = sld [smem:[#allocation3 + $0x295]] }
  0xf5   :  { %v1267_v34 = vadd.f32 %v7713_v27, %v1259_v7  ;;  %5170 = vmatprep.subr.bf16.mxu0 %v5367_v0  ;;  %v1398_v13 = vmul.f32 %v7805_v60, %v1396_v47  ;;  %v1405_v9 = vmul.f32 %v7814_v53, %v1404_v58  ;;  %9821 = vst [vmem:[#allocation11_spill] sm:$0xff] %v7859_v24  ;;  %v1420_v27 = vstv %s7613_s19  ;;  %v7869_v0 = vld [vmem:[%s9464_s2 + $0x110] sm:$0xff]  ;;  %v7891_v26 = vld [vmem:[%s9464_s2 + $0x128] sm:$0xff]  ;;  %s7930_s19 = sld [smem:[#allocation3 + $0x21c]] }
  0xf6   :  { %v1383_v45 = vadd.f32 %v1381_v54, %v1375_v42  ;;  %v1384_v23 = vadd.f32 %v1382_v17, %v1376_v33  ;;  %v1406_v50 = vmul.f32 %v7819_v21, %v1404_v58  ;;  %9822 = vst [vmem:[#allocation12_spill] sm:$0xff] %v7869_v0  ;;  %v1274_v11 = vadd.f32 %v7738_v57, %v1266_v39  ;;  %v7877_v54 = vld [vmem:[%s9464_s2 + $0x118] sm:$0xff]  ;;  %v7883_v17 = vld [vmem:[%s9464_s2 + $0x120] sm:$0xff]  ;;  %v7897_v42 = vld [vmem:[%s9464_s2 + $0x130] sm:$0xff] }
  0xf7   :  { %v1275_v47 = vadd.f32 %v7763_v12, %v1267_v34  ;;  %v1413_v15 = vmul.f32 %v7831_v8, %v1412_v62  ;;  %9823 = vst [vmem:[#allocation52_spill] sm:$0xff] %v7877_v54  ;;  %v1428_v52 = vstv %s7629_s20  ;;  %9824 = vst [vmem:[#allocation53_spill] sm:$0xff] %v7883_v17  ;;  %v1414_v12 = vmul.f32 %v7843_v55, %v1412_v62  ;;  %v5375_v62 = vld [vmem:[%s9465_s3 + $0x340] sm:$0xff]   ;;  %v7987_v8 = vld [vmem:[%s9464_s2 + $0x188] sm:$0xff]  ;;  %s8325_s20 = sld [smem:[#allocation3 + $0x28f]] }
  0xf8   :  { %5171 = vmatpush3.bf16.msra.mxu0 %v5369_v18  ;;  %v1391_v58 = vadd.f32 %v1389_v30, %v1383_v45  ;;  %v1392_v57 = vadd.f32 %v1390_v22, %v1384_v23  ;;  %9825 = vst [vmem:[#allocation13_spill] sm:$0xff] %v7891_v26  ;;  %v1436_v7 = vstv %s7641_s29  ;;  %9826 = vst [vmem:[#allocation14_spill] sm:$0xff] %v7897_v42  ;;  %v7912_v23 = vld [vmem:[%s9464_s2 + $0x138] sm:$0xff]  ;;  %v1452_v55 = vstv %s7668_s16  ;;  %s7954_s29 = sld [smem:[#allocation3 + $0x21d]]  ;;  %v8007_v21 = vld [vmem:[%s9464_s2 + $0x190] sm:$0xff]  ;;  %s8369_s16 = sld [smem:[#allocation3 + $0x294]] }
  0xf9   :  { %v1278_v33 = vadd.f32 %v1277_v40, %v1274_v11  ;;  %v1279_v18 = vadd.f32 %v1277_v40, %v1275_v47  ;;  %5172 = vmatprep.subr.bf16.mxu0 %v5371_v20  ;;  %v1421_v30 = vmul.f32 %v7850_v3, %v1420_v27  ;;  %v1422_v22 = vmul.f32 %v7859_v24, %v1420_v27  ;;  %v7918_v20 = vld [vmem:[%s9464_s2 + $0x140] sm:$0xff]  ;;  %v8029_v53 = vld [vmem:[%s9464_s2 + $0x1a8] sm:$0xff] }
  0xfa   :  { %v1399_v39 = vadd.f32 %v1397_v43, %v1391_v58  ;;  %v1400_v34 = vadd.f32 %v1398_v13, %v1392_v57  ;;  %v1429_v45 = vmul.f32 %v7869_v0, %v1428_v52  ;;  %9827 = vst [vmem:[#allocation15_spill] sm:$0xff] %v7912_v23  ;;  %v1444_v40 = vstv %s7655_s24  ;;  %9828 = vst [vmem:[#allocation16_spill] sm:$0xff] %v7918_v20  ;;  %v7923_v43 = vld [vmem:[%s9464_s2 + $0x148] sm:$0xff]  ;;  %v7928_v13 = vld [vmem:[%s9464_s2 + $0x150] sm:$0xff]  ;;  %s8123_s24 = sld [smem:[#allocation3 + $0x284]] }
  0xfb   :  { %9829 = vst [vmem:[#allocation17_spill] sm:$0xff] %v7923_v43  ;;  %9830 = vst [vmem:[#allocation18_spill] sm:$0xff] %v7928_v13  ;;  %v1280_v27 = vmax.f32 %v1278_v33, 0.0  ;;  %v1281_v11 = vmax.f32 %v1279_v18, 0.0  ;;  %v5346_v47 = vld [vmem:[%s9465_s3 + $0x280] sm:$0xff]   ;;  %v1430_v58 = vmul.f32 %v7877_v54, %v1428_v52  ;;  %v7937_v57 = vmul.f32 %v7883_v17, %v1436_v7  ;;  %v5348_v0 = vld [vmem:[%s9465_s3 + $0x2c8] sm:$0xff]  }
  0xfc   :  { %5173 = vmatpush3.bf16.msra.mxu0 %v5373_v38  ;;  %v1407_v24 = vadd.f32 %v1405_v9, %v1399_v39  ;;  %v1408_v3 = vadd.f32 %v1406_v50, %v1400_v34  ;;  %v7946_v33 = vld [vmem:[%s9464_s2 + $0x158] sm:$0xff]  ;;  %v1460_v18 = vstv %s7670_s23  ;;  %v7952_v52 = vld [vmem:[%s9464_s2 + $0x160] sm:$0xff]  ;;  %v1438_v9 = vmul.f32 %v7891_v26, %v1436_v7  ;;  %v7963_v39 = vld [vmem:[%s9464_s2 + $0x168] sm:$0xff]  ;;  %9837 = vst [vmem:[#allocation25_spill] sm:$0xff] %v7987_v8  ;;  %s8096_s23 = sld [smem:[#allocation3 + $0x283]] }
  0xfd   :  { %9831 = vst [vmem:[#allocation19_spill] sm:$0xff] %v7946_v33  ;;  %9832 = vst [vmem:[#allocation20_spill] sm:$0xff] %v7952_v52  ;;  %v5061_v17 = vpack.c.bf16 %v1281_v11, %v1281_v11  ;;  %v5060_v38 = vpack.c.bf16 %v1280_v27, %v1280_v27  ;;  %v7958_v50 = vmul.f32 %v7897_v42, %v1444_v40  ;;  %v7968_v34 = vld [vmem:[%s9464_s2 + $0x170] sm:$0xff]  ;;  %5202 = vmatprep.subr.bf16.mxu0 %v5375_v62  ;;  %v7976_v7 = vld [vmem:[%s9464_s2 + $0x178] sm:$0xff] }
  0xfe   :  { %9833 = vst [vmem:[#allocation21_spill] sm:$0xff] %v7963_v39  ;;  %9834 = vst [vmem:[#allocation22_spill] sm:$0xff] %v7968_v34  ;;  %v1415_v11 = vadd.f32 %v1413_v15, %v1407_v24  ;;  %v1416_v27 = vadd.f32 %v1414_v12, %v1408_v3  ;;  %v1468_v54 = vstv %s7708_s8  ;;  %v1476_v42 = vstv %s7731_s25  ;;  %v7982_v26 = vld [vmem:[%s9464_s2 + $0x180] sm:$0xff]  ;;  %v5350_v3 = vld [vmem:[%s9465_s3 + $0x288] sm:$0xff]   ;;  %s8220_s8 = sld [smem:[#allocation3 + $0x223]]  ;;  %s8234_s25 = sld [smem:[#allocation3 + $0x287]] }
  0xff   :  { %9835 = vst [vmem:[#allocation23_spill] sm:$0xff] %v7976_v7  ;;  %9836 = vst [vmem:[#allocation24_spill] sm:$0xff] %v7982_v26  ;;  %3742 = vmatprep.mubr.bf16.mxu1 %v5061_v17  ;;  %v1446_v24 = vmul.f32 %v7912_v23, %v1444_v40  ;;  %v7996_v15 = vmul.f32 %v7918_v20, %v1452_v55  ;;  %v7999_v12 = vmul.f32 %v7923_v43, %v1452_v55  ;;  %v8012_v17 = vld [vmem:[%s9464_s2 + $0x198] sm:$0xff]  ;;  %v5352_v55 = vld [vmem:[%s9465_s3 + $0x2d0] sm:$0xff]  }
 0x100   :  { %v8002_v62 = vmul.f32 %v7928_v13, %v1460_v18  ;;  %9838 = vst [vmem:[#allocation26_spill] sm:$0xff] %v8007_v21  ;;  %9839 = vst [vmem:[#allocation27_spill] sm:$0xff] %v8012_v17  ;;  %3743 = vmatmul.mubr.bf16.vlgmr.msra.gmra.mrb[4].mxu1 %v5060_v38  ;;  %v1423_v40 = vadd.f32 %v1421_v30, %v1415_v11  ;;  %v1424_v13 = vadd.f32 %v1422_v22, %v1416_v27  ;;  %v8024_v23 = vld [vmem:[%s9464_s2 + $0x1a0] sm:$0xff]  ;;  %v8048_v27 = vld [vmem:[%s9464_s2 + $0x1b0] sm:$0xff] }
 0x101   :  { %v1484_v43 = vstv %s7756_s9  ;;  %v1492_v20 = vstv %s7786_s27  ;;  %9840 = vst [vmem:[#allocation28_spill] sm:$0xff] %v8024_v23  ;;  %9841 = vst [vmem:[#allocation29_spill] sm:$0xff] %v8029_v53  ;;  %5181 = vmatpush3.bf16.msra.mxu1 %v5346_v47  ;;  %v8034_v30 = vmul.f32 %v7946_v33, %v1460_v18  ;;  %v8037_v22 = vmul.f32 %v7952_v52, %v1468_v54  ;;  %s8302_s27 = sld [smem:[#allocation5 + $0x4]] }
 0x102   :  { %v8040_v38 = vmul.f32 %v7963_v39, %v1468_v54  ;;  %v8043_v11 = vmul.f32 %v7968_v34, %v1476_v42  ;;  %9842 = vst [vmem:[#allocation30_spill] sm:$0xff] %v8048_v27  ;;  %5182 = vmatprep.subr.bf16.mxu1 %v5348_v0  ;;  %v1431_v60 = vadd.f32 %v1429_v45, %v1423_v40  ;;  %v1500_v14 = vstv %s7821_s1  ;;  %v5354_v54 = vld [vmem:[%s9465_s3 + $0x290] sm:$0xff]   ;;  %s8069_s1 = sld [smem:[#allocation3 + $0x281]]  ;;  %v5356_v45 = vld [vmem:[%s9465_s3 + $0x2d8] sm:$0xff]   ;;  %v8088_v40 = vld [vmem:[%s9464_s2 + $0x1c0] sm:$0xff]  ;;  %s8404_s9 = sld [smem:[#allocation3 + $0x29c]] }
 0x103   :  { %v1432_v47 = vadd.f32 %v1430_v58, %v1424_v13  ;;  %v1508_v18 = vstv %s7885_s14  ;;  %v8058_v34 = vmul.f32 %v7976_v7, %v1476_v42  ;;  %v8061_v39 = vmul.f32 %v7982_v26, %v1484_v43  ;;  %s8071_s14 = sld [smem:[#allocation3 + $0x282]]  ;;  %9844 = vst [vmem:[#allocation32_spill] sm:$0xff] %v8088_v40  ;;  %v8135_v26 = vld [vmem:[%s9464_s2 + $0x1f0] sm:$0xff]  ;;  %9853 = vst [vmem:[#allocation41_spill] sm:$0xff] %v8176_v51 }
 0x104   :  { %v8064_v52 = vmul.f32 %v7987_v8, %v1484_v43  ;;  %v8067_v0 = vmul.f32 %v8007_v21, %v1492_v20  ;;  %v1439_v42 = vadd.f32 %v7937_v57, %v1431_v60  ;;  %v8078_v58 = vmul.f32 %v8012_v17, %v1492_v20  ;;  %v8083_v43 = vld [vmem:[%s9464_s2 + $0x1b8] sm:$0xff]  ;;  %v8093_v21 = vld [vmem:[%s9464_s2 + $0x1c8] sm:$0xff]  ;;  %9849 = vst [vmem:[#allocation37_spill] sm:$0xff] %v8135_v26 }
 0x105   :  { %v1440_v13 = vadd.f32 %v1438_v9, %v1432_v47  ;;  %9843 = vst [vmem:[#allocation31_spill] sm:$0xff] %v8083_v43  ;;  %9845 = vst [vmem:[#allocation33_spill] sm:$0xff] %v8093_v21  ;;  %v1516_v60 = vstv %s7930_s19  ;;  %5183 = vmatpush3.bf16.msra.mxu1 %v5350_v3  ;;  %v8099_v20 = vmul.f32 %v8024_v23, %v1500_v14  ;;  %v8110_v47 = vld [vmem:[%s9464_s2 + $0x1d0] sm:$0xff]  ;;  %v8115_v17 = vld [vmem:[%s9464_s2 + $0x1d8] sm:$0xff]  ;;  %v1524_v3 = vstv %s7954_s29  ;;  %s8194_s19 = sld [smem:[#allocation3 + $0x285]]  ;;  %s8420_s29 = sld [smem:[#allocation3 + $0x2a1]] }
 0x106   :  { %v8102_v57 = vmul.f32 %v8029_v53, %v1500_v14  ;;  %v8105_v9 = vmul.f32 %v8048_v27, %v1508_v18  ;;  %9846 = vst [vmem:[#allocation34_spill] sm:$0xff] %v8110_v47  ;;  %v8121_v14 = vld [vmem:[%s9464_s2 + $0x1e0] sm:$0xff]  ;;  %5184 = vmatprep.subr.bf16.mxu1 %v5352_v55  ;;  %v1447_v27 = vadd.f32 %v7958_v50, %v1439_v42  ;;  %v8129_v23 = vld [vmem:[%s9464_s2 + $0x1e8] sm:$0xff]  ;;  %v1532_v8 = vstv %s7970_s15  ;;  %s8470_s15 = sld [smem:[#allocation3 + $0x303]] }
 0x107   :  { %9847 = vst [vmem:[#allocation35_spill] sm:$0xff] %v8121_v14  ;;  %v1448_v53 = vadd.f32 %v1446_v24, %v1440_v13  ;;  %9848 = vst [vmem:[#allocation36_spill] sm:$0xff] %v8129_v23  ;;  %v1540_v7 = vstv %s7989_s28  ;;  %v8139_v33 = vmul.f32 %v8083_v43, %v1508_v18  ;;  %v8142_v55 = vmul.f32 %v8088_v40, %v1516_v60  ;;  %v8150_v24 = vld [vmem:[%s9464_s2 + $0x1f8] sm:$0xff]  ;;  %v8155_v42 = vld [vmem:[%s9464_s2 + $0x200] sm:$0xff]  ;;  %s8351_s28 = sld [smem:[#allocation3 + $0x292]] }
 0x108   :  { %v8145_v50 = vmul.f32 %v8093_v21, %v1516_v60  ;;  %9850 = vst [vmem:[#allocation38_spill] sm:$0xff] %v8155_v42  ;;  %v1548_v13 = vstv %s8014_s30  ;;  %v1455_v18 = vadd.f32 %v7996_v15, %v1447_v27  ;;  %v8161_v40 = vmul.f32 %v8110_v47, %v1524_v3  ;;  %v8166_v60 = vld [vmem:[%s9464_s2 + $0x208] sm:$0xff]  ;;  %v8171_v21 = vld [vmem:[%s9464_s2 + $0x210] sm:$0xff]  ;;  %s8287_s30 = sld [smem:[#allocation3 + $0x28c]] }
 0x109   :  { %v1456_v43 = vadd.f32 %v7999_v12, %v1448_v53  ;;  %9851 = vst [vmem:[#allocation39_spill] sm:$0xff] %v8166_v60  ;;  %9852 = vst [vmem:[#allocation40_spill] sm:$0xff] %v8171_v21  ;;  %v1556_v15 = vstv %s8031_s0  ;;  %5185 = vmatpush3.bf16.msra.mxu1 %v5354_v54  ;;  %v5358_v53 = vld [vmem:[%s9465_s3 + $0x298] sm:$0xff]   ;;  %v8183_v12 = vmul.f32 %v8115_v17, %v1524_v3  ;;  %s8196_s0 = sld [smem:[#allocation3 + $0x286]]  ;;  %v5360_v54 = vld [vmem:[%s9465_s3 + $0x2e0] sm:$0xff]  }
 0x10a   :  { %v8186_v27 = vmul.f32 %v8121_v14, %v1532_v8  ;;  %v8189_v47 = vmul.f32 %v8129_v23, %v1532_v8  ;;  %v8192_v19 = vmul.f32 %v8135_v26, %v1540_v7  ;;  %5186 = vmatprep.subr.bf16.mxu1 %v5356_v45  ;;  %v1463_v3 = vadd.f32 %v8002_v62, %v1455_v18 }
 0x10b   :  { %v1464_v14 = vadd.f32 %v8034_v30, %v1456_v43  ;;  %v8204_v8 = vmul.f32 %v8150_v24, %v1540_v7  ;;  %v8207_v26 = vmul.f32 %v8155_v42, %v1548_v13  ;;  %v8210_v45 = vmul.f32 %v8166_v60, %v1548_v13  ;;  %v5362_v30 = vld [vmem:[%s9465_s3 + $0x2a0] sm:$0xff]  }
 0x10c   :  { %v8213_v23 = vmul.f32 %v8171_v21, %v1556_v15  ;;  %v8216_v62 = vmul.f32 %v8176_v51, %v1556_v15  ;;  %v1595_v7 = vstv %s8052_s22  ;;  %v1471_v43 = vadd.f32 %v8037_v22, %v1463_v3  ;;  %s8236_s22 = sld [smem:[#allocation3 + $0x288]]  ;;  %v5364_v22 = vld [vmem:[%s9465_s3 + $0x2e8] sm:$0xff]  }
 0x10d   :  { %v1472_v13 = vadd.f32 %v8040_v38, %v1464_v14  ;;  %v1596_v18 = vmul.f32 %v1595_v7, %v7501_v6  ;;  %v1597_v21 = vmul.f32 %v1595_v7, %v7517_v41  ;;  %5187 = vmatpush3.bf16.msra.mxu1 %v5358_v53  ;;  %v1601_v15 = vstv %s8069_s1  ;;  %s8249_s1 = sld [smem:[#allocation3 + $0x289]] }
 0x10e   :  { %v1609_v51 = vstv %s8071_s14  ;;  %v1617_v60 = vstv %s8096_s23  ;;  %v1625_v42 = vstv %s8123_s24  ;;  %5188 = vmatprep.subr.bf16.mxu1 %v5360_v54  ;;  %v1479_v38 = vadd.f32 %v8043_v11, %v1471_v43  ;;  %s8260_s24 = sld [smem:[#allocation3 + $0x28a]]  ;;  %s8711_s23 = sld [smem:[#allocation3 + $0x30e]] }
 0x10f   :  { %v1480_v6 = vadd.f32 %v8058_v34, %v1472_v13  ;;  %v1602_v41 = vmul.f32 %v7522_v28, %v1601_v15  ;;  %v1603_v14 = vmul.f32 %v7527_v63, %v1601_v15  ;;  %v1610_v53 = vmul.f32 %v7546_v29, %v1609_v51  ;;  %v5366_v63 = vld [vmem:[%s9465_s3 + $0x2a8] sm:$0xff]   ;;  %s9002_s14 = sld [smem:[#allocation3 + $0x320]] }
 0x110   :  { %v1611_v3 = vmul.f32 %v7551_v10, %v1609_v51  ;;  %v1618_v54 = vmul.f32 %v7566_v46, %v1617_v60  ;;  %v1619_v7 = vmul.f32 %v7571_v4, %v1617_v60  ;;  %v1487_v11 = vadd.f32 %v8061_v39, %v1479_v38  ;;  %v5368_v51 = vld [vmem:[%s9465_s3 + $0x2f0] sm:$0xff]  }
 0x111   :  { %v1488_v34 = vadd.f32 %v8064_v52, %v1480_v6  ;;  %v1604_v43 = vadd.f32 %v1602_v41, %v1596_v18  ;;  %v1605_v28 = vadd.f32 %v1603_v14, %v1597_v21  ;;  %5189 = vmatpush3.bf16.msra.mxu1 %v5362_v30  ;;  %v1626_v29 = vmul.f32 %v7604_v1, %v1625_v42 }
 0x112   :  { %v1627_v10 = vmul.f32 %v7609_v16, %v1625_v42  ;;  %v1633_v46 = vstv %s8194_s19  ;;  %v1641_v4 = vstv %s8196_s0  ;;  %5190 = vmatprep.subr.bf16.mxu1 %v5364_v22  ;;  %v1495_v21 = vadd.f32 %v8067_v0, %v1487_v11  ;;  %v8278_v0 = vld [vmem:[%s9464_s2 + $0x220] sm:$0xff]  ;;  %v8314_v11 = vld [vmem:[%s9464_s2 + $0x230] sm:$0xff]  ;;  %s8395_s19 = sld [smem:[#allocation3 + $0x29a]]  ;;  %s8397_s0 = sld [smem:[#allocation3 + $0x29b]] }
 0x113   :  { %v1496_v52 = vadd.f32 %v8078_v58, %v1488_v34  ;;  %v1612_v39 = vadd.f32 %v1610_v53, %v1604_v43  ;;  %v1613_v60 = vadd.f32 %v1611_v3, %v1605_v28  ;;  %v1564_v1 = vstv %s8218_s12  ;;  %s8307_s12 = sld [smem:[#allocation3 + $0x28d]] }
 0x114   :  { %v1572_v30 = vstv %s8220_s8  ;;  %v1634_v16 = vmul.f32 %v7622_v32, %v1633_v46  ;;  %v1635_v42 = vmul.f32 %v7627_v36, %v1633_v46  ;;  %v1503_v13 = vadd.f32 %v8099_v20, %v1495_v21  ;;  %v5370_v32 = vld [vmem:[%s9465_s3 + $0x2b0] sm:$0xff]   ;;  %s8415_s8 = sld [smem:[#allocation3 + $0x29f]] }
 0x115   :  { %v1504_v18 = vadd.f32 %v8102_v57, %v1496_v52  ;;  %v1620_v58 = vadd.f32 %v1618_v54, %v1612_v39  ;;  %v1621_v15 = vadd.f32 %v1619_v7, %v1613_v60  ;;  %5191 = vmatpush3.bf16.msra.mxu1 %v5366_v63  ;;  %v1642_v36 = vmul.f32 %v7639_v35, %v1641_v4  ;;  %v5372_v57 = vld [vmem:[%s9465_s3 + $0x2f8] sm:$0xff]   ;;  %v8297_v35 = vld [vmem:[%s9464_s2 + $0x228] sm:$0xff] }
 0x116   :  { %v1643_v22 = vmul.f32 %v7653_v2, %v1641_v4  ;;  %v1649_v20 = vstv %s8234_s25  ;;  %v1657_v38 = vstv %s8236_s22  ;;  %5192 = vmatprep.subr.bf16.mxu1 %v5368_v51  ;;  %v1511_v6 = vadd.f32 %v8105_v9, %v1503_v13  ;;  %s8323_s22 = sld [smem:[#allocation3 + $0x28e]]  ;;  %s8452_s25 = sld [smem:[#allocation3 + $0x300]] }
 0x117   :  { %v1512_v41 = vadd.f32 %v8139_v33, %v1504_v18  ;;  %v1628_v14 = vadd.f32 %v1626_v29, %v1620_v58  ;;  %v1629_v2 = vadd.f32 %v1627_v10, %v1621_v15  ;;  %v8300_v53 = vmul.f32 %v8278_v0, %v1564_v1  ;;  %v8332_v10 = vld [vmem:[%s9464_s2 + $0x238] sm:$0xff] }
 0x118   :  { %v1650_v3 = vmul.f32 %v7662_v31, %v1649_v20  ;;  %v1651_v54 = vmul.f32 %v7679_v59, %v1649_v20  ;;  %v1665_v9 = vstv %s8249_s1  ;;  %v1519_v33 = vadd.f32 %v8142_v55, %v1511_v6  ;;  %v5374_v31 = vld [vmem:[%s9465_s3 + $0x2b8] sm:$0xff]   ;;  %s8639_s1 = sld [smem:[#allocation3 + $0x30a]] }
 0x119   :  { %v1520_v7 = vadd.f32 %v8145_v50, %v1512_v41  ;;  %v1636_v34 = vadd.f32 %v1634_v16, %v1628_v14  ;;  %v1637_v43 = vadd.f32 %v1635_v42, %v1629_v2  ;;  %5193 = vmatpush3.bf16.msra.mxu1 %v5370_v32  ;;  %v1566_v59 = vmul.f32 %v8297_v35, %v1564_v1  ;;  %v9857_v14 = vld [vmem:[#allocation54_spill] sm:$0xff] }
 0x11a   :  { %v1658_v28 = vmul.f32 %v7694_v5, %v1657_v38  ;;  %v1659_v55 = vmul.f32 %v7700_v49, %v1657_v38  ;;  %v1673_v50 = vstv %s8260_s24  ;;  %5194 = vmatprep.subr.bf16.mxu1 %v5372_v57  ;;  %v1527_v63 = vadd.f32 %v8161_v40, %v1519_v33  ;;  %v5376_v5 = vld [vmem:[%s9465_s3 + $0x3c0] sm:$0xff]   ;;  %s8341_s24 = sld [smem:[#allocation3 + $0x290]] }
 0x11b   :  { %v1528_v29 = vadd.f32 %v8183_v12, %v1520_v7  ;;  %v1644_v46 = vadd.f32 %v1642_v36, %v1636_v34  ;;  %v1645_v4 = vadd.f32 %v1643_v22, %v1637_v43  ;;  %v1573_v49 = vmul.f32 %v8314_v11, %v1572_v30  ;;  %v9855_v22 = vld [vmem:[#allocation49_spill] sm:$0xff]  ;;  %v9858_v7 = vld [vmem:[#allocation55_spill] sm:$0xff]  ;;  %v9859_v43 = vld [vmem:[#allocation56_spill] sm:$0xff] }
 0x11c   :  { %v1666_v51 = vmul.f32 %v7706_v61, %v1665_v9  ;;  %v1667_v40 = vmul.f32 %v7719_v56, %v1665_v9  ;;  %v1681_v21 = vstv %s8271_s18  ;;  %v1535_v12 = vadd.f32 %v8186_v27, %v1527_v63  ;;  %s8361_s18 = sld [smem:[#allocation3 + $0x293]] }
 0x11d   :  { %v1536_v52 = vadd.f32 %v8189_v47, %v1528_v29  ;;  %v1652_v39 = vadd.f32 %v1650_v3, %v1644_v46  ;;  %v1653_v60 = vadd.f32 %v1651_v54, %v1645_v4  ;;  %5195 = vmatpush3.bf16.msra.mxu1 %v5374_v31  ;;  %v1574_v1 = vmul.f32 %v8332_v10, %v1572_v30 }
 0x11e   :  { %v1674_v61 = vmul.f32 %v7729_v37, %v1673_v50  ;;  %v1675_v56 = vmul.f32 %v7747_v44, %v1673_v50  ;;  %v1689_v16 = vstv %s8287_s30  ;;  %v1543_v42 = vadd.f32 %v8192_v19, %v1535_v12  ;;  %5224 = vmatprep.subr.bf16.mxu1 %v5376_v5  ;;  %s8386_s30 = sld [smem:[#allocation3 + $0x298]]  ;;  %v9862_v5 = vld [vmem:[#allocation50_spill] sm:$0xff]  ;;  %v9864_v12 = vld [vmem:[#allocation12_spill] sm:$0xff] }
 0x11f   :  { %v1544_v27 = vadd.f32 %v8204_v8, %v1536_v52  ;;  %v1660_v47 = vadd.f32 %v1658_v28, %v1652_v39  ;;  %v1661_v13 = vadd.f32 %v1659_v55, %v1653_v60  ;;  %v1578_v18 = vstv %s8302_s27  ;;  %v9854_v8 = vld [vmem:[#allocation48_spill] sm:$0xff]  ;;  %v9860_v28 = vld [vmem:[#allocation9_spill] sm:$0xff]  ;;  %s8407_s27 = sld [smem:[#allocation3 + $0x29d]] }
 0x120   :  { %v1682_v58 = vmul.f32 %v7754_v25, %v1681_v21  ;;  %v1683_v30 = vmul.f32 %v7769_v48, %v1681_v21  ;;  %v1697_v37 = vstv %s8307_s12  ;;  %v1551_v44 = vadd.f32 %v8207_v26, %v1543_v42  ;;  %v9866_v42 = vld [vmem:[#allocation53_spill] sm:$0xff]  ;;  %s8409_s12 = sld [smem:[#allocation3 + $0x29e]] }
 0x121   :  { %v1552_v15 = vadd.f32 %v8210_v45, %v1544_v27  ;;  %v1668_v19 = vadd.f32 %v1666_v51, %v1660_v47  ;;  %v1669_v32 = vadd.f32 %v1667_v40, %v1661_v13  ;;  %v1690_v36 = vmul.f32 %v9854_v8, %v1689_v16  ;;  %v9856_v45 = vld [vmem:[#allocation51_spill] sm:$0xff]  ;;  %v9867_v47 = vld [vmem:[#allocation13_spill] sm:$0xff] }
 0x122   :  { %v1691_v20 = vmul.f32 %v9855_v22, %v1689_v16  ;;  %v1705_v38 = vstv %s8323_s22  ;;  %v1713_v57 = vstv %s8325_s20  ;;  %v1559_v25 = vadd.f32 %v8213_v23, %v1551_v44  ;;  %v9863_v40 = vld [vmem:[#allocation11_spill] sm:$0xff]  ;;  %s8454_s22 = sld [smem:[#allocation3 + $0x301]]  ;;  %s8468_s20 = sld [smem:[#allocation3 + $0x302]] }
 0x123   :  { %v1560_v48 = vadd.f32 %v8216_v62, %v1552_v15  ;;  %v1676_v6 = vadd.f32 %v1674_v61, %v1668_v19  ;;  %v1677_v26 = vadd.f32 %v1675_v56, %v1669_v32  ;;  %v1698_v41 = vmul.f32 %v9856_v45, %v1697_v37  ;;  %v9869_v19 = vld [vmem:[#allocation15_spill] sm:$0xff] }
 0x124   :  { %v1699_v2 = vmul.f32 %v9857_v14, %v1697_v37  ;;  %v1721_v3 = vstv %s8341_s24  ;;  %v1729_v54 = vstv %s8343_s17  ;;  %v1567_v9 = vadd.f32 %v8300_v53, %v1559_v25  ;;  %v9861_v53 = vld [vmem:[#allocation10_spill] sm:$0xff]  ;;  %s8506_s17 = sld [smem:[#allocation3 + $0x304]]  ;;  %s8779_s24 = sld [smem:[#allocation3 + $0x311]] }
 0x125   :  { %v1568_v23 = vadd.f32 %v1566_v59, %v1560_v48  ;;  %v1684_v33 = vadd.f32 %v1682_v58, %v1676_v6  ;;  %v1685_v62 = vadd.f32 %v1683_v30, %v1677_v26  ;;  %v1706_v34 = vmul.f32 %v9858_v7, %v1705_v38  ;;  %v9870_v48 = vld [vmem:[#allocation16_spill] sm:$0xff]  ;;  %v9871_v26 = vld [vmem:[#allocation17_spill] sm:$0xff] }
 0x126   :  { %v1707_v31 = vmul.f32 %v9859_v43, %v1705_v38  ;;  %v1714_v55 = vmul.f32 %v9860_v28, %v1713_v57  ;;  %v1737_v50 = vstv %s8351_s28  ;;  %v1575_v63 = vadd.f32 %v1573_v49, %v1567_v9  ;;  %s8508_s28 = sld [smem:[#allocation3 + $0x305]] }
 0x127   :  { %v1576_v29 = vadd.f32 %v1574_v1, %v1568_v23  ;;  %v1692_v46 = vadd.f32 %v1690_v36, %v1684_v33  ;;  %v1693_v4 = vadd.f32 %v1691_v20, %v1685_v62  ;;  %v1715_v59 = vmul.f32 %v9861_v53, %v1713_v57  ;;  %v9865_v1 = vld [vmem:[#allocation52_spill] sm:$0xff]  ;;  %v9873_v23 = vld [vmem:[#allocation19_spill] sm:$0xff] }
 0x128   :  { %v1722_v51 = vmul.f32 %v9862_v5, %v1721_v3  ;;  %v1723_v21 = vmul.f32 %v9863_v40, %v1721_v3  ;;  %v1730_v52 = vmul.f32 %v9864_v12, %v1729_v54  ;;  %v1745_v56 = vstv %s8361_s18  ;;  %v9872_v3 = vld [vmem:[#allocation18_spill] sm:$0xff]  ;;  %v9874_v62 = vld [vmem:[#allocation20_spill] sm:$0xff]  ;;  %v9879_v5 = vld [vmem:[#allocation25_spill] sm:$0xff]  ;;  %s9018_s18 = sld [smem:[#allocation3 + $0x381]] }
 0x129   :  { %v1580_v39 = vadd.f32 %v1578_v18, %v1576_v29  ;;  %v1700_v60 = vadd.f32 %v1698_v41, %v1692_v46  ;;  %v1701_v61 = vadd.f32 %v1699_v2, %v1693_v4  ;;  %v8399_v49 = vadd.f32 %v1578_v18, %v1575_v63  ;;  %v9868_v18 = vld [vmem:[#allocation14_spill] sm:$0xff]  ;;  %v9877_v46 = vld [vmem:[#allocation23_spill] sm:$0xff]  ;;  %v9878_v53 = vld [vmem:[#allocation24_spill] sm:$0xff] }
 0x12a   :  { %v1731_v16 = vmul.f32 %v9865_v1, %v1729_v54  ;;  %v1738_v27 = vmul.f32 %v9866_v42, %v1737_v50  ;;  %v1739_v13 = vmul.f32 %v9867_v47, %v1737_v50  ;;  %v1753_v44 = vstv %s8369_s16  ;;  %v9880_v40 = vld [vmem:[#allocation26_spill] sm:$0xff]  ;;  %s9278_s16 = sld [smem:[#allocation3 + $0x38f]] }
 0x12b   :  { %v1582_v58 = vmax.f32 %v1580_v39, 0.0  ;;  %v1708_v30 = vadd.f32 %v1706_v34, %v1700_v60  ;;  %v1709_v37 = vadd.f32 %v1707_v31, %v1701_v61  ;;  %v1746_v15 = vmul.f32 %v9868_v18, %v1745_v56  ;;  %v9875_v34 = vld [vmem:[#allocation21_spill] sm:$0xff]  ;;  %v9876_v31 = vld [vmem:[#allocation22_spill] sm:$0xff]  ;;  %v9881_v39 = vld [vmem:[#allocation27_spill] sm:$0xff] }
 0x12c   :  { %v1747_v32 = vmul.f32 %v9869_v19, %v1745_v56  ;;  %v1761_v8 = vstv %s8375_s26  ;;  %v1769_v36 = vstv %s8377_s13  ;;  %v1777_v57 = vstv %s8380_s10  ;;  %v9882_v56 = vld [vmem:[#allocation28_spill] sm:$0xff]  ;;  %v9884_v47 = vld [vmem:[#allocation30_spill] sm:$0xff]  ;;  %v9885_v18 = vld [vmem:[#allocation31_spill] sm:$0xff]  ;;  %s8656_s13 = sld [smem:[#allocation3 + $0x30b]]  ;;  %s8664_s10 = sld [smem:[#allocation3 + $0x30c]] }
 0x12d   :  { %v5063_v22 = vpack.c.bf16 %v1582_v58, %v1582_v58  ;;  %v1716_v20 = vadd.f32 %v1714_v55, %v1708_v30  ;;  %v1717_v38 = vadd.f32 %v1715_v59, %v1709_v37  ;;  %v1581_v25 = vmax.f32 %v8399_v49, 0.0  ;;  %v8556_v49 = vld [vmem:[%s9464_s2 + $0x28] sm:$0xff]  ;;  %s8863_s26 = sld [smem:[#allocation3 + $0x317]] }
 0x12e   :  { %v1754_v6 = vmul.f32 %v9870_v48, %v1753_v44  ;;  %v1755_v45 = vmul.f32 %v9871_v26, %v1753_v44  ;;  %v1785_v41 = vstv %s8386_s30  ;;  %v1762_v54 = vmul.f32 %v9872_v3, %v1761_v8  ;;  %v9890_v3 = vld [vmem:[#allocation36_spill] sm:$0xff]  ;;  %s8604_s30 = sld [smem:[#allocation3 + $0x2a2]] }
 0x12f   :  { %3782 = vmatprep.mubr.bf16.mxu0 %v5063_v22  ;;  %v1724_v14 = vadd.f32 %v1722_v51, %v1716_v20  ;;  %v1725_v2 = vadd.f32 %v1723_v21, %v1717_v38  ;;  %v1793_v9 = vstv %s8388_s21  ;;  %v1763_v33 = vmul.f32 %v9873_v23, %v1761_v8  ;;  %v9886_v8 = vld [vmem:[#allocation32_spill] sm:$0xff]  ;;  %v9887_v22 = vld [vmem:[#allocation33_spill] sm:$0xff]  ;;  %s8606_s21 = sld [smem:[#allocation3 + $0x2a3]] }
 0x130   :  { %v1770_v7 = vmul.f32 %v9874_v62, %v1769_v36  ;;  %v1771_v43 = vmul.f32 %v9875_v34, %v1769_v36  ;;  %v8432_v28 = vmul.f32 %v9876_v31, %v1777_v57  ;;  %v1801_v63 = vstv %s8395_s19  ;;  %v9891_v23 = vld [vmem:[#allocation37_spill] sm:$0xff]  ;;  %s8799_s19 = sld [smem:[#allocation3 + $0x312]] }
 0x131   :  { %v1732_v55 = vadd.f32 %v1730_v52, %v1724_v14  ;;  %v1733_v50 = vadd.f32 %v1731_v16, %v1725_v2  ;;  %v1809_v29 = vstv %s8397_s0  ;;  %v8437_v4 = vmul.f32 %v9877_v46, %v1777_v57  ;;  %v9883_v16 = vld [vmem:[#allocation29_spill] sm:$0xff]  ;;  %v9889_v14 = vld [vmem:[#allocation35_spill] sm:$0xff]  ;;  %v9894_v46 = vld [vmem:[#allocation40_spill] sm:$0xff]  ;;  %s8971_s0 = sld [smem:[#allocation3 + $0x31f]] }
 0x132   :  { %v8440_v59 = vmul.f32 %v9878_v53, %v1785_v41  ;;  %v8443_v51 = vmul.f32 %v9879_v5, %v1785_v41  ;;  %v8446_v21 = vmul.f32 %v9880_v40, %v1793_v9  ;;  %v8449_v60 = vmul.f32 %v9881_v39, %v1793_v9  ;;  %v9895_v5 = vld [vmem:[#allocation41_spill] sm:$0xff] }
 0x133   :  { %v1740_v12 = vadd.f32 %v1738_v27, %v1732_v55  ;;  %v1741_v52 = vadd.f32 %v1739_v13, %v1733_v50  ;;  %v1817_v61 = vstv %s8404_s9  ;;  %v8457_v1 = vmul.f32 %v9882_v56, %v1801_v63  ;;  %v9892_v55 = vld [vmem:[#allocation38_spill] sm:$0xff]  ;;  %s8871_s9 = sld [smem:[#allocation3 + $0x318]] }
 0x134   :  { %v8460_v42 = vmul.f32 %v9883_v16, %v1801_v63  ;;  %v8463_v58 = vmul.f32 %v9884_v47, %v1809_v29  ;;  %v1825_v27 = vstv %s8407_s27  ;;  %v1833_v37 = vstv %s8409_s12  ;;  %v8519_v63 = vld [vmem:[%s9464_s2 + $0x8] sm:$0xff]  ;;  %v8551_v47 = vld [vmem:[%s9464_s2 + $0x20] sm:$0xff]  ;;  %s8892_s12 = sld [smem:[#allocation3 + $0x31a]]  ;;  %s9037_s27 = sld [smem:[#allocation3 + $0x383]] }
 0x135   :  { %v1748_v13 = vadd.f32 %v1746_v15, %v1740_v12  ;;  %v1749_v30 = vadd.f32 %v1747_v32, %v1741_v52  ;;  %v1841_v44 = vstv %s8415_s8  ;;  %v8473_v19 = vmul.f32 %v9885_v18, %v1809_v29  ;;  %v9888_v15 = vld [vmem:[#allocation34_spill] sm:$0xff]  ;;  %v8524_v29 = vld [vmem:[%s9464_s2 + $0x10] sm:$0xff]  ;;  %s8558_s8 = sld [smem:[#allocation3 + $0x306]] }
 0x136   :  { %v8476_v36 = vmul.f32 %v9886_v8, %v1817_v61  ;;  %v8479_v20 = vmul.f32 %v9887_v22, %v1817_v61  ;;  %v1849_v38 = vstv %s8417_s11  ;;  %v8483_v32 = vmul.f32 %v9888_v15, %v1825_v27  ;;  %v5379_v52 = vld [vmem:[%s9465_s3 + $0x348] sm:$0xff]   ;;  %s8560_s11 = sld [smem:[#allocation3 + $0x307]]  ;;  %v5383_v8 = vld [vmem:[%s9465_s3 + $0x350] sm:$0xff]  }
 0x137   :  { %v1756_v57 = vadd.f32 %v1754_v6, %v1748_v13  ;;  %v1757_v48 = vadd.f32 %v1755_v45, %v1749_v30  ;;  %v1857_v26 = vstv %s8420_s29  ;;  %v8487_v41 = vmul.f32 %v8115_v17, %v1825_v27  ;;  %v5377_v6 = vld [vmem:[%s9465_s3 + $0x300] sm:$0xff]   ;;  %v8569_v13 = vld [vmem:[%s9464_s2 + $0x30] sm:$0xff]  ;;  %v8574_v30 = vld [vmem:[%s9464_s2 + $0x38] sm:$0xff]  ;;  %s8755_s29 = sld [smem:[#allocation3 + $0x310]] }
 0x138   :  { %v8490_v2 = vmul.f32 %v9889_v14, %v1833_v37  ;;  %v8493_v9 = vmul.f32 %v9890_v3, %v1833_v37  ;;  %v8496_v62 = vmul.f32 %v9891_v23, %v1841_v44  ;;  %v8504_v45 = vld [vmem:[%s9464_s2] sm:$0xff]  ;;  %v8511_v31 = vmul.f32 %v8150_v24, %v1841_v44  ;;  %v9893_v24 = vld [vmem:[#allocation39_spill] sm:$0xff]  ;;  %v5381_v18 = vld [vmem:[%s9465_s3 + $0x308] sm:$0xff]  }
 0x139   :  { %v1764_v17 = vadd.f32 %v1762_v54, %v1756_v57  ;;  %v1765_v34 = vadd.f32 %v1763_v33, %v1757_v48  ;;  %v8514_v50 = vmul.f32 %v9892_v55, %v1849_v38  ;;  %v8529_v54 = vld [vmem:[%s9464_s2 + $0x18] sm:$0xff]  ;;  %v8532_v33 = vmul.f32 %v9893_v24, %v1849_v38 }
 0x13a   :  { %v8535_v53 = vmul.f32 %v9894_v46, %v1857_v26  ;;  %v8538_v40 = vmul.f32 %v9895_v5, %v1857_v26  ;;  %v5062_v12 = vpack.c.bf16 %v1581_v25, %v1581_v25  ;;  %v1896_v56 = vstv %s8452_s25  ;;  %v8596_v26 = vld [vmem:[%s9464_s2 + $0x48] sm:$0xff]  ;;  %s8825_s25 = sld [smem:[#allocation3 + $0x313]] }
 0x13b   :  { %v1772_v39 = vadd.f32 %v1770_v7, %v1764_v17  ;;  %v1773_v61 = vadd.f32 %v1771_v43, %v1765_v34  ;;  %v1902_v16 = vstv %s8454_s22  ;;  %v1897_v25 = vmul.f32 %v1896_v56, %v8504_v45  ;;  %v8613_v17 = vld [vmem:[%s9464_s2 + $0x50] sm:$0xff]  ;;  %v8618_v34 = vld [vmem:[%s9464_s2 + $0x58] sm:$0xff]  ;;  %s8940_s22 = sld [smem:[#allocation3 + $0x31d]] }
 0x13c   :  { %3783 = vmatmul.mubr.bf16.vlgmr.msra.gmra.mrb[8].mxu0 %v5062_v12  ;;  %v1898_v7 = vmul.f32 %v1896_v56, %v8519_v63  ;;  %v1903_v43 = vmul.f32 %v8524_v29, %v1902_v16  ;;  %v1904_v27 = vmul.f32 %v8529_v54, %v1902_v16  ;;  %v1910_v22 = vstv %s8468_s20  ;;  %s8598_s20 = sld [smem:[#allocation3 + $0x308]]  ;;  %v5385_v12 = vld [vmem:[%s9465_s3 + $0x310] sm:$0xff]  }
 0x13d   :  { %v1780_v37 = vadd.f32 %v8432_v28, %v1772_v39  ;;  %v1781_v44 = vadd.f32 %v8437_v4, %v1773_v61  ;;  %5203 = vmatpush3.bf16.msra.mxu0 %v5377_v6  ;;  %v1918_v38 = vstv %s8470_s15  ;;  %v1911_v15 = vmul.f32 %v8551_v47, %v1910_v22  ;;  %v8591_v4 = vld [vmem:[%s9464_s2 + $0x40] sm:$0xff]  ;;  %s8600_s15 = sld [smem:[#allocation3 + $0x309]] }
 0x13e   :  { %5204 = vmatprep.subr.bf16.mxu0 %v5379_v52  ;;  %v1905_v57 = vadd.f32 %v1903_v43, %v1897_v25  ;;  %v1906_v48 = vadd.f32 %v1904_v27, %v1898_v7  ;;  %v1912_v28 = vmul.f32 %v8556_v49, %v1910_v22  ;;  %v1919_v23 = vmul.f32 %v8569_v13, %v1918_v38  ;;  %v8632_v61 = vld [vmem:[%s9464_s2 + $0x60] sm:$0xff]  ;;  %v8649_v43 = vld [vmem:[%s9464_s2 + $0x70] sm:$0xff]  ;;  %v8654_v27 = vld [vmem:[%s9464_s2 + $0x78] sm:$0xff] }
 0x13f   :  { %v1788_v14 = vadd.f32 %v8440_v59, %v1780_v37  ;;  %v1789_v3 = vadd.f32 %v8443_v51, %v1781_v44  ;;  %v1920_v6 = vmul.f32 %v8574_v30, %v1918_v38  ;;  %v1926_v55 = vstv %s8506_s17  ;;  %s8693_s17 = sld [smem:[#allocation3 + $0x30d]] }
 0x140   :  { %v1913_v59 = vadd.f32 %v1911_v15, %v1905_v57  ;;  %v1914_v51 = vadd.f32 %v1912_v28, %v1906_v48  ;;  %v1934_v24 = vstv %s8508_s28  ;;  %v1927_v52 = vmul.f32 %v8591_v4, %v1926_v55  ;;  %s9330_s28 = sld [smem:[#allocation3 + $0x394]] }
 0x141   :  { %v1796_v46 = vadd.f32 %v8446_v21, %v1788_v14  ;;  %v1797_v5 = vadd.f32 %v8449_v60, %v1789_v3  ;;  %5205 = vmatpush3.bf16.msra.mxu0 %v5381_v18  ;;  %v1928_v39 = vmul.f32 %v8596_v26, %v1926_v55  ;;  %v8637_v21 = vld [vmem:[%s9464_s2 + $0x68] sm:$0xff]  ;;  %v5387_v60 = vld [vmem:[%s9465_s3 + $0x358] sm:$0xff]   ;;  %v1935_v25 = vmul.f32 %v8613_v17, %v1934_v24  ;;  %v8676_v3 = vld [vmem:[%s9464_s2 + $0x80] sm:$0xff] }
 0x142   :  { %5206 = vmatprep.subr.bf16.mxu0 %v5383_v8  ;;  %v1921_v56 = vadd.f32 %v1919_v23, %v1913_v59  ;;  %v1922_v16 = vadd.f32 %v1920_v6, %v1914_v51  ;;  %v1936_v7 = vmul.f32 %v8618_v34, %v1934_v24  ;;  %v1942_v18 = vstv %s8558_s8  ;;  %v8690_v51 = vld [vmem:[%s9464_s2 + $0x90] sm:$0xff]  ;;  %s9188_s8 = sld [smem:[#allocation3 + $0x38a]] }
 0x143   :  { %v1804_v37 = vadd.f32 %v8457_v1, %v1796_v46  ;;  %v1805_v44 = vadd.f32 %v8460_v42, %v1797_v5  ;;  %v1950_v8 = vstv %s8560_s11  ;;  %v1943_v57 = vmul.f32 %v8632_v61, %v1942_v18  ;;  %v5389_v1 = vld [vmem:[%s9465_s3 + $0x318] sm:$0xff]   ;;  %s8735_s11 = sld [smem:[#allocation3 + $0x30f]] }
 0x144   :  { %v1929_v22 = vadd.f32 %v1927_v52, %v1921_v56  ;;  %v1930_v38 = vadd.f32 %v1928_v39, %v1922_v16  ;;  %v1944_v48 = vmul.f32 %v8637_v21, %v1942_v18  ;;  %v1951_v42 = vmul.f32 %v8649_v43, %v1950_v8  ;;  %v8702_v52 = vld [vmem:[%s9464_s2 + $0x98] sm:$0xff] }
 0x145   :  { %v1812_v15 = vadd.f32 %v8463_v58, %v1804_v37  ;;  %v1813_v28 = vadd.f32 %v8473_v19, %v1805_v44  ;;  %5207 = vmatpush3.bf16.msra.mxu0 %v5385_v12  ;;  %v1952_v14 = vmul.f32 %v8654_v27, %v1950_v8  ;;  %v8681_v58 = vld [vmem:[%s9464_s2 + $0x88] sm:$0xff]  ;;  %v5391_v19 = vld [vmem:[%s9465_s3 + $0x360] sm:$0xff]   ;;  %v1958_v59 = vstv %s8598_s20  ;;  %s8957_s20 = sld [smem:[#allocation3 + $0x31e]] }
 0x146   :  { %5208 = vmatprep.subr.bf16.mxu0 %v5387_v60  ;;  %v1937_v23 = vadd.f32 %v1935_v25, %v1929_v22  ;;  %v1938_v6 = vadd.f32 %v1936_v7, %v1930_v38  ;;  %v1966_v55 = vstv %s8600_s15  ;;  %v1865_v5 = vstv %s8604_s30  ;;  %v5393_v7 = vld [vmem:[%s9465_s3 + $0x320] sm:$0xff]   ;;  %v8722_v44 = vld [vmem:[%s9464_s2 + $0xa8] sm:$0xff]  ;;  %s8909_s15 = sld [smem:[#allocation3 + $0x31b]]  ;;  %s9157_s30 = sld [smem:[#allocation3 + $0x387]] }
 0x147   :  { %v1820_v24 = vadd.f32 %v8476_v36, %v1812_v15  ;;  %v1821_v46 = vadd.f32 %v8479_v20, %v1813_v28  ;;  %v1873_v12 = vstv %s8606_s21  ;;  %v1959_v56 = vmul.f32 %v8676_v3, %v1958_v59  ;;  %v8709_v36 = vld [vmem:[%s9464_s2 + $0xa0] sm:$0xff]  ;;  %v8732_v38 = vld [vmem:[%s9464_s2 + $0xb0] sm:$0xff]  ;;  %s8887_s21 = sld [smem:[#allocation3 + $0x319]] }
 0x148   :  { %v1945_v39 = vadd.f32 %v1943_v57, %v1937_v23  ;;  %v1946_v60 = vadd.f32 %v1944_v48, %v1938_v6  ;;  %v1960_v16 = vmul.f32 %v8681_v58, %v1958_v59  ;;  %v1967_v37 = vmul.f32 %v8690_v51, %v1966_v55 }
 0x149   :  { %v1828_v20 = vadd.f32 %v8483_v32, %v1820_v24  ;;  %v1829_v25 = vadd.f32 %v8487_v41, %v1821_v46  ;;  %5209 = vmatpush3.bf16.msra.mxu0 %v5389_v1  ;;  %v1974_v18 = vstv %s8639_s1  ;;  %v5395_v32 = vld [vmem:[%s9465_s3 + $0x368] sm:$0xff]   ;;  %v1968_v22 = vmul.f32 %v8702_v52, %v1966_v55  ;;  %s8740_s1 = sld [smem:[#allocation5 + $0x5]] }
 0x14a   :  { %5210 = vmatprep.subr.bf16.mxu0 %v5391_v19  ;;  %v1953_v8 = vadd.f32 %v1951_v42, %v1945_v39  ;;  %v1954_v41 = vadd.f32 %v1952_v14, %v1946_v60  ;;  %v1982_v57 = vstv %s8656_s13  ;;  %v1866_v28 = vmul.f32 %v8278_v0, %v1865_v5  ;;  %v8746_v42 = vld [vmem:[%s9464_s2 + $0xb8] sm:$0xff]  ;;  %v5397_v55 = vld [vmem:[%s9465_s3 + $0x328] sm:$0xff]   ;;  %v8776_v39 = vld [vmem:[%s9464_s2 + $0xd0] sm:$0xff]  ;;  %s8938_s13 = sld [smem:[#allocation3 + $0x31c]] }
 0x14b   :  { %v1836_v48 = vadd.f32 %v8490_v2, %v1828_v20  ;;  %v1837_v15 = vadd.f32 %v8493_v9, %v1829_v25  ;;  %v1975_v1 = vmul.f32 %v8709_v36, %v1974_v18  ;;  %v1976_v23 = vmul.f32 %v8722_v44, %v1974_v18  ;;  %v8752_v2 = vld [vmem:[%s9464_s2 + $0xc0] sm:$0xff]  ;;  %v8767_v46 = vld [vmem:[%s9464_s2 + $0xc8] sm:$0xff] }
 0x14c   :  { %v1961_v14 = vadd.f32 %v1959_v56, %v1953_v8  ;;  %v1962_v19 = vadd.f32 %v1960_v16, %v1954_v41  ;;  %v1990_v0 = vstv %s8664_s10  ;;  %v1867_v59 = vmul.f32 %v8297_v35, %v1865_v5  ;;  %s9226_s10 = sld [smem:[#allocation3 + $0x38c]] }
 0x14d   :  { %v1844_v9 = vadd.f32 %v8496_v62, %v1836_v48  ;;  %v1845_v6 = vadd.f32 %v8511_v31, %v1837_v15  ;;  %5211 = vmatpush3.bf16.msra.mxu0 %v5393_v7  ;;  %v1983_v24 = vmul.f32 %v8732_v38, %v1982_v57  ;;  %v5399_v62 = vld [vmem:[%s9465_s3 + $0x370] sm:$0xff]   ;;  %v1984_v5 = vmul.f32 %v8746_v42, %v1982_v57  ;;  %v8790_v7 = vld [vmem:[%s9464_s2 + $0xd8] sm:$0xff]  ;;  %v8813_v48 = vld [vmem:[%s9464_s2 + $0xe8] sm:$0xff] }
 0x14e   :  { %5212 = vmatprep.subr.bf16.mxu0 %v5395_v32  ;;  %v1969_v31 = vadd.f32 %v1967_v37, %v1961_v14  ;;  %v1970_v35 = vadd.f32 %v1968_v22, %v1962_v19  ;;  %v1998_v60 = vstv %s8693_s17  ;;  %v1874_v20 = vmul.f32 %v8314_v11, %v1873_v12  ;;  %v5401_v22 = vld [vmem:[%s9465_s3 + $0x330] sm:$0xff]   ;;  %s8861_s17 = sld [smem:[#allocation3 + $0x316]] }
 0x14f   :  { %v1852_v56 = vadd.f32 %v8514_v50, %v1844_v9  ;;  %v1853_v16 = vadd.f32 %v8532_v33, %v1845_v6  ;;  %v1991_v25 = vmul.f32 %v8752_v2, %v1990_v0  ;;  %v1992_v32 = vmul.f32 %v8767_v46, %v1990_v0  ;;  %v8796_v50 = vld [vmem:[%s9464_s2 + $0xe0] sm:$0xff]  ;;  %v8822_v15 = vld [vmem:[%s9464_s2 + $0xf0] sm:$0xff]  ;;  %v8832_v9 = vld [vmem:[%s9464_s2 + $0xf8] sm:$0xff] }
 0x150   :  { %v1977_v37 = vadd.f32 %v1975_v1, %v1969_v31  ;;  %v1978_v18 = vadd.f32 %v1976_v23, %v1970_v35  ;;  %v2006_v33 = vstv %s8711_s23  ;;  %v1875_v41 = vmul.f32 %v8332_v10, %v1873_v12  ;;  %9896 = vst [vmem:[#allocation42_spill] sm:$0xff] %v8822_v15  ;;  %9897 = vst [vmem:[#allocation43_spill] sm:$0xff] %v8832_v9  ;;  %v5405_v35 = vld [vmem:[%s9465_s3 + $0x338] sm:$0xff]  }
 0x151   :  { %v1860_v11 = vadd.f32 %v8535_v53, %v1852_v56  ;;  %v1861_v8 = vadd.f32 %v8538_v40, %v1853_v16  ;;  %5213 = vmatpush3.bf16.msra.mxu0 %v5397_v55  ;;  %v1999_v57 = vmul.f32 %v8776_v39, %v1998_v60  ;;  %v5403_v53 = vld [vmem:[%s9465_s3 + $0x378] sm:$0xff]   ;;  %v2000_v12 = vmul.f32 %v8790_v7, %v1998_v60  ;;  %v8852_v60 = vld [vmem:[%s9464_s2 + $0x108] sm:$0xff] }
 0x152   :  { %5214 = vmatprep.subr.bf16.mxu0 %v5399_v62  ;;  %v1985_v40 = vadd.f32 %v1983_v24, %v1977_v37  ;;  %v1986_v10 = vadd.f32 %v1984_v5, %v1978_v18  ;;  %v2014_v1 = vstv %s8735_s11  ;;  %v1879_v23 = vstv %s8740_s1  ;;  %v8838_v62 = vld [vmem:[%s9464_s2 + $0x100] sm:$0xff]  ;;  %s8841_s11 = sld [smem:[#allocation3 + $0x314]]  ;;  %s8843_s1 = sld [smem:[#allocation3 + $0x315]]  ;;  %9899 = vst [vmem:[#allocation45_spill] sm:$0xff] %v8852_v60 }
 0x153   :  { %v1868_v14 = vadd.f32 %v1866_v28, %v1860_v11  ;;  %v1869_v19 = vadd.f32 %v1867_v59, %v1861_v8  ;;  %v2007_v0 = vmul.f32 %v8796_v50, %v2006_v33  ;;  %v2008_v24 = vmul.f32 %v8813_v48, %v2006_v33  ;;  %9898 = vst [vmem:[#allocation44_spill] sm:$0xff] %v8838_v62  ;;  %v8869_v11 = vld [vmem:[%s9464_s2 + $0x118] sm:$0xff] }
 0x154   :  { %v1993_v6 = vadd.f32 %v1991_v25, %v1985_v40  ;;  %v1994_v55 = vadd.f32 %v1992_v32, %v1986_v10  ;;  %v2022_v28 = vstv %s8755_s29  ;;  %v2015_v5 = vmul.f32 %v8822_v15, %v2014_v1  ;;  %9901 = vst [vmem:[#allocation47_spill] sm:$0xff] %v8869_v11  ;;  %v8884_v40 = vld [vmem:[%s9464_s2 + $0x128] sm:$0xff]  ;;  %s9159_s29 = sld [smem:[#allocation3 + $0x388]] }
 0x155   :  { %v1876_v59 = vadd.f32 %v1874_v20, %v1868_v14  ;;  %v1877_v31 = vadd.f32 %v1875_v41, %v1869_v19  ;;  %5215 = vmatpush3.bf16.msra.mxu0 %v5401_v22  ;;  %v2016_v25 = vmul.f32 %v8832_v9, %v2014_v1  ;;  %v8858_v20 = vld [vmem:[%s9464_s2 + $0x110] sm:$0xff]  ;;  %v2030_v37 = vstv %s8779_s24  ;;  %v8873_v8 = vpop.f32.mrb[0].mxu0  ;;  %9904 = vst [vmem:[#allocation51_spill] sm:$0xff] %v8884_v40  ;;  %s9201_s24 = sld [smem:[#allocation3 + $0x323]] }
 0x156   :  { %5216 = vmatprep.subr.bf16.mxu0 %v5403_v53  ;;  %v2001_v56 = vadd.f32 %v1999_v57, %v1993_v6  ;;  %v2002_v16 = vadd.f32 %v2000_v12, %v1994_v55  ;;  %9900 = vst [vmem:[#allocation46_spill] sm:$0xff] %v8858_v20  ;;  %v2023_v33 = vmul.f32 %v8838_v62, %v2022_v28  ;;  %9902 = vst [vmem:[#allocation48_spill] sm:$0xff] %v8873_v8  ;;  %v8879_v53 = vld [vmem:[%s9464_s2 + $0x120] sm:$0xff]  ;;  %v8889_v12 = vpop.f32.mrb[1].mxu0 }
 0x157   :  { %v1880_v18 = vadd.f32 %v1879_v23, %v1876_v59  ;;  %v1881_v32 = vadd.f32 %v1879_v23, %v1877_v31  ;;  %v2024_v57 = vmul.f32 %v8852_v60, %v2022_v28  ;;  %9903 = vst [vmem:[#allocation49_spill] sm:$0xff] %v8879_v53  ;;  %v2038_v10 = vstv %s8799_s19  ;;  %9905 = vst [vmem:[#allocation54_spill] sm:$0xff] %v8889_v12  ;;  %v5089_v23 = vpop.f32.mrb[2].mxu0  ;;  %v8901_v28 = vld [vmem:[%s9464_s2 + $0x130] sm:$0xff]  ;;  %v8906_v59 = vld [vmem:[%s9464_s2 + $0x138] sm:$0xff]  ;;  %s9145_s19 = sld [smem:[#allocation3 + $0x321]] }
 0x158   :  { %v2009_v41 = vadd.f32 %v2007_v0, %v2001_v56  ;;  %v2010_v22 = vadd.f32 %v2008_v24, %v2002_v16  ;;  %v2031_v19 = vmul.f32 %v8858_v20, %v2030_v37  ;;  %v5378_v0 = vld [vmem:[%s9465_s3 + $0x380] sm:$0xff]   ;;  %v2032_v24 = vmul.f32 %v8869_v11, %v2030_v37  ;;  %9906 = vst [vmem:[#allocation55_spill] sm:$0xff] %v8901_v28  ;;  %v5380_v16 = vld [vmem:[%s9465_s3 + $0x3c8] sm:$0xff]  }
 0x159   :  { %v1882_v1 = vmax.f32 %v1880_v18, 0.0  ;;  %v1883_v14 = vmax.f32 %v1881_v32, 0.0  ;;  %5217 = vmatpush3.bf16.msra.mxu0 %v5405_v35  ;;  %9907 = vst [vmem:[#allocation56_spill] sm:$0xff] %v8906_v59  ;;  %v2046_v31 = vstv %s8825_s25  ;;  %v5090_v35 = vpop.f32.mrb[3].mxu0  ;;  %v2040_v37 = vmul.f32 %v8884_v40, %v2038_v10  ;;  %v8919_v18 = vld [vmem:[%s9464_s2 + $0x140] sm:$0xff]  ;;  %v8924_v32 = vld [vmem:[%s9464_s2 + $0x148] sm:$0xff] }
 0x15a   :  { %v2017_v6 = vadd.f32 %v2015_v5, %v2009_v41  ;;  %v2018_v55 = vadd.f32 %v2016_v25, %v2010_v22  ;;  %v2039_v25 = vmul.f32 %v8879_v53, %v2038_v10  ;;  %9908 = vst [vmem:[#allocation9_spill] sm:$0xff] %v8919_v18  ;;  %9909 = vst [vmem:[#allocation10_spill] sm:$0xff] %v8924_v32  ;;  %v8935_v10 = vld [vmem:[%s9464_s2 + $0x158] sm:$0xff]  ;;  %v2062_v23 = vstv %s8843_s1  ;;  %v8955_v35 = vld [vmem:[%s9464_s2 + $0x168] sm:$0xff]  ;;  %s9062_s1 = sld [smem:[#allocation3 + $0x384]]  ;;  %s9182_s25 = sld [smem:[#allocation3 + $0x322]] }
 0x15b   :  { %v5065_v5 = vpack.c.bf16 %v1883_v14, %v1883_v14  ;;  %v5064_v56 = vpack.c.bf16 %v1882_v1, %v1882_v1  ;;  %v2054_v1 = vstv %s8841_s11  ;;  %v8930_v14 = vld [vmem:[%s9464_s2 + $0x150] sm:$0xff]  ;;  %9911 = vst [vmem:[#allocation11_spill] sm:$0xff] %v8935_v10  ;;  %9913 = vst [vmem:[#allocation52_spill] sm:$0xff] %v8955_v35  ;;  %v2070_v8 = vstv %s8861_s17  ;;  %v8983_v40 = vld [vmem:[%s9464_s2 + $0x180] sm:$0xff]  ;;  %s9304_s17 = sld [smem:[#allocation3 + $0x391]]  ;;  %s9342_s11 = sld [smem:[#allocation3 + $0x396]] }
 0x15c   :  { %v2025_v41 = vadd.f32 %v2023_v33, %v2017_v6  ;;  %v2026_v22 = vadd.f32 %v2024_v57, %v2018_v55  ;;  %9910 = vst [vmem:[#allocation50_spill] sm:$0xff] %v8930_v14  ;;  %v5382_v33 = vld [vmem:[%s9465_s3 + $0x388] sm:$0xff]   ;;  %v2047_v57 = vmul.f32 %v8901_v28, %v2046_v31  ;;  %v2048_v6 = vmul.f32 %v8906_v59, %v2046_v31  ;;  %v8950_v55 = vld [vmem:[%s9464_s2 + $0x160] sm:$0xff]  ;;  %v8963_v31 = vld [vmem:[%s9464_s2 + $0x170] sm:$0xff] }
 0x15d   :  { %3822 = vmatprep.mubr.bf16.mxu1 %v5065_v5  ;;  %9912 = vst [vmem:[#allocation12_spill] sm:$0xff] %v8950_v55  ;;  %9914 = vst [vmem:[#allocation53_spill] sm:$0xff] %v8963_v31  ;;  %v8968_v59 = vld [vmem:[%s9464_s2 + $0x178] sm:$0xff]  ;;  %v2078_v28 = vstv %s8863_s26  ;;  %s9035_s26 = sld [smem:[#allocation3 + $0x382]]  ;;  %v2126_v60 = vstv %s8940_s22  ;;  %s9290_s22 = sld [smem:[#allocation3 + $0x390]] }
 0x15e   :  { %3823 = vmatmul.mubr.bf16.vlgmr.msra.gmra.mrb[8].mxu1 %v5064_v56  ;;  %v2033_v5 = vadd.f32 %v2031_v19, %v2025_v41  ;;  %v2034_v12 = vadd.f32 %v2032_v24, %v2026_v22  ;;  %9915 = vst [vmem:[#allocation13_spill] sm:$0xff] %v8968_v59  ;;  %v5384_v19 = vld [vmem:[%s9465_s3 + $0x3d0] sm:$0xff]   ;;  %v2055_v24 = vmul.f32 %v8919_v18, %v2054_v1  ;;  %9916 = vst [vmem:[#allocation14_spill] sm:$0xff] %v8983_v40 }
 0x15f   :  { %5225 = vmatpush3.bf16.msra.mxu1 %v5378_v0  ;;  %v2056_v56 = vmul.f32 %v8924_v32, %v2054_v1  ;;  %v2063_v41 = vmul.f32 %v8930_v14, %v2062_v23  ;;  %v2064_v22 = vmul.f32 %v8935_v10, %v2062_v23  ;;  %v8988_v0 = vld [vmem:[%s9464_s2 + $0x188] sm:$0xff]  ;;  %v2086_v18 = vstv %s8871_s9  ;;  %v8994_v1 = vld [vmem:[%s9464_s2 + $0x190] sm:$0xff]  ;;  %v8999_v23 = vld [vmem:[%s9464_s2 + $0x198] sm:$0xff]  ;;  %s9234_s9 = sld [smem:[#allocation3 + $0x38d]] }
 0x160   :  { %9917 = vst [vmem:[#allocation15_spill] sm:$0xff] %v8988_v0  ;;  %5226 = vmatprep.subr.bf16.mxu1 %v5380_v16  ;;  %v2041_v53 = vadd.f32 %v2039_v25, %v2033_v5  ;;  %v2042_v11 = vadd.f32 %v2040_v37, %v2034_v12  ;;  %9918 = vst [vmem:[#allocation16_spill] sm:$0xff] %v8994_v1  ;;  %v2094_v10 = vstv %s8887_s21  ;;  %v5386_v12 = vld [vmem:[%s9465_s3 + $0x390] sm:$0xff]   ;;  %v9014_v14 = vld [vmem:[%s9464_s2 + $0x1a0] sm:$0xff]  ;;  %s9016_s21 = sld [smem:[#allocation3 + $0x380]] }
 0x161   :  { %9919 = vst [vmem:[#allocation17_spill] sm:$0xff] %v8999_v23  ;;  %v2071_v16 = vmul.f32 %v8950_v55, %v2070_v8  ;;  %v2072_v25 = vmul.f32 %v8955_v35, %v2070_v8  ;;  %v2079_v37 = vmul.f32 %v8963_v31, %v2078_v28  ;;  %v2080_v5 = vmul.f32 %v8968_v59, %v2078_v28  ;;  %v5388_v32 = vld [vmem:[%s9465_s3 + $0x3d8] sm:$0xff]   ;;  %v9026_v8 = vld [vmem:[%s9464_s2 + $0x1a8] sm:$0xff]  ;;  %v9032_v59 = vld [vmem:[%s9464_s2 + $0x1b0] sm:$0xff] }
 0x162   :  { %9920 = vst [vmem:[#allocation18_spill] sm:$0xff] %v9014_v14  ;;  %v2049_v55 = vadd.f32 %v2047_v57, %v2041_v53  ;;  %v2050_v20 = vadd.f32 %v2048_v6, %v2042_v11  ;;  %9921 = vst [vmem:[#allocation19_spill] sm:$0xff] %v9026_v8  ;;  %v2102_v28 = vstv %s8892_s12  ;;  %v2110_v31 = vstv %s8909_s15  ;;  %v9050_v35 = vld [vmem:[%s9464_s2 + $0x1b8] sm:$0xff]  ;;  %s9212_s15 = sld [smem:[#allocation3 + $0x38b]] }
 0x163   :  { %9922 = vst [vmem:[#allocation20_spill] sm:$0xff] %v9032_v59  ;;  %5227 = vmatpush3.bf16.msra.mxu1 %v5382_v33  ;;  %v2087_v11 = vmul.f32 %v8983_v40, %v2086_v18  ;;  %v2088_v53 = vmul.f32 %v8988_v0, %v2086_v18  ;;  %v9042_v57 = vmul.f32 %v8994_v1, %v2094_v10  ;;  %9923 = vst [vmem:[#allocation21_spill] sm:$0xff] %v9050_v35  ;;  %v9055_v33 = vld [vmem:[%s9464_s2 + $0x1c0] sm:$0xff]  ;;  %v9060_v18 = vld [vmem:[%s9464_s2 + $0x1c8] sm:$0xff] }
 0x164   :  { %v9045_v6 = vmul.f32 %v8999_v23, %v2094_v10  ;;  %9924 = vst [vmem:[#allocation22_spill] sm:$0xff] %v9055_v33  ;;  %9925 = vst [vmem:[#allocation23_spill] sm:$0xff] %v9060_v18  ;;  %5228 = vmatprep.subr.bf16.mxu1 %v5384_v19  ;;  %v2057_v10 = vadd.f32 %v2055_v24, %v2049_v55  ;;  %v2058_v23 = vadd.f32 %v2056_v56, %v2050_v20  ;;  %v9068_v0 = vld [vmem:[%s9464_s2 + $0x1d0] sm:$0xff]  ;;  %v9073_v40 = vld [vmem:[%s9464_s2 + $0x1d8] sm:$0xff] }
 0x165   :  { %v2118_v1 = vstv %s8938_s13  ;;  %9926 = vst [vmem:[#allocation24_spill] sm:$0xff] %v9068_v0  ;;  %9927 = vst [vmem:[#allocation25_spill] sm:$0xff] %v9073_v40  ;;  %v9077_v62 = vmul.f32 %v9014_v14, %v2102_v28  ;;  %v9080_v19 = vmul.f32 %v9026_v8, %v2102_v28  ;;  %v9083_v20 = vmul.f32 %v9032_v59, %v2110_v31  ;;  %v9088_v55 = vld [vmem:[%s9464_s2 + $0x1e0] sm:$0xff]  ;;  %v9093_v24 = vld [vmem:[%s9464_s2 + $0x1e8] sm:$0xff]  ;;  %s9252_s13 = sld [smem:[#allocation3 + $0x38e]] }
 0x166   :  { %9928 = vst [vmem:[#allocation26_spill] sm:$0xff] %v9088_v55  ;;  %9929 = vst [vmem:[#allocation27_spill] sm:$0xff] %v9093_v24  ;;  %v2134_v56 = vstv %s8957_s20  ;;  %v2065_v9 = vadd.f32 %v2063_v41, %v2057_v10  ;;  %v2066_v14 = vadd.f32 %v2064_v22, %v2058_v23  ;;  %v9097_v15 = vmul.f32 %v9050_v35, %v2110_v31  ;;  %v9102_v28 = vld [vmem:[%s9464_s2 + $0x1f0] sm:$0xff]  ;;  %v9107_v59 = vld [vmem:[%s9464_s2 + $0x1f8] sm:$0xff]  ;;  %s9125_s20 = sld [smem:[#allocation3 + $0x385]] }
 0x167   :  { %9930 = vst [vmem:[#allocation28_spill] sm:$0xff] %v9102_v28  ;;  %v2142_v8 = vstv %s8971_s0  ;;  %5229 = vmatpush3.bf16.msra.mxu1 %v5386_v12  ;;  %v5390_v41 = vld [vmem:[%s9465_s3 + $0x398] sm:$0xff]   ;;  %v9114_v31 = vmul.f32 %v9055_v33, %v2118_v1  ;;  %v9117_v22 = vmul.f32 %v9060_v18, %v2118_v1  ;;  %v9120_v23 = vmul.f32 %v9068_v0, %v2126_v60  ;;  %s9127_s0 = sld [smem:[#allocation3 + $0x386]]  ;;  %v5392_v12 = vld [vmem:[%s9465_s3 + $0x3e0] sm:$0xff]   ;;  %v5396_v18 = vld [vmem:[%s9465_s3 + $0x3e8] sm:$0xff]  }
 0x168   :  { %v9123_v10 = vmul.f32 %v9073_v40, %v2126_v60  ;;  %5230 = vmatprep.subr.bf16.mxu1 %v5388_v32  ;;  %v2073_v33 = vadd.f32 %v2071_v16, %v2065_v9  ;;  %v2074_v1 = vadd.f32 %v2072_v25, %v2066_v14  ;;  %v9133_v0 = vmul.f32 %v9088_v55, %v2134_v56  ;;  %v5394_v14 = vld [vmem:[%s9465_s3 + $0x3a0] sm:$0xff]  }
 0x169   :  { %v9136_v60 = vmul.f32 %v9093_v24, %v2134_v56  ;;  %v9139_v40 = vmul.f32 %v9102_v28, %v2142_v8  ;;  %v9142_v32 = vmul.f32 %v9107_v59, %v2142_v8  ;;  %v2197_v9 = vstv %s9016_s21 }
 0x16a   :  { %v2081_v16 = vadd.f32 %v2079_v37, %v2073_v33  ;;  %v2082_v25 = vadd.f32 %v2080_v5, %v2074_v1  ;;  %v2198_v55 = vmul.f32 %v2197_v9, %v8504_v45  ;;  %v2199_v56 = vmul.f32 %v2197_v9, %v8519_v63 }
 0x16b   :  { %5231 = vmatpush3.bf16.msra.mxu1 %v5390_v41  ;;  %v2203_v28 = vstv %s9018_s18  ;;  %v2211_v24 = vstv %s9035_s26  ;;  %v2219_v35 = vstv %s9037_s27  ;;  %v2227_v8 = vstv %s9062_s1  ;;  %s9170_s18 = sld [smem:[#allocation3 + $0x389]]  ;;  %s9394_s26 = sld [smem:[#allocation3 + $0x39f]] }
 0x16c   :  { %5232 = vmatprep.subr.bf16.mxu1 %v5392_v12  ;;  %v2089_v37 = vadd.f32 %v2087_v11, %v2081_v16  ;;  %v2090_v5 = vadd.f32 %v2088_v53, %v2082_v25  ;;  %v2204_v45 = vmul.f32 %v8524_v29, %v2203_v28  ;;  %v2205_v63 = vmul.f32 %v8529_v54, %v2203_v28  ;;  %v9177_v29 = vld [vmem:[%s9464_s2 + $0x200] sm:$0xff]  ;;  %s9406_s27 = sld [smem:[#allocation3 + $0x3a1]]  ;;  %s9411_s1 = sld [smem:[#allocation3 + $0x3a2]] }
 0x16d   :  { %v2212_v33 = vmul.f32 %v8551_v47, %v2211_v24  ;;  %v2213_v41 = vmul.f32 %v8556_v49, %v2211_v24  ;;  %v2220_v1 = vmul.f32 %v8569_v13, %v2219_v35  ;;  %v2221_v12 = vmul.f32 %v8574_v30, %v2219_v35  ;;  %v5398_v49 = vld [vmem:[%s9465_s3 + $0x3a8] sm:$0xff]  }
 0x16e   :  { %v2097_v9 = vadd.f32 %v9042_v57, %v2089_v37  ;;  %v2098_v11 = vadd.f32 %v9045_v6, %v2090_v5  ;;  %v2206_v54 = vadd.f32 %v2204_v45, %v2198_v55  ;;  %v2207_v47 = vadd.f32 %v2205_v63, %v2199_v56  ;;  %v5400_v57 = vld [vmem:[%s9465_s3 + $0x3f0] sm:$0xff]   ;;  %v5404_v5 = vld [vmem:[%s9465_s3 + $0x3f8] sm:$0xff]  }
 0x16f   :  { %5233 = vmatpush3.bf16.msra.mxu1 %v5394_v14  ;;  %v2228_v13 = vmul.f32 %v8591_v4, %v2227_v8  ;;  %v2229_v30 = vmul.f32 %v8596_v26, %v2227_v8  ;;  %v2235_v35 = vstv %s9125_s20  ;;  %v2243_v53 = vstv %s9127_s0 }
 0x170   :  { %5234 = vmatprep.subr.bf16.mxu1 %v5396_v18  ;;  %v2105_v6 = vadd.f32 %v9077_v62, %v2097_v9  ;;  %v2106_v55 = vadd.f32 %v9080_v19, %v2098_v11  ;;  %v2214_v24 = vadd.f32 %v2212_v33, %v2206_v54  ;;  %v2215_v28 = vadd.f32 %v2213_v41, %v2207_v47  ;;  %v9210_v19 = vld [vmem:[%s9464_s2 + $0x208] sm:$0xff]  ;;  %v9241_v11 = vld [vmem:[%s9464_s2 + $0x218] sm:$0xff] }
 0x171   :  { %v9931_v14 = vstv %s9002_s14  ;;  %v2158_v26 = vstv %s9145_s19  ;;  %v2236_v18 = vmul.f32 %v8613_v17, %v2235_v35  ;;  %v2237_v16 = vmul.f32 %v8618_v34, %v2235_v35  ;;  %v5402_v17 = vld [vmem:[%s9465_s3 + $0x3b0] sm:$0xff]   ;;  %s9315_s19 = sld [smem:[#allocation3 + $0x392]]  ;;  %s9372_s14 = sld [smem:[#allocation3 + $0x39c]] }
 0x172   :  { %v9198_v4 = vmul.f32 %v9177_v29, %v9931_v14  ;;  %v2113_v25 = vadd.f32 %v9083_v20, %v2105_v6  ;;  %v2114_v62 = vadd.f32 %v9097_v15, %v2106_v55  ;;  %v2222_v56 = vadd.f32 %v2220_v1, %v2214_v24 }
 0x173   :  { %v2223_v8 = vadd.f32 %v2221_v12, %v2215_v28  ;;  %5235 = vmatpush3.bf16.msra.mxu1 %v5398_v49  ;;  %v2244_v34 = vmul.f32 %v8632_v61, %v2243_v53  ;;  %v2245_v15 = vmul.f32 %v8637_v21, %v2243_v53  ;;  %v2251_v20 = vstv %s9157_s30  ;;  %s9362_s30 = sld [smem:[#allocation3 + $0x39a]] }
 0x174   :  { %v2259_v37 = vstv %s9159_s29  ;;  %5236 = vmatprep.subr.bf16.mxu1 %v5400_v57  ;;  %v2121_v45 = vadd.f32 %v9114_v31, %v2113_v25  ;;  %v2122_v63 = vadd.f32 %v9117_v22, %v2114_v62  ;;  %v2230_v33 = vadd.f32 %v2228_v13, %v2222_v56  ;;  %v9243_v49 = vpop.f32.mrb[0].mxu1  ;;  %v9261_v57 = vld [vmem:[%s9464_s2 + $0x228] sm:$0xff]  ;;  %s9367_s29 = sld [smem:[#allocation3 + $0x39b]] }
 0x175   :  { %v2231_v41 = vadd.f32 %v2229_v30, %v2223_v8  ;;  %v9932_v1 = vmov %v9931_v14  ;;  %v2252_v21 = vmul.f32 %v8649_v43, %v2251_v20  ;;  %v2253_v12 = vmul.f32 %v8654_v27, %v2251_v20  ;;  %v5406_v43 = vld [vmem:[%s9465_s3 + $0x3b8] sm:$0xff]   ;;  %v9254_v30 = vpop.f32.mrb[1].mxu1  ;;  %s9267_s3 = sld [smem:[#allocation5 + $0x6]] }
 0x176   :  { %v2152_v61 = vmul.f32 %v9210_v19, %v9932_v1  ;;  %v2267_v9 = vstv %s9170_s18  ;;  %v2129_v31 = vadd.f32 %v9120_v23, %v2121_v45  ;;  %v2130_v22 = vadd.f32 %v9123_v10, %v2122_v63  ;;  %v5111_v55 = vpop.f32.mrb[2].mxu1  ;;  %s9380_s18 = sld [smem:[#allocation3 + $0x39d]] }
 0x177   :  { %v2238_v54 = vadd.f32 %v2236_v18, %v2230_v33  ;;  %v2239_v47 = vadd.f32 %v2237_v16, %v2231_v41  ;;  %5237 = vmatpush3.bf16.msra.mxu1 %v5402_v17  ;;  %v2166_v27 = vstv %s9182_s25  ;;  %v2260_v23 = vmul.f32 %v8676_v3, %v2259_v37  ;;  %v5112_v14 = vpop.f32.mrb[3].mxu1  ;;  %v9275_v18 = vld [vmem:[%s9464_s2 + $0x238] sm:$0xff]  ;;  %v9287_v17 = vld [vmem:[%s9464_s2 + $0x210] sm:$0xff]  ;;  %s4890_s25 = sld [smem:[#allocation5 + $0x7]] }
 0x178   :  { %v2261_v10 = vmul.f32 %v8681_v58, %v2259_v37  ;;  %v2275_v13 = vstv %s9188_s8  ;;  %5238 = vmatprep.subr.bf16.mxu1 %v5404_v5  ;;  %v2137_v35 = vadd.f32 %v9133_v0, %v2129_v31  ;;  %v2138_v53 = vadd.f32 %v9136_v60, %v2130_v22  ;;  %v9934_v55 = vld [vmem:[#allocation43_spill] sm:$0xff]  ;;  %v9935_v14 = vld [vmem:[#allocation44_spill] sm:$0xff] }
 0x179   :  { %v2246_v6 = vadd.f32 %v2244_v34, %v2238_v54  ;;  %v2247_v3 = vadd.f32 %v2245_v15, %v2239_v47  ;;  %v2160_v58 = vmul.f32 %v9241_v11, %v2158_v26  ;;  %v2174_v24 = vstv %s9201_s24  ;;  %s9347_s24 = sld [smem:[#allocation3 + $0x397]] }
 0x17a   :  { %v2268_v28 = vmul.f32 %v8690_v51, %v2267_v9  ;;  %v2269_v0 = vmul.f32 %v8702_v52, %v2267_v9  ;;  %v2146_v60 = vadd.f32 %v9142_v32, %v2138_v53  ;;  %v2283_v62 = vstv %s9212_s15  ;;  %s9321_s15 = sld [smem:[#allocation3 + $0x393]] }
 0x17b   :  { %v2254_v16 = vadd.f32 %v2252_v21, %v2246_v6  ;;  %v2255_v25 = vadd.f32 %v2253_v12, %v2247_v3  ;;  %5239 = vmatpush3.bf16.msra.mxu1 %v5406_v43  ;;  %v2145_v51 = vadd.f32 %v9139_v40, %v2137_v35  ;;  %v2168_v52 = vmul.f32 %v9261_v57, %v2166_v27  ;;  %v9933_v6 = vld [vmem:[#allocation42_spill] sm:$0xff] }
 0x17c   :  { %v2276_v56 = vmul.f32 %v8709_v36, %v2275_v13  ;;  %v2277_v32 = vmul.f32 %v8722_v44, %v2275_v13  ;;  %v2154_v8 = vadd.f32 %v2152_v61, %v2146_v60  ;;  %v2291_v20 = vstv %s9226_s10  ;;  %s9352_s10 = sld [smem:[#allocation3 + $0x398]] }
 0x17d   :  { %v2262_v34 = vadd.f32 %v2260_v23, %v2254_v16  ;;  %v2263_v15 = vadd.f32 %v2261_v10, %v2255_v25  ;;  %v2176_v40 = vmul.f32 %v9275_v18, %v2174_v24  ;;  %v2284_v36 = vmul.f32 %v8732_v38, %v2283_v62  ;;  %v9309_v38 = vld [vmem:[%s9464_s2 + $0x220] sm:$0xff] }
 0x17e   :  { %v2299_v37 = vstv %s9234_s9  ;;  %v2162_v44 = vadd.f32 %v2160_v58, %v2154_v8  ;;  %v2285_v63 = vmul.f32 %v8746_v42, %v2283_v62  ;;  %v2153_v33 = vadd.f32 %v9198_v4, %v2145_v51  ;;  %s9357_s9 = sld [smem:[#allocation3 + $0x399]] }
 0x17f   :  { %v2270_v5 = vadd.f32 %v2268_v28, %v2262_v34  ;;  %v2271_v45 = vadd.f32 %v2269_v0, %v2263_v15  ;;  %v2159_v41 = vmul.f32 %v9287_v17, %v2158_v26  ;;  %v2292_v1 = vmul.f32 %v8752_v2, %v2291_v20  ;;  %v9937_v15 = vld [vmem:[#allocation46_spill] sm:$0xff] }
 0x180   :  { %v2307_v61 = vstv %s9252_s13  ;;  %v2170_v21 = vadd.f32 %v2168_v52, %v2162_v44  ;;  %v2293_v42 = vmul.f32 %v8767_v46, %v2291_v20  ;;  %v2180_v4 = vstv %s9267_s3  ;;  %v9936_v52 = vld [vmem:[#allocation45_spill] sm:$0xff]  ;;  %v9938_v20 = vld [vmem:[#allocation47_spill] sm:$0xff]  ;;  %s9401_s3 = sld [smem:[#allocation3 + $0x3a0]] }
 0x181   :  { %v2278_v12 = vadd.f32 %v2276_v56, %v2270_v5  ;;  %v2279_v9 = vadd.f32 %v2277_v32, %v2271_v45  ;;  %v2300_v31 = vmul.f32 %v8776_v39, %v2299_v37  ;;  %v2301_v26 = vmul.f32 %v8790_v7, %v2299_v37  ;;  %v9326_v39 = vld [vmem:[%s9464_s2 + $0x230] sm:$0xff]  ;;  %s9338_s2 = sld [smem:[#allocation3 + $0x395]]  ;;  %v9939_v45 = vld [vmem:[#allocation49_spill] sm:$0xff] }
 0x182   :  { %v2178_v2 = vadd.f32 %v2176_v40, %v2170_v21  ;;  %v2315_v47 = vstv %s9278_s16  ;;  %v2161_v43 = vadd.f32 %v2159_v41, %v2153_v33  ;;  %v2167_v23 = vmul.f32 %v9309_v38, %v2166_v27  ;;  %v9940_v33 = vld [vmem:[#allocation51_spill] sm:$0xff]  ;;  %s4887_s16 = sld [smem:[#allocation3 + $0x3a3]] }
 0x183   :  { %v2286_v22 = vadd.f32 %v2284_v36, %v2278_v12  ;;  %v2287_v54 = vadd.f32 %v2285_v63, %v2279_v9  ;;  %v2308_v10 = vmul.f32 %v8796_v50, %v2307_v61  ;;  %v2309_v46 = vmul.f32 %v8813_v48, %v2307_v61  ;;  %v9941_v12 = vld [vmem:[#allocation55_spill] sm:$0xff] }
 0x184   :  { %v2182_v7 = vadd.f32 %v2180_v4, %v2178_v2  ;;  %v2323_v53 = vstv %s9290_s22  ;;  %v2316_v27 = vmul.f32 %v9933_v6, %v2315_v47  ;;  %v2317_v58 = vmul.f32 %v9934_v55, %v2315_v47  ;;  %v9943_v47 = vld [vmem:[#allocation9_spill] sm:$0xff]  ;;  %v9946_v6 = vld [vmem:[#allocation11_spill] sm:$0xff]  ;;  %v9947_v55 = vld [vmem:[#allocation12_spill] sm:$0xff] }
 0x185   :  { %v2294_v13 = vadd.f32 %v2292_v1, %v2286_v22  ;;  %v2295_v35 = vadd.f32 %v2293_v42, %v2287_v54  ;;  %v2169_v28 = vadd.f32 %v2167_v23, %v2161_v43  ;;  %v2175_v0 = vmul.f32 %v9326_v39, %v2174_v24  ;;  %v9942_v42 = vld [vmem:[#allocation56_spill] sm:$0xff]  ;;  %v9944_v23 = vld [vmem:[#allocation10_spill] sm:$0xff] }
 0x186   :  { %v2184_v50 = vmax.f32 %v2182_v7, 0.0  ;;  %v2324_v60 = vmul.f32 %v9935_v14, %v2323_v53  ;;  %v2331_v16 = vstv %s9304_s17  ;;  %v2325_v56 = vmul.f32 %v9936_v52, %v2323_v53 }
 0x187   :  { %v2302_v3 = vadd.f32 %v2300_v31, %v2294_v13  ;;  %v2303_v48 = vadd.f32 %v2301_v26, %v2295_v35  ;;  %v2339_v32 = vstv %s9315_s19  ;;  %v2332_v24 = vmul.f32 %v9937_v15, %v2331_v16  ;;  %v9945_v35 = vld [vmem:[#allocation50_spill] sm:$0xff] }
 0x188   :  { %v5067_v25 = vpack.c.bf16 %v2184_v50, %v2184_v50  ;;  %v2333_v40 = vmul.f32 %v9938_v20, %v2331_v16  ;;  %v2177_v36 = vadd.f32 %v2175_v0, %v2169_v28  ;;  %v2347_v37 = vstv %s9321_s15  ;;  %v9948_v28 = vld [vmem:[#allocation52_spill] sm:$0xff]  ;;  %v9952_v15 = vld [vmem:[#allocation54_spill] sm:$0xff] }
 0x189   :  { %v2310_v62 = vadd.f32 %v2308_v10, %v2302_v3  ;;  %v2311_v51 = vadd.f32 %v2309_v46, %v2303_v48  ;;  %v2340_v63 = vmul.f32 %v9939_v45, %v2339_v32  ;;  %v2341_v41 = vmul.f32 %v9940_v33, %v2339_v32 }
 0x18a   :  { %3862 = vmatprep.mubr.bf16.mxu0 %v5067_v25  ;;  %v2355_v1 = vstv %s9330_s28  ;;  %v2348_v9 = vmul.f32 %v9941_v12, %v2347_v37  ;;  %v2349_v31 = vmul.f32 %v9942_v42, %v2347_v37  ;;  %v2181_v26 = vadd.f32 %v2180_v4, %v2177_v36  ;;  %v9949_v25 = vld [vmem:[#allocation53_spill] sm:$0xff]  ;;  %v9953_v37 = vld [vmem:[#allocation14_spill] sm:$0xff] }
 0x18b   :  { %v2318_v8 = vadd.f32 %v2316_v27, %v2310_v62  ;;  %v2319_v34 = vadd.f32 %v2317_v58, %v2311_v51  ;;  %v2363_v2 = vstv %s9338_s2  ;;  %v2356_v43 = vmul.f32 %v9943_v47, %v2355_v1  ;;  %v9950_v51 = vld [vmem:[#allocation13_spill] sm:$0xff] }
 0x18c   :  { %v2357_v10 = vmul.f32 %v9944_v23, %v2355_v1  ;;  %v2371_v46 = vstv %s9342_s11  ;;  %v2364_v53 = vmul.f32 %v9945_v35, %v2363_v2  ;;  %v2365_v4 = vmul.f32 %v9946_v6, %v2363_v2  ;;  %v9956_v12 = vld [vmem:[#allocation17_spill] sm:$0xff] }
 0x18d   :  { %v2326_v44 = vadd.f32 %v2324_v60, %v2318_v8  ;;  %v2327_v5 = vadd.f32 %v2325_v56, %v2319_v34  ;;  %v2183_v27 = vmax.f32 %v2181_v26, 0.0  ;;  %v2379_v50 = vstv %s9347_s24  ;;  %v4892_v56 = vld [vmem:[%s9466_s4] ss:$0 sm:$0xff]  ;;  %v9951_v34 = vld [vmem:[#allocation48_spill] sm:$0xff]  ;;  %s9389_s4 = sld [smem:[#allocation3 + $0x39e]]  ;;  %v9957_v26 = vld [vmem:[#allocation18_spill] sm:$0xff] }
 0x18e   :  { %v2372_v58 = vmul.f32 %v9947_v55, %v2371_v46  ;;  %v2373_v0 = vmul.f32 %v9948_v28, %v2371_v46  ;;  %v2387_v14 = vstv %s9352_s10  ;;  %v2380_v62 = vmul.f32 %v9949_v25, %v2379_v50  ;;  %v9963_v28 = vld [vmem:[#allocation24_spill] sm:$0xff] }
 0x18f   :  { %v2334_v61 = vadd.f32 %v2332_v24, %v2326_v44  ;;  %v2335_v21 = vadd.f32 %v2333_v40, %v2327_v5  ;;  %v2381_v52 = vmul.f32 %v9950_v51, %v2379_v50  ;;  %v2395_v32 = vstv %s9357_s9  ;;  %v9954_v5 = vld [vmem:[#allocation15_spill] sm:$0xff]  ;;  %v9965_v51 = vld [vmem:[#allocation26_spill] sm:$0xff] }
 0x190   :  { %v5066_v8 = vpack.c.bf16 %v2183_v27, %v2183_v27  ;;  %v5088_v24 = vadd.f32 %v9952_v15, %v9951_v34  ;;  %v5110_v20 = vadd.f32 %v9254_v30, %v9243_v49  ;;  %v2388_v44 = vmul.f32 %v9953_v37, %v2387_v14  ;;  %v9962_v50 = vld [vmem:[#allocation23_spill] sm:$0xff] }
 0x191   :  { %v2342_v22 = vadd.f32 %v2340_v63, %v2334_v61  ;;  %v2343_v54 = vadd.f32 %v2341_v41, %v2335_v21  ;;  %v2389_v45 = vmul.f32 %v9954_v5, %v2387_v14  ;;  %v2403_v63 = vstv %s9362_s30  ;;  %v9955_v61 = vld [vmem:[#allocation16_spill] sm:$0xff]  ;;  %v9964_v14 = vld [vmem:[#allocation25_spill] sm:$0xff] }
 0x192   :  { %3863 = vmatmul.mubr.bf16.vlgmr.msra.gmra.mrb[12].mxu0 %v5066_v8  ;;  %v3625_v33 = vadd.f32 %v5088_v24, %v4892_v56  ;;  %v2396_v21 = vmul.f32 %v9955_v61, %v2395_v32  ;;  %v2411_v49 = vstv %s9367_s29  ;;  %v2404_v2 = vmul.f32 %v9957_v26, %v2403_v63  ;;  %v9966_v56 = vld [vmem:[#allocation27_spill] sm:$0xff]  ;;  %v9967_v24 = vld [vmem:[#allocation28_spill] sm:$0xff] }
 0x193   :  { %v2350_v7 = vadd.f32 %v2348_v9, %v2342_v22  ;;  %v2351_v13 = vadd.f32 %v2349_v31, %v2343_v54  ;;  %v2397_v9 = vmul.f32 %v9956_v12, %v2395_v32  ;;  %v9958_v22 = vld [vmem:[#allocation19_spill] sm:$0xff]  ;;  %v2419_v47 = vstv %s9372_s14 }
 0x194   :  { %v9396_v30 = vadd.f32 %v5110_v20, %v3625_v33  ;;  %v2405_v54 = vmul.f32 %v9958_v22, %v2403_v63  ;;  %v2427_v35 = vstv %s9380_s18  ;;  %v2451_v8 = vstv %s9401_s3 }
 0x195   :  { %v2358_v3 = vadd.f32 %v2356_v43, %v2350_v7  ;;  %v2359_v48 = vadd.f32 %v2357_v10, %v2351_v13  ;;  %v9959_v10 = vld [vmem:[#allocation20_spill] sm:$0xff]  ;;  %v9960_v7 = vld [vmem:[#allocation21_spill] sm:$0xff]  ;;  %v2452_v5 = vmul.f32 %v9177_v29, %v2451_v8  ;;  %v2467_v63 = vstv %s9411_s1 }
 0x196   :  { %v2412_v46 = vmul.f32 %v9959_v10, %v2411_v49  ;;  %v2413_v13 = vmul.f32 %v9960_v7, %v2411_v49  ;;  %v2469_v49 = vmul.f32 %v9261_v57, %v2467_v63  ;;  %v2481_v22 = vstv %s4890_s25  ;;  %v5407_v57 = vld [vmem:[%s9467_s5] sm:$0xff]  }
 0x197   :  { %v2366_v60 = vadd.f32 %v2364_v53, %v2358_v3  ;;  %v2367_v16 = vadd.f32 %v2365_v4, %v2359_v48  ;;  %v9961_v4 = vld [vmem:[#allocation22_spill] sm:$0xff]  ;;  %v2421_v3 = vmul.f32 %v9962_v50, %v2419_v47  ;;  %v2435_v48 = vstv %s9389_s4 }
 0x198   :  { %v2420_v27 = vmul.f32 %v9961_v4, %v2419_v47  ;;  %v2437_v32 = vmul.f32 %v9966_v56, %v2435_v48  ;;  %v5409_v4 = vld [vmem:[%s9467_s5 + $0x10] sm:$0xff]   ;;  %v5414_v56 = vld [vmem:[%s9467_s5 + $0x38] sm:$0xff]  }
 0x199   :  { %v2374_v40 = vadd.f32 %v2372_v58, %v2366_v60  ;;  %v2375_v36 = vadd.f32 %v2373_v0, %v2367_v16  ;;  %v2428_v0 = vmul.f32 %v9963_v28, %v2427_v35  ;;  %v2429_v60 = vmul.f32 %v9964_v14, %v2427_v35  ;;  %v5408_v35 = vld [vmem:[%s9467_s5 + $0x8] sm:$0xff]  }
 0x19a   :  { %v2443_v16 = vstv %s9394_s26 }
 0x19b   :  { %v2382_v41 = vadd.f32 %v2380_v62, %v2374_v40  ;;  %v2383_v1 = vadd.f32 %v2381_v52, %v2375_v36  ;;  %v2436_v52 = vmul.f32 %v9965_v51, %v2435_v48  ;;  %v2444_v20 = vmul.f32 %v9967_v24, %v2443_v16 }
 0x19c   :  { %v2445_v40 = vmul.f32 %v9107_v59, %v2443_v16  ;;  %v2459_v36 = vstv %s9406_s27  ;;  %v2468_v59 = vmul.f32 %v9309_v38, %v2467_v63 }
 0x19d   :  { %v2390_v42 = vadd.f32 %v2388_v44, %v2382_v41  ;;  %v2391_v31 = vadd.f32 %v2389_v45, %v2383_v1  ;;  %v2453_v45 = vmul.f32 %v9210_v19, %v2451_v8  ;;  %v2460_v1 = vmul.f32 %v9287_v17, %v2459_v36 }
 0x19e   :  { %v2461_v61 = vmul.f32 %v9241_v11, %v2459_v36 }
 0x19f   :  { %v2398_v43 = vadd.f32 %v2396_v21, %v2390_v42  ;;  %v2399_v23 = vadd.f32 %v2397_v9, %v2391_v31  ;;  %v2475_v21 = vstv %s4887_s16 }
 0x1a0   :  { %v2476_v29 = vmul.f32 %v9326_v39, %v2475_v21  ;;  %v2477_v19 = vmul.f32 %v9275_v18, %v2475_v21 }
 0x1a1   :  { %v2406_v53 = vadd.f32 %v2404_v2, %v2398_v43  ;;  %v2407_v6 = vadd.f32 %v2405_v54, %v2399_v23 }
 0x1a3   :  { %v2414_v55 = vadd.f32 %v2412_v46, %v2406_v53  ;;  %v2415_v58 = vadd.f32 %v2413_v13, %v2407_v6  ;;  %v5445_v13 = vmov 0.0  }
 0x1a4   :  { %5255 = vmatprep.subr.bf16.mxu0 %v5445_v13  ;;  %5271 = vmatprep.mubr.msk.bf16.mxu0 %vm5446_vm0, %v5445_v13 }
 0x1a5   :  { %v2422_v25 = vadd.f32 %v2420_v27, %v2414_v55  ;;  %v2423_v62 = vadd.f32 %v2421_v3, %v2415_v58  ;;  %5256 = vmatpush3.bf16.msra.mxu0 %v5407_v57  ;;  %v5411_v27 = vld [vmem:[%s9467_s5 + $0x20] sm:$0xff]  }
 0x1a6   :  { %5257 = vmatprep.subr.bf16.mxu0 %v5445_v13 }
 0x1a7   :  { %v2430_v34 = vadd.f32 %v2428_v0, %v2422_v25  ;;  %v2431_v15 = vadd.f32 %v2429_v60, %v2423_v62  ;;  %v5412_v0 = vld [vmem:[%s9467_s5 + $0x28] sm:$0xff]   ;;  %v5413_v62 = vld [vmem:[%s9467_s5 + $0x30] sm:$0xff]  }
 0x1a9   :  { %v2438_v37 = vadd.f32 %v2436_v52, %v2430_v34  ;;  %v2439_v44 = vadd.f32 %v2437_v32, %v2431_v15  ;;  %5258 = vmatpush3.bf16.msra.mxu0 %v5408_v35 }
 0x1aa   :  { %5259 = vmatprep.subr.bf16.mxu0 %v5445_v13 }
 0x1ab   :  { %v2446_v33 = vadd.f32 %v2444_v20, %v2438_v37  ;;  %v2447_v41 = vadd.f32 %v2445_v40, %v2439_v44 }
 0x1ad   :  { %v2454_v12 = vadd.f32 %v2452_v5, %v2446_v33  ;;  %v2455_v9 = vadd.f32 %v2453_v45, %v2447_v41  ;;  %5260 = vmatpush3.bf16.msra.mxu0 %v5409_v4 }
 0x1ae   :  { %5261 = vmatprep.subr.bf16.mxu0 %v5445_v13 }
 0x1af   :  { %v2462_v42 = vadd.f32 %v2460_v1, %v2454_v12  ;;  %v2463_v31 = vadd.f32 %v2461_v61, %v2455_v9 }
 0x1b1   :  { %v2470_v26 = vadd.f32 %v2468_v59, %v2462_v42  ;;  %v2471_v2 = vadd.f32 %v2469_v49, %v2463_v31  ;;  %v5037_v59 = vld [vmem:[%s9468_s6] ss:$0 sm:$0xff] }
 0x1b2   :  { %v5130_v47 = vpop.f32.mrb[4].mxu0 }
 0x1b3   :  { %v2478_v54 = vadd.f32 %v2476_v29, %v2470_v26  ;;  %v2479_v17 = vadd.f32 %v2477_v19, %v2471_v2  ;;  %v5131_v23 = vpop.f32.mrb[5].mxu0 }
 0x1b4   :  { %v5132_v10 = vadd.f32 %v5131_v23, %v5130_v47  ;;  %v5133_v46 = vpop.f32.mrb[6].mxu0 }
 0x1b5   :  { %v2482_v11 = vadd.f32 %v2481_v22, %v2478_v54  ;;  %v2483_v43 = vadd.f32 %v2481_v22, %v2479_v17  ;;  %v5134_v39 = vpop.f32.mrb[7].mxu0 }
 0x1b6   :  { %v3705_v18 = vadd.f32 %v5132_v10, %v9396_v30  ;;  %v5410_v30 = vld [vmem:[%s9467_s5 + $0x18] sm:$0xff]  }
 0x1b7   :  { %v2484_v38 = vmax.f32 %v2482_v11, 0.0  ;;  %v2485_v7 = vmax.f32 %v2483_v43, 0.0  ;;  %5262 = vmatpush3.bf16.msra.mxu0 %v5410_v30 }
 0x1b8   :  { %5263 = vmatprep.subr.bf16.mxu0 %v5445_v13 }
 0x1b9   :  { %v5069_v53 = vpack.c.bf16 %v2485_v7, %v2485_v7  ;;  %v5068_v6 = vpack.c.bf16 %v2484_v38, %v2484_v38 }
 0x1bb   :  { %3902 = vmatprep.mubr.bf16.mxu1 %v5069_v53  ;;  %5264 = vmatpush3.bf16.msra.mxu0 %v5411_v27 }
 0x1bc   :  { %3903 = vmatmul.mubr.bf16.vlgmr.msra.gmra.mrb[12].mxu1 %v5068_v6  ;;  %5265 = vmatprep.subr.bf16.mxu0 %v5445_v13 }
 0x1bf   :  { %5266 = vmatpush3.bf16.msra.mxu0 %v5412_v0 }
 0x1c0   :  { %5267 = vmatprep.subr.bf16.mxu0 %v5445_v13 }
 0x1c3   :  { %5268 = vmatpush3.bf16.msra.mxu0 %v5413_v62 }
 0x1c4   :  { %5269 = vmatprep.subr.bf16.mxu0 %v5445_v13 }
 0x1c7   :  { %5270 = vmatpush3.bf16.msra.mxu0 %v5414_v56 }
 0x1d3   :  { %v5152_v50 = vpop.f32.mrb[4].mxu1 }
 0x1d4   :  { %v5153_v3 = vpop.f32.mrb[5].mxu1 }
 0x1d5   :  { %v5154_v48 = vadd.f32 %v5153_v3, %v5152_v50  ;;  %v5155_v55 = vpop.f32.mrb[6].mxu1 }
 0x1d6   :  { %v5156_v58 = vpop.f32.mrb[7].mxu1 }
 0x1d7   :  { %v3745_v28 = vadd.f32 %v5154_v48, %v3705_v18 }
 0x20f   :  { %v5174_v14 = vpop.f32.mrb[8].mxu0 }
 0x210   :  { %v5175_v60 = vpop.f32.mrb[9].mxu0 }
 0x211   :  { %v5176_v16 = vadd.f32 %v5175_v60, %v5174_v14  ;;  %v5177_v25 = vpop.f32.mrb[10].mxu0 }
 0x212   :  { %v5178_v51 = vpop.f32.mrb[11].mxu0 }
 0x213   :  { %v3785_v52 = vadd.f32 %v5176_v16, %v3745_v28 }
 0x231   :  { %v5196_v32 = vpop.f32.mrb[8].mxu1 }
 0x232   :  { %v5197_v8 = vpop.f32.mrb[9].mxu1 }
 0x233   :  { %v5198_v34 = vadd.f32 %v5197_v8, %v5196_v32  ;;  %v5199_v15 = vpop.f32.mrb[10].mxu1 }
 0x234   :  { %v5200_v24 = vpop.f32.mrb[11].mxu1 }
 0x235   :  { %v3825_v20 = vadd.f32 %v5198_v34, %v3785_v52 }
 0x265   :  { %v5218_v40 = vpop.f32.mrb[12].mxu0 }
 0x266   :  { %v5219_v36 = vpop.f32.mrb[13].mxu0 }
 0x267   :  { %v5220_v37 = vadd.f32 %v5219_v36, %v5218_v40  ;;  %v5221_v44 = vpop.f32.mrb[14].mxu0 }
 0x268   :  { %v5222_v5 = vpop.f32.mrb[15].mxu0 }
 0x269   :  { %v3865_v45 = vadd.f32 %v5220_v37, %v3825_v20 }
 0x28f   :  { %v5240_v63 = vpop.f32.mrb[12].mxu1 }
 0x290   :  { %v5241_v33 = vpop.f32.mrb[13].mxu1 }
 0x291   :  { %v5242_v41 = vadd.f32 %v5241_v33, %v5240_v63  ;;  %v5243_v1 = vpop.f32.mrb[14].mxu1 }
 0x292   :  { %v5244_v61 = vpop.f32.mrb[15].mxu1 }
 0x293   :  { %v3905_v21 = vadd.f32 %v5242_v41, %v3865_v45 }
 0x295   :  { %v3910_v12 = vmax.f32 %v3905_v21, 0.0 }
 0x297   :  { %v3911_v9 = vpack.c.bf16 %v3910_v12, %v3910_v12 }
 0x299   :  { %5272 = vmatmul.mubr.bf16.vlgmr.msra.gmra.mrb[16].mxu0 %v3911_v9 }
 0x36c   :  { %v4017_v49 = vpop.f32.mrb[16].mxu0 }
 0x36d   :  { %v4018_v42 = vadd.f32 %v5037_v59, %v4017_v49  ;;  %v5273_v31 = vpop.f32.mrb[17].mxu0 }
 0x36e   :  { %v4020_v29 = vpop.f32.mrb[18].mxu0 }
 0x36f   :  { %4023 = vst [vmem:[%s9469_s7] sm:$0xff] %v4018_v42  ;;  %v5274_v19 = vpop.f32.mrb[19].mxu0 }
 0x370   :  { %4028 = vsyncpa [#allocation4], 1 }
 0x371   :  { %4029 = vsyncpa [#allocation6], 1 }

</bundles_post_ra>
